<compile_context>
chip_gen: v6e
topology: v6e:2x2x1
jax: 0.10.0
libtpu: 0.0.40
codegen_flags: <defaults>
</compile_context>

<pallas_src>
import jax
import jax.numpy as jnp
from jax import lax
from jax.experimental import pallas as pl
from jax.experimental.pallas import tpu as pltpu

# Single-pass MXU matmuls regardless of the global jax_default_matmul_precision.
_PREC = lax.Precision.DEFAULT


def _round_up(x, m):
    return -(-x // m) * m


# ----------------------------------------------------------------------------
# Fused Pallas kernel (all GRU layers + metadata path + feature assembly)
# ----------------------------------------------------------------------------
def _make_backbone_kernel(n_layers, ts, BB, D, H, F, pad_steps, S):
    """Fused kernel for static (n_layers, chunk ts, batch block BB, D, H, F)."""
    three_h = 3 * H
    unroll = True if ts <= 32 else 8

    def kernel(x_ref, meta_ref, mw_ref, mb_ref, h0_ref, *rest):
        layer_refs = rest[: 4 * n_layers]          # [wih, whh, b_in, b_hn] * L
        feat_ref = rest[4 * n_layers]               # [ts, BB, H+F]
        hT_ref = rest[4 * n_layers + 1]             # [L,  BB, H]
        seq_sc = rest[4 * n_layers + 2]             # [ts, BB, H]  layer output
        i_sc = rest[4 * n_layers + 3]               # [ts, BB, 3H] input proj
        h_sc = rest[4 * n_layers + 4]               # [L,  BB, H]  hidden carry
        meta_sc = rest[4 * n_layers + 5]            # [BB, F]      meta cache

        chunk = pl.program_id(1)

        # First chunk of a batch block: init hidden carry + compute metadata
        # Linear/ReLU once (normalization + mask already folded into mw/mb).
        @pl.when(chunk == 0)
        def _init():
            h_sc[...] = h0_ref[...]
            meta_sc[...] = jnp.maximum(
                jnp.dot(meta_ref[...], mw_ref[...], precision=_PREC,
                        preferred_element_type=jnp.float32) + mb_ref[...],
                0.0)

        # Metadata half of the feature slab (lane offset H; lane-dense store).
        feat_ref[:, :, H:] = jnp.broadcast_to(meta_sc[...][None], (ts, BB, F))

        # Number of real (non-padded) timesteps in this chunk (only needed when
        # S was padded up to a multiple of ts).
        valid = S - chunk * ts if pad_steps else None

        for l in range(n_layers):
            wih_ref, whh_ref, b_in_ref, b_hn_ref = layer_refs[4 * l: 4 * (l + 1)]
            last_layer = (l == n_layers - 1)

            # Hoisted input projection for the whole chunk: one MXU-friendly
            # matmul instead of 3 tiny per-timestep matmuls on the serial path.
            if l == 0:
                xin = x_ref[...].reshape(ts * BB, D)
            else:
                xin = seq_sc[...].reshape(ts * BB, H)
            i_all = jnp.dot(xin, wih_ref[...], precision=_PREC,
                            preferred_element_type=jnp.float32) + b_in_ref[...]
            i_sc[...] = i_all.reshape(ts, BB, three_h)

            # Loop-invariant loads / broadcasts hoisted out of the recurrence.
            whh = whh_ref[...]
            b_hn = jnp.broadcast_to(b_hn_ref[...], (BB, H))

            def step(t, h, whh=whh, b_hn=b_hn, last_layer=last_layer):
                gi = i_sc[t]                                         # [BB, 3H]
                gh = jnp.dot(h, whh, precision=_PREC,
                             preferred_element_type=jnp.float32)     # [BB, 3H]
                r = jax.nn.sigmoid(gi[:, :H] + gh[:, :H])
                z = jax.nn.sigmoid(gi[:, H:2 * H] + gh[:, H:2 * H])
                ng = jnp.tanh(gi[:, 2 * H:] + r * (gh[:, 2 * H:] + b_hn))
                h_new = (1.0 - z) * ng + z * h
                if pad_steps:
                    # Hold the state on padded timesteps (multiplicative blend
                    # with a scalar keeps the lowering trivial).
                    keep = (t < valid).astype(jnp.float32)
                    h_new = keep * h_new + (1.0 - keep) * h
                if last_layer:
                    # Direct lane-aligned store into the feature slab; no
                    # chunk-epilogue concatenate / copy.
                    feat_ref[t, :, :H] = h_new
                else:
                    seq_sc[t] = h_new
                return h_new

            h_sc[l] = lax.fori_loop(0, ts, step, h_sc[l], unroll=unroll)

        # Final hidden state: resident output block, written only on the last
        # chunk of this batch block.
        @pl.when(chunk == pl.num_programs(1) - 1)
        def _fin():
            hT_ref[...] = h_sc[...]

    return kernel


# ----------------------------------------------------------------------------
# Trace-time parameter fusion (zero runtime cost)
# ----------------------------------------------------------------------------
def _fuse_gru_params(params):
    """Fuse (r,z,n) gates, pre-sum r/z biases, fold layer-0 input norm."""
    fused = []
    for l in range(params["n_layers"]):
        wih = params["wih"][l]            # [3, Din, H]  (r, z, n)
        whh = params["whh"][l]            # [3, H,   H]
        bih = params["bih"][l]            # [3, 1,   H]
        bhh = params["bhh"][l]            # [3, 1,   H]
        din = wih.shape[1]
        wih_f = jnp.concatenate([wih[0], wih[1], wih[2]], axis=-1)   # [Din, 3H]
        whh_f = jnp.concatenate([whh[0], whh[1], whh[2]], axis=-1)   # [H,   3H]
        bih_f = jnp.concatenate([bih[0], bih[1], bih[2]], axis=-1)   # [1,   3H]
        if l == 0:
            mean, inv_std = params["dyn_mean"], params["dyn_inv_std"]  # [1, Din]
            bih_f = bih_f - jnp.dot(mean * inv_std, wih_f)
            wih_f = wih_f * inv_std.reshape(din, 1)
        b_in = bih_f + jnp.concatenate(
            [bhh[0], bhh[1], jnp.zeros_like(bhh[2])], axis=-1)         # [1, 3H]
        b_hn = bhh[2]                                                  # [1, H]
        fused.extend([wih_f, whh_f, b_in, b_hn])
    return fused


def _fuse_meta_params(params):
    """Fold metadata normalization + feature mask into the Linear layer."""
    scale = params["meta_inv_std"] * params["meta_mask"]               # [1, M]
    mw = params["meta_w"] * jnp.transpose(scale)                       # [M, F]
    mb = params["meta_b"] - jnp.dot(params["meta_mean"] * scale, params["meta_w"])
    return mw, mb


# ----------------------------------------------------------------------------
# VMEM budgeting
# ----------------------------------------------------------------------------
def _vmem_plan(S, BB, D, H, F, M, L, seq_chunk):
    """Derive (chunk size, vmem_limit_bytes) from the chip's VMEM capacity."""
    try:
        cap = int(pltpu.get_tpu_info().vmem_capacity_bytes)
    except Exception:
        cap = 64 * 1024 * 1024            # conservative default (v7x per-TC VMEM)
    vmem_limit = int(min(cap * 0.8, cap - (8 << 20)))

    rD = _round_up(D, 128)
    rHF = _round_up(H + F, 128)
    r3H = _round_up(3 * H, 128)
    rH = _round_up(H, 128)
    rF = _round_up(F, 128)
    rM = _round_up(M, 128)

    # Chunk-size-independent footprint (weights worst-case double-buffered).
    fixed = 0
    for l in range(L):
        din = D if l == 0 else H
        fixed += _round_up(din, 8) * r3H + H * r3H + 8 * r3H + 8 * rH
    fixed += _round_up(M, 8) * rF + 8 * rF
    fixed *= 2
    fixed += L * BB * rH * 3 + BB * rF + BB * rM * 2
    fixed *= 4                                       # f32 bytes

    budget = max(vmem_limit - fixed - (4 << 20), 1 << 20)
    # Per-timestep bytes: x (2 bufs, lane-padded) + feat (2 bufs) + seq_sc + i_sc.
    per_ts = 4 * BB * (2 * rD + 2 * rHF + rH + r3H)
    ts = max(1, budget // per_ts)
    ts = int(min(ts, seq_chunk, S))
    return ts, vmem_limit


# ----------------------------------------------------------------------------
# Wrapper
# ----------------------------------------------------------------------------
def backbone_forward(params, data, metadata, state, *, seq_chunk=512,
                     batch_blocks=None):
    """data: [B, S, D] (batch_first), metadata: [B, M], state: [L, B, H] (GRU).

    Returns (features [B, S, H + F_meta], new_state [L, B, H]).
    batch_blocks: number of batch-parallel grid blocks (set 2 on v7x to use
    both TensorCores; default 1 is best on single-TC v5e/v6e).
    """
    data = data.astype(jnp.float32)
    metadata = metadata.astype(jnp.float32)
    state = state.astype(jnp.float32)

    B0, S, D = data.shape
    L = params["n_layers"]
    H = params["rnn_n_features"]
    F = params["meta_w"].shape[-1]
    M = metadata.shape[-1]

    n_bb = int(batch_blocks) if batch_blocks else 1

    # Pad batch to a multiple of 8 * n_bb (f32 sublane alignment per block).
    B = _round_up(B0, 8 * n_bb)
    if B != B0:
        data = jnp.pad(data, ((0, B - B0), (0, 0), (0, 0)))
        metadata = jnp.pad(metadata, ((0, B - B0), (0, 0)))
        state = jnp.pad(state, ((0, 0), (0, B - B0), (0, 0)))
    BB = B // n_bb

    # Chunk size from VMEM budget (only one chunk of activations is resident;
    # hidden state is carried across chunks).  Ragged sequences are padded up
    # to a multiple of ts and masked in-kernel (never degrade to ts=1).
    ts, vmem_limit = _vmem_plan(S, BB, D, H, F, M, L, seq_chunk)
    n_chunks = -(-S // ts)
    S_pad = n_chunks * ts
    pad = S_pad - S
    if pad:
        data = jnp.pad(data, ((0, 0), (0, pad), (0, 0)))

    layer_params = _fuse_gru_params(params)
    mw, mb = _fuse_meta_params(params)

    # [B, S_pad, D] -> [S_pad, B, D]: tiny (D is the raw dynamic input size).
    x_sbd = jnp.transpose(data, (1, 0, 2))

    kernel = _make_backbone_kernel(L, ts, BB, D, H, F, pad > 0, S)

    def run(single_buffer):
        sb_kwargs = dict(pipeline_mode=pl.Buffered(1)) if single_buffer else {}

        def cspec(shape, imap):
            return pl.BlockSpec(shape, imap, **sb_kwargs)

        in_specs = [
            pl.BlockSpec((ts, BB, D), lambda bb, s: (s, bb, 0)),   # x chunk
            pl.BlockSpec((BB, M), lambda bb, s: (bb, 0)),          # metadata
            cspec((M, F), lambda bb, s: (0, 0)),                   # fused meta W
            cspec((1, F), lambda bb, s: (0, 0)),                   # fused meta b
            pl.BlockSpec((L, BB, H), lambda bb, s: (0, bb, 0)),    # h0
        ]
        for l in range(L):
            din = D if l == 0 else H
            in_specs += [cspec((din, 3 * H), lambda bb, s: (0, 0)),  # fused W_ih
                         cspec((H, 3 * H), lambda bb, s: (0, 0)),    # fused W_hh
                         cspec((1, 3 * H), lambda bb, s: (0, 0)),    # input bias
                         cspec((1, H), lambda bb, s: (0, 0))]        # b_hn

        out_specs = (
            pl.BlockSpec((ts, BB, H + F), lambda bb, s: (s, bb, 0)),  # features
            pl.BlockSpec((L, BB, H), lambda bb, s: (0, bb, 0)),       # final h
        )

        return pl.pallas_call(
            kernel,
            out_shape=(jax.ShapeDtypeStruct((S_pad, B, H + F), jnp.float32),
                       jax.ShapeDtypeStruct((L, B, H), jnp.float32)),
            grid_spec=pltpu.PrefetchScalarGridSpec(
                num_scalar_prefetch=0,
                grid=(n_bb, n_chunks),
                in_specs=in_specs,
                out_specs=out_specs,
                scratch_shapes=[pltpu.VMEM((ts, BB, H), jnp.float32),      # layer out
                                pltpu.VMEM((ts, BB, 3 * H), jnp.float32),  # input proj
                                pltpu.VMEM((L, BB, H), jnp.float32),       # h carry
                                pltpu.VMEM((BB, F), jnp.float32)]),        # meta cache
            compiler_params=pltpu.CompilerParams(
                dimension_semantics=("parallel", "arbitrary"),
                vmem_limit_bytes=int(vmem_limit)),
        )(x_sbd, metadata, mw, mb, state, *layer_params)

    try:
        feat_sbf, hT = run(single_buffer=True)
        jax.block_until_ready((feat_sbf, hT))
    except Exception:
        # TODO(synk): pl.Buffered(1) (single-buffered grid-invariant inputs)
        #             not supported on this JAX build; use default buffering.
        feat_sbf, hT = run(single_buffer=False)

    # Back to batch-first and drop sequence / batch padding.
    features = jnp.transpose(feat_sbf[:S], (1, 0, 2))[:B0]
    return features, hT[:, :B0]


# ----------------------------------------------------------------------------
# Deterministic parameter init + pure-JAX reference
# ----------------------------------------------------------------------------
def _uniform(key, shape, bound):
    return jax.random.uniform(key, shape, jnp.float32, -bound, bound)


def make_params(key, n_layers, rnn_input_size, rnn_n_features,
                metadata_input_size, metadata_n_features):
    H = rnn_n_features
    keys = iter(jax.random.split(key, 8 * n_layers + 8))
    bound = 1.0 / jnp.sqrt(H)
    wih, whh, bih, bhh = [], [], [], []
    for l in range(n_layers):
        d_in = rnn_input_size if l == 0 else H
        wih.append(_uniform(next(keys), (3, d_in, H), bound))
        whh.append(_uniform(next(keys), (3, H, H), bound))
        bih.append(_uniform(next(keys), (3, 1, H), bound))
        bhh.append(_uniform(next(keys), (3, 1, H), bound))
    mb = 1.0 / jnp.sqrt(metadata_input_size)
    return dict(
        n_layers=n_layers,
        rnn_n_features=H,
        wih=wih, whh=whh, bih=bih, bhh=bhh,
        meta_w=_uniform(next(keys), (metadata_input_size, metadata_n_features), mb),
        meta_b=_uniform(next(keys), (1, metadata_n_features), mb),
        meta_mask=jnp.ones((1, metadata_input_size), jnp.float32),
        dyn_mean=_uniform(next(keys), (1, rnn_input_size), 0.5),
        dyn_inv_std=1.0 / (1.0 + jnp.abs(_uniform(next(keys), (1, rnn_input_size), 0.5))),
        meta_mean=_uniform(next(keys), (1, metadata_input_size), 0.5),
        meta_inv_std=1.0 / (1.0 + jnp.abs(_uniform(next(keys), (1, metadata_input_size), 0.5))),
    )


def _mm(a, b):
    return jnp.dot(a, b, precision=_PREC)


def reference_forward(params, data, metadata, state):
    """Pure-JAX reference mirroring the PyTorch forward semantics."""
    data = data.astype(jnp.float32)
    metadata = metadata.astype(jnp.float32)
    B, S, D = data.shape
    H = params["rnn_n_features"]

    m = (metadata - params["meta_mean"]) * params["meta_inv_std"]
    m = m * params["meta_mask"]
    meta_out = jnp.maximum(_mm(m, params["meta_w"]) + params["meta_b"], 0.0)

    x = jnp.transpose(data, (1, 0, 2))
    new_hidden = []
    layer_in = x
    for l in range(params["n_layers"]):
        if l == 0:
            mean, inv_std = params["dyn_mean"], params["dyn_inv_std"]
        else:
            mean, inv_std = jnp.zeros((1, H)), jnp.ones((1, H))
        wih, whh = params["wih"][l], params["whh"][l]
        bih, bhh = params["bih"][l], params["bhh"][l]
        h = state[l]
        outs = []
        for t in range(layer_in.shape[0]):
            x_t = (layer_in[t] - mean) * inv_std
            r = jax.nn.sigmoid(_mm(x_t, wih[0]) + bih[0] + _mm(h, whh[0]) + bhh[0])
            z = jax.nn.sigmoid(_mm(x_t, wih[1]) + bih[1] + _mm(h, whh[1]) + bhh[1])
            n = jnp.tanh(_mm(x_t, wih[2]) + bih[2] + r * (_mm(h, whh[2]) + bhh[2]))
            h = (1.0 - z) * n + z * h
            outs.append(h)
        new_hidden.append(h)
        layer_in = jnp.stack(outs, axis=0)
    output = jnp.transpose(layer_in, (1, 0, 2))
    F = meta_out.shape[-1]
    meta_rep = jnp.broadcast_to(meta_out[:, None, :], (B, S, F))
    return jnp.concatenate([output, meta_rep], axis=-1), jnp.stack(new_hidden, 0)


# ----------------------------------------------------------------------------
if __name__ == "__main__":
    RNN_IN, RNN_H = 2, 128             # rnn_input_size, rnn_n_features
    META_IN, META_F = 4, 128           # metadata_input_size, metadata_n_features
    N_LAYERS = 2

    key = jax.random.PRNGKey(0)
    kp, kd1, km1, kd2, km2 = jax.random.split(key, 5)
    params = make_params(kp, N_LAYERS, RNN_IN, RNN_H, META_IN, META_F)

    # --- Config 1: even chunking, batch padding, 2 batch blocks (parallel axis)
    B1, S1 = 12, 16
    data1 = jax.random.normal(kd1, (B1, S1, RNN_IN), jnp.float32)
    meta1 = jax.random.normal(km1, (B1, META_IN), jnp.float32)
    state1 = jnp.zeros((N_LAYERS, B1, RNN_H), jnp.float32)   # Backbone.init_state (GRU)

    feat1, hid1 = backbone_forward(params, data1, meta1, state1,
                                   seq_chunk=8, batch_blocks=2)
    feat1 = jax.block_until_ready(feat1)
    hid1 = jax.block_until_ready(hid1)
    assert feat1.shape == (B1, S1, RNN_H + META_F)
    assert hid1.shape == (N_LAYERS, B1, RNN_H)
    ref_f1, ref_h1 = reference_forward(params, data1, meta1, state1)
    assert jnp.allclose(feat1, ref_f1, atol=2e-2, rtol=2e-2)
    assert jnp.allclose(hid1, ref_h1, atol=2e-2, rtol=2e-2)

    # --- Config 2: ragged sequence length (S not a multiple of the chunk)
    B2, S2 = 4, 13
    data2 = jax.random.normal(kd2, (B2, S2, RNN_IN), jnp.float32)
    meta2 = jax.random.normal(km2, (B2, META_IN), jnp.float32)
    state2 = jnp.zeros((N_LAYERS, B2, RNN_H), jnp.float32)

    feat2, hid2 = backbone_forward(params, data2, meta2, state2, seq_chunk=8)
    feat2 = jax.block_until_ready(feat2)
    hid2 = jax.block_until_ready(hid2)
    assert feat2.shape == (B2, S2, RNN_H + META_F)
    assert hid2.shape == (N_LAYERS, B2, RNN_H)
    ref_f2, ref_h2 = reference_forward(params, data2, meta2, state2)
    assert jnp.allclose(feat2, ref_f2, atol=2e-2, rtol=2e-2)
    assert jnp.allclose(hid2, ref_h2, atol=2e-2, rtol=2e-2)

    print("KERNEL_OK")
</pallas_src>

<mosaic_0001>
module attributes {stable_mosaic.version = 11 : i64} {
  func.func @kernel(%arg0: i32, %arg1: i32, %arg2: memref<8x8x2xf32, #tpu.memory_space<vmem>>, %arg3: memref<8x4xf32, #tpu.memory_space<vmem>>, %arg4: memref<4x128xf32, #tpu.memory_space<vmem>>, %arg5: memref<1x128xf32, #tpu.memory_space<vmem>>, %arg6: memref<2x8x128xf32, #tpu.memory_space<vmem>>, %arg7: memref<2x384xf32, #tpu.memory_space<vmem>>, %arg8: memref<128x384xf32, #tpu.memory_space<vmem>>, %arg9: memref<1x384xf32, #tpu.memory_space<vmem>>, %arg10: memref<1x128xf32, #tpu.memory_space<vmem>>, %arg11: memref<128x384xf32, #tpu.memory_space<vmem>>, %arg12: memref<128x384xf32, #tpu.memory_space<vmem>>, %arg13: memref<1x384xf32, #tpu.memory_space<vmem>>, %arg14: memref<1x128xf32, #tpu.memory_space<vmem>>, %arg15: memref<8x8x256xf32, #tpu.memory_space<vmem>>, %arg16: memref<2x8x128xf32, #tpu.memory_space<vmem>>, %arg17: memref<8x8x128xf32, #tpu.memory_space<vmem>>, %arg18: memref<8x8x384xf32, #tpu.memory_space<vmem>>, %arg19: memref<2x8x128xf32, #tpu.memory_space<vmem>>, %arg20: memref<8x128xf32, #tpu.memory_space<vmem>>) attributes {dimension_semantics = [#tpu.dimension_semantics<parallel>, #tpu.dimension_semantics<arbitrary>], iteration_bounds = array<i64: 2, 2>, scalar_prefetch = 0 : i64, scratch_operands = 4 : i64, tpu.core_type = #tpu.core_type<tc>, window_params = [{transform_indices = @transform_0, window_bounds = array<i64: 8, 8, 2>}, {transform_indices = @transform_1, window_bounds = array<i64: 8, 4>}, {pipeline_mode = #tpu.pipeline_mode<synchronous>, transform_indices = @transform_2, window_bounds = array<i64: 4, 128>}, {pipeline_mode = #tpu.pipeline_mode<synchronous>, transform_indices = @transform_3, window_bounds = array<i64: 1, 128>}, {transform_indices = @transform_4, window_bounds = array<i64: 2, 8, 128>}, {pipeline_mode = #tpu.pipeline_mode<synchronous>, transform_indices = @transform_5, window_bounds = array<i64: 2, 384>}, {pipeline_mode = #tpu.pipeline_mode<synchronous>, transform_indices = @transform_6, window_bounds = array<i64: 128, 384>}, {pipeline_mode = #tpu.pipeline_mode<synchronous>, transform_indices = @transform_7, window_bounds = array<i64: 1, 384>}, {pipeline_mode = #tpu.pipeline_mode<synchronous>, transform_indices = @transform_8, window_bounds = array<i64: 1, 128>}, {pipeline_mode = #tpu.pipeline_mode<synchronous>, transform_indices = @transform_9, window_bounds = array<i64: 128, 384>}, {pipeline_mode = #tpu.pipeline_mode<synchronous>, transform_indices = @transform_10, window_bounds = array<i64: 128, 384>}, {pipeline_mode = #tpu.pipeline_mode<synchronous>, transform_indices = @transform_11, window_bounds = array<i64: 1, 384>}, {pipeline_mode = #tpu.pipeline_mode<synchronous>, transform_indices = @transform_12, window_bounds = array<i64: 1, 128>}, {transform_indices = @transform_13, window_bounds = array<i64: 8, 8, 256>}, {transform_indices = @transform_14, window_bounds = array<i64: 2, 8, 128>}]} {
    %c0_i32 = arith.constant 0 : i32
    %0 = arith.cmpi eq, %arg1, %c0_i32 : i32
    %1 = arith.extui %0 : i1 to i32
    %c0_i32_0 = arith.constant 0 : i32
    %2 = arith.cmpi ne, %1, %c0_i32_0 : i32
    scf.if %2 {
      %c0_184 = arith.constant 0 : index
      %c0_185 = arith.constant 0 : index
      %c0_186 = arith.constant 0 : index
      %607 = vector.load %arg6[%c0_184, %c0_185, %c0_186] : memref<2x8x128xf32, #tpu.memory_space<vmem>>, vector<2x8x128xf32>
      %c0_187 = arith.constant 0 : index
      %c0_188 = arith.constant 0 : index
      %c0_189 = arith.constant 0 : index
      %608 = vector.load %arg19[%c0_187, %c0_188, %c0_189] : memref<2x8x128xf32, #tpu.memory_space<vmem>>, vector<2x8x128xf32>
      tpu.vector_store %arg19[%c0_187, %c0_188, %c0_189], %607 {strides = array<i32>} : memref<2x8x128xf32, #tpu.memory_space<vmem>>, vector<2x8x128xf32>,
      %c0_190 = arith.constant 0 : index
      %c0_191 = arith.constant 0 : index
      %609 = vector.load %arg3[%c0_190, %c0_191] : memref<8x4xf32, #tpu.memory_space<vmem>>, vector<8x4xf32>
      %c0_192 = arith.constant 0 : index
      %c0_193 = arith.constant 0 : index
      %610 = vector.load %arg4[%c0_192, %c0_193] : memref<4x128xf32, #tpu.memory_space<vmem>>, vector<4x128xf32>
      %cst_194 = arith.constant dense<0.000000e+00> : vector<8x128xf32>
      %611 = tpu.matmul %609, %610, %cst_194 {dimension_numbers = #tpu.dot_dimension_numbers<[1], [0], [0], [1], [0, 0, 1, 1], [], []>} : vector<8x4xf32>, vector<4x128xf32>, vector<8x128xf32> -> vector<8x128xf32>
      %c0_195 = arith.constant 0 : index
      %c0_196 = arith.constant 0 : index
      %612 = vector.load %arg5[%c0_195, %c0_196] : memref<1x128xf32, #tpu.memory_space<vmem>>, vector<1x128xf32>
      %613 = vector.broadcast %612 : vector<1x128xf32> to vector<8x128xf32>
      %614 = arith.addf %611, %613 : vector<8x128xf32>
      %cst_197 = arith.constant 0.000000e+00 : f32
      %615 = vector.broadcast %cst_197 : f32 to vector<8x128xf32>
      %616 = arith.maximumf %614, %615 : vector<8x128xf32>
      %c0_198 = arith.constant 0 : index
      %c0_199 = arith.constant 0 : index
      %617 = vector.load %arg20[%c0_198, %c0_199] : memref<8x128xf32, #tpu.memory_space<vmem>>, vector<8x128xf32>
      tpu.vector_store %arg20[%c0_198, %c0_199], %616 {strides = array<i32>} : memref<8x128xf32, #tpu.memory_space<vmem>>, vector<8x128xf32>,
    } else {
    }
    %c0 = arith.constant 0 : index
    %c0_1 = arith.constant 0 : index
    %3 = vector.load %arg20[%c0, %c0_1] : memref<8x128xf32, #tpu.memory_space<vmem>>, vector<8x128xf32>
    %4 = vector.shape_cast %3 : vector<8x128xf32> to vector<1x8x128xf32>
    %5 = vector.shape_cast %4 : vector<1x8x128xf32> to vector<1x8x128xf32>
    %6 = vector.broadcast %5 : vector<1x8x128xf32> to vector<8x8x128xf32>
    %c0_2 = arith.constant 0 : index
    %c0_3 = arith.constant 0 : index
    %c128 = arith.constant 128 : index
    %7 = vector.load %arg15[%c0_2, %c0_3, %c128] : memref<8x8x256xf32, #tpu.memory_space<vmem>>, vector<8x8x128xf32>
    tpu.vector_store %arg15[%c0_2, %c0_3, %c128], %6 {strides = array<i32>} : memref<8x8x256xf32, #tpu.memory_space<vmem>>, vector<8x8x128xf32>,
    %c0_4 = arith.constant 0 : index
    %c0_5 = arith.constant 0 : index
    %c0_6 = arith.constant 0 : index
    %8 = vector.load %arg2[%c0_4, %c0_5, %c0_6] : memref<8x8x2xf32, #tpu.memory_space<vmem>>, vector<8x8x2xf32>
    %9 = vector.shape_cast %8 : vector<8x8x2xf32> to vector<64x2xf32>
    %c0_7 = arith.constant 0 : index
    %c0_8 = arith.constant 0 : index
    %10 = vector.load %arg7[%c0_7, %c0_8] : memref<2x384xf32, #tpu.memory_space<vmem>>, vector<2x384xf32>
    %cst = arith.constant dense<0.000000e+00> : vector<64x384xf32>
    %11 = tpu.matmul %9, %10, %cst {dimension_numbers = #tpu.dot_dimension_numbers<[1], [0], [0], [1], [0, 0, 1, 1], [], []>} : vector<64x2xf32>, vector<2x384xf32>, vector<64x384xf32> -> vector<64x384xf32>
    %c0_9 = arith.constant 0 : index
    %c0_10 = arith.constant 0 : index
    %12 = vector.load %arg9[%c0_9, %c0_10] : memref<1x384xf32, #tpu.memory_space<vmem>>, vector<1x384xf32>
    %13 = vector.broadcast %12 : vector<1x384xf32> to vector<64x384xf32>
    %14 = arith.addf %11, %13 : vector<64x384xf32>
    %15 = vector.shape_cast %14 : vector<64x384xf32> to vector<8x8x384xf32>
    %c0_11 = arith.constant 0 : index
    %c0_12 = arith.constant 0 : index
    %c0_13 = arith.constant 0 : index
    %16 = vector.load %arg18[%c0_11, %c0_12, %c0_13] : memref<8x8x384xf32, #tpu.memory_space<vmem>>, vector<8x8x384xf32>
    tpu.vector_store %arg18[%c0_11, %c0_12, %c0_13], %15 {strides = array<i32>} : memref<8x8x384xf32, #tpu.memory_space<vmem>>, vector<8x8x384xf32>,
    %c0_14 = arith.constant 0 : index
    %c0_15 = arith.constant 0 : index
    %17 = vector.load %arg8[%c0_14, %c0_15] : memref<128x384xf32, #tpu.memory_space<vmem>>, vector<128x384xf32>
    %c0_16 = arith.constant 0 : index
    %c0_17 = arith.constant 0 : index
    %18 = vector.load %arg10[%c0_16, %c0_17] : memref<1x128xf32, #tpu.memory_space<vmem>>, vector<1x128xf32>
    %19 = vector.shape_cast %18 : vector<1x128xf32> to vector<1x128xf32>
    %20 = vector.broadcast %19 : vector<1x128xf32> to vector<8x128xf32>
    %c0_18 = arith.constant 0 : index
    %c0_19 = arith.constant 0 : index
    %c0_20 = arith.constant 0 : index
    %21 = vector.load %arg19[%c0_18, %c0_19, %c0_20] : memref<2x8x128xf32, #tpu.memory_space<vmem>>, vector<1x8x128xf32>
    %22 = vector.shape_cast %21 : vector<1x8x128xf32> to vector<8x128xf32>
    %c0_i32_21 = arith.constant 0 : i32
    %23 = arith.index_cast %c0_i32_21 : i32 to index
    %c0_22 = arith.constant 0 : index
    %c0_23 = arith.constant 0 : index
    %24 = vector.load %arg18[%23, %c0_22, %c0_23] : memref<8x8x384xf32, #tpu.memory_space<vmem>>, vector<1x8x384xf32>
    %25 = vector.shape_cast %24 : vector<1x8x384xf32> to vector<8x384xf32>
    %cst_24 = arith.constant dense<0.000000e+00> : vector<8x384xf32>
    %26 = tpu.matmul %22, %17, %cst_24 {dimension_numbers = #tpu.dot_dimension_numbers<[1], [0], [0], [1], [0, 0, 1, 1], [], []>} : vector<8x128xf32>, vector<128x384xf32>, vector<8x384xf32> -> vector<8x384xf32>
    %27 = vector.extract_strided_slice %25 {offsets = [0, 0], sizes = [8, 128], strides = [1, 1]} : vector<8x384xf32> to vector<8x128xf32>
    %28 = vector.extract_strided_slice %26 {offsets = [0, 0], sizes = [8, 128], strides = [1, 1]} : vector<8x384xf32> to vector<8x128xf32>
    %29 = arith.addf %27, %28 : vector<8x128xf32>
    %30 = arith.negf %29 : vector<8x128xf32>
    %31 = math.exp %30 : vector<8x128xf32>
    %cst_25 = arith.constant 1.000000e+00 : f32
    %32 = vector.broadcast %cst_25 : f32 to vector<8x128xf32>
    %33 = arith.addf %32, %31 : vector<8x128xf32>
    %34 = arith.divf %32, %33 : vector<8x128xf32>
    %35 = vector.extract_strided_slice %25 {offsets = [0, 128], sizes = [8, 128], strides = [1, 1]} : vector<8x384xf32> to vector<8x128xf32>
    %36 = vector.extract_strided_slice %26 {offsets = [0, 128], sizes = [8, 128], strides = [1, 1]} : vector<8x384xf32> to vector<8x128xf32>
    %37 = arith.addf %35, %36 : vector<8x128xf32>
    %38 = arith.negf %37 : vector<8x128xf32>
    %39 = math.exp %38 : vector<8x128xf32>
    %cst_26 = arith.constant 1.000000e+00 : f32
    %40 = vector.broadcast %cst_26 : f32 to vector<8x128xf32>
    %41 = arith.addf %40, %39 : vector<8x128xf32>
    %42 = arith.divf %40, %41 : vector<8x128xf32>
    %43 = vector.extract_strided_slice %25 {offsets = [0, 256], sizes = [8, 128], strides = [1, 1]} : vector<8x384xf32> to vector<8x128xf32>
    %44 = vector.extract_strided_slice %26 {offsets = [0, 256], sizes = [8, 128], strides = [1, 1]} : vector<8x384xf32> to vector<8x128xf32>
    %45 = arith.addf %44, %20 : vector<8x128xf32>
    %46 = arith.mulf %34, %45 : vector<8x128xf32>
    %47 = arith.addf %43, %46 : vector<8x128xf32>
    %48 = math.tanh %47 : vector<8x128xf32>
    %cst_27 = arith.constant 1.000000e+00 : f32
    %49 = vector.broadcast %cst_27 : f32 to vector<8x128xf32>
    %50 = arith.subf %49, %42 : vector<8x128xf32>
    %51 = arith.mulf %50, %48 : vector<8x128xf32>
    %52 = arith.mulf %42, %22 : vector<8x128xf32>
    %53 = arith.addf %51, %52 : vector<8x128xf32>
    %54 = arith.index_cast %c0_i32_21 : i32 to index
    %c0_28 = arith.constant 0 : index
    %c0_29 = arith.constant 0 : index
    %55 = vector.load %arg17[%54, %c0_28, %c0_29] : memref<8x8x128xf32, #tpu.memory_space<vmem>>, vector<1x8x128xf32>
    %56 = vector.shape_cast %55 : vector<1x8x128xf32> to vector<8x128xf32>
    %57 = vector.shape_cast %53 : vector<8x128xf32> to vector<1x8x128xf32>
    tpu.vector_store %arg17[%54, %c0_28, %c0_29], %57 {strides = array<i32>} : memref<8x8x128xf32, #tpu.memory_space<vmem>>, vector<1x8x128xf32>,
    %c1_i32 = arith.constant 1 : i32
    %58 = arith.index_cast %c1_i32 : i32 to index
    %c0_30 = arith.constant 0 : index
    %c0_31 = arith.constant 0 : index
    %59 = vector.load %arg18[%58, %c0_30, %c0_31] : memref<8x8x384xf32, #tpu.memory_space<vmem>>, vector<1x8x384xf32>
    %60 = vector.shape_cast %59 : vector<1x8x384xf32> to vector<8x384xf32>
    %cst_32 = arith.constant dense<0.000000e+00> : vector<8x384xf32>
    %61 = tpu.matmul %53, %17, %cst_32 {dimension_numbers = #tpu.dot_dimension_numbers<[1], [0], [0], [1], [0, 0, 1, 1], [], []>} : vector<8x128xf32>, vector<128x384xf32>, vector<8x384xf32> -> vector<8x384xf32>
    %62 = vector.extract_strided_slice %60 {offsets = [0, 0], sizes = [8, 128], strides = [1, 1]} : vector<8x384xf32> to vector<8x128xf32>
    %63 = vector.extract_strided_slice %61 {offsets = [0, 0], sizes = [8, 128], strides = [1, 1]} : vector<8x384xf32> to vector<8x128xf32>
    %64 = arith.addf %62, %63 : vector<8x128xf32>
    %65 = arith.negf %64 : vector<8x128xf32>
    %66 = math.exp %65 : vector<8x128xf32>
    %cst_33 = arith.constant 1.000000e+00 : f32
    %67 = vector.broadcast %cst_33 : f32 to vector<8x128xf32>
    %68 = arith.addf %67, %66 : vector<8x128xf32>
    %69 = arith.divf %67, %68 : vector<8x128xf32>
    %70 = vector.extract_strided_slice %60 {offsets = [0, 128], sizes = [8, 128], strides = [1, 1]} : vector<8x384xf32> to vector<8x128xf32>
    %71 = vector.extract_strided_slice %61 {offsets = [0, 128], sizes = [8, 128], strides = [1, 1]} : vector<8x384xf32> to vector<8x128xf32>
    %72 = arith.addf %70, %71 : vector<8x128xf32>
    %73 = arith.negf %72 : vector<8x128xf32>
    %74 = math.exp %73 : vector<8x128xf32>
    %cst_34 = arith.constant 1.000000e+00 : f32
    %75 = vector.broadcast %cst_34 : f32 to vector<8x128xf32>
    %76 = arith.addf %75, %74 : vector<8x128xf32>
    %77 = arith.divf %75, %76 : vector<8x128xf32>
    %78 = vector.extract_strided_slice %60 {offsets = [0, 256], sizes = [8, 128], strides = [1, 1]} : vector<8x384xf32> to vector<8x128xf32>
    %79 = vector.extract_strided_slice %61 {offsets = [0, 256], sizes = [8, 128], strides = [1, 1]} : vector<8x384xf32> to vector<8x128xf32>
    %80 = arith.addf %79, %20 : vector<8x128xf32>
    %81 = arith.mulf %69, %80 : vector<8x128xf32>
    %82 = arith.addf %78, %81 : vector<8x128xf32>
    %83 = math.tanh %82 : vector<8x128xf32>
    %cst_35 = arith.constant 1.000000e+00 : f32
    %84 = vector.broadcast %cst_35 : f32 to vector<8x128xf32>
    %85 = arith.subf %84, %77 : vector<8x128xf32>
    %86 = arith.mulf %85, %83 : vector<8x128xf32>
    %87 = arith.mulf %77, %53 : vector<8x128xf32>
    %88 = arith.addf %86, %87 : vector<8x128xf32>
    %89 = arith.index_cast %c1_i32 : i32 to index
    %c0_36 = arith.constant 0 : index
    %c0_37 = arith.constant 0 : index
    %90 = vector.load %arg17[%89, %c0_36, %c0_37] : memref<8x8x128xf32, #tpu.memory_space<vmem>>, vector<1x8x128xf32>
    %91 = vector.shape_cast %90 : vector<1x8x128xf32> to vector<8x128xf32>
    %92 = vector.shape_cast %88 : vector<8x128xf32> to vector<1x8x128xf32>
    tpu.vector_store %arg17[%89, %c0_36, %c0_37], %92 {strides = array<i32>} : memref<8x8x128xf32, #tpu.memory_space<vmem>>, vector<1x8x128xf32>,
    %c2_i32 = arith.constant 2 : i32
    %93 = arith.index_cast %c2_i32 : i32 to index
    %c0_38 = arith.constant 0 : index
    %c0_39 = arith.constant 0 : index
    %94 = vector.load %arg18[%93, %c0_38, %c0_39] : memref<8x8x384xf32, #tpu.memory_space<vmem>>, vector<1x8x384xf32>
    %95 = vector.shape_cast %94 : vector<1x8x384xf32> to vector<8x384xf32>
    %cst_40 = arith.constant dense<0.000000e+00> : vector<8x384xf32>
    %96 = tpu.matmul %88, %17, %cst_40 {dimension_numbers = #tpu.dot_dimension_numbers<[1], [0], [0], [1], [0, 0, 1, 1], [], []>} : vector<8x128xf32>, vector<128x384xf32>, vector<8x384xf32> -> vector<8x384xf32>
    %97 = vector.extract_strided_slice %95 {offsets = [0, 0], sizes = [8, 128], strides = [1, 1]} : vector<8x384xf32> to vector<8x128xf32>
    %98 = vector.extract_strided_slice %96 {offsets = [0, 0], sizes = [8, 128], strides = [1, 1]} : vector<8x384xf32> to vector<8x128xf32>
    %99 = arith.addf %97, %98 : vector<8x128xf32>
    %100 = arith.negf %99 : vector<8x128xf32>
    %101 = math.exp %100 : vector<8x128xf32>
    %cst_41 = arith.constant 1.000000e+00 : f32
    %102 = vector.broadcast %cst_41 : f32 to vector<8x128xf32>
    %103 = arith.addf %102, %101 : vector<8x128xf32>
    %104 = arith.divf %102, %103 : vector<8x128xf32>
    %105 = vector.extract_strided_slice %95 {offsets = [0, 128], sizes = [8, 128], strides = [1, 1]} : vector<8x384xf32> to vector<8x128xf32>
    %106 = vector.extract_strided_slice %96 {offsets = [0, 128], sizes = [8, 128], strides = [1, 1]} : vector<8x384xf32> to vector<8x128xf32>
    %107 = arith.addf %105, %106 : vector<8x128xf32>
    %108 = arith.negf %107 : vector<8x128xf32>
    %109 = math.exp %108 : vector<8x128xf32>
    %cst_42 = arith.constant 1.000000e+00 : f32
    %110 = vector.broadcast %cst_42 : f32 to vector<8x128xf32>
    %111 = arith.addf %110, %109 : vector<8x128xf32>
    %112 = arith.divf %110, %111 : vector<8x128xf32>
    %113 = vector.extract_strided_slice %95 {offsets = [0, 256], sizes = [8, 128], strides = [1, 1]} : vector<8x384xf32> to vector<8x128xf32>
    %114 = vector.extract_strided_slice %96 {offsets = [0, 256], sizes = [8, 128], strides = [1, 1]} : vector<8x384xf32> to vector<8x128xf32>
    %115 = arith.addf %114, %20 : vector<8x128xf32>
    %116 = arith.mulf %104, %115 : vector<8x128xf32>
    %117 = arith.addf %113, %116 : vector<8x128xf32>
    %118 = math.tanh %117 : vector<8x128xf32>
    %cst_43 = arith.constant 1.000000e+00 : f32
    %119 = vector.broadcast %cst_43 : f32 to vector<8x128xf32>
    %120 = arith.subf %119, %112 : vector<8x128xf32>
    %121 = arith.mulf %120, %118 : vector<8x128xf32>
    %122 = arith.mulf %112, %88 : vector<8x128xf32>
    %123 = arith.addf %121, %122 : vector<8x128xf32>
    %124 = arith.index_cast %c2_i32 : i32 to index
    %c0_44 = arith.constant 0 : index
    %c0_45 = arith.constant 0 : index
    %125 = vector.load %arg17[%124, %c0_44, %c0_45] : memref<8x8x128xf32, #tpu.memory_space<vmem>>, vector<1x8x128xf32>
    %126 = vector.shape_cast %125 : vector<1x8x128xf32> to vector<8x128xf32>
    %127 = vector.shape_cast %123 : vector<8x128xf32> to vector<1x8x128xf32>
    tpu.vector_store %arg17[%124, %c0_44, %c0_45], %127 {strides = array<i32>} : memref<8x8x128xf32, #tpu.memory_space<vmem>>, vector<1x8x128xf32>,
    %c3_i32 = arith.constant 3 : i32
    %128 = arith.index_cast %c3_i32 : i32 to index
    %c0_46 = arith.constant 0 : index
    %c0_47 = arith.constant 0 : index
    %129 = vector.load %arg18[%128, %c0_46, %c0_47] : memref<8x8x384xf32, #tpu.memory_space<vmem>>, vector<1x8x384xf32>
    %130 = vector.shape_cast %129 : vector<1x8x384xf32> to vector<8x384xf32>
    %cst_48 = arith.constant dense<0.000000e+00> : vector<8x384xf32>
    %131 = tpu.matmul %123, %17, %cst_48 {dimension_numbers = #tpu.dot_dimension_numbers<[1], [0], [0], [1], [0, 0, 1, 1], [], []>} : vector<8x128xf32>, vector<128x384xf32>, vector<8x384xf32> -> vector<8x384xf32>
    %132 = vector.extract_strided_slice %130 {offsets = [0, 0], sizes = [8, 128], strides = [1, 1]} : vector<8x384xf32> to vector<8x128xf32>
    %133 = vector.extract_strided_slice %131 {offsets = [0, 0], sizes = [8, 128], strides = [1, 1]} : vector<8x384xf32> to vector<8x128xf32>
    %134 = arith.addf %132, %133 : vector<8x128xf32>
    %135 = arith.negf %134 : vector<8x128xf32>
    %136 = math.exp %135 : vector<8x128xf32>
    %cst_49 = arith.constant 1.000000e+00 : f32
    %137 = vector.broadcast %cst_49 : f32 to vector<8x128xf32>
    %138 = arith.addf %137, %136 : vector<8x128xf32>
    %139 = arith.divf %137, %138 : vector<8x128xf32>
    %140 = vector.extract_strided_slice %130 {offsets = [0, 128], sizes = [8, 128], strides = [1, 1]} : vector<8x384xf32> to vector<8x128xf32>
    %141 = vector.extract_strided_slice %131 {offsets = [0, 128], sizes = [8, 128], strides = [1, 1]} : vector<8x384xf32> to vector<8x128xf32>
    %142 = arith.addf %140, %141 : vector<8x128xf32>
    %143 = arith.negf %142 : vector<8x128xf32>
    %144 = math.exp %143 : vector<8x128xf32>
    %cst_50 = arith.constant 1.000000e+00 : f32
    %145 = vector.broadcast %cst_50 : f32 to vector<8x128xf32>
    %146 = arith.addf %145, %144 : vector<8x128xf32>
    %147 = arith.divf %145, %146 : vector<8x128xf32>
    %148 = vector.extract_strided_slice %130 {offsets = [0, 256], sizes = [8, 128], strides = [1, 1]} : vector<8x384xf32> to vector<8x128xf32>
    %149 = vector.extract_strided_slice %131 {offsets = [0, 256], sizes = [8, 128], strides = [1, 1]} : vector<8x384xf32> to vector<8x128xf32>
    %150 = arith.addf %149, %20 : vector<8x128xf32>
    %151 = arith.mulf %139, %150 : vector<8x128xf32>
    %152 = arith.addf %148, %151 : vector<8x128xf32>
    %153 = math.tanh %152 : vector<8x128xf32>
    %cst_51 = arith.constant 1.000000e+00 : f32
    %154 = vector.broadcast %cst_51 : f32 to vector<8x128xf32>
    %155 = arith.subf %154, %147 : vector<8x128xf32>
    %156 = arith.mulf %155, %153 : vector<8x128xf32>
    %157 = arith.mulf %147, %123 : vector<8x128xf32>
    %158 = arith.addf %156, %157 : vector<8x128xf32>
    %159 = arith.index_cast %c3_i32 : i32 to index
    %c0_52 = arith.constant 0 : index
    %c0_53 = arith.constant 0 : index
    %160 = vector.load %arg17[%159, %c0_52, %c0_53] : memref<8x8x128xf32, #tpu.memory_space<vmem>>, vector<1x8x128xf32>
    %161 = vector.shape_cast %160 : vector<1x8x128xf32> to vector<8x128xf32>
    %162 = vector.shape_cast %158 : vector<8x128xf32> to vector<1x8x128xf32>
    tpu.vector_store %arg17[%159, %c0_52, %c0_53], %162 {strides = array<i32>} : memref<8x8x128xf32, #tpu.memory_space<vmem>>, vector<1x8x128xf32>,
    %c4_i32 = arith.constant 4 : i32
    %163 = arith.index_cast %c4_i32 : i32 to index
    %c0_54 = arith.constant 0 : index
    %c0_55 = arith.constant 0 : index
    %164 = vector.load %arg18[%163, %c0_54, %c0_55] : memref<8x8x384xf32, #tpu.memory_space<vmem>>, vector<1x8x384xf32>
    %165 = vector.shape_cast %164 : vector<1x8x384xf32> to vector<8x384xf32>
    %cst_56 = arith.constant dense<0.000000e+00> : vector<8x384xf32>
    %166 = tpu.matmul %158, %17, %cst_56 {dimension_numbers = #tpu.dot_dimension_numbers<[1], [0], [0], [1], [0, 0, 1, 1], [], []>} : vector<8x128xf32>, vector<128x384xf32>, vector<8x384xf32> -> vector<8x384xf32>
    %167 = vector.extract_strided_slice %165 {offsets = [0, 0], sizes = [8, 128], strides = [1, 1]} : vector<8x384xf32> to vector<8x128xf32>
    %168 = vector.extract_strided_slice %166 {offsets = [0, 0], sizes = [8, 128], strides = [1, 1]} : vector<8x384xf32> to vector<8x128xf32>
    %169 = arith.addf %167, %168 : vector<8x128xf32>
    %170 = arith.negf %169 : vector<8x128xf32>
    %171 = math.exp %170 : vector<8x128xf32>
    %cst_57 = arith.constant 1.000000e+00 : f32
    %172 = vector.broadcast %cst_57 : f32 to vector<8x128xf32>
    %173 = arith.addf %172, %171 : vector<8x128xf32>
    %174 = arith.divf %172, %173 : vector<8x128xf32>
    %175 = vector.extract_strided_slice %165 {offsets = [0, 128], sizes = [8, 128], strides = [1, 1]} : vector<8x384xf32> to vector<8x128xf32>
    %176 = vector.extract_strided_slice %166 {offsets = [0, 128], sizes = [8, 128], strides = [1, 1]} : vector<8x384xf32> to vector<8x128xf32>
    %177 = arith.addf %175, %176 : vector<8x128xf32>
    %178 = arith.negf %177 : vector<8x128xf32>
    %179 = math.exp %178 : vector<8x128xf32>
    %cst_58 = arith.constant 1.000000e+00 : f32
    %180 = vector.broadcast %cst_58 : f32 to vector<8x128xf32>
    %181 = arith.addf %180, %179 : vector<8x128xf32>
    %182 = arith.divf %180, %181 : vector<8x128xf32>
    %183 = vector.extract_strided_slice %165 {offsets = [0, 256], sizes = [8, 128], strides = [1, 1]} : vector<8x384xf32> to vector<8x128xf32>
    %184 = vector.extract_strided_slice %166 {offsets = [0, 256], sizes = [8, 128], strides = [1, 1]} : vector<8x384xf32> to vector<8x128xf32>
    %185 = arith.addf %184, %20 : vector<8x128xf32>
    %186 = arith.mulf %174, %185 : vector<8x128xf32>
    %187 = arith.addf %183, %186 : vector<8x128xf32>
    %188 = math.tanh %187 : vector<8x128xf32>
    %cst_59 = arith.constant 1.000000e+00 : f32
    %189 = vector.broadcast %cst_59 : f32 to vector<8x128xf32>
    %190 = arith.subf %189, %182 : vector<8x128xf32>
    %191 = arith.mulf %190, %188 : vector<8x128xf32>
    %192 = arith.mulf %182, %158 : vector<8x128xf32>
    %193 = arith.addf %191, %192 : vector<8x128xf32>
    %194 = arith.index_cast %c4_i32 : i32 to index
    %c0_60 = arith.constant 0 : index
    %c0_61 = arith.constant 0 : index
    %195 = vector.load %arg17[%194, %c0_60, %c0_61] : memref<8x8x128xf32, #tpu.memory_space<vmem>>, vector<1x8x128xf32>
    %196 = vector.shape_cast %195 : vector<1x8x128xf32> to vector<8x128xf32>
    %197 = vector.shape_cast %193 : vector<8x128xf32> to vector<1x8x128xf32>
    tpu.vector_store %arg17[%194, %c0_60, %c0_61], %197 {strides = array<i32>} : memref<8x8x128xf32, #tpu.memory_space<vmem>>, vector<1x8x128xf32>,
    %c5_i32 = arith.constant 5 : i32
    %198 = arith.index_cast %c5_i32 : i32 to index
    %c0_62 = arith.constant 0 : index
    %c0_63 = arith.constant 0 : index
    %199 = vector.load %arg18[%198, %c0_62, %c0_63] : memref<8x8x384xf32, #tpu.memory_space<vmem>>, vector<1x8x384xf32>
    %200 = vector.shape_cast %199 : vector<1x8x384xf32> to vector<8x384xf32>
    %cst_64 = arith.constant dense<0.000000e+00> : vector<8x384xf32>
    %201 = tpu.matmul %193, %17, %cst_64 {dimension_numbers = #tpu.dot_dimension_numbers<[1], [0], [0], [1], [0, 0, 1, 1], [], []>} : vector<8x128xf32>, vector<128x384xf32>, vector<8x384xf32> -> vector<8x384xf32>
    %202 = vector.extract_strided_slice %200 {offsets = [0, 0], sizes = [8, 128], strides = [1, 1]} : vector<8x384xf32> to vector<8x128xf32>
    %203 = vector.extract_strided_slice %201 {offsets = [0, 0], sizes = [8, 128], strides = [1, 1]} : vector<8x384xf32> to vector<8x128xf32>
    %204 = arith.addf %202, %203 : vector<8x128xf32>
    %205 = arith.negf %204 : vector<8x128xf32>
    %206 = math.exp %205 : vector<8x128xf32>
    %cst_65 = arith.constant 1.000000e+00 : f32
    %207 = vector.broadcast %cst_65 : f32 to vector<8x128xf32>
    %208 = arith.addf %207, %206 : vector<8x128xf32>
    %209 = arith.divf %207, %208 : vector<8x128xf32>
    %210 = vector.extract_strided_slice %200 {offsets = [0, 128], sizes = [8, 128], strides = [1, 1]} : vector<8x384xf32> to vector<8x128xf32>
    %211 = vector.extract_strided_slice %201 {offsets = [0, 128], sizes = [8, 128], strides = [1, 1]} : vector<8x384xf32> to vector<8x128xf32>
    %212 = arith.addf %210, %211 : vector<8x128xf32>
    %213 = arith.negf %212 : vector<8x128xf32>
    %214 = math.exp %213 : vector<8x128xf32>
    %cst_66 = arith.constant 1.000000e+00 : f32
    %215 = vector.broadcast %cst_66 : f32 to vector<8x128xf32>
    %216 = arith.addf %215, %214 : vector<8x128xf32>
    %217 = arith.divf %215, %216 : vector<8x128xf32>
    %218 = vector.extract_strided_slice %200 {offsets = [0, 256], sizes = [8, 128], strides = [1, 1]} : vector<8x384xf32> to vector<8x128xf32>
    %219 = vector.extract_strided_slice %201 {offsets = [0, 256], sizes = [8, 128], strides = [1, 1]} : vector<8x384xf32> to vector<8x128xf32>
    %220 = arith.addf %219, %20 : vector<8x128xf32>
    %221 = arith.mulf %209, %220 : vector<8x128xf32>
    %222 = arith.addf %218, %221 : vector<8x128xf32>
    %223 = math.tanh %222 : vector<8x128xf32>
    %cst_67 = arith.constant 1.000000e+00 : f32
    %224 = vector.broadcast %cst_67 : f32 to vector<8x128xf32>
    %225 = arith.subf %224, %217 : vector<8x128xf32>
    %226 = arith.mulf %225, %223 : vector<8x128xf32>
    %227 = arith.mulf %217, %193 : vector<8x128xf32>
    %228 = arith.addf %226, %227 : vector<8x128xf32>
    %229 = arith.index_cast %c5_i32 : i32 to index
    %c0_68 = arith.constant 0 : index
    %c0_69 = arith.constant 0 : index
    %230 = vector.load %arg17[%229, %c0_68, %c0_69] : memref<8x8x128xf32, #tpu.memory_space<vmem>>, vector<1x8x128xf32>
    %231 = vector.shape_cast %230 : vector<1x8x128xf32> to vector<8x128xf32>
    %232 = vector.shape_cast %228 : vector<8x128xf32> to vector<1x8x128xf32>
    tpu.vector_store %arg17[%229, %c0_68, %c0_69], %232 {strides = array<i32>} : memref<8x8x128xf32, #tpu.memory_space<vmem>>, vector<1x8x128xf32>,
    %c6_i32 = arith.constant 6 : i32
    %233 = arith.index_cast %c6_i32 : i32 to index
    %c0_70 = arith.constant 0 : index
    %c0_71 = arith.constant 0 : index
    %234 = vector.load %arg18[%233, %c0_70, %c0_71] : memref<8x8x384xf32, #tpu.memory_space<vmem>>, vector<1x8x384xf32>
    %235 = vector.shape_cast %234 : vector<1x8x384xf32> to vector<8x384xf32>
    %cst_72 = arith.constant dense<0.000000e+00> : vector<8x384xf32>
    %236 = tpu.matmul %228, %17, %cst_72 {dimension_numbers = #tpu.dot_dimension_numbers<[1], [0], [0], [1], [0, 0, 1, 1], [], []>} : vector<8x128xf32>, vector<128x384xf32>, vector<8x384xf32> -> vector<8x384xf32>
    %237 = vector.extract_strided_slice %235 {offsets = [0, 0], sizes = [8, 128], strides = [1, 1]} : vector<8x384xf32> to vector<8x128xf32>
    %238 = vector.extract_strided_slice %236 {offsets = [0, 0], sizes = [8, 128], strides = [1, 1]} : vector<8x384xf32> to vector<8x128xf32>
    %239 = arith.addf %237, %238 : vector<8x128xf32>
    %240 = arith.negf %239 : vector<8x128xf32>
    %241 = math.exp %240 : vector<8x128xf32>
    %cst_73 = arith.constant 1.000000e+00 : f32
    %242 = vector.broadcast %cst_73 : f32 to vector<8x128xf32>
    %243 = arith.addf %242, %241 : vector<8x128xf32>
    %244 = arith.divf %242, %243 : vector<8x128xf32>
    %245 = vector.extract_strided_slice %235 {offsets = [0, 128], sizes = [8, 128], strides = [1, 1]} : vector<8x384xf32> to vector<8x128xf32>
    %246 = vector.extract_strided_slice %236 {offsets = [0, 128], sizes = [8, 128], strides = [1, 1]} : vector<8x384xf32> to vector<8x128xf32>
    %247 = arith.addf %245, %246 : vector<8x128xf32>
    %248 = arith.negf %247 : vector<8x128xf32>
    %249 = math.exp %248 : vector<8x128xf32>
    %cst_74 = arith.constant 1.000000e+00 : f32
    %250 = vector.broadcast %cst_74 : f32 to vector<8x128xf32>
    %251 = arith.addf %250, %249 : vector<8x128xf32>
    %252 = arith.divf %250, %251 : vector<8x128xf32>
    %253 = vector.extract_strided_slice %235 {offsets = [0, 256], sizes = [8, 128], strides = [1, 1]} : vector<8x384xf32> to vector<8x128xf32>
    %254 = vector.extract_strided_slice %236 {offsets = [0, 256], sizes = [8, 128], strides = [1, 1]} : vector<8x384xf32> to vector<8x128xf32>
    %255 = arith.addf %254, %20 : vector<8x128xf32>
    %256 = arith.mulf %244, %255 : vector<8x128xf32>
    %257 = arith.addf %253, %256 : vector<8x128xf32>
    %258 = math.tanh %257 : vector<8x128xf32>
    %cst_75 = arith.constant 1.000000e+00 : f32
    %259 = vector.broadcast %cst_75 : f32 to vector<8x128xf32>
    %260 = arith.subf %259, %252 : vector<8x128xf32>
    %261 = arith.mulf %260, %258 : vector<8x128xf32>
    %262 = arith.mulf %252, %228 : vector<8x128xf32>
    %263 = arith.addf %261, %262 : vector<8x128xf32>
    %264 = arith.index_cast %c6_i32 : i32 to index
    %c0_76 = arith.constant 0 : index
    %c0_77 = arith.constant 0 : index
    %265 = vector.load %arg17[%264, %c0_76, %c0_77] : memref<8x8x128xf32, #tpu.memory_space<vmem>>, vector<1x8x128xf32>
    %266 = vector.shape_cast %265 : vector<1x8x128xf32> to vector<8x128xf32>
    %267 = vector.shape_cast %263 : vector<8x128xf32> to vector<1x8x128xf32>
    tpu.vector_store %arg17[%264, %c0_76, %c0_77], %267 {strides = array<i32>} : memref<8x8x128xf32, #tpu.memory_space<vmem>>, vector<1x8x128xf32>,
    %c7_i32 = arith.constant 7 : i32
    %268 = arith.index_cast %c7_i32 : i32 to index
    %c0_78 = arith.constant 0 : index
    %c0_79 = arith.constant 0 : index
    %269 = vector.load %arg18[%268, %c0_78, %c0_79] : memref<8x8x384xf32, #tpu.memory_space<vmem>>, vector<1x8x384xf32>
    %270 = vector.shape_cast %269 : vector<1x8x384xf32> to vector<8x384xf32>
    %cst_80 = arith.constant dense<0.000000e+00> : vector<8x384xf32>
    %271 = tpu.matmul %263, %17, %cst_80 {dimension_numbers = #tpu.dot_dimension_numbers<[1], [0], [0], [1], [0, 0, 1, 1], [], []>} : vector<8x128xf32>, vector<128x384xf32>, vector<8x384xf32> -> vector<8x384xf32>
    %272 = vector.extract_strided_slice %270 {offsets = [0, 0], sizes = [8, 128], strides = [1, 1]} : vector<8x384xf32> to vector<8x128xf32>
    %273 = vector.extract_strided_slice %271 {offsets = [0, 0], sizes = [8, 128], strides = [1, 1]} : vector<8x384xf32> to vector<8x128xf32>
    %274 = arith.addf %272, %273 : vector<8x128xf32>
    %275 = arith.negf %274 : vector<8x128xf32>
    %276 = math.exp %275 : vector<8x128xf32>
    %cst_81 = arith.constant 1.000000e+00 : f32
    %277 = vector.broadcast %cst_81 : f32 to vector<8x128xf32>
    %278 = arith.addf %277, %276 : vector<8x128xf32>
    %279 = arith.divf %277, %278 : vector<8x128xf32>
    %280 = vector.extract_strided_slice %270 {offsets = [0, 128], sizes = [8, 128], strides = [1, 1]} : vector<8x384xf32> to vector<8x128xf32>
    %281 = vector.extract_strided_slice %271 {offsets = [0, 128], sizes = [8, 128], strides = [1, 1]} : vector<8x384xf32> to vector<8x128xf32>
    %282 = arith.addf %280, %281 : vector<8x128xf32>
    %283 = arith.negf %282 : vector<8x128xf32>
    %284 = math.exp %283 : vector<8x128xf32>
    %cst_82 = arith.constant 1.000000e+00 : f32
    %285 = vector.broadcast %cst_82 : f32 to vector<8x128xf32>
    %286 = arith.addf %285, %284 : vector<8x128xf32>
    %287 = arith.divf %285, %286 : vector<8x128xf32>
    %288 = vector.extract_strided_slice %270 {offsets = [0, 256], sizes = [8, 128], strides = [1, 1]} : vector<8x384xf32> to vector<8x128xf32>
    %289 = vector.extract_strided_slice %271 {offsets = [0, 256], sizes = [8, 128], strides = [1, 1]} : vector<8x384xf32> to vector<8x128xf32>
    %290 = arith.addf %289, %20 : vector<8x128xf32>
    %291 = arith.mulf %279, %290 : vector<8x128xf32>
    %292 = arith.addf %288, %291 : vector<8x128xf32>
    %293 = math.tanh %292 : vector<8x128xf32>
    %cst_83 = arith.constant 1.000000e+00 : f32
    %294 = vector.broadcast %cst_83 : f32 to vector<8x128xf32>
    %295 = arith.subf %294, %287 : vector<8x128xf32>
    %296 = arith.mulf %295, %293 : vector<8x128xf32>
    %297 = arith.mulf %287, %263 : vector<8x128xf32>
    %298 = arith.addf %296, %297 : vector<8x128xf32>
    %299 = arith.index_cast %c7_i32 : i32 to index
    %c0_84 = arith.constant 0 : index
    %c0_85 = arith.constant 0 : index
    %300 = vector.load %arg17[%299, %c0_84, %c0_85] : memref<8x8x128xf32, #tpu.memory_space<vmem>>, vector<1x8x128xf32>
    %301 = vector.shape_cast %300 : vector<1x8x128xf32> to vector<8x128xf32>
    %302 = vector.shape_cast %298 : vector<8x128xf32> to vector<1x8x128xf32>
    tpu.vector_store %arg17[%299, %c0_84, %c0_85], %302 {strides = array<i32>} : memref<8x8x128xf32, #tpu.memory_space<vmem>>, vector<1x8x128xf32>,
    %c8_i32 = arith.constant 8 : i32
    %c0_86 = arith.constant 0 : index
    %c0_87 = arith.constant 0 : index
    %c0_88 = arith.constant 0 : index
    %303 = vector.load %arg19[%c0_86, %c0_87, %c0_88] : memref<2x8x128xf32, #tpu.memory_space<vmem>>, vector<1x8x128xf32>
    %304 = vector.shape_cast %303 : vector<1x8x128xf32> to vector<8x128xf32>
    %305 = vector.shape_cast %298 : vector<8x128xf32> to vector<1x8x128xf32>
    tpu.vector_store %arg19[%c0_86, %c0_87, %c0_88], %305 {strides = array<i32>} : memref<2x8x128xf32, #tpu.memory_space<vmem>>, vector<1x8x128xf32>,
    %c0_89 = arith.constant 0 : index
    %c0_90 = arith.constant 0 : index
    %c0_91 = arith.constant 0 : index
    %306 = vector.load %arg17[%c0_89, %c0_90, %c0_91] : memref<8x8x128xf32, #tpu.memory_space<vmem>>, vector<8x8x128xf32>
    %307 = vector.shape_cast %306 : vector<8x8x128xf32> to vector<64x128xf32>
    %c0_92 = arith.constant 0 : index
    %c0_93 = arith.constant 0 : index
    %308 = vector.load %arg11[%c0_92, %c0_93] : memref<128x384xf32, #tpu.memory_space<vmem>>, vector<128x384xf32>
    %cst_94 = arith.constant dense<0.000000e+00> : vector<64x384xf32>
    %309 = tpu.matmul %307, %308, %cst_94 {dimension_numbers = #tpu.dot_dimension_numbers<[1], [0], [0], [1], [0, 0, 1, 1], [], []>} : vector<64x128xf32>, vector<128x384xf32>, vector<64x384xf32> -> vector<64x384xf32>
    %c0_95 = arith.constant 0 : index
    %c0_96 = arith.constant 0 : index
    %310 = vector.load %arg13[%c0_95, %c0_96] : memref<1x384xf32, #tpu.memory_space<vmem>>, vector<1x384xf32>
    %311 = vector.broadcast %310 : vector<1x384xf32> to vector<64x384xf32>
    %312 = arith.addf %309, %311 : vector<64x384xf32>
    %313 = vector.shape_cast %312 : vector<64x384xf32> to vector<8x8x384xf32>
    %c0_97 = arith.constant 0 : index
    %c0_98 = arith.constant 0 : index
    %c0_99 = arith.constant 0 : index
    %314 = vector.load %arg18[%c0_97, %c0_98, %c0_99] : memref<8x8x384xf32, #tpu.memory_space<vmem>>, vector<8x8x384xf32>
    tpu.vector_store %arg18[%c0_97, %c0_98, %c0_99], %313 {strides = array<i32>} : memref<8x8x384xf32, #tpu.memory_space<vmem>>, vector<8x8x384xf32>,
    %c0_100 = arith.constant 0 : index
    %c0_101 = arith.constant 0 : index
    %315 = vector.load %arg12[%c0_100, %c0_101] : memref<128x384xf32, #tpu.memory_space<vmem>>, vector<128x384xf32>
    %c0_102 = arith.constant 0 : index
    %c0_103 = arith.constant 0 : index
    %316 = vector.load %arg14[%c0_102, %c0_103] : memref<1x128xf32, #tpu.memory_space<vmem>>, vector<1x128xf32>
    %317 = vector.shape_cast %316 : vector<1x128xf32> to vector<1x128xf32>
    %318 = vector.broadcast %317 : vector<1x128xf32> to vector<8x128xf32>
    %c1 = arith.constant 1 : index
    %c0_104 = arith.constant 0 : index
    %c0_105 = arith.constant 0 : index
    %319 = vector.load %arg19[%c1, %c0_104, %c0_105] : memref<2x8x128xf32, #tpu.memory_space<vmem>>, vector<1x8x128xf32>
    %320 = vector.shape_cast %319 : vector<1x8x128xf32> to vector<8x128xf32>
    %c0_i32_106 = arith.constant 0 : i32
    %321 = arith.index_cast %c0_i32_106 : i32 to index
    %c0_107 = arith.constant 0 : index
    %c0_108 = arith.constant 0 : index
    %322 = vector.load %arg18[%321, %c0_107, %c0_108] : memref<8x8x384xf32, #tpu.memory_space<vmem>>, vector<1x8x384xf32>
    %323 = vector.shape_cast %322 : vector<1x8x384xf32> to vector<8x384xf32>
    %cst_109 = arith.constant dense<0.000000e+00> : vector<8x384xf32>
    %324 = tpu.matmul %320, %315, %cst_109 {dimension_numbers = #tpu.dot_dimension_numbers<[1], [0], [0], [1], [0, 0, 1, 1], [], []>} : vector<8x128xf32>, vector<128x384xf32>, vector<8x384xf32> -> vector<8x384xf32>
    %325 = vector.extract_strided_slice %323 {offsets = [0, 0], sizes = [8, 128], strides = [1, 1]} : vector<8x384xf32> to vector<8x128xf32>
    %326 = vector.extract_strided_slice %324 {offsets = [0, 0], sizes = [8, 128], strides = [1, 1]} : vector<8x384xf32> to vector<8x128xf32>
    %327 = arith.addf %325, %326 : vector<8x128xf32>
    %328 = arith.negf %327 : vector<8x128xf32>
    %329 = math.exp %328 : vector<8x128xf32>
    %cst_110 = arith.constant 1.000000e+00 : f32
    %330 = vector.broadcast %cst_110 : f32 to vector<8x128xf32>
    %331 = arith.addf %330, %329 : vector<8x128xf32>
    %332 = arith.divf %330, %331 : vector<8x128xf32>
    %333 = vector.extract_strided_slice %323 {offsets = [0, 128], sizes = [8, 128], strides = [1, 1]} : vector<8x384xf32> to vector<8x128xf32>
    %334 = vector.extract_strided_slice %324 {offsets = [0, 128], sizes = [8, 128], strides = [1, 1]} : vector<8x384xf32> to vector<8x128xf32>
    %335 = arith.addf %333, %334 : vector<8x128xf32>
    %336 = arith.negf %335 : vector<8x128xf32>
    %337 = math.exp %336 : vector<8x128xf32>
    %cst_111 = arith.constant 1.000000e+00 : f32
    %338 = vector.broadcast %cst_111 : f32 to vector<8x128xf32>
    %339 = arith.addf %338, %337 : vector<8x128xf32>
    %340 = arith.divf %338, %339 : vector<8x128xf32>
    %341 = vector.extract_strided_slice %323 {offsets = [0, 256], sizes = [8, 128], strides = [1, 1]} : vector<8x384xf32> to vector<8x128xf32>
    %342 = vector.extract_strided_slice %324 {offsets = [0, 256], sizes = [8, 128], strides = [1, 1]} : vector<8x384xf32> to vector<8x128xf32>
    %343 = arith.addf %342, %318 : vector<8x128xf32>
    %344 = arith.mulf %332, %343 : vector<8x128xf32>
    %345 = arith.addf %341, %344 : vector<8x128xf32>
    %346 = math.tanh %345 : vector<8x128xf32>
    %cst_112 = arith.constant 1.000000e+00 : f32
    %347 = vector.broadcast %cst_112 : f32 to vector<8x128xf32>
    %348 = arith.subf %347, %340 : vector<8x128xf32>
    %349 = arith.mulf %348, %346 : vector<8x128xf32>
    %350 = arith.mulf %340, %320 : vector<8x128xf32>
    %351 = arith.addf %349, %350 : vector<8x128xf32>
    %352 = arith.index_cast %c0_i32_106 : i32 to index
    %c0_113 = arith.constant 0 : index
    %c0_114 = arith.constant 0 : index
    %353 = vector.load %arg15[%352, %c0_113, %c0_114] : memref<8x8x256xf32, #tpu.memory_space<vmem>>, vector<1x8x128xf32>
    %354 = vector.shape_cast %353 : vector<1x8x128xf32> to vector<8x128xf32>
    %355 = vector.shape_cast %351 : vector<8x128xf32> to vector<1x8x128xf32>
    tpu.vector_store %arg15[%352, %c0_113, %c0_114], %355 {strides = array<i32>} : memref<8x8x256xf32, #tpu.memory_space<vmem>>, vector<1x8x128xf32>,
    %c1_i32_115 = arith.constant 1 : i32
    %356 = arith.index_cast %c1_i32_115 : i32 to index
    %c0_116 = arith.constant 0 : index
    %c0_117 = arith.constant 0 : index
    %357 = vector.load %arg18[%356, %c0_116, %c0_117] : memref<8x8x384xf32, #tpu.memory_space<vmem>>, vector<1x8x384xf32>
    %358 = vector.shape_cast %357 : vector<1x8x384xf32> to vector<8x384xf32>
    %cst_118 = arith.constant dense<0.000000e+00> : vector<8x384xf32>
    %359 = tpu.matmul %351, %315, %cst_118 {dimension_numbers = #tpu.dot_dimension_numbers<[1], [0], [0], [1], [0, 0, 1, 1], [], []>} : vector<8x128xf32>, vector<128x384xf32>, vector<8x384xf32> -> vector<8x384xf32>
    %360 = vector.extract_strided_slice %358 {offsets = [0, 0], sizes = [8, 128], strides = [1, 1]} : vector<8x384xf32> to vector<8x128xf32>
    %361 = vector.extract_strided_slice %359 {offsets = [0, 0], sizes = [8, 128], strides = [1, 1]} : vector<8x384xf32> to vector<8x128xf32>
    %362 = arith.addf %360, %361 : vector<8x128xf32>
    %363 = arith.negf %362 : vector<8x128xf32>
    %364 = math.exp %363 : vector<8x128xf32>
    %cst_119 = arith.constant 1.000000e+00 : f32
    %365 = vector.broadcast %cst_119 : f32 to vector<8x128xf32>
    %366 = arith.addf %365, %364 : vector<8x128xf32>
    %367 = arith.divf %365, %366 : vector<8x128xf32>
    %368 = vector.extract_strided_slice %358 {offsets = [0, 128], sizes = [8, 128], strides = [1, 1]} : vector<8x384xf32> to vector<8x128xf32>
    %369 = vector.extract_strided_slice %359 {offsets = [0, 128], sizes = [8, 128], strides = [1, 1]} : vector<8x384xf32> to vector<8x128xf32>
    %370 = arith.addf %368, %369 : vector<8x128xf32>
    %371 = arith.negf %370 : vector<8x128xf32>
    %372 = math.exp %371 : vector<8x128xf32>
    %cst_120 = arith.constant 1.000000e+00 : f32
    %373 = vector.broadcast %cst_120 : f32 to vector<8x128xf32>
    %374 = arith.addf %373, %372 : vector<8x128xf32>
    %375 = arith.divf %373, %374 : vector<8x128xf32>
    %376 = vector.extract_strided_slice %358 {offsets = [0, 256], sizes = [8, 128], strides = [1, 1]} : vector<8x384xf32> to vector<8x128xf32>
    %377 = vector.extract_strided_slice %359 {offsets = [0, 256], sizes = [8, 128], strides = [1, 1]} : vector<8x384xf32> to vector<8x128xf32>
    %378 = arith.addf %377, %318 : vector<8x128xf32>
    %379 = arith.mulf %367, %378 : vector<8x128xf32>
    %380 = arith.addf %376, %379 : vector<8x128xf32>
    %381 = math.tanh %380 : vector<8x128xf32>
    %cst_121 = arith.constant 1.000000e+00 : f32
    %382 = vector.broadcast %cst_121 : f32 to vector<8x128xf32>
    %383 = arith.subf %382, %375 : vector<8x128xf32>
    %384 = arith.mulf %383, %381 : vector<8x128xf32>
    %385 = arith.mulf %375, %351 : vector<8x128xf32>
    %386 = arith.addf %384, %385 : vector<8x128xf32>
    %387 = arith.index_cast %c1_i32_115 : i32 to index
    %c0_122 = arith.constant 0 : index
    %c0_123 = arith.constant 0 : index
    %388 = vector.load %arg15[%387, %c0_122, %c0_123] : memref<8x8x256xf32, #tpu.memory_space<vmem>>, vector<1x8x128xf32>
    %389 = vector.shape_cast %388 : vector<1x8x128xf32> to vector<8x128xf32>
    %390 = vector.shape_cast %386 : vector<8x128xf32> to vector<1x8x128xf32>
    tpu.vector_store %arg15[%387, %c0_122, %c0_123], %390 {strides = array<i32>} : memref<8x8x256xf32, #tpu.memory_space<vmem>>, vector<1x8x128xf32>,
    %c2_i32_124 = arith.constant 2 : i32
    %391 = arith.index_cast %c2_i32_124 : i32 to index
    %c0_125 = arith.constant 0 : index
    %c0_126 = arith.constant 0 : index
    %392 = vector.load %arg18[%391, %c0_125, %c0_126] : memref<8x8x384xf32, #tpu.memory_space<vmem>>, vector<1x8x384xf32>
    %393 = vector.shape_cast %392 : vector<1x8x384xf32> to vector<8x384xf32>
    %cst_127 = arith.constant dense<0.000000e+00> : vector<8x384xf32>
    %394 = tpu.matmul %386, %315, %cst_127 {dimension_numbers = #tpu.dot_dimension_numbers<[1], [0], [0], [1], [0, 0, 1, 1], [], []>} : vector<8x128xf32>, vector<128x384xf32>, vector<8x384xf32> -> vector<8x384xf32>
    %395 = vector.extract_strided_slice %393 {offsets = [0, 0], sizes = [8, 128], strides = [1, 1]} : vector<8x384xf32> to vector<8x128xf32>
    %396 = vector.extract_strided_slice %394 {offsets = [0, 0], sizes = [8, 128], strides = [1, 1]} : vector<8x384xf32> to vector<8x128xf32>
    %397 = arith.addf %395, %396 : vector<8x128xf32>
    %398 = arith.negf %397 : vector<8x128xf32>
    %399 = math.exp %398 : vector<8x128xf32>
    %cst_128 = arith.constant 1.000000e+00 : f32
    %400 = vector.broadcast %cst_128 : f32 to vector<8x128xf32>
    %401 = arith.addf %400, %399 : vector<8x128xf32>
    %402 = arith.divf %400, %401 : vector<8x128xf32>
    %403 = vector.extract_strided_slice %393 {offsets = [0, 128], sizes = [8, 128], strides = [1, 1]} : vector<8x384xf32> to vector<8x128xf32>
    %404 = vector.extract_strided_slice %394 {offsets = [0, 128], sizes = [8, 128], strides = [1, 1]} : vector<8x384xf32> to vector<8x128xf32>
    %405 = arith.addf %403, %404 : vector<8x128xf32>
    %406 = arith.negf %405 : vector<8x128xf32>
    %407 = math.exp %406 : vector<8x128xf32>
    %cst_129 = arith.constant 1.000000e+00 : f32
    %408 = vector.broadcast %cst_129 : f32 to vector<8x128xf32>
    %409 = arith.addf %408, %407 : vector<8x128xf32>
    %410 = arith.divf %408, %409 : vector<8x128xf32>
    %411 = vector.extract_strided_slice %393 {offsets = [0, 256], sizes = [8, 128], strides = [1, 1]} : vector<8x384xf32> to vector<8x128xf32>
    %412 = vector.extract_strided_slice %394 {offsets = [0, 256], sizes = [8, 128], strides = [1, 1]} : vector<8x384xf32> to vector<8x128xf32>
    %413 = arith.addf %412, %318 : vector<8x128xf32>
    %414 = arith.mulf %402, %413 : vector<8x128xf32>
    %415 = arith.addf %411, %414 : vector<8x128xf32>
    %416 = math.tanh %415 : vector<8x128xf32>
    %cst_130 = arith.constant 1.000000e+00 : f32
    %417 = vector.broadcast %cst_130 : f32 to vector<8x128xf32>
    %418 = arith.subf %417, %410 : vector<8x128xf32>
    %419 = arith.mulf %418, %416 : vector<8x128xf32>
    %420 = arith.mulf %410, %386 : vector<8x128xf32>
    %421 = arith.addf %419, %420 : vector<8x128xf32>
    %422 = arith.index_cast %c2_i32_124 : i32 to index
    %c0_131 = arith.constant 0 : index
    %c0_132 = arith.constant 0 : index
    %423 = vector.load %arg15[%422, %c0_131, %c0_132] : memref<8x8x256xf32, #tpu.memory_space<vmem>>, vector<1x8x128xf32>
    %424 = vector.shape_cast %423 : vector<1x8x128xf32> to vector<8x128xf32>
    %425 = vector.shape_cast %421 : vector<8x128xf32> to vector<1x8x128xf32>
    tpu.vector_store %arg15[%422, %c0_131, %c0_132], %425 {strides = array<i32>} : memref<8x8x256xf32, #tpu.memory_space<vmem>>, vector<1x8x128xf32>,
    %c3_i32_133 = arith.constant 3 : i32
    %426 = arith.index_cast %c3_i32_133 : i32 to index
    %c0_134 = arith.constant 0 : index
    %c0_135 = arith.constant 0 : index
    %427 = vector.load %arg18[%426, %c0_134, %c0_135] : memref<8x8x384xf32, #tpu.memory_space<vmem>>, vector<1x8x384xf32>
    %428 = vector.shape_cast %427 : vector<1x8x384xf32> to vector<8x384xf32>
    %cst_136 = arith.constant dense<0.000000e+00> : vector<8x384xf32>
    %429 = tpu.matmul %421, %315, %cst_136 {dimension_numbers = #tpu.dot_dimension_numbers<[1], [0], [0], [1], [0, 0, 1, 1], [], []>} : vector<8x128xf32>, vector<128x384xf32>, vector<8x384xf32> -> vector<8x384xf32>
    %430 = vector.extract_strided_slice %428 {offsets = [0, 0], sizes = [8, 128], strides = [1, 1]} : vector<8x384xf32> to vector<8x128xf32>
    %431 = vector.extract_strided_slice %429 {offsets = [0, 0], sizes = [8, 128], strides = [1, 1]} : vector<8x384xf32> to vector<8x128xf32>
    %432 = arith.addf %430, %431 : vector<8x128xf32>
    %433 = arith.negf %432 : vector<8x128xf32>
    %434 = math.exp %433 : vector<8x128xf32>
    %cst_137 = arith.constant 1.000000e+00 : f32
    %435 = vector.broadcast %cst_137 : f32 to vector<8x128xf32>
    %436 = arith.addf %435, %434 : vector<8x128xf32>
    %437 = arith.divf %435, %436 : vector<8x128xf32>
    %438 = vector.extract_strided_slice %428 {offsets = [0, 128], sizes = [8, 128], strides = [1, 1]} : vector<8x384xf32> to vector<8x128xf32>
    %439 = vector.extract_strided_slice %429 {offsets = [0, 128], sizes = [8, 128], strides = [1, 1]} : vector<8x384xf32> to vector<8x128xf32>
    %440 = arith.addf %438, %439 : vector<8x128xf32>
    %441 = arith.negf %440 : vector<8x128xf32>
    %442 = math.exp %441 : vector<8x128xf32>
    %cst_138 = arith.constant 1.000000e+00 : f32
    %443 = vector.broadcast %cst_138 : f32 to vector<8x128xf32>
    %444 = arith.addf %443, %442 : vector<8x128xf32>
    %445 = arith.divf %443, %444 : vector<8x128xf32>
    %446 = vector.extract_strided_slice %428 {offsets = [0, 256], sizes = [8, 128], strides = [1, 1]} : vector<8x384xf32> to vector<8x128xf32>
    %447 = vector.extract_strided_slice %429 {offsets = [0, 256], sizes = [8, 128], strides = [1, 1]} : vector<8x384xf32> to vector<8x128xf32>
    %448 = arith.addf %447, %318 : vector<8x128xf32>
    %449 = arith.mulf %437, %448 : vector<8x128xf32>
    %450 = arith.addf %446, %449 : vector<8x128xf32>
    %451 = math.tanh %450 : vector<8x128xf32>
    %cst_139 = arith.constant 1.000000e+00 : f32
    %452 = vector.broadcast %cst_139 : f32 to vector<8x128xf32>
    %453 = arith.subf %452, %445 : vector<8x128xf32>
    %454 = arith.mulf %453, %451 : vector<8x128xf32>
    %455 = arith.mulf %445, %421 : vector<8x128xf32>
    %456 = arith.addf %454, %455 : vector<8x128xf32>
    %457 = arith.index_cast %c3_i32_133 : i32 to index
    %c0_140 = arith.constant 0 : index
    %c0_141 = arith.constant 0 : index
    %458 = vector.load %arg15[%457, %c0_140, %c0_141] : memref<8x8x256xf32, #tpu.memory_space<vmem>>, vector<1x8x128xf32>
    %459 = vector.shape_cast %458 : vector<1x8x128xf32> to vector<8x128xf32>
    %460 = vector.shape_cast %456 : vector<8x128xf32> to vector<1x8x128xf32>
    tpu.vector_store %arg15[%457, %c0_140, %c0_141], %460 {strides = array<i32>} : memref<8x8x256xf32, #tpu.memory_space<vmem>>, vector<1x8x128xf32>,
    %c4_i32_142 = arith.constant 4 : i32
    %461 = arith.index_cast %c4_i32_142 : i32 to index
    %c0_143 = arith.constant 0 : index
    %c0_144 = arith.constant 0 : index
    %462 = vector.load %arg18[%461, %c0_143, %c0_144] : memref<8x8x384xf32, #tpu.memory_space<vmem>>, vector<1x8x384xf32>
    %463 = vector.shape_cast %462 : vector<1x8x384xf32> to vector<8x384xf32>
    %cst_145 = arith.constant dense<0.000000e+00> : vector<8x384xf32>
    %464 = tpu.matmul %456, %315, %cst_145 {dimension_numbers = #tpu.dot_dimension_numbers<[1], [0], [0], [1], [0, 0, 1, 1], [], []>} : vector<8x128xf32>, vector<128x384xf32>, vector<8x384xf32> -> vector<8x384xf32>
    %465 = vector.extract_strided_slice %463 {offsets = [0, 0], sizes = [8, 128], strides = [1, 1]} : vector<8x384xf32> to vector<8x128xf32>
    %466 = vector.extract_strided_slice %464 {offsets = [0, 0], sizes = [8, 128], strides = [1, 1]} : vector<8x384xf32> to vector<8x128xf32>
    %467 = arith.addf %465, %466 : vector<8x128xf32>
    %468 = arith.negf %467 : vector<8x128xf32>
    %469 = math.exp %468 : vector<8x128xf32>
    %cst_146 = arith.constant 1.000000e+00 : f32
    %470 = vector.broadcast %cst_146 : f32 to vector<8x128xf32>
    %471 = arith.addf %470, %469 : vector<8x128xf32>
    %472 = arith.divf %470, %471 : vector<8x128xf32>
    %473 = vector.extract_strided_slice %463 {offsets = [0, 128], sizes = [8, 128], strides = [1, 1]} : vector<8x384xf32> to vector<8x128xf32>
    %474 = vector.extract_strided_slice %464 {offsets = [0, 128], sizes = [8, 128], strides = [1, 1]} : vector<8x384xf32> to vector<8x128xf32>
    %475 = arith.addf %473, %474 : vector<8x128xf32>
    %476 = arith.negf %475 : vector<8x128xf32>
    %477 = math.exp %476 : vector<8x128xf32>
    %cst_147 = arith.constant 1.000000e+00 : f32
    %478 = vector.broadcast %cst_147 : f32 to vector<8x128xf32>
    %479 = arith.addf %478, %477 : vector<8x128xf32>
    %480 = arith.divf %478, %479 : vector<8x128xf32>
    %481 = vector.extract_strided_slice %463 {offsets = [0, 256], sizes = [8, 128], strides = [1, 1]} : vector<8x384xf32> to vector<8x128xf32>
    %482 = vector.extract_strided_slice %464 {offsets = [0, 256], sizes = [8, 128], strides = [1, 1]} : vector<8x384xf32> to vector<8x128xf32>
    %483 = arith.addf %482, %318 : vector<8x128xf32>
    %484 = arith.mulf %472, %483 : vector<8x128xf32>
    %485 = arith.addf %481, %484 : vector<8x128xf32>
    %486 = math.tanh %485 : vector<8x128xf32>
    %cst_148 = arith.constant 1.000000e+00 : f32
    %487 = vector.broadcast %cst_148 : f32 to vector<8x128xf32>
    %488 = arith.subf %487, %480 : vector<8x128xf32>
    %489 = arith.mulf %488, %486 : vector<8x128xf32>
    %490 = arith.mulf %480, %456 : vector<8x128xf32>
    %491 = arith.addf %489, %490 : vector<8x128xf32>
    %492 = arith.index_cast %c4_i32_142 : i32 to index
    %c0_149 = arith.constant 0 : index
    %c0_150 = arith.constant 0 : index
    %493 = vector.load %arg15[%492, %c0_149, %c0_150] : memref<8x8x256xf32, #tpu.memory_space<vmem>>, vector<1x8x128xf32>
    %494 = vector.shape_cast %493 : vector<1x8x128xf32> to vector<8x128xf32>
    %495 = vector.shape_cast %491 : vector<8x128xf32> to vector<1x8x128xf32>
    tpu.vector_store %arg15[%492, %c0_149, %c0_150], %495 {strides = array<i32>} : memref<8x8x256xf32, #tpu.memory_space<vmem>>, vector<1x8x128xf32>,
    %c5_i32_151 = arith.constant 5 : i32
    %496 = arith.index_cast %c5_i32_151 : i32 to index
    %c0_152 = arith.constant 0 : index
    %c0_153 = arith.constant 0 : index
    %497 = vector.load %arg18[%496, %c0_152, %c0_153] : memref<8x8x384xf32, #tpu.memory_space<vmem>>, vector<1x8x384xf32>
    %498 = vector.shape_cast %497 : vector<1x8x384xf32> to vector<8x384xf32>
    %cst_154 = arith.constant dense<0.000000e+00> : vector<8x384xf32>
    %499 = tpu.matmul %491, %315, %cst_154 {dimension_numbers = #tpu.dot_dimension_numbers<[1], [0], [0], [1], [0, 0, 1, 1], [], []>} : vector<8x128xf32>, vector<128x384xf32>, vector<8x384xf32> -> vector<8x384xf32>
    %500 = vector.extract_strided_slice %498 {offsets = [0, 0], sizes = [8, 128], strides = [1, 1]} : vector<8x384xf32> to vector<8x128xf32>
    %501 = vector.extract_strided_slice %499 {offsets = [0, 0], sizes = [8, 128], strides = [1, 1]} : vector<8x384xf32> to vector<8x128xf32>
    %502 = arith.addf %500, %501 : vector<8x128xf32>
    %503 = arith.negf %502 : vector<8x128xf32>
    %504 = math.exp %503 : vector<8x128xf32>
    %cst_155 = arith.constant 1.000000e+00 : f32
    %505 = vector.broadcast %cst_155 : f32 to vector<8x128xf32>
    %506 = arith.addf %505, %504 : vector<8x128xf32>
    %507 = arith.divf %505, %506 : vector<8x128xf32>
    %508 = vector.extract_strided_slice %498 {offsets = [0, 128], sizes = [8, 128], strides = [1, 1]} : vector<8x384xf32> to vector<8x128xf32>
    %509 = vector.extract_strided_slice %499 {offsets = [0, 128], sizes = [8, 128], strides = [1, 1]} : vector<8x384xf32> to vector<8x128xf32>
    %510 = arith.addf %508, %509 : vector<8x128xf32>
    %511 = arith.negf %510 : vector<8x128xf32>
    %512 = math.exp %511 : vector<8x128xf32>
    %cst_156 = arith.constant 1.000000e+00 : f32
    %513 = vector.broadcast %cst_156 : f32 to vector<8x128xf32>
    %514 = arith.addf %513, %512 : vector<8x128xf32>
    %515 = arith.divf %513, %514 : vector<8x128xf32>
    %516 = vector.extract_strided_slice %498 {offsets = [0, 256], sizes = [8, 128], strides = [1, 1]} : vector<8x384xf32> to vector<8x128xf32>
    %517 = vector.extract_strided_slice %499 {offsets = [0, 256], sizes = [8, 128], strides = [1, 1]} : vector<8x384xf32> to vector<8x128xf32>
    %518 = arith.addf %517, %318 : vector<8x128xf32>
    %519 = arith.mulf %507, %518 : vector<8x128xf32>
    %520 = arith.addf %516, %519 : vector<8x128xf32>
    %521 = math.tanh %520 : vector<8x128xf32>
    %cst_157 = arith.constant 1.000000e+00 : f32
    %522 = vector.broadcast %cst_157 : f32 to vector<8x128xf32>
    %523 = arith.subf %522, %515 : vector<8x128xf32>
    %524 = arith.mulf %523, %521 : vector<8x128xf32>
    %525 = arith.mulf %515, %491 : vector<8x128xf32>
    %526 = arith.addf %524, %525 : vector<8x128xf32>
    %527 = arith.index_cast %c5_i32_151 : i32 to index
    %c0_158 = arith.constant 0 : index
    %c0_159 = arith.constant 0 : index
    %528 = vector.load %arg15[%527, %c0_158, %c0_159] : memref<8x8x256xf32, #tpu.memory_space<vmem>>, vector<1x8x128xf32>
    %529 = vector.shape_cast %528 : vector<1x8x128xf32> to vector<8x128xf32>
    %530 = vector.shape_cast %526 : vector<8x128xf32> to vector<1x8x128xf32>
    tpu.vector_store %arg15[%527, %c0_158, %c0_159], %530 {strides = array<i32>} : memref<8x8x256xf32, #tpu.memory_space<vmem>>, vector<1x8x128xf32>,
    %c6_i32_160 = arith.constant 6 : i32
    %531 = arith.index_cast %c6_i32_160 : i32 to index
    %c0_161 = arith.constant 0 : index
    %c0_162 = arith.constant 0 : index
    %532 = vector.load %arg18[%531, %c0_161, %c0_162] : memref<8x8x384xf32, #tpu.memory_space<vmem>>, vector<1x8x384xf32>
    %533 = vector.shape_cast %532 : vector<1x8x384xf32> to vector<8x384xf32>
    %cst_163 = arith.constant dense<0.000000e+00> : vector<8x384xf32>
    %534 = tpu.matmul %526, %315, %cst_163 {dimension_numbers = #tpu.dot_dimension_numbers<[1], [0], [0], [1], [0, 0, 1, 1], [], []>} : vector<8x128xf32>, vector<128x384xf32>, vector<8x384xf32> -> vector<8x384xf32>
    %535 = vector.extract_strided_slice %533 {offsets = [0, 0], sizes = [8, 128], strides = [1, 1]} : vector<8x384xf32> to vector<8x128xf32>
    %536 = vector.extract_strided_slice %534 {offsets = [0, 0], sizes = [8, 128], strides = [1, 1]} : vector<8x384xf32> to vector<8x128xf32>
    %537 = arith.addf %535, %536 : vector<8x128xf32>
    %538 = arith.negf %537 : vector<8x128xf32>
    %539 = math.exp %538 : vector<8x128xf32>
    %cst_164 = arith.constant 1.000000e+00 : f32
    %540 = vector.broadcast %cst_164 : f32 to vector<8x128xf32>
    %541 = arith.addf %540, %539 : vector<8x128xf32>
    %542 = arith.divf %540, %541 : vector<8x128xf32>
    %543 = vector.extract_strided_slice %533 {offsets = [0, 128], sizes = [8, 128], strides = [1, 1]} : vector<8x384xf32> to vector<8x128xf32>
    %544 = vector.extract_strided_slice %534 {offsets = [0, 128], sizes = [8, 128], strides = [1, 1]} : vector<8x384xf32> to vector<8x128xf32>
    %545 = arith.addf %543, %544 : vector<8x128xf32>
    %546 = arith.negf %545 : vector<8x128xf32>
    %547 = math.exp %546 : vector<8x128xf32>
    %cst_165 = arith.constant 1.000000e+00 : f32
    %548 = vector.broadcast %cst_165 : f32 to vector<8x128xf32>
    %549 = arith.addf %548, %547 : vector<8x128xf32>
    %550 = arith.divf %548, %549 : vector<8x128xf32>
    %551 = vector.extract_strided_slice %533 {offsets = [0, 256], sizes = [8, 128], strides = [1, 1]} : vector<8x384xf32> to vector<8x128xf32>
    %552 = vector.extract_strided_slice %534 {offsets = [0, 256], sizes = [8, 128], strides = [1, 1]} : vector<8x384xf32> to vector<8x128xf32>
    %553 = arith.addf %552, %318 : vector<8x128xf32>
    %554 = arith.mulf %542, %553 : vector<8x128xf32>
    %555 = arith.addf %551, %554 : vector<8x128xf32>
    %556 = math.tanh %555 : vector<8x128xf32>
    %cst_166 = arith.constant 1.000000e+00 : f32
    %557 = vector.broadcast %cst_166 : f32 to vector<8x128xf32>
    %558 = arith.subf %557, %550 : vector<8x128xf32>
    %559 = arith.mulf %558, %556 : vector<8x128xf32>
    %560 = arith.mulf %550, %526 : vector<8x128xf32>
    %561 = arith.addf %559, %560 : vector<8x128xf32>
    %562 = arith.index_cast %c6_i32_160 : i32 to index
    %c0_167 = arith.constant 0 : index
    %c0_168 = arith.constant 0 : index
    %563 = vector.load %arg15[%562, %c0_167, %c0_168] : memref<8x8x256xf32, #tpu.memory_space<vmem>>, vector<1x8x128xf32>
    %564 = vector.shape_cast %563 : vector<1x8x128xf32> to vector<8x128xf32>
    %565 = vector.shape_cast %561 : vector<8x128xf32> to vector<1x8x128xf32>
    tpu.vector_store %arg15[%562, %c0_167, %c0_168], %565 {strides = array<i32>} : memref<8x8x256xf32, #tpu.memory_space<vmem>>, vector<1x8x128xf32>,
    %c7_i32_169 = arith.constant 7 : i32
    %566 = arith.index_cast %c7_i32_169 : i32 to index
    %c0_170 = arith.constant 0 : index
    %c0_171 = arith.constant 0 : index
    %567 = vector.load %arg18[%566, %c0_170, %c0_171] : memref<8x8x384xf32, #tpu.memory_space<vmem>>, vector<1x8x384xf32>
    %568 = vector.shape_cast %567 : vector<1x8x384xf32> to vector<8x384xf32>
    %cst_172 = arith.constant dense<0.000000e+00> : vector<8x384xf32>
    %569 = tpu.matmul %561, %315, %cst_172 {dimension_numbers = #tpu.dot_dimension_numbers<[1], [0], [0], [1], [0, 0, 1, 1], [], []>} : vector<8x128xf32>, vector<128x384xf32>, vector<8x384xf32> -> vector<8x384xf32>
    %570 = vector.extract_strided_slice %568 {offsets = [0, 0], sizes = [8, 128], strides = [1, 1]} : vector<8x384xf32> to vector<8x128xf32>
    %571 = vector.extract_strided_slice %569 {offsets = [0, 0], sizes = [8, 128], strides = [1, 1]} : vector<8x384xf32> to vector<8x128xf32>
    %572 = arith.addf %570, %571 : vector<8x128xf32>
    %573 = arith.negf %572 : vector<8x128xf32>
    %574 = math.exp %573 : vector<8x128xf32>
    %cst_173 = arith.constant 1.000000e+00 : f32
    %575 = vector.broadcast %cst_173 : f32 to vector<8x128xf32>
    %576 = arith.addf %575, %574 : vector<8x128xf32>
    %577 = arith.divf %575, %576 : vector<8x128xf32>
    %578 = vector.extract_strided_slice %568 {offsets = [0, 128], sizes = [8, 128], strides = [1, 1]} : vector<8x384xf32> to vector<8x128xf32>
    %579 = vector.extract_strided_slice %569 {offsets = [0, 128], sizes = [8, 128], strides = [1, 1]} : vector<8x384xf32> to vector<8x128xf32>
    %580 = arith.addf %578, %579 : vector<8x128xf32>
    %581 = arith.negf %580 : vector<8x128xf32>
    %582 = math.exp %581 : vector<8x128xf32>
    %cst_174 = arith.constant 1.000000e+00 : f32
    %583 = vector.broadcast %cst_174 : f32 to vector<8x128xf32>
    %584 = arith.addf %583, %582 : vector<8x128xf32>
    %585 = arith.divf %583, %584 : vector<8x128xf32>
    %586 = vector.extract_strided_slice %568 {offsets = [0, 256], sizes = [8, 128], strides = [1, 1]} : vector<8x384xf32> to vector<8x128xf32>
    %587 = vector.extract_strided_slice %569 {offsets = [0, 256], sizes = [8, 128], strides = [1, 1]} : vector<8x384xf32> to vector<8x128xf32>
    %588 = arith.addf %587, %318 : vector<8x128xf32>
    %589 = arith.mulf %577, %588 : vector<8x128xf32>
    %590 = arith.addf %586, %589 : vector<8x128xf32>
    %591 = math.tanh %590 : vector<8x128xf32>
    %cst_175 = arith.constant 1.000000e+00 : f32
    %592 = vector.broadcast %cst_175 : f32 to vector<8x128xf32>
    %593 = arith.subf %592, %585 : vector<8x128xf32>
    %594 = arith.mulf %593, %591 : vector<8x128xf32>
    %595 = arith.mulf %585, %561 : vector<8x128xf32>
    %596 = arith.addf %594, %595 : vector<8x128xf32>
    %597 = arith.index_cast %c7_i32_169 : i32 to index
    %c0_176 = arith.constant 0 : index
    %c0_177 = arith.constant 0 : index
    %598 = vector.load %arg15[%597, %c0_176, %c0_177] : memref<8x8x256xf32, #tpu.memory_space<vmem>>, vector<1x8x128xf32>
    %599 = vector.shape_cast %598 : vector<1x8x128xf32> to vector<8x128xf32>
    %600 = vector.shape_cast %596 : vector<8x128xf32> to vector<1x8x128xf32>
    tpu.vector_store %arg15[%597, %c0_176, %c0_177], %600 {strides = array<i32>} : memref<8x8x256xf32, #tpu.memory_space<vmem>>, vector<1x8x128xf32>,
    %c8_i32_178 = arith.constant 8 : i32
    %c1_179 = arith.constant 1 : index
    %c0_180 = arith.constant 0 : index
    %c0_181 = arith.constant 0 : index
    %601 = vector.load %arg19[%c1_179, %c0_180, %c0_181] : memref<2x8x128xf32, #tpu.memory_space<vmem>>, vector<1x8x128xf32>
    %602 = vector.shape_cast %601 : vector<1x8x128xf32> to vector<8x128xf32>
    %603 = vector.shape_cast %596 : vector<8x128xf32> to vector<1x8x128xf32>
    tpu.vector_store %arg19[%c1_179, %c0_180, %c0_181], %603 {strides = array<i32>} : memref<2x8x128xf32, #tpu.memory_space<vmem>>, vector<1x8x128xf32>,
    %c1_i32_182 = arith.constant 1 : i32
    %604 = arith.cmpi eq, %arg1, %c1_i32_182 : i32
    %605 = arith.extui %604 : i1 to i32
    %c0_i32_183 = arith.constant 0 : i32
    %606 = arith.cmpi ne, %605, %c0_i32_183 : i32
    scf.if %606 {
      %c0_184 = arith.constant 0 : index
      %c0_185 = arith.constant 0 : index
      %c0_186 = arith.constant 0 : index
      %607 = vector.load %arg19[%c0_184, %c0_185, %c0_186] : memref<2x8x128xf32, #tpu.memory_space<vmem>>, vector<2x8x128xf32>
      %c0_187 = arith.constant 0 : index
      %c0_188 = arith.constant 0 : index
      %c0_189 = arith.constant 0 : index
      %608 = vector.load %arg16[%c0_187, %c0_188, %c0_189] : memref<2x8x128xf32, #tpu.memory_space<vmem>>, vector<2x8x128xf32>
      tpu.vector_store %arg16[%c0_187, %c0_188, %c0_189], %607 {strides = array<i32>} : memref<2x8x128xf32, #tpu.memory_space<vmem>>, vector<2x8x128xf32>,
    } else {
    }
    return
  }
  func.func @transform_0(%arg0: i32, %arg1: i32) -> (i32, i32, i32) {
    %c0_i32 = arith.constant 0 : i32
    %c0_i32_0 = arith.constant 0 : i32
    return %arg1, %arg0, %c0_i32 : i32, i32, i32
  }
  func.func @transform_1(%arg0: i32, %arg1: i32) -> (i32, i32) {
    %c0_i32 = arith.constant 0 : i32
    %c0_i32_0 = arith.constant 0 : i32
    return %arg0, %c0_i32 : i32, i32
  }
  func.func @transform_2(%arg0: i32, %arg1: i32) -> (i32, i32) {
    %c0_i32 = arith.constant 0 : i32
    %c0_i32_0 = arith.constant 0 : i32
    %c0_i32_1 = arith.constant 0 : i32
    return %c0_i32, %c0_i32_0 : i32, i32
  }
  func.func @transform_3(%arg0: i32, %arg1: i32) -> (i32, i32) {
    %c0_i32 = arith.constant 0 : i32
    %c0_i32_0 = arith.constant 0 : i32
    %c0_i32_1 = arith.constant 0 : i32
    return %c0_i32, %c0_i32_0 : i32, i32
  }
  func.func @transform_4(%arg0: i32, %arg1: i32) -> (i32, i32, i32) {
    %c0_i32 = arith.constant 0 : i32
    %c0_i32_0 = arith.constant 0 : i32
    %c0_i32_1 = arith.constant 0 : i32
    return %c0_i32, %arg0, %c0_i32_0 : i32, i32, i32
  }
  func.func @transform_5(%arg0: i32, %arg1: i32) -> (i32, i32) {
    %c0_i32 = arith.constant 0 : i32
    %c0_i32_0 = arith.constant 0 : i32
    %c0_i32_1 = arith.constant 0 : i32
    return %c0_i32, %c0_i32_0 : i32, i32
  }
  func.func @transform_6(%arg0: i32, %arg1: i32) -> (i32, i32) {
    %c0_i32 = arith.constant 0 : i32
    %c0_i32_0 = arith.constant 0 : i32
    %c0_i32_1 = arith.constant 0 : i32
    return %c0_i32, %c0_i32_0 : i32, i32
  }
  func.func @transform_7(%arg0: i32, %arg1: i32) -> (i32, i32) {
    %c0_i32 = arith.constant 0 : i32
    %c0_i32_0 = arith.constant 0 : i32
    %c0_i32_1 = arith.constant 0 : i32
    return %c0_i32, %c0_i32_0 : i32, i32
  }
  func.func @transform_8(%arg0: i32, %arg1: i32) -> (i32, i32) {
    %c0_i32 = arith.constant 0 : i32
    %c0_i32_0 = arith.constant 0 : i32
    %c0_i32_1 = arith.constant 0 : i32
    return %c0_i32, %c0_i32_0 : i32, i32
  }
  func.func @transform_9(%arg0: i32, %arg1: i32) -> (i32, i32) {
    %c0_i32 = arith.constant 0 : i32
    %c0_i32_0 = arith.constant 0 : i32
    %c0_i32_1 = arith.constant 0 : i32
    return %c0_i32, %c0_i32_0 : i32, i32
  }
  func.func @transform_10(%arg0: i32, %arg1: i32) -> (i32, i32) {
    %c0_i32 = arith.constant 0 : i32
    %c0_i32_0 = arith.constant 0 : i32
    %c0_i32_1 = arith.constant 0 : i32
    return %c0_i32, %c0_i32_0 : i32, i32
  }
  func.func @transform_11(%arg0: i32, %arg1: i32) -> (i32, i32) {
    %c0_i32 = arith.constant 0 : i32
    %c0_i32_0 = arith.constant 0 : i32
    %c0_i32_1 = arith.constant 0 : i32
    return %c0_i32, %c0_i32_0 : i32, i32
  }
  func.func @transform_12(%arg0: i32, %arg1: i32) -> (i32, i32) {
    %c0_i32 = arith.constant 0 : i32
    %c0_i32_0 = arith.constant 0 : i32
    %c0_i32_1 = arith.constant 0 : i32
    return %c0_i32, %c0_i32_0 : i32, i32
  }
  func.func @transform_13(%arg0: i32, %arg1: i32) -> (i32, i32, i32) {
    %c0_i32 = arith.constant 0 : i32
    %c0_i32_0 = arith.constant 0 : i32
    return %arg1, %arg0, %c0_i32 : i32, i32, i32
  }
  func.func @transform_14(%arg0: i32, %arg1: i32) -> (i32, i32, i32) {
    %c0_i32 = arith.constant 0 : i32
    %c0_i32_0 = arith.constant 0 : i32
    %c0_i32_1 = arith.constant 0 : i32
    return %c0_i32, %arg0, %c0_i32_0 : i32, i32, i32
  }
}

module attributes {stable_mosaic.version = 11 : i64} {
  func.func @kernel(%arg0: i32, %arg1: i32, %arg2: memref<8x8x2xf32, #tpu.memory_space<vmem>>, %arg3: memref<8x4xf32, #tpu.memory_space<vmem>>, %arg4: memref<4x128xf32, #tpu.memory_space<vmem>>, %arg5: memref<1x128xf32, #tpu.memory_space<vmem>>, %arg6: memref<2x8x128xf32, #tpu.memory_space<vmem>>, %arg7: memref<2x384xf32, #tpu.memory_space<vmem>>, %arg8: memref<128x384xf32, #tpu.memory_space<vmem>>, %arg9: memref<1x384xf32, #tpu.memory_space<vmem>>, %arg10: memref<1x128xf32, #tpu.memory_space<vmem>>, %arg11: memref<128x384xf32, #tpu.memory_space<vmem>>, %arg12: memref<128x384xf32, #tpu.memory_space<vmem>>, %arg13: memref<1x384xf32, #tpu.memory_space<vmem>>, %arg14: memref<1x128xf32, #tpu.memory_space<vmem>>, %arg15: memref<8x8x256xf32, #tpu.memory_space<vmem>>, %arg16: memref<2x8x128xf32, #tpu.memory_space<vmem>>, %arg17: memref<8x8x128xf32, #tpu.memory_space<vmem>>, %arg18: memref<8x8x384xf32, #tpu.memory_space<vmem>>, %arg19: memref<2x8x128xf32, #tpu.memory_space<vmem>>, %arg20: memref<8x128xf32, #tpu.memory_space<vmem>>) attributes {dimension_semantics = [#tpu.dimension_semantics<parallel>, #tpu.dimension_semantics<arbitrary>], iteration_bounds = array<i64: 2, 2>, scalar_prefetch = 0 : i64, scratch_operands = 4 : i64, tpu.core_type = #tpu.core_type<tc>, window_params = [{transform_indices = @transform_0, window_bounds = array<i64: 8, 8, 2>}, {transform_indices = @transform_1, window_bounds = array<i64: 8, 4>}, {pipeline_mode = #tpu.pipeline_mode<synchronous>, transform_indices = @transform_2, window_bounds = array<i64: 4, 128>}, {pipeline_mode = #tpu.pipeline_mode<synchronous>, transform_indices = @transform_3, window_bounds = array<i64: 1, 128>}, {transform_indices = @transform_4, window_bounds = array<i64: 2, 8, 128>}, {pipeline_mode = #tpu.pipeline_mode<synchronous>, transform_indices = @transform_5, window_bounds = array<i64: 2, 384>}, {pipeline_mode = #tpu.pipeline_mode<synchronous>, transform_indices = @transform_6, window_bounds = array<i64: 128, 384>}, {pipeline_mode = #tpu.pipeline_mode<synchronous>, transform_indices = @transform_7, window_bounds = array<i64: 1, 384>}, {pipeline_mode = #tpu.pipeline_mode<synchronous>, transform_indices = @transform_8, window_bounds = array<i64: 1, 128>}, {pipeline_mode = #tpu.pipeline_mode<synchronous>, transform_indices = @transform_9, window_bounds = array<i64: 128, 384>}, {pipeline_mode = #tpu.pipeline_mode<synchronous>, transform_indices = @transform_10, window_bounds = array<i64: 128, 384>}, {pipeline_mode = #tpu.pipeline_mode<synchronous>, transform_indices = @transform_11, window_bounds = array<i64: 1, 384>}, {pipeline_mode = #tpu.pipeline_mode<synchronous>, transform_indices = @transform_12, window_bounds = array<i64: 1, 128>}, {transform_indices = @transform_13, window_bounds = array<i64: 8, 8, 256>}, {transform_indices = @transform_14, window_bounds = array<i64: 2, 8, 128>}]} {
    %c0_i32 = arith.constant 0 : i32
    %0 = arith.cmpi eq, %arg1, %c0_i32 : i32
    %1 = arith.extui %0 : i1 to i32
    %c0_i32_0 = arith.constant 0 : i32
    %2 = arith.cmpi ne, %1, %c0_i32_0 : i32
    scf.if %2 {
      %c0_184 = arith.constant 0 : index
      %c0_185 = arith.constant 0 : index
      %c0_186 = arith.constant 0 : index
      %607 = vector.load %arg6[%c0_184, %c0_185, %c0_186] : memref<2x8x128xf32, #tpu.memory_space<vmem>>, vector<2x8x128xf32>
      %c0_187 = arith.constant 0 : index
      %c0_188 = arith.constant 0 : index
      %c0_189 = arith.constant 0 : index
      %608 = vector.load %arg19[%c0_187, %c0_188, %c0_189] : memref<2x8x128xf32, #tpu.memory_space<vmem>>, vector<2x8x128xf32>
      tpu.vector_store %arg19[%c0_187, %c0_188, %c0_189], %607 {strides = array<i32>} : memref<2x8x128xf32, #tpu.memory_space<vmem>>, vector<2x8x128xf32>,
      %c0_190 = arith.constant 0 : index
      %c0_191 = arith.constant 0 : index
      %609 = vector.load %arg3[%c0_190, %c0_191] : memref<8x4xf32, #tpu.memory_space<vmem>>, vector<8x4xf32>
      %c0_192 = arith.constant 0 : index
      %c0_193 = arith.constant 0 : index
      %610 = vector.load %arg4[%c0_192, %c0_193] : memref<4x128xf32, #tpu.memory_space<vmem>>, vector<4x128xf32>
      %cst_194 = arith.constant dense<0.000000e+00> : vector<8x128xf32>
      %611 = tpu.matmul %609, %610, %cst_194 {dimension_numbers = #tpu.dot_dimension_numbers<[1], [0], [0], [1], [0, 0, 1, 1], [], []>} : vector<8x4xf32>, vector<4x128xf32>, vector<8x128xf32> -> vector<8x128xf32>
      %c0_195 = arith.constant 0 : index
      %c0_196 = arith.constant 0 : index
      %612 = vector.load %arg5[%c0_195, %c0_196] : memref<1x128xf32, #tpu.memory_space<vmem>>, vector<1x128xf32>
      %613 = vector.broadcast %612 : vector<1x128xf32> to vector<8x128xf32>
      %614 = arith.addf %611, %613 : vector<8x128xf32>
      %cst_197 = arith.constant 0.000000e+00 : f32
      %615 = vector.broadcast %cst_197 : f32 to vector<8x128xf32>
      %616 = arith.maximumf %614, %615 : vector<8x128xf32>
      %c0_198 = arith.constant 0 : index
      %c0_199 = arith.constant 0 : index
      %617 = vector.load %arg20[%c0_198, %c0_199] : memref<8x128xf32, #tpu.memory_space<vmem>>, vector<8x128xf32>
      tpu.vector_store %arg20[%c0_198, %c0_199], %616 {strides = array<i32>} : memref<8x128xf32, #tpu.memory_space<vmem>>, vector<8x128xf32>,
    } else {
    }
    %c0 = arith.constant 0 : index
    %c0_1 = arith.constant 0 : index
    %3 = vector.load %arg20[%c0, %c0_1] : memref<8x128xf32, #tpu.memory_space<vmem>>, vector<8x128xf32>
    %4 = vector.shape_cast %3 : vector<8x128xf32> to vector<1x8x128xf32>
    %5 = vector.shape_cast %4 : vector<1x8x128xf32> to vector<1x8x128xf32>
    %6 = vector.broadcast %5 : vector<1x8x128xf32> to vector<8x8x128xf32>
    %c0_2 = arith.constant 0 : index
    %c0_3 = arith.constant 0 : index
    %c128 = arith.constant 128 : index
    %7 = vector.load %arg15[%c0_2, %c0_3, %c128] : memref<8x8x256xf32, #tpu.memory_space<vmem>>, vector<8x8x128xf32>
    tpu.vector_store %arg15[%c0_2, %c0_3, %c128], %6 {strides = array<i32>} : memref<8x8x256xf32, #tpu.memory_space<vmem>>, vector<8x8x128xf32>,
    %c0_4 = arith.constant 0 : index
    %c0_5 = arith.constant 0 : index
    %c0_6 = arith.constant 0 : index
    %8 = vector.load %arg2[%c0_4, %c0_5, %c0_6] : memref<8x8x2xf32, #tpu.memory_space<vmem>>, vector<8x8x2xf32>
    %9 = vector.shape_cast %8 : vector<8x8x2xf32> to vector<64x2xf32>
    %c0_7 = arith.constant 0 : index
    %c0_8 = arith.constant 0 : index
    %10 = vector.load %arg7[%c0_7, %c0_8] : memref<2x384xf32, #tpu.memory_space<vmem>>, vector<2x384xf32>
    %cst = arith.constant dense<0.000000e+00> : vector<64x384xf32>
    %11 = tpu.matmul %9, %10, %cst {dimension_numbers = #tpu.dot_dimension_numbers<[1], [0], [0], [1], [0, 0, 1, 1], [], []>} : vector<64x2xf32>, vector<2x384xf32>, vector<64x384xf32> -> vector<64x384xf32>
    %c0_9 = arith.constant 0 : index
    %c0_10 = arith.constant 0 : index
    %12 = vector.load %arg9[%c0_9, %c0_10] : memref<1x384xf32, #tpu.memory_space<vmem>>, vector<1x384xf32>
    %13 = vector.broadcast %12 : vector<1x384xf32> to vector<64x384xf32>
    %14 = arith.addf %11, %13 : vector<64x384xf32>
    %15 = vector.shape_cast %14 : vector<64x384xf32> to vector<8x8x384xf32>
    %c0_11 = arith.constant 0 : index
    %c0_12 = arith.constant 0 : index
    %c0_13 = arith.constant 0 : index
    %16 = vector.load %arg18[%c0_11, %c0_12, %c0_13] : memref<8x8x384xf32, #tpu.memory_space<vmem>>, vector<8x8x384xf32>
    tpu.vector_store %arg18[%c0_11, %c0_12, %c0_13], %15 {strides = array<i32>} : memref<8x8x384xf32, #tpu.memory_space<vmem>>, vector<8x8x384xf32>,
    %c0_14 = arith.constant 0 : index
    %c0_15 = arith.constant 0 : index
    %17 = vector.load %arg8[%c0_14, %c0_15] : memref<128x384xf32, #tpu.memory_space<vmem>>, vector<128x384xf32>
    %c0_16 = arith.constant 0 : index
    %c0_17 = arith.constant 0 : index
    %18 = vector.load %arg10[%c0_16, %c0_17] : memref<1x128xf32, #tpu.memory_space<vmem>>, vector<1x128xf32>
    %19 = vector.shape_cast %18 : vector<1x128xf32> to vector<1x128xf32>
    %20 = vector.broadcast %19 : vector<1x128xf32> to vector<8x128xf32>
    %c0_18 = arith.constant 0 : index
    %c0_19 = arith.constant 0 : index
    %c0_20 = arith.constant 0 : index
    %21 = vector.load %arg19[%c0_18, %c0_19, %c0_20] : memref<2x8x128xf32, #tpu.memory_space<vmem>>, vector<1x8x128xf32>
    %22 = vector.shape_cast %21 : vector<1x8x128xf32> to vector<8x128xf32>
    %c0_i32_21 = arith.constant 0 : i32
    %23 = arith.index_cast %c0_i32_21 : i32 to index
    %c0_22 = arith.constant 0 : index
    %c0_23 = arith.constant 0 : index
    %24 = vector.load %arg18[%23, %c0_22, %c0_23] : memref<8x8x384xf32, #tpu.memory_space<vmem>>, vector<1x8x384xf32>
    %25 = vector.shape_cast %24 : vector<1x8x384xf32> to vector<8x384xf32>
    %cst_24 = arith.constant dense<0.000000e+00> : vector<8x384xf32>
    %26 = tpu.matmul %22, %17, %cst_24 {dimension_numbers = #tpu.dot_dimension_numbers<[1], [0], [0], [1], [0, 0, 1, 1], [], []>} : vector<8x128xf32>, vector<128x384xf32>, vector<8x384xf32> -> vector<8x384xf32>
    %27 = vector.extract_strided_slice %25 {offsets = [0, 0], sizes = [8, 128], strides = [1, 1]} : vector<8x384xf32> to vector<8x128xf32>
    %28 = vector.extract_strided_slice %26 {offsets = [0, 0], sizes = [8, 128], strides = [1, 1]} : vector<8x384xf32> to vector<8x128xf32>
    %29 = arith.addf %27, %28 : vector<8x128xf32>
    %30 = arith.negf %29 : vector<8x128xf32>
    %31 = math.exp %30 : vector<8x128xf32>
    %cst_25 = arith.constant 1.000000e+00 : f32
    %32 = vector.broadcast %cst_25 : f32 to vector<8x128xf32>
    %33 = arith.addf %32, %31 : vector<8x128xf32>
    %34 = arith.divf %32, %33 : vector<8x128xf32>
    %35 = vector.extract_strided_slice %25 {offsets = [0, 128], sizes = [8, 128], strides = [1, 1]} : vector<8x384xf32> to vector<8x128xf32>
    %36 = vector.extract_strided_slice %26 {offsets = [0, 128], sizes = [8, 128], strides = [1, 1]} : vector<8x384xf32> to vector<8x128xf32>
    %37 = arith.addf %35, %36 : vector<8x128xf32>
    %38 = arith.negf %37 : vector<8x128xf32>
    %39 = math.exp %38 : vector<8x128xf32>
    %cst_26 = arith.constant 1.000000e+00 : f32
    %40 = vector.broadcast %cst_26 : f32 to vector<8x128xf32>
    %41 = arith.addf %40, %39 : vector<8x128xf32>
    %42 = arith.divf %40, %41 : vector<8x128xf32>
    %43 = vector.extract_strided_slice %25 {offsets = [0, 256], sizes = [8, 128], strides = [1, 1]} : vector<8x384xf32> to vector<8x128xf32>
    %44 = vector.extract_strided_slice %26 {offsets = [0, 256], sizes = [8, 128], strides = [1, 1]} : vector<8x384xf32> to vector<8x128xf32>
    %45 = arith.addf %44, %20 : vector<8x128xf32>
    %46 = arith.mulf %34, %45 : vector<8x128xf32>
    %47 = arith.addf %43, %46 : vector<8x128xf32>
    %48 = math.tanh %47 : vector<8x128xf32>
    %cst_27 = arith.constant 1.000000e+00 : f32
    %49 = vector.broadcast %cst_27 : f32 to vector<8x128xf32>
    %50 = arith.subf %49, %42 : vector<8x128xf32>
    %51 = arith.mulf %50, %48 : vector<8x128xf32>
    %52 = arith.mulf %42, %22 : vector<8x128xf32>
    %53 = arith.addf %51, %52 : vector<8x128xf32>
    %54 = arith.index_cast %c0_i32_21 : i32 to index
    %c0_28 = arith.constant 0 : index
    %c0_29 = arith.constant 0 : index
    %55 = vector.load %arg17[%54, %c0_28, %c0_29] : memref<8x8x128xf32, #tpu.memory_space<vmem>>, vector<1x8x128xf32>
    %56 = vector.shape_cast %55 : vector<1x8x128xf32> to vector<8x128xf32>
    %57 = vector.shape_cast %53 : vector<8x128xf32> to vector<1x8x128xf32>
    tpu.vector_store %arg17[%54, %c0_28, %c0_29], %57 {strides = array<i32>} : memref<8x8x128xf32, #tpu.memory_space<vmem>>, vector<1x8x128xf32>,
    %c1_i32 = arith.constant 1 : i32
    %58 = arith.index_cast %c1_i32 : i32 to index
    %c0_30 = arith.constant 0 : index
    %c0_31 = arith.constant 0 : index
    %59 = vector.load %arg18[%58, %c0_30, %c0_31] : memref<8x8x384xf32, #tpu.memory_space<vmem>>, vector<1x8x384xf32>
    %60 = vector.shape_cast %59 : vector<1x8x384xf32> to vector<8x384xf32>
    %cst_32 = arith.constant dense<0.000000e+00> : vector<8x384xf32>
    %61 = tpu.matmul %53, %17, %cst_32 {dimension_numbers = #tpu.dot_dimension_numbers<[1], [0], [0], [1], [0, 0, 1, 1], [], []>} : vector<8x128xf32>, vector<128x384xf32>, vector<8x384xf32> -> vector<8x384xf32>
    %62 = vector.extract_strided_slice %60 {offsets = [0, 0], sizes = [8, 128], strides = [1, 1]} : vector<8x384xf32> to vector<8x128xf32>
    %63 = vector.extract_strided_slice %61 {offsets = [0, 0], sizes = [8, 128], strides = [1, 1]} : vector<8x384xf32> to vector<8x128xf32>
    %64 = arith.addf %62, %63 : vector<8x128xf32>
    %65 = arith.negf %64 : vector<8x128xf32>
    %66 = math.exp %65 : vector<8x128xf32>
    %cst_33 = arith.constant 1.000000e+00 : f32
    %67 = vector.broadcast %cst_33 : f32 to vector<8x128xf32>
    %68 = arith.addf %67, %66 : vector<8x128xf32>
    %69 = arith.divf %67, %68 : vector<8x128xf32>
    %70 = vector.extract_strided_slice %60 {offsets = [0, 128], sizes = [8, 128], strides = [1, 1]} : vector<8x384xf32> to vector<8x128xf32>
    %71 = vector.extract_strided_slice %61 {offsets = [0, 128], sizes = [8, 128], strides = [1, 1]} : vector<8x384xf32> to vector<8x128xf32>
    %72 = arith.addf %70, %71 : vector<8x128xf32>
    %73 = arith.negf %72 : vector<8x128xf32>
    %74 = math.exp %73 : vector<8x128xf32>
    %cst_34 = arith.constant 1.000000e+00 : f32
    %75 = vector.broadcast %cst_34 : f32 to vector<8x128xf32>
    %76 = arith.addf %75, %74 : vector<8x128xf32>
    %77 = arith.divf %75, %76 : vector<8x128xf32>
    %78 = vector.extract_strided_slice %60 {offsets = [0, 256], sizes = [8, 128], strides = [1, 1]} : vector<8x384xf32> to vector<8x128xf32>
    %79 = vector.extract_strided_slice %61 {offsets = [0, 256], sizes = [8, 128], strides = [1, 1]} : vector<8x384xf32> to vector<8x128xf32>
    %80 = arith.addf %79, %20 : vector<8x128xf32>
    %81 = arith.mulf %69, %80 : vector<8x128xf32>
    %82 = arith.addf %78, %81 : vector<8x128xf32>
    %83 = math.tanh %82 : vector<8x128xf32>
    %cst_35 = arith.constant 1.000000e+00 : f32
    %84 = vector.broadcast %cst_35 : f32 to vector<8x128xf32>
    %85 = arith.subf %84, %77 : vector<8x128xf32>
    %86 = arith.mulf %85, %83 : vector<8x128xf32>
    %87 = arith.mulf %77, %53 : vector<8x128xf32>
    %88 = arith.addf %86, %87 : vector<8x128xf32>
    %89 = arith.index_cast %c1_i32 : i32 to index
    %c0_36 = arith.constant 0 : index
    %c0_37 = arith.constant 0 : index
    %90 = vector.load %arg17[%89, %c0_36, %c0_37] : memref<8x8x128xf32, #tpu.memory_space<vmem>>, vector<1x8x128xf32>
    %91 = vector.shape_cast %90 : vector<1x8x128xf32> to vector<8x128xf32>
    %92 = vector.shape_cast %88 : vector<8x128xf32> to vector<1x8x128xf32>
    tpu.vector_store %arg17[%89, %c0_36, %c0_37], %92 {strides = array<i32>} : memref<8x8x128xf32, #tpu.memory_space<vmem>>, vector<1x8x128xf32>,
    %c2_i32 = arith.constant 2 : i32
    %93 = arith.index_cast %c2_i32 : i32 to index
    %c0_38 = arith.constant 0 : index
    %c0_39 = arith.constant 0 : index
    %94 = vector.load %arg18[%93, %c0_38, %c0_39] : memref<8x8x384xf32, #tpu.memory_space<vmem>>, vector<1x8x384xf32>
    %95 = vector.shape_cast %94 : vector<1x8x384xf32> to vector<8x384xf32>
    %cst_40 = arith.constant dense<0.000000e+00> : vector<8x384xf32>
    %96 = tpu.matmul %88, %17, %cst_40 {dimension_numbers = #tpu.dot_dimension_numbers<[1], [0], [0], [1], [0, 0, 1, 1], [], []>} : vector<8x128xf32>, vector<128x384xf32>, vector<8x384xf32> -> vector<8x384xf32>
    %97 = vector.extract_strided_slice %95 {offsets = [0, 0], sizes = [8, 128], strides = [1, 1]} : vector<8x384xf32> to vector<8x128xf32>
    %98 = vector.extract_strided_slice %96 {offsets = [0, 0], sizes = [8, 128], strides = [1, 1]} : vector<8x384xf32> to vector<8x128xf32>
    %99 = arith.addf %97, %98 : vector<8x128xf32>
    %100 = arith.negf %99 : vector<8x128xf32>
    %101 = math.exp %100 : vector<8x128xf32>
    %cst_41 = arith.constant 1.000000e+00 : f32
    %102 = vector.broadcast %cst_41 : f32 to vector<8x128xf32>
    %103 = arith.addf %102, %101 : vector<8x128xf32>
    %104 = arith.divf %102, %103 : vector<8x128xf32>
    %105 = vector.extract_strided_slice %95 {offsets = [0, 128], sizes = [8, 128], strides = [1, 1]} : vector<8x384xf32> to vector<8x128xf32>
    %106 = vector.extract_strided_slice %96 {offsets = [0, 128], sizes = [8, 128], strides = [1, 1]} : vector<8x384xf32> to vector<8x128xf32>
    %107 = arith.addf %105, %106 : vector<8x128xf32>
    %108 = arith.negf %107 : vector<8x128xf32>
    %109 = math.exp %108 : vector<8x128xf32>
    %cst_42 = arith.constant 1.000000e+00 : f32
    %110 = vector.broadcast %cst_42 : f32 to vector<8x128xf32>
    %111 = arith.addf %110, %109 : vector<8x128xf32>
    %112 = arith.divf %110, %111 : vector<8x128xf32>
    %113 = vector.extract_strided_slice %95 {offsets = [0, 256], sizes = [8, 128], strides = [1, 1]} : vector<8x384xf32> to vector<8x128xf32>
    %114 = vector.extract_strided_slice %96 {offsets = [0, 256], sizes = [8, 128], strides = [1, 1]} : vector<8x384xf32> to vector<8x128xf32>
    %115 = arith.addf %114, %20 : vector<8x128xf32>
    %116 = arith.mulf %104, %115 : vector<8x128xf32>
    %117 = arith.addf %113, %116 : vector<8x128xf32>
    %118 = math.tanh %117 : vector<8x128xf32>
    %cst_43 = arith.constant 1.000000e+00 : f32
    %119 = vector.broadcast %cst_43 : f32 to vector<8x128xf32>
    %120 = arith.subf %119, %112 : vector<8x128xf32>
    %121 = arith.mulf %120, %118 : vector<8x128xf32>
    %122 = arith.mulf %112, %88 : vector<8x128xf32>
    %123 = arith.addf %121, %122 : vector<8x128xf32>
    %124 = arith.index_cast %c2_i32 : i32 to index
    %c0_44 = arith.constant 0 : index
    %c0_45 = arith.constant 0 : index
    %125 = vector.load %arg17[%124, %c0_44, %c0_45] : memref<8x8x128xf32, #tpu.memory_space<vmem>>, vector<1x8x128xf32>
    %126 = vector.shape_cast %125 : vector<1x8x128xf32> to vector<8x128xf32>
    %127 = vector.shape_cast %123 : vector<8x128xf32> to vector<1x8x128xf32>
    tpu.vector_store %arg17[%124, %c0_44, %c0_45], %127 {strides = array<i32>} : memref<8x8x128xf32, #tpu.memory_space<vmem>>, vector<1x8x128xf32>,
    %c3_i32 = arith.constant 3 : i32
    %128 = arith.index_cast %c3_i32 : i32 to index
    %c0_46 = arith.constant 0 : index
    %c0_47 = arith.constant 0 : index
    %129 = vector.load %arg18[%128, %c0_46, %c0_47] : memref<8x8x384xf32, #tpu.memory_space<vmem>>, vector<1x8x384xf32>
    %130 = vector.shape_cast %129 : vector<1x8x384xf32> to vector<8x384xf32>
    %cst_48 = arith.constant dense<0.000000e+00> : vector<8x384xf32>
    %131 = tpu.matmul %123, %17, %cst_48 {dimension_numbers = #tpu.dot_dimension_numbers<[1], [0], [0], [1], [0, 0, 1, 1], [], []>} : vector<8x128xf32>, vector<128x384xf32>, vector<8x384xf32> -> vector<8x384xf32>
    %132 = vector.extract_strided_slice %130 {offsets = [0, 0], sizes = [8, 128], strides = [1, 1]} : vector<8x384xf32> to vector<8x128xf32>
    %133 = vector.extract_strided_slice %131 {offsets = [0, 0], sizes = [8, 128], strides = [1, 1]} : vector<8x384xf32> to vector<8x128xf32>
    %134 = arith.addf %132, %133 : vector<8x128xf32>
    %135 = arith.negf %134 : vector<8x128xf32>
    %136 = math.exp %135 : vector<8x128xf32>
    %cst_49 = arith.constant 1.000000e+00 : f32
    %137 = vector.broadcast %cst_49 : f32 to vector<8x128xf32>
    %138 = arith.addf %137, %136 : vector<8x128xf32>
    %139 = arith.divf %137, %138 : vector<8x128xf32>
    %140 = vector.extract_strided_slice %130 {offsets = [0, 128], sizes = [8, 128], strides = [1, 1]} : vector<8x384xf32> to vector<8x128xf32>
    %141 = vector.extract_strided_slice %131 {offsets = [0, 128], sizes = [8, 128], strides = [1, 1]} : vector<8x384xf32> to vector<8x128xf32>
    %142 = arith.addf %140, %141 : vector<8x128xf32>
    %143 = arith.negf %142 : vector<8x128xf32>
    %144 = math.exp %143 : vector<8x128xf32>
    %cst_50 = arith.constant 1.000000e+00 : f32
    %145 = vector.broadcast %cst_50 : f32 to vector<8x128xf32>
    %146 = arith.addf %145, %144 : vector<8x128xf32>
    %147 = arith.divf %145, %146 : vector<8x128xf32>
    %148 = vector.extract_strided_slice %130 {offsets = [0, 256], sizes = [8, 128], strides = [1, 1]} : vector<8x384xf32> to vector<8x128xf32>
    %149 = vector.extract_strided_slice %131 {offsets = [0, 256], sizes = [8, 128], strides = [1, 1]} : vector<8x384xf32> to vector<8x128xf32>
    %150 = arith.addf %149, %20 : vector<8x128xf32>
    %151 = arith.mulf %139, %150 : vector<8x128xf32>
    %152 = arith.addf %148, %151 : vector<8x128xf32>
    %153 = math.tanh %152 : vector<8x128xf32>
    %cst_51 = arith.constant 1.000000e+00 : f32
    %154 = vector.broadcast %cst_51 : f32 to vector<8x128xf32>
    %155 = arith.subf %154, %147 : vector<8x128xf32>
    %156 = arith.mulf %155, %153 : vector<8x128xf32>
    %157 = arith.mulf %147, %123 : vector<8x128xf32>
    %158 = arith.addf %156, %157 : vector<8x128xf32>
    %159 = arith.index_cast %c3_i32 : i32 to index
    %c0_52 = arith.constant 0 : index
    %c0_53 = arith.constant 0 : index
    %160 = vector.load %arg17[%159, %c0_52, %c0_53] : memref<8x8x128xf32, #tpu.memory_space<vmem>>, vector<1x8x128xf32>
    %161 = vector.shape_cast %160 : vector<1x8x128xf32> to vector<8x128xf32>
    %162 = vector.shape_cast %158 : vector<8x128xf32> to vector<1x8x128xf32>
    tpu.vector_store %arg17[%159, %c0_52, %c0_53], %162 {strides = array<i32>} : memref<8x8x128xf32, #tpu.memory_space<vmem>>, vector<1x8x128xf32>,
    %c4_i32 = arith.constant 4 : i32
    %163 = arith.index_cast %c4_i32 : i32 to index
    %c0_54 = arith.constant 0 : index
    %c0_55 = arith.constant 0 : index
    %164 = vector.load %arg18[%163, %c0_54, %c0_55] : memref<8x8x384xf32, #tpu.memory_space<vmem>>, vector<1x8x384xf32>
    %165 = vector.shape_cast %164 : vector<1x8x384xf32> to vector<8x384xf32>
    %cst_56 = arith.constant dense<0.000000e+00> : vector<8x384xf32>
    %166 = tpu.matmul %158, %17, %cst_56 {dimension_numbers = #tpu.dot_dimension_numbers<[1], [0], [0], [1], [0, 0, 1, 1], [], []>} : vector<8x128xf32>, vector<128x384xf32>, vector<8x384xf32> -> vector<8x384xf32>
    %167 = vector.extract_strided_slice %165 {offsets = [0, 0], sizes = [8, 128], strides = [1, 1]} : vector<8x384xf32> to vector<8x128xf32>
    %168 = vector.extract_strided_slice %166 {offsets = [0, 0], sizes = [8, 128], strides = [1, 1]} : vector<8x384xf32> to vector<8x128xf32>
    %169 = arith.addf %167, %168 : vector<8x128xf32>
    %170 = arith.negf %169 : vector<8x128xf32>
    %171 = math.exp %170 : vector<8x128xf32>
    %cst_57 = arith.constant 1.000000e+00 : f32
    %172 = vector.broadcast %cst_57 : f32 to vector<8x128xf32>
    %173 = arith.addf %172, %171 : vector<8x128xf32>
    %174 = arith.divf %172, %173 : vector<8x128xf32>
    %175 = vector.extract_strided_slice %165 {offsets = [0, 128], sizes = [8, 128], strides = [1, 1]} : vector<8x384xf32> to vector<8x128xf32>
    %176 = vector.extract_strided_slice %166 {offsets = [0, 128], sizes = [8, 128], strides = [1, 1]} : vector<8x384xf32> to vector<8x128xf32>
    %177 = arith.addf %175, %176 : vector<8x128xf32>
    %178 = arith.negf %177 : vector<8x128xf32>
    %179 = math.exp %178 : vector<8x128xf32>
    %cst_58 = arith.constant 1.000000e+00 : f32
    %180 = vector.broadcast %cst_58 : f32 to vector<8x128xf32>
    %181 = arith.addf %180, %179 : vector<8x128xf32>
    %182 = arith.divf %180, %181 : vector<8x128xf32>
    %183 = vector.extract_strided_slice %165 {offsets = [0, 256], sizes = [8, 128], strides = [1, 1]} : vector<8x384xf32> to vector<8x128xf32>
    %184 = vector.extract_strided_slice %166 {offsets = [0, 256], sizes = [8, 128], strides = [1, 1]} : vector<8x384xf32> to vector<8x128xf32>
    %185 = arith.addf %184, %20 : vector<8x128xf32>
    %186 = arith.mulf %174, %185 : vector<8x128xf32>
    %187 = arith.addf %183, %186 : vector<8x128xf32>
    %188 = math.tanh %187 : vector<8x128xf32>
    %cst_59 = arith.constant 1.000000e+00 : f32
    %189 = vector.broadcast %cst_59 : f32 to vector<8x128xf32>
    %190 = arith.subf %189, %182 : vector<8x128xf32>
    %191 = arith.mulf %190, %188 : vector<8x128xf32>
    %192 = arith.mulf %182, %158 : vector<8x128xf32>
    %193 = arith.addf %191, %192 : vector<8x128xf32>
    %194 = arith.index_cast %c4_i32 : i32 to index
    %c0_60 = arith.constant 0 : index
    %c0_61 = arith.constant 0 : index
    %195 = vector.load %arg17[%194, %c0_60, %c0_61] : memref<8x8x128xf32, #tpu.memory_space<vmem>>, vector<1x8x128xf32>
    %196 = vector.shape_cast %195 : vector<1x8x128xf32> to vector<8x128xf32>
    %197 = vector.shape_cast %193 : vector<8x128xf32> to vector<1x8x128xf32>
    tpu.vector_store %arg17[%194, %c0_60, %c0_61], %197 {strides = array<i32>} : memref<8x8x128xf32, #tpu.memory_space<vmem>>, vector<1x8x128xf32>,
    %c5_i32 = arith.constant 5 : i32
    %198 = arith.index_cast %c5_i32 : i32 to index
    %c0_62 = arith.constant 0 : index
    %c0_63 = arith.constant 0 : index
    %199 = vector.load %arg18[%198, %c0_62, %c0_63] : memref<8x8x384xf32, #tpu.memory_space<vmem>>, vector<1x8x384xf32>
    %200 = vector.shape_cast %199 : vector<1x8x384xf32> to vector<8x384xf32>
    %cst_64 = arith.constant dense<0.000000e+00> : vector<8x384xf32>
    %201 = tpu.matmul %193, %17, %cst_64 {dimension_numbers = #tpu.dot_dimension_numbers<[1], [0], [0], [1], [0, 0, 1, 1], [], []>} : vector<8x128xf32>, vector<128x384xf32>, vector<8x384xf32> -> vector<8x384xf32>
    %202 = vector.extract_strided_slice %200 {offsets = [0, 0], sizes = [8, 128], strides = [1, 1]} : vector<8x384xf32> to vector<8x128xf32>
    %203 = vector.extract_strided_slice %201 {offsets = [0, 0], sizes = [8, 128], strides = [1, 1]} : vector<8x384xf32> to vector<8x128xf32>
    %204 = arith.addf %202, %203 : vector<8x128xf32>
    %205 = arith.negf %204 : vector<8x128xf32>
    %206 = math.exp %205 : vector<8x128xf32>
    %cst_65 = arith.constant 1.000000e+00 : f32
    %207 = vector.broadcast %cst_65 : f32 to vector<8x128xf32>
    %208 = arith.addf %207, %206 : vector<8x128xf32>
    %209 = arith.divf %207, %208 : vector<8x128xf32>
    %210 = vector.extract_strided_slice %200 {offsets = [0, 128], sizes = [8, 128], strides = [1, 1]} : vector<8x384xf32> to vector<8x128xf32>
    %211 = vector.extract_strided_slice %201 {offsets = [0, 128], sizes = [8, 128], strides = [1, 1]} : vector<8x384xf32> to vector<8x128xf32>
    %212 = arith.addf %210, %211 : vector<8x128xf32>
    %213 = arith.negf %212 : vector<8x128xf32>
    %214 = math.exp %213 : vector<8x128xf32>
    %cst_66 = arith.constant 1.000000e+00 : f32
    %215 = vector.broadcast %cst_66 : f32 to vector<8x128xf32>
    %216 = arith.addf %215, %214 : vector<8x128xf32>
    %217 = arith.divf %215, %216 : vector<8x128xf32>
    %218 = vector.extract_strided_slice %200 {offsets = [0, 256], sizes = [8, 128], strides = [1, 1]} : vector<8x384xf32> to vector<8x128xf32>
    %219 = vector.extract_strided_slice %201 {offsets = [0, 256], sizes = [8, 128], strides = [1, 1]} : vector<8x384xf32> to vector<8x128xf32>
    %220 = arith.addf %219, %20 : vector<8x128xf32>
    %221 = arith.mulf %209, %220 : vector<8x128xf32>
    %222 = arith.addf %218, %221 : vector<8x128xf32>
    %223 = math.tanh %222 : vector<8x128xf32>
    %cst_67 = arith.constant 1.000000e+00 : f32
    %224 = vector.broadcast %cst_67 : f32 to vector<8x128xf32>
    %225 = arith.subf %224, %217 : vector<8x128xf32>
    %226 = arith.mulf %225, %223 : vector<8x128xf32>
    %227 = arith.mulf %217, %193 : vector<8x128xf32>
    %228 = arith.addf %226, %227 : vector<8x128xf32>
    %229 = arith.index_cast %c5_i32 : i32 to index
    %c0_68 = arith.constant 0 : index
    %c0_69 = arith.constant 0 : index
    %230 = vector.load %arg17[%229, %c0_68, %c0_69] : memref<8x8x128xf32, #tpu.memory_space<vmem>>, vector<1x8x128xf32>
    %231 = vector.shape_cast %230 : vector<1x8x128xf32> to vector<8x128xf32>
    %232 = vector.shape_cast %228 : vector<8x128xf32> to vector<1x8x128xf32>
    tpu.vector_store %arg17[%229, %c0_68, %c0_69], %232 {strides = array<i32>} : memref<8x8x128xf32, #tpu.memory_space<vmem>>, vector<1x8x128xf32>,
    %c6_i32 = arith.constant 6 : i32
    %233 = arith.index_cast %c6_i32 : i32 to index
    %c0_70 = arith.constant 0 : index
    %c0_71 = arith.constant 0 : index
    %234 = vector.load %arg18[%233, %c0_70, %c0_71] : memref<8x8x384xf32, #tpu.memory_space<vmem>>, vector<1x8x384xf32>
    %235 = vector.shape_cast %234 : vector<1x8x384xf32> to vector<8x384xf32>
    %cst_72 = arith.constant dense<0.000000e+00> : vector<8x384xf32>
    %236 = tpu.matmul %228, %17, %cst_72 {dimension_numbers = #tpu.dot_dimension_numbers<[1], [0], [0], [1], [0, 0, 1, 1], [], []>} : vector<8x128xf32>, vector<128x384xf32>, vector<8x384xf32> -> vector<8x384xf32>
    %237 = vector.extract_strided_slice %235 {offsets = [0, 0], sizes = [8, 128], strides = [1, 1]} : vector<8x384xf32> to vector<8x128xf32>
    %238 = vector.extract_strided_slice %236 {offsets = [0, 0], sizes = [8, 128], strides = [1, 1]} : vector<8x384xf32> to vector<8x128xf32>
    %239 = arith.addf %237, %238 : vector<8x128xf32>
    %240 = arith.negf %239 : vector<8x128xf32>
    %241 = math.exp %240 : vector<8x128xf32>
    %cst_73 = arith.constant 1.000000e+00 : f32
    %242 = vector.broadcast %cst_73 : f32 to vector<8x128xf32>
    %243 = arith.addf %242, %241 : vector<8x128xf32>
    %244 = arith.divf %242, %243 : vector<8x128xf32>
    %245 = vector.extract_strided_slice %235 {offsets = [0, 128], sizes = [8, 128], strides = [1, 1]} : vector<8x384xf32> to vector<8x128xf32>
    %246 = vector.extract_strided_slice %236 {offsets = [0, 128], sizes = [8, 128], strides = [1, 1]} : vector<8x384xf32> to vector<8x128xf32>
    %247 = arith.addf %245, %246 : vector<8x128xf32>
    %248 = arith.negf %247 : vector<8x128xf32>
    %249 = math.exp %248 : vector<8x128xf32>
    %cst_74 = arith.constant 1.000000e+00 : f32
    %250 = vector.broadcast %cst_74 : f32 to vector<8x128xf32>
    %251 = arith.addf %250, %249 : vector<8x128xf32>
    %252 = arith.divf %250, %251 : vector<8x128xf32>
    %253 = vector.extract_strided_slice %235 {offsets = [0, 256], sizes = [8, 128], strides = [1, 1]} : vector<8x384xf32> to vector<8x128xf32>
    %254 = vector.extract_strided_slice %236 {offsets = [0, 256], sizes = [8, 128], strides = [1, 1]} : vector<8x384xf32> to vector<8x128xf32>
    %255 = arith.addf %254, %20 : vector<8x128xf32>
    %256 = arith.mulf %244, %255 : vector<8x128xf32>
    %257 = arith.addf %253, %256 : vector<8x128xf32>
    %258 = math.tanh %257 : vector<8x128xf32>
    %cst_75 = arith.constant 1.000000e+00 : f32
    %259 = vector.broadcast %cst_75 : f32 to vector<8x128xf32>
    %260 = arith.subf %259, %252 : vector<8x128xf32>
    %261 = arith.mulf %260, %258 : vector<8x128xf32>
    %262 = arith.mulf %252, %228 : vector<8x128xf32>
    %263 = arith.addf %261, %262 : vector<8x128xf32>
    %264 = arith.index_cast %c6_i32 : i32 to index
    %c0_76 = arith.constant 0 : index
    %c0_77 = arith.constant 0 : index
    %265 = vector.load %arg17[%264, %c0_76, %c0_77] : memref<8x8x128xf32, #tpu.memory_space<vmem>>, vector<1x8x128xf32>
    %266 = vector.shape_cast %265 : vector<1x8x128xf32> to vector<8x128xf32>
    %267 = vector.shape_cast %263 : vector<8x128xf32> to vector<1x8x128xf32>
    tpu.vector_store %arg17[%264, %c0_76, %c0_77], %267 {strides = array<i32>} : memref<8x8x128xf32, #tpu.memory_space<vmem>>, vector<1x8x128xf32>,
    %c7_i32 = arith.constant 7 : i32
    %268 = arith.index_cast %c7_i32 : i32 to index
    %c0_78 = arith.constant 0 : index
    %c0_79 = arith.constant 0 : index
    %269 = vector.load %arg18[%268, %c0_78, %c0_79] : memref<8x8x384xf32, #tpu.memory_space<vmem>>, vector<1x8x384xf32>
    %270 = vector.shape_cast %269 : vector<1x8x384xf32> to vector<8x384xf32>
    %cst_80 = arith.constant dense<0.000000e+00> : vector<8x384xf32>
    %271 = tpu.matmul %263, %17, %cst_80 {dimension_numbers = #tpu.dot_dimension_numbers<[1], [0], [0], [1], [0, 0, 1, 1], [], []>} : vector<8x128xf32>, vector<128x384xf32>, vector<8x384xf32> -> vector<8x384xf32>
    %272 = vector.extract_strided_slice %270 {offsets = [0, 0], sizes = [8, 128], strides = [1, 1]} : vector<8x384xf32> to vector<8x128xf32>
    %273 = vector.extract_strided_slice %271 {offsets = [0, 0], sizes = [8, 128], strides = [1, 1]} : vector<8x384xf32> to vector<8x128xf32>
    %274 = arith.addf %272, %273 : vector<8x128xf32>
    %275 = arith.negf %274 : vector<8x128xf32>
    %276 = math.exp %275 : vector<8x128xf32>
    %cst_81 = arith.constant 1.000000e+00 : f32
    %277 = vector.broadcast %cst_81 : f32 to vector<8x128xf32>
    %278 = arith.addf %277, %276 : vector<8x128xf32>
    %279 = arith.divf %277, %278 : vector<8x128xf32>
    %280 = vector.extract_strided_slice %270 {offsets = [0, 128], sizes = [8, 128], strides = [1, 1]} : vector<8x384xf32> to vector<8x128xf32>
    %281 = vector.extract_strided_slice %271 {offsets = [0, 128], sizes = [8, 128], strides = [1, 1]} : vector<8x384xf32> to vector<8x128xf32>
    %282 = arith.addf %280, %281 : vector<8x128xf32>
    %283 = arith.negf %282 : vector<8x128xf32>
    %284 = math.exp %283 : vector<8x128xf32>
    %cst_82 = arith.constant 1.000000e+00 : f32
    %285 = vector.broadcast %cst_82 : f32 to vector<8x128xf32>
    %286 = arith.addf %285, %284 : vector<8x128xf32>
    %287 = arith.divf %285, %286 : vector<8x128xf32>
    %288 = vector.extract_strided_slice %270 {offsets = [0, 256], sizes = [8, 128], strides = [1, 1]} : vector<8x384xf32> to vector<8x128xf32>
    %289 = vector.extract_strided_slice %271 {offsets = [0, 256], sizes = [8, 128], strides = [1, 1]} : vector<8x384xf32> to vector<8x128xf32>
    %290 = arith.addf %289, %20 : vector<8x128xf32>
    %291 = arith.mulf %279, %290 : vector<8x128xf32>
    %292 = arith.addf %288, %291 : vector<8x128xf32>
    %293 = math.tanh %292 : vector<8x128xf32>
    %cst_83 = arith.constant 1.000000e+00 : f32
    %294 = vector.broadcast %cst_83 : f32 to vector<8x128xf32>
    %295 = arith.subf %294, %287 : vector<8x128xf32>
    %296 = arith.mulf %295, %293 : vector<8x128xf32>
    %297 = arith.mulf %287, %263 : vector<8x128xf32>
    %298 = arith.addf %296, %297 : vector<8x128xf32>
    %299 = arith.index_cast %c7_i32 : i32 to index
    %c0_84 = arith.constant 0 : index
    %c0_85 = arith.constant 0 : index
    %300 = vector.load %arg17[%299, %c0_84, %c0_85] : memref<8x8x128xf32, #tpu.memory_space<vmem>>, vector<1x8x128xf32>
    %301 = vector.shape_cast %300 : vector<1x8x128xf32> to vector<8x128xf32>
    %302 = vector.shape_cast %298 : vector<8x128xf32> to vector<1x8x128xf32>
    tpu.vector_store %arg17[%299, %c0_84, %c0_85], %302 {strides = array<i32>} : memref<8x8x128xf32, #tpu.memory_space<vmem>>, vector<1x8x128xf32>,
    %c8_i32 = arith.constant 8 : i32
    %c0_86 = arith.constant 0 : index
    %c0_87 = arith.constant 0 : index
    %c0_88 = arith.constant 0 : index
    %303 = vector.load %arg19[%c0_86, %c0_87, %c0_88] : memref<2x8x128xf32, #tpu.memory_space<vmem>>, vector<1x8x128xf32>
    %304 = vector.shape_cast %303 : vector<1x8x128xf32> to vector<8x128xf32>
    %305 = vector.shape_cast %298 : vector<8x128xf32> to vector<1x8x128xf32>
    tpu.vector_store %arg19[%c0_86, %c0_87, %c0_88], %305 {strides = array<i32>} : memref<2x8x128xf32, #tpu.memory_space<vmem>>, vector<1x8x128xf32>,
    %c0_89 = arith.constant 0 : index
    %c0_90 = arith.constant 0 : index
    %c0_91 = arith.constant 0 : index
    %306 = vector.load %arg17[%c0_89, %c0_90, %c0_91] : memref<8x8x128xf32, #tpu.memory_space<vmem>>, vector<8x8x128xf32>
    %307 = vector.shape_cast %306 : vector<8x8x128xf32> to vector<64x128xf32>
    %c0_92 = arith.constant 0 : index
    %c0_93 = arith.constant 0 : index
    %308 = vector.load %arg11[%c0_92, %c0_93] : memref<128x384xf32, #tpu.memory_space<vmem>>, vector<128x384xf32>
    %cst_94 = arith.constant dense<0.000000e+00> : vector<64x384xf32>
    %309 = tpu.matmul %307, %308, %cst_94 {dimension_numbers = #tpu.dot_dimension_numbers<[1], [0], [0], [1], [0, 0, 1, 1], [], []>} : vector<64x128xf32>, vector<128x384xf32>, vector<64x384xf32> -> vector<64x384xf32>
    %c0_95 = arith.constant 0 : index
    %c0_96 = arith.constant 0 : index
    %310 = vector.load %arg13[%c0_95, %c0_96] : memref<1x384xf32, #tpu.memory_space<vmem>>, vector<1x384xf32>
    %311 = vector.broadcast %310 : vector<1x384xf32> to vector<64x384xf32>
    %312 = arith.addf %309, %311 : vector<64x384xf32>
    %313 = vector.shape_cast %312 : vector<64x384xf32> to vector<8x8x384xf32>
    %c0_97 = arith.constant 0 : index
    %c0_98 = arith.constant 0 : index
    %c0_99 = arith.constant 0 : index
    %314 = vector.load %arg18[%c0_97, %c0_98, %c0_99] : memref<8x8x384xf32, #tpu.memory_space<vmem>>, vector<8x8x384xf32>
    tpu.vector_store %arg18[%c0_97, %c0_98, %c0_99], %313 {strides = array<i32>} : memref<8x8x384xf32, #tpu.memory_space<vmem>>, vector<8x8x384xf32>,
    %c0_100 = arith.constant 0 : index
    %c0_101 = arith.constant 0 : index
    %315 = vector.load %arg12[%c0_100, %c0_101] : memref<128x384xf32, #tpu.memory_space<vmem>>, vector<128x384xf32>
    %c0_102 = arith.constant 0 : index
    %c0_103 = arith.constant 0 : index
    %316 = vector.load %arg14[%c0_102, %c0_103] : memref<1x128xf32, #tpu.memory_space<vmem>>, vector<1x128xf32>
    %317 = vector.shape_cast %316 : vector<1x128xf32> to vector<1x128xf32>
    %318 = vector.broadcast %317 : vector<1x128xf32> to vector<8x128xf32>
    %c1 = arith.constant 1 : index
    %c0_104 = arith.constant 0 : index
    %c0_105 = arith.constant 0 : index
    %319 = vector.load %arg19[%c1, %c0_104, %c0_105] : memref<2x8x128xf32, #tpu.memory_space<vmem>>, vector<1x8x128xf32>
    %320 = vector.shape_cast %319 : vector<1x8x128xf32> to vector<8x128xf32>
    %c0_i32_106 = arith.constant 0 : i32
    %321 = arith.index_cast %c0_i32_106 : i32 to index
    %c0_107 = arith.constant 0 : index
    %c0_108 = arith.constant 0 : index
    %322 = vector.load %arg18[%321, %c0_107, %c0_108] : memref<8x8x384xf32, #tpu.memory_space<vmem>>, vector<1x8x384xf32>
    %323 = vector.shape_cast %322 : vector<1x8x384xf32> to vector<8x384xf32>
    %cst_109 = arith.constant dense<0.000000e+00> : vector<8x384xf32>
    %324 = tpu.matmul %320, %315, %cst_109 {dimension_numbers = #tpu.dot_dimension_numbers<[1], [0], [0], [1], [0, 0, 1, 1], [], []>} : vector<8x128xf32>, vector<128x384xf32>, vector<8x384xf32> -> vector<8x384xf32>
    %325 = vector.extract_strided_slice %323 {offsets = [0, 0], sizes = [8, 128], strides = [1, 1]} : vector<8x384xf32> to vector<8x128xf32>
    %326 = vector.extract_strided_slice %324 {offsets = [0, 0], sizes = [8, 128], strides = [1, 1]} : vector<8x384xf32> to vector<8x128xf32>
    %327 = arith.addf %325, %326 : vector<8x128xf32>
    %328 = arith.negf %327 : vector<8x128xf32>
    %329 = math.exp %328 : vector<8x128xf32>
    %cst_110 = arith.constant 1.000000e+00 : f32
    %330 = vector.broadcast %cst_110 : f32 to vector<8x128xf32>
    %331 = arith.addf %330, %329 : vector<8x128xf32>
    %332 = arith.divf %330, %331 : vector<8x128xf32>
    %333 = vector.extract_strided_slice %323 {offsets = [0, 128], sizes = [8, 128], strides = [1, 1]} : vector<8x384xf32> to vector<8x128xf32>
    %334 = vector.extract_strided_slice %324 {offsets = [0, 128], sizes = [8, 128], strides = [1, 1]} : vector<8x384xf32> to vector<8x128xf32>
    %335 = arith.addf %333, %334 : vector<8x128xf32>
    %336 = arith.negf %335 : vector<8x128xf32>
    %337 = math.exp %336 : vector<8x128xf32>
    %cst_111 = arith.constant 1.000000e+00 : f32
    %338 = vector.broadcast %cst_111 : f32 to vector<8x128xf32>
    %339 = arith.addf %338, %337 : vector<8x128xf32>
    %340 = arith.divf %338, %339 : vector<8x128xf32>
    %341 = vector.extract_strided_slice %323 {offsets = [0, 256], sizes = [8, 128], strides = [1, 1]} : vector<8x384xf32> to vector<8x128xf32>
    %342 = vector.extract_strided_slice %324 {offsets = [0, 256], sizes = [8, 128], strides = [1, 1]} : vector<8x384xf32> to vector<8x128xf32>
    %343 = arith.addf %342, %318 : vector<8x128xf32>
    %344 = arith.mulf %332, %343 : vector<8x128xf32>
    %345 = arith.addf %341, %344 : vector<8x128xf32>
    %346 = math.tanh %345 : vector<8x128xf32>
    %cst_112 = arith.constant 1.000000e+00 : f32
    %347 = vector.broadcast %cst_112 : f32 to vector<8x128xf32>
    %348 = arith.subf %347, %340 : vector<8x128xf32>
    %349 = arith.mulf %348, %346 : vector<8x128xf32>
    %350 = arith.mulf %340, %320 : vector<8x128xf32>
    %351 = arith.addf %349, %350 : vector<8x128xf32>
    %352 = arith.index_cast %c0_i32_106 : i32 to index
    %c0_113 = arith.constant 0 : index
    %c0_114 = arith.constant 0 : index
    %353 = vector.load %arg15[%352, %c0_113, %c0_114] : memref<8x8x256xf32, #tpu.memory_space<vmem>>, vector<1x8x128xf32>
    %354 = vector.shape_cast %353 : vector<1x8x128xf32> to vector<8x128xf32>
    %355 = vector.shape_cast %351 : vector<8x128xf32> to vector<1x8x128xf32>
    tpu.vector_store %arg15[%352, %c0_113, %c0_114], %355 {strides = array<i32>} : memref<8x8x256xf32, #tpu.memory_space<vmem>>, vector<1x8x128xf32>,
    %c1_i32_115 = arith.constant 1 : i32
    %356 = arith.index_cast %c1_i32_115 : i32 to index
    %c0_116 = arith.constant 0 : index
    %c0_117 = arith.constant 0 : index
    %357 = vector.load %arg18[%356, %c0_116, %c0_117] : memref<8x8x384xf32, #tpu.memory_space<vmem>>, vector<1x8x384xf32>
    %358 = vector.shape_cast %357 : vector<1x8x384xf32> to vector<8x384xf32>
    %cst_118 = arith.constant dense<0.000000e+00> : vector<8x384xf32>
    %359 = tpu.matmul %351, %315, %cst_118 {dimension_numbers = #tpu.dot_dimension_numbers<[1], [0], [0], [1], [0, 0, 1, 1], [], []>} : vector<8x128xf32>, vector<128x384xf32>, vector<8x384xf32> -> vector<8x384xf32>
    %360 = vector.extract_strided_slice %358 {offsets = [0, 0], sizes = [8, 128], strides = [1, 1]} : vector<8x384xf32> to vector<8x128xf32>
    %361 = vector.extract_strided_slice %359 {offsets = [0, 0], sizes = [8, 128], strides = [1, 1]} : vector<8x384xf32> to vector<8x128xf32>
    %362 = arith.addf %360, %361 : vector<8x128xf32>
    %363 = arith.negf %362 : vector<8x128xf32>
    %364 = math.exp %363 : vector<8x128xf32>
    %cst_119 = arith.constant 1.000000e+00 : f32
    %365 = vector.broadcast %cst_119 : f32 to vector<8x128xf32>
    %366 = arith.addf %365, %364 : vector<8x128xf32>
    %367 = arith.divf %365, %366 : vector<8x128xf32>
    %368 = vector.extract_strided_slice %358 {offsets = [0, 128], sizes = [8, 128], strides = [1, 1]} : vector<8x384xf32> to vector<8x128xf32>
    %369 = vector.extract_strided_slice %359 {offsets = [0, 128], sizes = [8, 128], strides = [1, 1]} : vector<8x384xf32> to vector<8x128xf32>
    %370 = arith.addf %368, %369 : vector<8x128xf32>
    %371 = arith.negf %370 : vector<8x128xf32>
    %372 = math.exp %371 : vector<8x128xf32>
    %cst_120 = arith.constant 1.000000e+00 : f32
    %373 = vector.broadcast %cst_120 : f32 to vector<8x128xf32>
    %374 = arith.addf %373, %372 : vector<8x128xf32>
    %375 = arith.divf %373, %374 : vector<8x128xf32>
    %376 = vector.extract_strided_slice %358 {offsets = [0, 256], sizes = [8, 128], strides = [1, 1]} : vector<8x384xf32> to vector<8x128xf32>
    %377 = vector.extract_strided_slice %359 {offsets = [0, 256], sizes = [8, 128], strides = [1, 1]} : vector<8x384xf32> to vector<8x128xf32>
    %378 = arith.addf %377, %318 : vector<8x128xf32>
    %379 = arith.mulf %367, %378 : vector<8x128xf32>
    %380 = arith.addf %376, %379 : vector<8x128xf32>
    %381 = math.tanh %380 : vector<8x128xf32>
    %cst_121 = arith.constant 1.000000e+00 : f32
    %382 = vector.broadcast %cst_121 : f32 to vector<8x128xf32>
    %383 = arith.subf %382, %375 : vector<8x128xf32>
    %384 = arith.mulf %383, %381 : vector<8x128xf32>
    %385 = arith.mulf %375, %351 : vector<8x128xf32>
    %386 = arith.addf %384, %385 : vector<8x128xf32>
    %387 = arith.index_cast %c1_i32_115 : i32 to index
    %c0_122 = arith.constant 0 : index
    %c0_123 = arith.constant 0 : index
    %388 = vector.load %arg15[%387, %c0_122, %c0_123] : memref<8x8x256xf32, #tpu.memory_space<vmem>>, vector<1x8x128xf32>
    %389 = vector.shape_cast %388 : vector<1x8x128xf32> to vector<8x128xf32>
    %390 = vector.shape_cast %386 : vector<8x128xf32> to vector<1x8x128xf32>
    tpu.vector_store %arg15[%387, %c0_122, %c0_123], %390 {strides = array<i32>} : memref<8x8x256xf32, #tpu.memory_space<vmem>>, vector<1x8x128xf32>,
    %c2_i32_124 = arith.constant 2 : i32
    %391 = arith.index_cast %c2_i32_124 : i32 to index
    %c0_125 = arith.constant 0 : index
    %c0_126 = arith.constant 0 : index
    %392 = vector.load %arg18[%391, %c0_125, %c0_126] : memref<8x8x384xf32, #tpu.memory_space<vmem>>, vector<1x8x384xf32>
    %393 = vector.shape_cast %392 : vector<1x8x384xf32> to vector<8x384xf32>
    %cst_127 = arith.constant dense<0.000000e+00> : vector<8x384xf32>
    %394 = tpu.matmul %386, %315, %cst_127 {dimension_numbers = #tpu.dot_dimension_numbers<[1], [0], [0], [1], [0, 0, 1, 1], [], []>} : vector<8x128xf32>, vector<128x384xf32>, vector<8x384xf32> -> vector<8x384xf32>
    %395 = vector.extract_strided_slice %393 {offsets = [0, 0], sizes = [8, 128], strides = [1, 1]} : vector<8x384xf32> to vector<8x128xf32>
    %396 = vector.extract_strided_slice %394 {offsets = [0, 0], sizes = [8, 128], strides = [1, 1]} : vector<8x384xf32> to vector<8x128xf32>
    %397 = arith.addf %395, %396 : vector<8x128xf32>
    %398 = arith.negf %397 : vector<8x128xf32>
    %399 = math.exp %398 : vector<8x128xf32>
    %cst_128 = arith.constant 1.000000e+00 : f32
    %400 = vector.broadcast %cst_128 : f32 to vector<8x128xf32>
    %401 = arith.addf %400, %399 : vector<8x128xf32>
    %402 = arith.divf %400, %401 : vector<8x128xf32>
    %403 = vector.extract_strided_slice %393 {offsets = [0, 128], sizes = [8, 128], strides = [1, 1]} : vector<8x384xf32> to vector<8x128xf32>
    %404 = vector.extract_strided_slice %394 {offsets = [0, 128], sizes = [8, 128], strides = [1, 1]} : vector<8x384xf32> to vector<8x128xf32>
    %405 = arith.addf %403, %404 : vector<8x128xf32>
    %406 = arith.negf %405 : vector<8x128xf32>
    %407 = math.exp %406 : vector<8x128xf32>
    %cst_129 = arith.constant 1.000000e+00 : f32
    %408 = vector.broadcast %cst_129 : f32 to vector<8x128xf32>
    %409 = arith.addf %408, %407 : vector<8x128xf32>
    %410 = arith.divf %408, %409 : vector<8x128xf32>
    %411 = vector.extract_strided_slice %393 {offsets = [0, 256], sizes = [8, 128], strides = [1, 1]} : vector<8x384xf32> to vector<8x128xf32>
    %412 = vector.extract_strided_slice %394 {offsets = [0, 256], sizes = [8, 128], strides = [1, 1]} : vector<8x384xf32> to vector<8x128xf32>
    %413 = arith.addf %412, %318 : vector<8x128xf32>
    %414 = arith.mulf %402, %413 : vector<8x128xf32>
    %415 = arith.addf %411, %414 : vector<8x128xf32>
    %416 = math.tanh %415 : vector<8x128xf32>
    %cst_130 = arith.constant 1.000000e+00 : f32
    %417 = vector.broadcast %cst_130 : f32 to vector<8x128xf32>
    %418 = arith.subf %417, %410 : vector<8x128xf32>
    %419 = arith.mulf %418, %416 : vector<8x128xf32>
    %420 = arith.mulf %410, %386 : vector<8x128xf32>
    %421 = arith.addf %419, %420 : vector<8x128xf32>
    %422 = arith.index_cast %c2_i32_124 : i32 to index
    %c0_131 = arith.constant 0 : index
    %c0_132 = arith.constant 0 : index
    %423 = vector.load %arg15[%422, %c0_131, %c0_132] : memref<8x8x256xf32, #tpu.memory_space<vmem>>, vector<1x8x128xf32>
    %424 = vector.shape_cast %423 : vector<1x8x128xf32> to vector<8x128xf32>
    %425 = vector.shape_cast %421 : vector<8x128xf32> to vector<1x8x128xf32>
    tpu.vector_store %arg15[%422, %c0_131, %c0_132], %425 {strides = array<i32>} : memref<8x8x256xf32, #tpu.memory_space<vmem>>, vector<1x8x128xf32>,
    %c3_i32_133 = arith.constant 3 : i32
    %426 = arith.index_cast %c3_i32_133 : i32 to index
    %c0_134 = arith.constant 0 : index
    %c0_135 = arith.constant 0 : index
    %427 = vector.load %arg18[%426, %c0_134, %c0_135] : memref<8x8x384xf32, #tpu.memory_space<vmem>>, vector<1x8x384xf32>
    %428 = vector.shape_cast %427 : vector<1x8x384xf32> to vector<8x384xf32>
    %cst_136 = arith.constant dense<0.000000e+00> : vector<8x384xf32>
    %429 = tpu.matmul %421, %315, %cst_136 {dimension_numbers = #tpu.dot_dimension_numbers<[1], [0], [0], [1], [0, 0, 1, 1], [], []>} : vector<8x128xf32>, vector<128x384xf32>, vector<8x384xf32> -> vector<8x384xf32>
    %430 = vector.extract_strided_slice %428 {offsets = [0, 0], sizes = [8, 128], strides = [1, 1]} : vector<8x384xf32> to vector<8x128xf32>
    %431 = vector.extract_strided_slice %429 {offsets = [0, 0], sizes = [8, 128], strides = [1, 1]} : vector<8x384xf32> to vector<8x128xf32>
    %432 = arith.addf %430, %431 : vector<8x128xf32>
    %433 = arith.negf %432 : vector<8x128xf32>
    %434 = math.exp %433 : vector<8x128xf32>
    %cst_137 = arith.constant 1.000000e+00 : f32
    %435 = vector.broadcast %cst_137 : f32 to vector<8x128xf32>
    %436 = arith.addf %435, %434 : vector<8x128xf32>
    %437 = arith.divf %435, %436 : vector<8x128xf32>
    %438 = vector.extract_strided_slice %428 {offsets = [0, 128], sizes = [8, 128], strides = [1, 1]} : vector<8x384xf32> to vector<8x128xf32>
    %439 = vector.extract_strided_slice %429 {offsets = [0, 128], sizes = [8, 128], strides = [1, 1]} : vector<8x384xf32> to vector<8x128xf32>
    %440 = arith.addf %438, %439 : vector<8x128xf32>
    %441 = arith.negf %440 : vector<8x128xf32>
    %442 = math.exp %441 : vector<8x128xf32>
    %cst_138 = arith.constant 1.000000e+00 : f32
    %443 = vector.broadcast %cst_138 : f32 to vector<8x128xf32>
    %444 = arith.addf %443, %442 : vector<8x128xf32>
    %445 = arith.divf %443, %444 : vector<8x128xf32>
    %446 = vector.extract_strided_slice %428 {offsets = [0, 256], sizes = [8, 128], strides = [1, 1]} : vector<8x384xf32> to vector<8x128xf32>
    %447 = vector.extract_strided_slice %429 {offsets = [0, 256], sizes = [8, 128], strides = [1, 1]} : vector<8x384xf32> to vector<8x128xf32>
    %448 = arith.addf %447, %318 : vector<8x128xf32>
    %449 = arith.mulf %437, %448 : vector<8x128xf32>
    %450 = arith.addf %446, %449 : vector<8x128xf32>
    %451 = math.tanh %450 : vector<8x128xf32>
    %cst_139 = arith.constant 1.000000e+00 : f32
    %452 = vector.broadcast %cst_139 : f32 to vector<8x128xf32>
    %453 = arith.subf %452, %445 : vector<8x128xf32>
    %454 = arith.mulf %453, %451 : vector<8x128xf32>
    %455 = arith.mulf %445, %421 : vector<8x128xf32>
    %456 = arith.addf %454, %455 : vector<8x128xf32>
    %457 = arith.index_cast %c3_i32_133 : i32 to index
    %c0_140 = arith.constant 0 : index
    %c0_141 = arith.constant 0 : index
    %458 = vector.load %arg15[%457, %c0_140, %c0_141] : memref<8x8x256xf32, #tpu.memory_space<vmem>>, vector<1x8x128xf32>
    %459 = vector.shape_cast %458 : vector<1x8x128xf32> to vector<8x128xf32>
    %460 = vector.shape_cast %456 : vector<8x128xf32> to vector<1x8x128xf32>
    tpu.vector_store %arg15[%457, %c0_140, %c0_141], %460 {strides = array<i32>} : memref<8x8x256xf32, #tpu.memory_space<vmem>>, vector<1x8x128xf32>,
    %c4_i32_142 = arith.constant 4 : i32
    %461 = arith.index_cast %c4_i32_142 : i32 to index
    %c0_143 = arith.constant 0 : index
    %c0_144 = arith.constant 0 : index
    %462 = vector.load %arg18[%461, %c0_143, %c0_144] : memref<8x8x384xf32, #tpu.memory_space<vmem>>, vector<1x8x384xf32>
    %463 = vector.shape_cast %462 : vector<1x8x384xf32> to vector<8x384xf32>
    %cst_145 = arith.constant dense<0.000000e+00> : vector<8x384xf32>
    %464 = tpu.matmul %456, %315, %cst_145 {dimension_numbers = #tpu.dot_dimension_numbers<[1], [0], [0], [1], [0, 0, 1, 1], [], []>} : vector<8x128xf32>, vector<128x384xf32>, vector<8x384xf32> -> vector<8x384xf32>
    %465 = vector.extract_strided_slice %463 {offsets = [0, 0], sizes = [8, 128], strides = [1, 1]} : vector<8x384xf32> to vector<8x128xf32>
    %466 = vector.extract_strided_slice %464 {offsets = [0, 0], sizes = [8, 128], strides = [1, 1]} : vector<8x384xf32> to vector<8x128xf32>
    %467 = arith.addf %465, %466 : vector<8x128xf32>
    %468 = arith.negf %467 : vector<8x128xf32>
    %469 = math.exp %468 : vector<8x128xf32>
    %cst_146 = arith.constant 1.000000e+00 : f32
    %470 = vector.broadcast %cst_146 : f32 to vector<8x128xf32>
    %471 = arith.addf %470, %469 : vector<8x128xf32>
    %472 = arith.divf %470, %471 : vector<8x128xf32>
    %473 = vector.extract_strided_slice %463 {offsets = [0, 128], sizes = [8, 128], strides = [1, 1]} : vector<8x384xf32> to vector<8x128xf32>
    %474 = vector.extract_strided_slice %464 {offsets = [0, 128], sizes = [8, 128], strides = [1, 1]} : vector<8x384xf32> to vector<8x128xf32>
    %475 = arith.addf %473, %474 : vector<8x128xf32>
    %476 = arith.negf %475 : vector<8x128xf32>
    %477 = math.exp %476 : vector<8x128xf32>
    %cst_147 = arith.constant 1.000000e+00 : f32
    %478 = vector.broadcast %cst_147 : f32 to vector<8x128xf32>
    %479 = arith.addf %478, %477 : vector<8x128xf32>
    %480 = arith.divf %478, %479 : vector<8x128xf32>
    %481 = vector.extract_strided_slice %463 {offsets = [0, 256], sizes = [8, 128], strides = [1, 1]} : vector<8x384xf32> to vector<8x128xf32>
    %482 = vector.extract_strided_slice %464 {offsets = [0, 256], sizes = [8, 128], strides = [1, 1]} : vector<8x384xf32> to vector<8x128xf32>
    %483 = arith.addf %482, %318 : vector<8x128xf32>
    %484 = arith.mulf %472, %483 : vector<8x128xf32>
    %485 = arith.addf %481, %484 : vector<8x128xf32>
    %486 = math.tanh %485 : vector<8x128xf32>
    %cst_148 = arith.constant 1.000000e+00 : f32
    %487 = vector.broadcast %cst_148 : f32 to vector<8x128xf32>
    %488 = arith.subf %487, %480 : vector<8x128xf32>
    %489 = arith.mulf %488, %486 : vector<8x128xf32>
    %490 = arith.mulf %480, %456 : vector<8x128xf32>
    %491 = arith.addf %489, %490 : vector<8x128xf32>
    %492 = arith.index_cast %c4_i32_142 : i32 to index
    %c0_149 = arith.constant 0 : index
    %c0_150 = arith.constant 0 : index
    %493 = vector.load %arg15[%492, %c0_149, %c0_150] : memref<8x8x256xf32, #tpu.memory_space<vmem>>, vector<1x8x128xf32>
    %494 = vector.shape_cast %493 : vector<1x8x128xf32> to vector<8x128xf32>
    %495 = vector.shape_cast %491 : vector<8x128xf32> to vector<1x8x128xf32>
    tpu.vector_store %arg15[%492, %c0_149, %c0_150], %495 {strides = array<i32>} : memref<8x8x256xf32, #tpu.memory_space<vmem>>, vector<1x8x128xf32>,
    %c5_i32_151 = arith.constant 5 : i32
    %496 = arith.index_cast %c5_i32_151 : i32 to index
    %c0_152 = arith.constant 0 : index
    %c0_153 = arith.constant 0 : index
    %497 = vector.load %arg18[%496, %c0_152, %c0_153] : memref<8x8x384xf32, #tpu.memory_space<vmem>>, vector<1x8x384xf32>
    %498 = vector.shape_cast %497 : vector<1x8x384xf32> to vector<8x384xf32>
    %cst_154 = arith.constant dense<0.000000e+00> : vector<8x384xf32>
    %499 = tpu.matmul %491, %315, %cst_154 {dimension_numbers = #tpu.dot_dimension_numbers<[1], [0], [0], [1], [0, 0, 1, 1], [], []>} : vector<8x128xf32>, vector<128x384xf32>, vector<8x384xf32> -> vector<8x384xf32>
    %500 = vector.extract_strided_slice %498 {offsets = [0, 0], sizes = [8, 128], strides = [1, 1]} : vector<8x384xf32> to vector<8x128xf32>
    %501 = vector.extract_strided_slice %499 {offsets = [0, 0], sizes = [8, 128], strides = [1, 1]} : vector<8x384xf32> to vector<8x128xf32>
    %502 = arith.addf %500, %501 : vector<8x128xf32>
    %503 = arith.negf %502 : vector<8x128xf32>
    %504 = math.exp %503 : vector<8x128xf32>
    %cst_155 = arith.constant 1.000000e+00 : f32
    %505 = vector.broadcast %cst_155 : f32 to vector<8x128xf32>
    %506 = arith.addf %505, %504 : vector<8x128xf32>
    %507 = arith.divf %505, %506 : vector<8x128xf32>
    %508 = vector.extract_strided_slice %498 {offsets = [0, 128], sizes = [8, 128], strides = [1, 1]} : vector<8x384xf32> to vector<8x128xf32>
    %509 = vector.extract_strided_slice %499 {offsets = [0, 128], sizes = [8, 128], strides = [1, 1]} : vector<8x384xf32> to vector<8x128xf32>
    %510 = arith.addf %508, %509 : vector<8x128xf32>
    %511 = arith.negf %510 : vector<8x128xf32>
    %512 = math.exp %511 : vector<8x128xf32>
    %cst_156 = arith.constant 1.000000e+00 : f32
    %513 = vector.broadcast %cst_156 : f32 to vector<8x128xf32>
    %514 = arith.addf %513, %512 : vector<8x128xf32>
    %515 = arith.divf %513, %514 : vector<8x128xf32>
    %516 = vector.extract_strided_slice %498 {offsets = [0, 256], sizes = [8, 128], strides = [1, 1]} : vector<8x384xf32> to vector<8x128xf32>
    %517 = vector.extract_strided_slice %499 {offsets = [0, 256], sizes = [8, 128], strides = [1, 1]} : vector<8x384xf32> to vector<8x128xf32>
    %518 = arith.addf %517, %318 : vector<8x128xf32>
    %519 = arith.mulf %507, %518 : vector<8x128xf32>
    %520 = arith.addf %516, %519 : vector<8x128xf32>
    %521 = math.tanh %520 : vector<8x128xf32>
    %cst_157 = arith.constant 1.000000e+00 : f32
    %522 = vector.broadcast %cst_157 : f32 to vector<8x128xf32>
    %523 = arith.subf %522, %515 : vector<8x128xf32>
    %524 = arith.mulf %523, %521 : vector<8x128xf32>
    %525 = arith.mulf %515, %491 : vector<8x128xf32>
    %526 = arith.addf %524, %525 : vector<8x128xf32>
    %527 = arith.index_cast %c5_i32_151 : i32 to index
    %c0_158 = arith.constant 0 : index
    %c0_159 = arith.constant 0 : index
    %528 = vector.load %arg15[%527, %c0_158, %c0_159] : memref<8x8x256xf32, #tpu.memory_space<vmem>>, vector<1x8x128xf32>
    %529 = vector.shape_cast %528 : vector<1x8x128xf32> to vector<8x128xf32>
    %530 = vector.shape_cast %526 : vector<8x128xf32> to vector<1x8x128xf32>
    tpu.vector_store %arg15[%527, %c0_158, %c0_159], %530 {strides = array<i32>} : memref<8x8x256xf32, #tpu.memory_space<vmem>>, vector<1x8x128xf32>,
    %c6_i32_160 = arith.constant 6 : i32
    %531 = arith.index_cast %c6_i32_160 : i32 to index
    %c0_161 = arith.constant 0 : index
    %c0_162 = arith.constant 0 : index
    %532 = vector.load %arg18[%531, %c0_161, %c0_162] : memref<8x8x384xf32, #tpu.memory_space<vmem>>, vector<1x8x384xf32>
    %533 = vector.shape_cast %532 : vector<1x8x384xf32> to vector<8x384xf32>
    %cst_163 = arith.constant dense<0.000000e+00> : vector<8x384xf32>
    %534 = tpu.matmul %526, %315, %cst_163 {dimension_numbers = #tpu.dot_dimension_numbers<[1], [0], [0], [1], [0, 0, 1, 1], [], []>} : vector<8x128xf32>, vector<128x384xf32>, vector<8x384xf32> -> vector<8x384xf32>
    %535 = vector.extract_strided_slice %533 {offsets = [0, 0], sizes = [8, 128], strides = [1, 1]} : vector<8x384xf32> to vector<8x128xf32>
    %536 = vector.extract_strided_slice %534 {offsets = [0, 0], sizes = [8, 128], strides = [1, 1]} : vector<8x384xf32> to vector<8x128xf32>
    %537 = arith.addf %535, %536 : vector<8x128xf32>
    %538 = arith.negf %537 : vector<8x128xf32>
    %539 = math.exp %538 : vector<8x128xf32>
    %cst_164 = arith.constant 1.000000e+00 : f32
    %540 = vector.broadcast %cst_164 : f32 to vector<8x128xf32>
    %541 = arith.addf %540, %539 : vector<8x128xf32>
    %542 = arith.divf %540, %541 : vector<8x128xf32>
    %543 = vector.extract_strided_slice %533 {offsets = [0, 128], sizes = [8, 128], strides = [1, 1]} : vector<8x384xf32> to vector<8x128xf32>
    %544 = vector.extract_strided_slice %534 {offsets = [0, 128], sizes = [8, 128], strides = [1, 1]} : vector<8x384xf32> to vector<8x128xf32>
    %545 = arith.addf %543, %544 : vector<8x128xf32>
    %546 = arith.negf %545 : vector<8x128xf32>
    %547 = math.exp %546 : vector<8x128xf32>
    %cst_165 = arith.constant 1.000000e+00 : f32
    %548 = vector.broadcast %cst_165 : f32 to vector<8x128xf32>
    %549 = arith.addf %548, %547 : vector<8x128xf32>
    %550 = arith.divf %548, %549 : vector<8x128xf32>
    %551 = vector.extract_strided_slice %533 {offsets = [0, 256], sizes = [8, 128], strides = [1, 1]} : vector<8x384xf32> to vector<8x128xf32>
    %552 = vector.extract_strided_slice %534 {offsets = [0, 256], sizes = [8, 128], strides = [1, 1]} : vector<8x384xf32> to vector<8x128xf32>
    %553 = arith.addf %552, %318 : vector<8x128xf32>
    %554 = arith.mulf %542, %553 : vector<8x128xf32>
    %555 = arith.addf %551, %554 : vector<8x128xf32>
    %556 = math.tanh %555 : vector<8x128xf32>
    %cst_166 = arith.constant 1.000000e+00 : f32
    %557 = vector.broadcast %cst_166 : f32 to vector<8x128xf32>
    %558 = arith.subf %557, %550 : vector<8x128xf32>
    %559 = arith.mulf %558, %556 : vector<8x128xf32>
    %560 = arith.mulf %550, %526 : vector<8x128xf32>
    %561 = arith.addf %559, %560 : vector<8x128xf32>
    %562 = arith.index_cast %c6_i32_160 : i32 to index
    %c0_167 = arith.constant 0 : index
    %c0_168 = arith.constant 0 : index
    %563 = vector.load %arg15[%562, %c0_167, %c0_168] : memref<8x8x256xf32, #tpu.memory_space<vmem>>, vector<1x8x128xf32>
    %564 = vector.shape_cast %563 : vector<1x8x128xf32> to vector<8x128xf32>
    %565 = vector.shape_cast %561 : vector<8x128xf32> to vector<1x8x128xf32>
    tpu.vector_store %arg15[%562, %c0_167, %c0_168], %565 {strides = array<i32>} : memref<8x8x256xf32, #tpu.memory_space<vmem>>, vector<1x8x128xf32>,
    %c7_i32_169 = arith.constant 7 : i32
    %566 = arith.index_cast %c7_i32_169 : i32 to index
    %c0_170 = arith.constant 0 : index
    %c0_171 = arith.constant 0 : index
    %567 = vector.load %arg18[%566, %c0_170, %c0_171] : memref<8x8x384xf32, #tpu.memory_space<vmem>>, vector<1x8x384xf32>
    %568 = vector.shape_cast %567 : vector<1x8x384xf32> to vector<8x384xf32>
    %cst_172 = arith.constant dense<0.000000e+00> : vector<8x384xf32>
    %569 = tpu.matmul %561, %315, %cst_172 {dimension_numbers = #tpu.dot_dimension_numbers<[1], [0], [0], [1], [0, 0, 1, 1], [], []>} : vector<8x128xf32>, vector<128x384xf32>, vector<8x384xf32> -> vector<8x384xf32>
    %570 = vector.extract_strided_slice %568 {offsets = [0, 0], sizes = [8, 128], strides = [1, 1]} : vector<8x384xf32> to vector<8x128xf32>
    %571 = vector.extract_strided_slice %569 {offsets = [0, 0], sizes = [8, 128], strides = [1, 1]} : vector<8x384xf32> to vector<8x128xf32>
    %572 = arith.addf %570, %571 : vector<8x128xf32>
    %573 = arith.negf %572 : vector<8x128xf32>
    %574 = math.exp %573 : vector<8x128xf32>
    %cst_173 = arith.constant 1.000000e+00 : f32
    %575 = vector.broadcast %cst_173 : f32 to vector<8x128xf32>
    %576 = arith.addf %575, %574 : vector<8x128xf32>
    %577 = arith.divf %575, %576 : vector<8x128xf32>
    %578 = vector.extract_strided_slice %568 {offsets = [0, 128], sizes = [8, 128], strides = [1, 1]} : vector<8x384xf32> to vector<8x128xf32>
    %579 = vector.extract_strided_slice %569 {offsets = [0, 128], sizes = [8, 128], strides = [1, 1]} : vector<8x384xf32> to vector<8x128xf32>
    %580 = arith.addf %578, %579 : vector<8x128xf32>
    %581 = arith.negf %580 : vector<8x128xf32>
    %582 = math.exp %581 : vector<8x128xf32>
    %cst_174 = arith.constant 1.000000e+00 : f32
    %583 = vector.broadcast %cst_174 : f32 to vector<8x128xf32>
    %584 = arith.addf %583, %582 : vector<8x128xf32>
    %585 = arith.divf %583, %584 : vector<8x128xf32>
    %586 = vector.extract_strided_slice %568 {offsets = [0, 256], sizes = [8, 128], strides = [1, 1]} : vector<8x384xf32> to vector<8x128xf32>
    %587 = vector.extract_strided_slice %569 {offsets = [0, 256], sizes = [8, 128], strides = [1, 1]} : vector<8x384xf32> to vector<8x128xf32>
    %588 = arith.addf %587, %318 : vector<8x128xf32>
    %589 = arith.mulf %577, %588 : vector<8x128xf32>
    %590 = arith.addf %586, %589 : vector<8x128xf32>
    %591 = math.tanh %590 : vector<8x128xf32>
    %cst_175 = arith.constant 1.000000e+00 : f32
    %592 = vector.broadcast %cst_175 : f32 to vector<8x128xf32>
    %593 = arith.subf %592, %585 : vector<8x128xf32>
    %594 = arith.mulf %593, %591 : vector<8x128xf32>
    %595 = arith.mulf %585, %561 : vector<8x128xf32>
    %596 = arith.addf %594, %595 : vector<8x128xf32>
    %597 = arith.index_cast %c7_i32_169 : i32 to index
    %c0_176 = arith.constant 0 : index
    %c0_177 = arith.constant 0 : index
    %598 = vector.load %arg15[%597, %c0_176, %c0_177] : memref<8x8x256xf32, #tpu.memory_space<vmem>>, vector<1x8x128xf32>
    %599 = vector.shape_cast %598 : vector<1x8x128xf32> to vector<8x128xf32>
    %600 = vector.shape_cast %596 : vector<8x128xf32> to vector<1x8x128xf32>
    tpu.vector_store %arg15[%597, %c0_176, %c0_177], %600 {strides = array<i32>} : memref<8x8x256xf32, #tpu.memory_space<vmem>>, vector<1x8x128xf32>,
    %c8_i32_178 = arith.constant 8 : i32
    %c1_179 = arith.constant 1 : index
    %c0_180 = arith.constant 0 : index
    %c0_181 = arith.constant 0 : index
    %601 = vector.load %arg19[%c1_179, %c0_180, %c0_181] : memref<2x8x128xf32, #tpu.memory_space<vmem>>, vector<1x8x128xf32>
    %602 = vector.shape_cast %601 : vector<1x8x128xf32> to vector<8x128xf32>
    %603 = vector.shape_cast %596 : vector<8x128xf32> to vector<1x8x128xf32>
    tpu.vector_store %arg19[%c1_179, %c0_180, %c0_181], %603 {strides = array<i32>} : memref<2x8x128xf32, #tpu.memory_space<vmem>>, vector<1x8x128xf32>,
    %c1_i32_182 = arith.constant 1 : i32
    %604 = arith.cmpi eq, %arg1, %c1_i32_182 : i32
    %605 = arith.extui %604 : i1 to i32
    %c0_i32_183 = arith.constant 0 : i32
    %606 = arith.cmpi ne, %605, %c0_i32_183 : i32
    scf.if %606 {
      %c0_184 = arith.constant 0 : index
      %c0_185 = arith.constant 0 : index
      %c0_186 = arith.constant 0 : index
      %607 = vector.load %arg19[%c0_184, %c0_185, %c0_186] : memref<2x8x128xf32, #tpu.memory_space<vmem>>, vector<2x8x128xf32>
      %c0_187 = arith.constant 0 : index
      %c0_188 = arith.constant 0 : index
      %c0_189 = arith.constant 0 : index
      %608 = vector.load %arg16[%c0_187, %c0_188, %c0_189] : memref<2x8x128xf32, #tpu.memory_space<vmem>>, vector<2x8x128xf32>
      tpu.vector_store %arg16[%c0_187, %c0_188, %c0_189], %607 {strides = array<i32>} : memref<2x8x128xf32, #tpu.memory_space<vmem>>, vector<2x8x128xf32>,
    } else {
    }
    return
  }
  func.func @transform_0(%arg0: i32, %arg1: i32) -> (i32, i32, i32) {
    %c0_i32 = arith.constant 0 : i32
    %c0_i32_0 = arith.constant 0 : i32
    return %arg1, %arg0, %c0_i32 : i32, i32, i32
  }
  func.func @transform_1(%arg0: i32, %arg1: i32) -> (i32, i32) {
    %c0_i32 = arith.constant 0 : i32
    %c0_i32_0 = arith.constant 0 : i32
    return %arg0, %c0_i32 : i32, i32
  }
  func.func @transform_2(%arg0: i32, %arg1: i32) -> (i32, i32) {
    %c0_i32 = arith.constant 0 : i32
    %c0_i32_0 = arith.constant 0 : i32
    %c0_i32_1 = arith.constant 0 : i32
    return %c0_i32, %c0_i32_0 : i32, i32
  }
  func.func @transform_3(%arg0: i32, %arg1: i32) -> (i32, i32) {
    %c0_i32 = arith.constant 0 : i32
    %c0_i32_0 = arith.constant 0 : i32
    %c0_i32_1 = arith.constant 0 : i32
    return %c0_i32, %c0_i32_0 : i32, i32
  }
  func.func @transform_4(%arg0: i32, %arg1: i32) -> (i32, i32, i32) {
    %c0_i32 = arith.constant 0 : i32
    %c0_i32_0 = arith.constant 0 : i32
    %c0_i32_1 = arith.constant 0 : i32
    return %c0_i32, %arg0, %c0_i32_0 : i32, i32, i32
  }
  func.func @transform_5(%arg0: i32, %arg1: i32) -> (i32, i32) {
    %c0_i32 = arith.constant 0 : i32
    %c0_i32_0 = arith.constant 0 : i32
    %c0_i32_1 = arith.constant 0 : i32
    return %c0_i32, %c0_i32_0 : i32, i32
  }
  func.func @transform_6(%arg0: i32, %arg1: i32) -> (i32, i32) {
    %c0_i32 = arith.constant 0 : i32
    %c0_i32_0 = arith.constant 0 : i32
    %c0_i32_1 = arith.constant 0 : i32
    return %c0_i32, %c0_i32_0 : i32, i32
  }
  func.func @transform_7(%arg0: i32, %arg1: i32) -> (i32, i32) {
    %c0_i32 = arith.constant 0 : i32
    %c0_i32_0 = arith.constant 0 : i32
    %c0_i32_1 = arith.constant 0 : i32
    return %c0_i32, %c0_i32_0 : i32, i32
  }
  func.func @transform_8(%arg0: i32, %arg1: i32) -> (i32, i32) {
    %c0_i32 = arith.constant 0 : i32
    %c0_i32_0 = arith.constant 0 : i32
    %c0_i32_1 = arith.constant 0 : i32
    return %c0_i32, %c0_i32_0 : i32, i32
  }
  func.func @transform_9(%arg0: i32, %arg1: i32) -> (i32, i32) {
    %c0_i32 = arith.constant 0 : i32
    %c0_i32_0 = arith.constant 0 : i32
    %c0_i32_1 = arith.constant 0 : i32
    return %c0_i32, %c0_i32_0 : i32, i32
  }
  func.func @transform_10(%arg0: i32, %arg1: i32) -> (i32, i32) {
    %c0_i32 = arith.constant 0 : i32
    %c0_i32_0 = arith.constant 0 : i32
    %c0_i32_1 = arith.constant 0 : i32
    return %c0_i32, %c0_i32_0 : i32, i32
  }
  func.func @transform_11(%arg0: i32, %arg1: i32) -> (i32, i32) {
    %c0_i32 = arith.constant 0 : i32
    %c0_i32_0 = arith.constant 0 : i32
    %c0_i32_1 = arith.constant 0 : i32
    return %c0_i32, %c0_i32_0 : i32, i32
  }
  func.func @transform_12(%arg0: i32, %arg1: i32) -> (i32, i32) {
    %c0_i32 = arith.constant 0 : i32
    %c0_i32_0 = arith.constant 0 : i32
    %c0_i32_1 = arith.constant 0 : i32
    return %c0_i32, %c0_i32_0 : i32, i32
  }
  func.func @transform_13(%arg0: i32, %arg1: i32) -> (i32, i32, i32) {
    %c0_i32 = arith.constant 0 : i32
    %c0_i32_0 = arith.constant 0 : i32
    return %arg1, %arg0, %c0_i32 : i32, i32, i32
  }
  func.func @transform_14(%arg0: i32, %arg1: i32) -> (i32, i32, i32) {
    %c0_i32 = arith.constant 0 : i32
    %c0_i32_0 = arith.constant 0 : i32
    %c0_i32_1 = arith.constant 0 : i32
    return %c0_i32, %arg0, %c0_i32_0 : i32, i32, i32
  }
}

</mosaic_0001>

<bundles_post_ra>
// kernel: tpu_custom_call.1
= control target key start
LH: loop header
LB: loop body
LE: loop exit
PB: predicated region body
PF: predicated region fallthrough
CT: control target
= control target key end

     0   :  { %s8397_s0 = inlined_call_operand.vmem [shape: f32[16,16,2], index: 0, kind: input, shape index: {}]   ;;  %s8398_s1 = inlined_call_operand.vmem [shape: f32[16,4], index: 1, kind: input, shape index: {}]   ;;  %s8399_s2 = inlined_call_operand.vmem [shape: f32[4,128], index: 2, kind: input, shape index: {}]   ;;  %s8400_s3 = inlined_call_operand.vmem [shape: f32[1,128], index: 3, kind: input, shape index: {}]   ;;  %s8401_s4 = inlined_call_operand.vmem [shape: f32[2,16,128], index: 4, kind: input, shape index: {}]   ;;  %s8402_s5 = inlined_call_operand.vmem [shape: f32[2,384], index: 5, kind: input, shape index: {}]   ;;  %s8403_s6 = inlined_call_operand.hbm [shape: f32[128,384], index: 6, kind: input, shape index: {}]   ;;  %s8404_s7 = inlined_call_operand.vmem [shape: f32[1,384], index: 7, kind: input, shape index: {}]   ;;  %s8405_s8 = inlined_call_operand.vmem [shape: f32[1,128], index: 8, kind: input, shape index: {}]   ;;  %s8406_s9 = inlined_call_operand.hbm [shape: f32[128,384], index: 9, kind: input, shape index: {}]   ;;  %s8407_s10 = inlined_call_operand.hbm [shape: f32[128,384], index: 10, kind: input, shape index: {}]   ;;  %s8408_s11 = inlined_call_operand.vmem [shape: f32[1,384], index: 11, kind: input, shape index: {}]   ;;  %s8409_s12 = inlined_call_operand.vmem [shape: f32[1,128], index: 12, kind: input, shape index: {}]   ;;  %s8410_s13 = inlined_call_operand.hbm [shape: f32[16,16,256], index: 13, kind: output, shape index: {0}]   ;;  %s8411_s14 = inlined_call_operand.hbm [shape: f32[2,16,128], index: 14, kind: output, shape index: {1}]  }
   0x1   :  { %8481 = sst [smem:[#allocation59_spill]] %s8397_s0 }
   0x2   :  { %8482 = sst [smem:[#allocation60_spill]] %s8398_s1 }
   0x3   :  { %8483 = sst [smem:[#allocation61_spill]] %s8399_s2 }
   0x4   :  { %8484 = sst [smem:[#allocation62_spill]] %s8400_s3 }
   0x5   :  { %8485 = sst [smem:[#allocation63_spill]] %s8401_s4 }
   0x6   :  { %8486 = sst [smem:[#allocation64_spill]] %s8402_s5 }
   0x7   :  { %8487 = sst [smem:[#allocation65_spill]] %s8403_s6 }
   0x8   :  { %8488 = sst [smem:[#allocation66_spill]] %s8404_s7 }
   0x9   :  { %8489 = sst [smem:[#allocation67_spill]] %s8405_s8 }
   0xa   :  { %8490 = sst [smem:[#allocation68_spill]] %s8406_s9 }
   0xb   :  { %8491 = sst [smem:[#allocation69_spill]] %s8408_s11 }
   0xc   :  { %8492 = sst [smem:[#allocation70_spill]] %s8409_s12 }
   0xd   :  { %8493 = sst [smem:[#allocation71_spill]] %s8410_s13 }
   0xe   :  { %8494 = sst [smem:[#allocation72_spill]] %s8411_s14 }
   0xf   :  { %20 = vsyncpa [#allocation9], 0 }
  0x10   :  { %21 = vsyncpa [#allocation12], 0 }
  0x11   :  { %22 = vsyncpa [#allocation10], 0 }
  0x12   :  { %24 = vsyncpa [#allocation10 + $0x1], 0 }
  0x13   :  { %25 = vsyncpa [#allocation16], 0 }
  0x14   :  { %27 = vsyncpa [#allocation16 + $0x1], 0  ;;  %s6205_s29 = smov 0   ;;  %s6207_s30 = smov 0  }
  0x15   :  { %s6209_s15 = smov 0   ;;  %s6211_s16 = smov 0  }
  0x16   :  { %s6213_s17 = smov 0   ;;  %s6215_s18 = smov 0  }
  0x17   :  { %s6217_s19 = smov 0   ;;  %s6219_s20 = smov 0  }
  0x18   :  { %s6221_s21 = smov 0   ;;  %s6223_s22 = smov 0  }
  0x19   :  { %s6225_s23 = smov 0  }
  0x1a LB: > { %8495 = sst [smem:[#allocation21_spill]] %s6071_s29  ;;  %s4450_s25 = sadd.s32 4294967294, %s6111_s23   ;;  %s6111_s23 = sphi %s6225_s23, %s33_s23   ;;  %s6107_s22 = sphi %s6223_s22, %s8733_s22   ;;  %s6103_s21 = sphi %s6221_s21, %s8732_s21   ;;  %s6099_s20 = sphi %s6219_s20, %s8731_s20   ;;  %s6095_s19 = sphi %s6217_s19, %s8730_s19   ;;  %s6091_s18 = sphi %s6215_s18, %s8729_s18   ;;  %s6087_s17 = sphi %s6213_s17, %s8728_s17   ;;  %s6083_s16 = sphi %s6211_s16, %s8727_s16   ;;  %s6079_s15 = sphi %s6209_s15, %s8726_s15   ;;  %s6075_s30 = sphi %s6207_s30, %s8725_s30   ;;  %s6071_s29 = sphi %s6205_s29, %s8724_s29  }
  0x1b   : > { %8496 = sst [smem:[#allocation22_spill]] %s6075_s30  ;;  %s42_s26 = sadd.s32 1, %s6103_s21 }
  0x1c   : > { %8497 = sst [smem:[#allocation23_spill]] %s6095_s19  ;;  %s45_s27 = sadd.s32 1, %s6107_s22 }
  0x1d   : > { %p43_p0 = scmp.ge.s32.totalorder %s42_s26, 2  ;;  %s54_s28 = sadd.s32 1, %s6091_s18 }
  0x1e   : > { %p61_p1 = scmp.ne.s32.totalorder %s6091_s18, %s6087_s17  ;;  %p62_p2 = scmp.eq.s32.totalorder %s6111_s23, 0 }
  0x1f   : > { %s8735_s26 = smov (%p43_p0, %s42_s26), 0  ;;  %s8737_s27 = smov (!%p43_p0, %s45_s27), %s6107_s22 }
  0x20   : > { %8498 = sst [smem:[#allocation24_spill]] %s8735_s26  ;;  %s49_s14 = ssub.s32 %s6103_s21, %s8735_s26 }
  0x21   : > { %p6273_p3 = por %p62_p2, %p61_p1  ;;  %p47_p4 = scmp.ge.s32.totalorder %s8737_s27, 2 }
  0x22   : > { %s148_s13 = sadd.s32 1, %s6083_s16  ;;  %p155_p5 = scmp.ne.s32.totalorder %s6083_s16, %s6079_s15 }
  0x23   : > { %s8500_s12 = sadd.s32 4294967295, %s6111_s23   ;;  %s8739_s27 = smov (%p47_p4, %s8737_s27), 0 }
  0x24   : > { %p6282_p6 = scmp.eq.s32.totalorder %s8500_s12, 3  ;;  %8502 = sst [smem:[#allocation25_spill]] %s8739_s27 }
  0x25   : > { %p6291_p7 = por %p155_p5, %p62_p2  ;;  %s50_s12 = ssub.s32 %s6107_s22, %s8739_s27 }
  0x26   : > { %p6297_p8 = por %p6282_p6, %p61_p1  ;;  %p360_p9 = scmp.ne.s32.totalorder %s6087_s17, %s6075_s30 }
  0x27   : > { %s51_s7 = sor.u32 %s50_s12, %s49_s14  ;;  %p146_p10 = scmp.eq.s32.totalorder %s50_s12, 0 }
  0x28   : > { %s8504_s8 = scalar_select %p6297_p8, 1, 0 }
  0x29   : > { %p52_p11 = scmp.eq.s32.totalorder %s51_s7, 0  ;;  %p361_p12 = scmp.eq.s32.totalorder %s4450_s25, 3 }
  0x2a   : > { %s6306_s5 = scalar_select %p146_p10, %s6083_s16, %s148_s13  }
  0x2b   : > { %s6309_s3 = scalar_select %p52_p11, %s6091_s18, %s54_s28  }
  0x2c   : > { %8505 = sst [smem:[#allocation26_spill]] %s6306_s5  ;;  %p6311_p13 = por %p361_p12, %p360_p9 }
  0x2d   : > { %8506 = sst [smem:[#allocation27_spill]] %s6309_s3  ;;  %p6320_p0 = por %p6282_p6, %p155_p5 }
  0x2e   : > { %s8507_s2 = scalar_select %p6311_p13, 1, 0 }
  0x2f   : > { %s8509_s19 = scalar_select %p6320_p0, 1, 0 }
  0x30   : > { %8508 = sst [smem:[#allocation28_spill]] %s8507_s2  ;;  %p386_p1 = scmp.ne.s32.totalorder %s6079_s15, %s6071_s29 }
  0x31   : > { %p4451_p2 = scmp.ge.s32.totalorder %s6111_s23, 1  ;;  %p394_p4 = scmp.lt.s32.totalorder %s6111_s23, 5 }
  0x32   : > { %p6328_p8 = por %p386_p1, %p361_p12  ;;  %s8512_s13 = sadd.s32 4294967295, %s6111_s23  }
  0x33   : > { %p6334_p10 = scmp.eq.s32.totalorder %s8512_s13, 0  ;;  %p6338_p9 = pnand %p4451_p2, %p394_p4 }
  0x34   : > { %s8510_s7 = scalar_select %p6328_p8, 1, 0 }
  0x35   : > { %p5493_p5 = pneg %p6338_p9  ;;  %s6113_s11 = smov [#allocation11]  }
  0x36   : > { %8511 = sst [smem:[#allocation29_spill]] %s8510_s7  ;;  %s434_s28 = sshll.u32 %s6113_s11, 4  ;;  %s435_s28 = int_to_ptr.vmem [resolvable:$true] %s434_s28 }
  0x37   : > { %p6346_p6 = pnand %p6334_p10, %p5493_p5  ;;  %s5890_s13 = scalar_lea.vmem %s435_s28, 6144 }
  0x38   : > { %p5891_p12 = scmp.ne.s32.totalorder %s435_s28, %s5890_s13  ;;  %p5898_p4 = scmp.lt.s32.totalorder %s435_s28, %s435_s28 }
  0x39   : > { %p5881_p11 = pneg %p6346_p6  ;;  %p5899_p8 = scmp.lt.s32.totalorder %s5890_s13, %s5890_s13 }
  0x3b   : > { %p5893_p1 = pnand %p5891_p12, %p5881_p11  ;;  %p5900_p13 = por %p5899_p8, %p5898_p4 }
  0x3d   : > { %p5894_p2 = pneg %p5893_p1 }
  0x3f   : > { %p5901_p0 = pnand %p5900_p13, %p5894_p2 }
  0x41   : > { %5904 = shalt.err (!%p5901_p0)
}
  0x42   : > { %s6114_s11 = smov 384   ;;  %s6115_s27 = smov 24  }
  0x43   : > { %s8516_s9 = sld [smem:[#allocation68_spill]]  ;;  %s6116_s7 = smov [#allocation8]  }
  0x44   : > { %s415_s29 = sshll.u32 %s6116_s7, 4  ;;  %s6117_s2 = smov [#allocation13]   ;;  %s416_s29 = int_to_ptr.vmem [resolvable:$true] %s415_s29 }
  0x45   : > { %s447_s13 = sshll.u32 %s6117_s2, 4  ;;  %s5916_s30 = scalar_lea.vmem %s416_s29, 6144  ;;  %s448_s13 = int_to_ptr.vmem [resolvable:$true] %s447_s13 }
  0x46   : > { %p5917_p8 = scmp.ne.s32.totalorder %s416_s29, %s5916_s30  ;;  %p5924_p5 = scmp.lt.s32.totalorder %s416_s29, %s416_s29 }
  0x47   : > { %p5925_p12 = scmp.lt.s32.totalorder %s5916_s30, %s5916_s30 }
  0x48   : > { %p5919_p13 = pnand %p5917_p8, %p5881_p11 }
  0x49   : > { %5499 = dma.hbm_to_vmem [thread:$0]  (!%p6346_p6), %s8516_s9, 6144, %s435_s28, [#allocation12], %s6114_s11, %s6114_s11, %s6115_s27  }
  0x4a   : > { %p5920_p0 = pneg %p5919_p13  ;;  %p5926_p1 = por %p5925_p12, %p5924_p5 }
  0x4c   : > { %p5927_p2 = pnand %p5926_p1, %p5920_p0 }
  0x4e   : > { %5930 = shalt.err (!%p5927_p2)
}
  0x4f   : > { %s8517_s6 = sld [smem:[#allocation65_spill]]  ;;  %s5942_s2 = scalar_lea.vmem %s448_s13, 6144 }
  0x50   : > { %p5943_p4 = scmp.ne.s32.totalorder %s448_s13, %s5942_s2  ;;  %p5950_p5 = scmp.lt.s32.totalorder %s448_s13, %s448_s13 }
  0x51   : > { %p5951_p0 = scmp.lt.s32.totalorder %s5942_s2, %s5942_s2 }
  0x52   : > { %p5945_p8 = pnand %p5943_p4, %p5881_p11 }
  0x53   : > { %p5952_p12 = por %p5951_p0, %p5950_p5 }
  0x54   : > { %p5946_p13 = pneg %p5945_p8 }
  0x55   : > { %5496 = dma.hbm_to_vmem [thread:$0]  (!%p6346_p6), %s8517_s6, 6144, %s416_s29, [#allocation9], %s6114_s11, %s6114_s11, %s6115_s27  }
  0x56   : > { %p5953_p1 = pnand %p5952_p12, %p5946_p13 }
  0x58   : > { %5956 = shalt.err (!%p5953_p1)
}
  0x59   : > { %5502 = dma.hbm_to_vmem [thread:$0]  (!%p6346_p6), %s8407_s10, 6144, %s448_s13, [#allocation12], %s6114_s11, %s6114_s11, %s6115_s27  }
  0x5a   : > { %p4455_p2 = scmp.ge.s32.totalorder %s6111_s23, 4 }
  0x5c   : > { %463 = sbr.rel (%p4455_p2) target bundleno = 122 (0x7a), region = 56 }
  0x61   : > { %466 = sbr.rel (!%p6273_p3) target bundleno = 111 (0x6f), region = 60  ;;  %s468_s29 = sand.u32 (%p6273_p3), 1, %s6091_s18  }
  0x62   : > { %s4545_s28 = sshll.u32 (%p6273_p3), %s6103_s21, 4  ;;  %s4456_s3 = sshll.u32 (%p6273_p3), %s468_s29, 6 }
  0x63   : > { %s473_s12 = sadd.s32 (%p6273_p3), %s6107_s22, %s4545_s28  ;;  %s8518_s0 = sld [smem:[#allocation59_spill]] (%p6273_p3) }
  0x64   : > { %s4459_s5 = sshll.u32 (%p6273_p3), %s473_s12, 3  ;;  %s470_s27 = scalar_lea.vmem (%p6273_p3), [#allocation6], %s4456_s3 }
  0x69   : > { %s475_s9 = scalar_lea.vmem %s8518_s0, %s4459_s5 }
  0x6a   : > { %v518_v0 = vld [vmem:[%s475_s9] sm:$0xff]  ;;  %v520_v1 = vld [vmem:[%s475_s9 + $0x10] sm:$0xff] }
  0x6b   : > { %v522_v2 = vld [vmem:[%s475_s9 + $0x20] sm:$0xff]  ;;  %519 = vst [vmem:[%s470_s27] sm:$0xff] %v518_v0  ;;  %521 = vst [vmem:[%s470_s27 + $0x8] sm:$0xff] %v520_v1  ;;  %v524_v3 = vld [vmem:[%s475_s9 + $0x30] sm:$0xff] }
  0x6c   : > { %523 = vst [vmem:[%s470_s27 + $0x10] sm:$0xff] %v522_v2  ;;  %v526_v4 = vld [vmem:[%s475_s9 + $0x40] sm:$0xff]  ;;  %v528_v5 = vld [vmem:[%s475_s9 + $0x50] sm:$0xff]  ;;  %525 = vst [vmem:[%s470_s27 + $0x18] sm:$0xff] %v524_v3 }
  0x6d   : > { %527 = vst [vmem:[%s470_s27 + $0x20] sm:$0xff] %v526_v4  ;;  %529 = vst [vmem:[%s470_s27 + $0x28] sm:$0xff] %v528_v5  ;;  %v530_v6 = vld [vmem:[%s475_s9 + $0x60] sm:$0xff]  ;;  %v532_v7 = vld [vmem:[%s475_s9 + $0x70] sm:$0xff] }
  0x6e   : > { %531 = vst [vmem:[%s470_s27 + $0x30] sm:$0xff] %v530_v6  ;;  %533 = vst [vmem:[%s470_s27 + $0x38] sm:$0xff] %v532_v7 }
  0x6f PF: > { %546 = sbr.rel (!%p6291_p7) target bundleno = 122 (0x7a), region = 102  ;;  %s548_s6 = sand.u32 (%p6291_p7), 1, %s6083_s16  }
  0x70   : > { %s4461_s24 = sshll.u32 (%p6291_p7), %s6107_s22, 3  ;;  %s4460_s11 = sshll.u32 (%p6291_p7), %s548_s6, 4 }
  0x71   : > { %s8519_s4 = sld [smem:[#allocation63_spill]] (%p6291_p7)  ;;  %s550_s29 = scalar_lea.vmem (%p6291_p7), [#allocation7], %s4460_s11 }
  0x77   : > { %s552_s7 = scalar_lea.vmem %s8519_s4, %s4461_s24 }
  0x78   : > { %v583_v8 = vld [vmem:[%s552_s7] sm:$0xff]  ;;  %v585_v9 = vld [vmem:[%s552_s7 + $0x10] sm:$0xff] }
  0x79   : > { %584 = vst [vmem:[%s550_s29] sm:$0xff] %v583_v8  ;;  %586 = vst [vmem:[%s550_s29 + $0x8] sm:$0xff] %v585_v9 }
  0x7a PF: > { %595 = sbr.rel (%p6338_p9) target bundleno = 4449 (0x1161), region = 140 }
  0x7f   : > { %s6404_s9 = sand.u32 1, %s6087_s17   ;;  %s8480_s26 = sand.u32 1, %s6079_s15  }
  0x80   : > { %s4463_s28 = sshll.u32 %s6404_s9, 6  ;;  %s4464_s3 = sshll.u32 %s8480_s26, 4 }
  0x81   : > { %s6410_s12 = scalar_lea.vmem [#allocation6], %s4463_s28  ;;  %s607_s5 = scalar_lea.vmem [#allocation7], %s4464_s3 }
  0x82   : > { %6054 = dma.done.wait (%p6334_p10), [#allocation9], 6144  }
  0x83   : > { %6056 = vsyncadd (%p6334_p10), [#allocation9], 4294961152 }
  0x84   : > { %6058 = dma.done.wait (%p6334_p10), [#allocation12], 12288  }
  0x85   : > { %6060 = vsyncadd (%p6334_p10), [#allocation12], 4294955008  ;;  %s4468_s25 = sshll.u32 %s6404_s9, 7  ;;  %p676_p3 = scmp.lt.s32.totalorder %s6099_s20, 1 }
  0x86   : > { %s8520_s1 = sld [smem:[#allocation60_spill]]  ;;  %s6426_s13 = scalar_lea.vmem [#allocation14], %s4468_s25 }
  0x87   : > { %s677_s2 = scalar_select %p676_p3, %s6099_s20, 1 }
  0x88   : > { %s6428_s30 = scalar_lea.vmem [#allocation15], %s4464_s3  ;;  %s8521_s7 = sld [smem:[#allocation23_spill]] }
  0x89   : > { %s4470_s27 = sshll.u32 %s677_s2, 3 }
  0x8c   : > { %s679_s11 = scalar_lea.vmem %s8520_s1, %s4470_s27 }
  0x8e   : > { %p4471_p7 = scmp.ne.s32.totalorder %s8521_s7, 0 }
  0x8f   : > { %s8522_s28 = sld [smem:[#allocation61_spill]] (!%p4471_p7) }
  0x90   : > { %684 = sbr.rel (%p4471_p7) target bundleno = 350 (0x15e), region = 164  ;;  %s8523_s2 = sld [smem:[#allocation62_spill]] (!%p4471_p7) }
  0x95   : > { %v685_v10 = vld [vmem:[%s607_s5] sm:$0xff]  ;;  %v686_v11 = vld [vmem:[%s607_s5 + $0x8] sm:$0xff]  ;;  %vm702_vm0 = vcmask 1043456   ;;  %v6118_v13 = vmov 0.0   ;;  %vm698_vm1 = vcmask 31744   ;;  %vm6119_vm2 = vmmov 0  }
  0x96   : > { %v690_v12 = vld [vmem:[%s8522_s28] sm:$0xf]  ;;  %687 = vst [vmem:[#allocation4] sm:$0xff] %v685_v10  ;;  %688 = vst [vmem:[#allocation4 + $0x8] sm:$0xff] %v686_v11  ;;  %4854 = vmatprep.subr.mxu0 %v6118_v13  ;;  %4856 = vmatprep.mubr.msk.f32.mxu0 %vm6119_vm2, %v6118_v13 }
  0x97   : > { %v689_v14 = vld [vmem:[%s679_s11] sm:$0xff]  ;;  %4855 = vmatpush3.msk.msra.mxu0 %vm702_vm0, %v690_v12 }
  0x98   : > { %4857 = vmatmul.mubr.msk.f32.vlgmr.msra.gmra.mxu0 %vm698_vm1, %v689_v14  ;;  %v4472_v15 = vld [vmem:[%s8523_s2] ss:$0 sm:$0xff] }
 0x158   : > { %v772_v16 = vpop.f32.mrf.mxu0 }
 0x159   : > { %v773_v17 = vadd.f32 %v4472_v15, %v772_v16 }
 0x15a   : > { %v4858_v18 = vpop.f32.mrf.mxu0 }
 0x15b   : > { %v776_v19 = vmax.f32 %v773_v17, 0.0 }
 0x15d   : > { %777 = vst [vmem:[#allocation5] sm:$0xff] %v776_v19 }
 0x15e PF: > { %v798_v21 = vlaneseq  ;;  %v6120_v23 = vmov 1983009808   ;;  %v8425_v25 = vmov 0.0   ;;  %v787_v26 = vld [vmem:[%s6410_s12] sm:$0xff]  ;;  %vm830_vm3 = vcmask 15360   ;;  %s8525_s6 = sld [smem:[#allocation64_spill]] }
 0x15f   : > { %v816_v24 = vunpack.c.l.s4 %v6120_v23  ;;  %926 = vmatprep.mubr.f32.mxu0 %v8425_v25  ;;  %4861 = vmatprep.mubr.msk.f32.mxu1 %vm830_vm3, %v787_v26  ;;  %vm855_vm4 = vcmask 1041408   ;;  %v6454_v34 = vld [vmem:[#allocation8 + $0x170] sm:$0xff]  ;;  %v6456_v35 = vld [vmem:[#allocation8 + $0x168] sm:$0xff]  ;;  %v6460_v37 = vld [vmem:[#allocation8 + $0x158] sm:$0xff]  ;;  %vm6122_vm5 = vmmov 0   ;;  %s8532_s11 = sld [smem:[#allocation66_spill]] }
 0x160   : > { %v6445_v22 = vshrl.u32 %v798_v21, 7  ;;  %8526 = vst [vmem:[#allocation31_spill] sm:$0xff] %v6454_v34  ;;  %v788_v36 = vld [vmem:[%s6410_s12 + $0x8] sm:$0xff]  ;;  %v6465_v38 = vld [vmem:[#allocation8 + $0x150] sm:$0xff]  ;;  %v6469_v39 = vld [vmem:[#allocation8 + $0x140] sm:$0xff]  ;;  %s8554_s29 = sld [smem:[#allocation67_spill]] }
 0x161   : > { %v817_v28 = vunpack.c.0.s8 %v816_v24  ;;  %v6471_v40 = vld [vmem:[#allocation8 + $0x178] sm:$0xff]  ;;  %v6478_v42 = vld [vmem:[#allocation8 + $0x128] sm:$0xff]  ;;  %v6481_v43 = vld [vmem:[#allocation8 + $0x160] sm:$0xff]  ;;  %s8635_s27 = sld [smem:[#allocation69_spill]] }
 0x162   : > { %8524 = vst [vmem:[#allocation30_spill] sm:$0xff] %v6445_v22  ;;  %v6474_v41 = vld [vmem:[#allocation8 + $0x138] sm:$0xff]  ;;  %v6485_v44 = vld [vmem:[#allocation8 + $0x120] sm:$0xff]  ;;  %v6490_v45 = vld [vmem:[%s6410_s12 + $0x10] sm:$0xff]  ;;  %s8646_s24 = sld [smem:[#allocation70_spill]] }
 0x163   : > { %v820_v30 = vsub.s32 %v817_v28, %v6445_v22  ;;  %v6492_v46 = vld [vmem:[#allocation8 + $0x110] sm:$0xff]  ;;  %v6495_v47 = vld [vmem:[#allocation8 + $0x108] sm:$0xff]  ;;  %v6499_v48 = vld [vmem:[#allocation8 + $0xf8] sm:$0xff]  ;;  %v8424_v28 = vsub.s32 2, %v6445_v22  ;;  %s8707_s14 = sld [smem:[#allocation23_spill]] }
 0x164   : > { %v778_v20 = vld [vmem:[#allocation5] sm:$0xff]  ;;  %v795_v27 = vld [vmem:[%s8525_s6] sm:$0x3f]  ;;  %v6507_v50 = vld [vmem:[#allocation8 + $0xf0] sm:$0xff] }
 0x165   : > { %779 = vst [vmem:[%s6426_s13 + $0x8] sm:$0xff] %v778_v20  ;;  %780 = vst [vmem:[%s6426_s13 + $0x18] sm:$0xff] %v778_v20  ;;  %v814_v29 = vcombine.high %v795_v27, %v795_v27  ;;  %v821_v31 = vrot.slane %v795_v27, %v820_v30  ;;  %v6502_v49 = vld [vmem:[#allocation8 + $0x148] sm:$0xff]  ;;  %v6512_v51 = vld [vmem:[%s6410_s12 + $0x18] sm:$0xff] }
 0x166   : > { %781 = vst [vmem:[%s6426_s13 + $0x28] sm:$0xff] %v778_v20  ;;  %782 = vst [vmem:[%s6426_s13 + $0x38] sm:$0xff] %v778_v20  ;;  %v6514_v52 = vld [vmem:[#allocation8 + $0xe0] sm:$0xff]  ;;  %v6517_v53 = vld [vmem:[#allocation8 + $0xd8] sm:$0xff]  ;;  %s8555_s28 = smov %s8554_s29 }
 0x167   : > { %783 = vst [vmem:[%s6426_s13 + $0x48] sm:$0xff] %v778_v20  ;;  %784 = vst [vmem:[%s6426_s13 + $0x58] sm:$0xff] %v778_v20  ;;  %v828_v32 = vrot.slane %v814_v29, %v820_v30  ;;  %v829_v33 = vcombine.high %v821_v31, %v821_v31  ;;  %v6521_v54 = vld [vmem:[#allocation8 + $0xc8] sm:$0xff]  ;;  %v6524_v55 = vld [vmem:[#allocation8 + $0x130] sm:$0xff] }
 0x168   : > { %785 = vst [vmem:[%s6426_s13 + $0x68] sm:$0xff] %v778_v20  ;;  %786 = vst [vmem:[%s6426_s13 + $0x78] sm:$0xff] %v778_v20  ;;  %v6529_v56 = vld [vmem:[#allocation8 + $0xc0] sm:$0xff]  ;;  %v6536_v58 = vld [vmem:[#allocation8 + $0xb0] sm:$0xff] }
 0x169   : > { %4859 = vmatprep.subr.msk.mxu1 %vm855_vm4, %v828_v32  ;;  %4475 = vmatprep.subr.msk.mxu0 %vm855_vm4, %v829_v33  ;;  %v6534_v57 = vld [vmem:[%s6410_s12 + $0x20] sm:$0xff]  ;;  %v6539_v59 = vld [vmem:[#allocation8 + $0xa8] sm:$0xff]  ;;  %v6543_v60 = vld [vmem:[#allocation8 + $0x98] sm:$0xff]  ;;  %p4535_p10 = scmp.ne.s32.totalorder %s8707_s14, 1 }
 0x16a   : > { %4860 = vmatpush3.msk.msra.mxu1 %vm855_vm4, %v828_v32  ;;  %4476 = vmatpush1.msk.msra.mxu0 %vm855_vm4, %v821_v31  ;;  %v6546_v61 = vld [vmem:[#allocation8 + $0x118] sm:$0xff]  ;;  %v6551_v62 = vld [vmem:[#allocation8 + $0x90] sm:$0xff]  ;;  %v6556_v63 = vld [vmem:[%s6410_s12 + $0x28] sm:$0xff]  ;;  %v8437_v31 = vsub.s32 0, %v6445_v22 }
 0x16b   : > { %4873 = vmatprep.subr.mxu1 %v8425_v25  ;;  %4862 = vmatmul.mubr.msk.f32.vlgmr.msra.gmra.mxu1 %vm830_vm3, %v788_v36  ;;  %v6558_v0 = vld [vmem:[#allocation8 + $0x80] sm:$0xff]  ;;  %v6561_v1 = vld [vmem:[#allocation8 + $0x78] sm:$0xff]  ;;  %v6565_v2 = vld [vmem:[#allocation8 + $0x68] sm:$0xff] }
 0x16c   : > { %4477 = vmatmul.mubr.msk.f32.vlgmr.msra.gmra.mxu0 %vm830_vm3, %v787_v26  ;;  %1163 = vmatprep.subr.mxu0 %v6454_v34  ;;  %v6568_v3 = vld [vmem:[#allocation8 + $0x100] sm:$0xff]  ;;  %v793_v5 = vld [vmem:[%s6410_s12 + $0x30] sm:$0xff]  ;;  %v6581_v7 = vld [vmem:[#allocation8 + $0x48] sm:$0xff] }
 0x16d   : > { %1164 = vmatpush1.msra.mxu0 %v6456_v35  ;;  %932 = vmatprep.mubr.f32.mxu0 %v8425_v25  ;;  %v6573_v4 = vld [vmem:[#allocation8 + $0x60] sm:$0xff]  ;;  %v6578_v6 = vld [vmem:[#allocation8 + $0x50] sm:$0xff]  ;;  %v6585_v8 = vld [vmem:[#allocation8 + $0x38] sm:$0xff] }
 0x16e   : > { %1165 = vmatprep.subr.mxu0 %v6460_v37  ;;  %4874 = vmatpush3.msra.mxu1 %v6471_v40  ;;  %v6588_v9 = vld [vmem:[#allocation8 + $0xe8] sm:$0xff]  ;;  %v6592_v10 = vld [vmem:[#allocation8 + $0x30] sm:$0xff]  ;;  %v794_v11 = vld [vmem:[%s6410_s12 + $0x38] sm:$0xff] }
 0x16f   : > { %1166 = vmatpush1.msra.mxu0 %v6465_v38  ;;  %4875 = vmatprep.subr.mxu1 %v8425_v25  ;;  %v6597_v12 = vld [vmem:[#allocation8 + $0x20] sm:$0xff]  ;;  %v6600_v13 = vld [vmem:[#allocation8 + $0x18] sm:$0xff]  ;;  %v6604_v14 = vld [vmem:[#allocation8 + $0x8] sm:$0xff] }
 0x170   : > { %4478 = vmatmul.mubr.msk.f32.gmra.mxu0 %vm830_vm3, %v788_v36  ;;  %1167 = vmatprep.subr.mxu0 %v6469_v39  ;;  %8527 = vst [vmem:[#allocation32_spill] sm:$0xff] %v6600_v13  ;;  %8528 = vst [vmem:[#allocation33_spill] sm:$0xff] %v6604_v14  ;;  %v6607_v15 = vld [vmem:[#allocation8 + $0xd0] sm:$0xff]  ;;  %v6611_v16 = vld [vmem:[#allocation8] sm:$0xff] }
 0x171   : > { %1168 = vmatpush1.msra.mxu0 %v6474_v41  ;;  %938 = vmatprep.mubr.f32.mxu0 %v8425_v25  ;;  %8529 = vst [vmem:[#allocation34_spill] sm:$0xff] %v6611_v16  ;;  %v6615_v17 = vld [vmem:[#allocation4] sm:$0xff]  ;;  %v6617_v18 = vld [vmem:[#allocation8 + $0xb8] sm:$0xff]  ;;  %v6623_v19 = vld [vmem:[#allocation8 + $0xa0] sm:$0xff] }
 0x172   : > { %1169 = vmatprep.subr.mxu0 %v6478_v42  ;;  %4876 = vmatpush3.msra.mxu1 %v6481_v43  ;;  %v6630_v20 = vld [vmem:[#allocation8 + $0x88] sm:$0xff]  ;;  %v6637_v21 = vld [vmem:[#allocation8 + $0x70] sm:$0xff]  ;;  %v6643_v23 = vld [vmem:[#allocation8 + $0x58] sm:$0xff] }
 0x173   : > { %1170 = vmatpush1.msra.mxu0 %v6485_v44  ;;  %4877 = vmatprep.subr.mxu1 %v8425_v25  ;;  %v6651_v24 = vld [vmem:[#allocation8 + $0x40] sm:$0xff]  ;;  %v6656_v26 = vld [vmem:[#allocation8 + $0x28] sm:$0xff]  ;;  %v6663_v27 = vld [vmem:[#allocation8 + $0x10] sm:$0xff] }
 0x174   : > { %4479 = vmatmul.mubr.msk.f32.gmra.mxu0 %vm830_vm3, %v6490_v45  ;;  %1171 = vmatprep.subr.mxu0 %v6492_v46  ;;  %8530 = vst [vmem:[#allocation35_spill] sm:$0xff] %v6656_v26  ;;  %8531 = vst [vmem:[#allocation36_spill] sm:$0xff] %v6663_v27  ;;  %v796_v29 = vld [vmem:[%s8532_s11] sm:$0x7] }
 0x175   : > { %1172 = vmatpush1.msra.mxu0 %v6495_v47  ;;  %944 = vmatprep.mubr.f32.mxu0 %v8425_v25  ;;  %v6741_v30 = vrot.slane %v796_v29, %v8424_v28 }
 0x176   : > { %1173 = vmatprep.subr.mxu0 %v6499_v48  ;;  %4878 = vmatpush3.msra.mxu1 %v6502_v49 }
 0x177   : > { %1174 = vmatpush1.msra.mxu0 %v6507_v50  ;;  %4879 = vmatprep.subr.mxu1 %v8425_v25 }
 0x178   : > { %4480 = vmatmul.mubr.msk.f32.gmra.mxu0 %vm830_vm3, %v6512_v51  ;;  %1175 = vmatprep.subr.mxu0 %v6514_v52 }
 0x179   : > { %1176 = vmatpush1.msra.mxu0 %v6517_v53  ;;  %950 = vmatprep.mubr.f32.mxu0 %v8425_v25 }
 0x17a   : > { %1177 = vmatprep.subr.mxu0 %v6521_v54  ;;  %4880 = vmatpush3.msra.mxu1 %v6524_v55 }
 0x17b   : > { %1178 = vmatpush1.msra.mxu0 %v6529_v56  ;;  %4881 = vmatprep.subr.mxu1 %v8425_v25 }
 0x17c   : > { %4481 = vmatmul.mubr.msk.f32.gmra.mxu0 %vm830_vm3, %v6534_v57  ;;  %1179 = vmatprep.subr.mxu0 %v6536_v58 }
 0x17d   : > { %1180 = vmatpush1.msra.mxu0 %v6539_v59  ;;  %956 = vmatprep.mubr.f32.mxu0 %v8425_v25 }
 0x17e   : > { %1181 = vmatprep.subr.mxu0 %v6543_v60  ;;  %4882 = vmatpush3.msra.mxu1 %v6546_v61 }
 0x17f   : > { %1182 = vmatpush1.msra.mxu0 %v6551_v62  ;;  %4883 = vmatprep.subr.mxu1 %v8425_v25 }
 0x180   : > { %4482 = vmatmul.mubr.msk.f32.gmra.mxu0 %vm830_vm3, %v6556_v63  ;;  %1183 = vmatprep.subr.mxu0 %v6558_v0 }
 0x181   : > { %1184 = vmatpush1.msra.mxu0 %v6561_v1  ;;  %962 = vmatprep.mubr.f32.mxu0 %v8425_v25 }
 0x182   : > { %1185 = vmatprep.subr.mxu0 %v6565_v2  ;;  %4884 = vmatpush3.msra.mxu1 %v6568_v3 }
 0x183   : > { %1186 = vmatpush1.msra.mxu0 %v6573_v4  ;;  %4885 = vmatprep.subr.mxu1 %v8425_v25 }
 0x184   : > { %4483 = vmatmul.mubr.msk.f32.gmra.mxu0 %vm830_vm3, %v793_v5  ;;  %1187 = vmatprep.subr.mxu0 %v6578_v6 }
 0x185   : > { %1188 = vmatpush1.msra.mxu0 %v6581_v7  ;;  %968 = vmatprep.mubr.f32.mxu0 %v8425_v25 }
 0x186   : > { %1189 = vmatprep.subr.mxu0 %v6585_v8  ;;  %4886 = vmatpush3.msra.mxu1 %v6588_v9 }
 0x187   : > { %1190 = vmatpush1.msra.mxu0 %v6592_v10  ;;  %4887 = vmatprep.subr.mxu1 %v8425_v25 }
 0x188   : > { %4484 = vmatmul.mubr.msk.f32.gmra.mxu0 %vm830_vm3, %v794_v11  ;;  %1191 = vmatprep.subr.mxu0 %v6597_v12 }
 0x189   : > { %1192 = vmatpush1.msra.mxu0 %v6600_v13  ;;  %1227 = vmatprep.mubr.f32.mxu0 %v8425_v25 }
 0x18a   : > { %1193 = vmatprep.subr.mxu0 %v6604_v14  ;;  %4888 = vmatpush3.msra.mxu1 %v6607_v15 }
 0x18b   : > { %1194 = vmatpush1.msra.mxu0 %v6611_v16  ;;  %4889 = vmatprep.subr.mxu1 %v8425_v25 }
 0x18c   : > { %1228 = vmatmul.mubr.f32.vlgmr.msra.gmra.mxu0 %v6615_v17  ;;  %4890 = vmatpush3.msra.mxu1 %v6617_v18 }
 0x18d   : > { %4891 = vmatprep.subr.mxu1 %v8425_v25  ;;  %4864 = vmatprep.mubr.msk.f32.mxu1 %vm830_vm3, %v6490_v45  ;;  %v8442_v45 = vsub.s32 1, %v6445_v22 }
 0x18e   : > { %4892 = vmatpush3.msra.mxu1 %v6623_v19  ;;  %1331 = vmatprep.subr.mxu0 %v6454_v34 }
 0x18f   : > { %4865 = vmatmul.mubr.msk.f32.gmra.mxu1 %vm830_vm3, %v6512_v51  ;;  %4893 = vmatprep.subr.mxu1 %v8425_v25 }
 0x190   : > { %4894 = vmatpush3.msra.mxu1 %v6630_v20  ;;  %4867 = vmatprep.mubr.msk.f32.mxu1 %vm830_vm3, %v6534_v57  ;;  %v801_v57 = vrot.slane %v796_v29, %v8437_v31 }
 0x191   : > { %4895 = vmatprep.subr.mxu1 %v8425_v25  ;;  %1332 = vmatpush1.msra.mxu0 %v6456_v35 }
 0x192   : > { %4896 = vmatpush3.msra.mxu1 %v6637_v21  ;;  %1333 = vmatprep.subr.mxu0 %v6460_v37 }
 0x193   : > { %4868 = vmatmul.mubr.msk.f32.gmra.mxu1 %vm830_vm3, %v6556_v63  ;;  %4897 = vmatprep.subr.mxu1 %v8425_v25 }
 0x194   : > { %4898 = vmatpush3.msra.mxu1 %v6643_v23  ;;  %4870 = vmatprep.mubr.msk.f32.mxu1 %vm830_vm3, %v793_v5  ;;  %v805_v5 = vrot.slane %v796_v29, %v8442_v45 }
 0x195   : > { %4899 = vmatprep.subr.mxu1 %v8425_v25  ;;  %1334 = vmatpush1.msra.mxu0 %v6465_v38 }
 0x196   : > { %4900 = vmatpush3.msra.mxu1 %v6651_v24  ;;  %1335 = vmatprep.subr.mxu0 %v6469_v39 }
 0x197   : > { %4871 = vmatmul.mubr.msk.f32.gmra.mxu1 %vm830_vm3, %v794_v11  ;;  %4901 = vmatprep.subr.mxu1 %v8425_v25 }
 0x198   : > { %4902 = vmatpush3.msra.mxu1 %v6656_v26  ;;  %4905 = vmatprep.mubr.msk.f32.mxu1 %vm6122_vm5, %v8425_v25 }
 0x199   : > { %4903 = vmatprep.subr.mxu1 %v8425_v25  ;;  %1336 = vmatpush1.msra.mxu0 %v6474_v41 }
 0x19a   : > { %4904 = vmatpush3.msra.mxu1 %v6663_v27  ;;  %1337 = vmatprep.subr.mxu0 %v6478_v42 }
 0x19b   : > { %4906 = vmatmul.mubr.f32.vlgmr.msra.gmra.mxu1 %v6615_v17  ;;  %4908 = vmatprep.subr.mxu1 %v8425_v25 }
 0x19c   : > { %4909 = vmatpush3.msra.mxu1 %v6471_v40  ;;  %1338 = vmatpush1.msra.mxu0 %v6485_v44 }
 0x19d   : > { %4910 = vmatprep.subr.mxu1 %v8425_v25  ;;  %1339 = vmatprep.subr.mxu0 %v6492_v46 }
 0x19e   : > { %4911 = vmatpush3.msra.mxu1 %v6481_v43  ;;  %1340 = vmatpush1.msra.mxu0 %v6495_v47 }
 0x19f   : > { %4912 = vmatprep.subr.mxu1 %v8425_v25  ;;  %1341 = vmatprep.subr.mxu0 %v6499_v48 }
 0x1a0   : > { %4913 = vmatpush3.msra.mxu1 %v6502_v49  ;;  %1342 = vmatpush1.msra.mxu0 %v6507_v50 }
 0x1a1   : > { %4914 = vmatprep.subr.mxu1 %v8425_v25  ;;  %1343 = vmatprep.subr.mxu0 %v6514_v52 }
 0x1a2   : > { %4915 = vmatpush3.msra.mxu1 %v6524_v55  ;;  %1344 = vmatpush1.msra.mxu0 %v6517_v53 }
 0x1a3   : > { %4916 = vmatprep.subr.mxu1 %v8425_v25  ;;  %1345 = vmatprep.subr.mxu0 %v6521_v54 }
 0x1a4   : > { %4917 = vmatpush3.msra.mxu1 %v6546_v61  ;;  %1346 = vmatpush1.msra.mxu0 %v6529_v56 }
 0x1a5   : > { %4918 = vmatprep.subr.mxu1 %v8425_v25  ;;  %1347 = vmatprep.subr.mxu0 %v6536_v58 }
 0x1a6   : > { %4919 = vmatpush3.msra.mxu1 %v6568_v3  ;;  %1348 = vmatpush1.msra.mxu0 %v6539_v59 }
 0x1a7   : > { %4920 = vmatprep.subr.mxu1 %v8425_v25  ;;  %1349 = vmatprep.subr.mxu0 %v6543_v60 }
 0x1a8   : > { %4921 = vmatpush3.msra.mxu1 %v6588_v9  ;;  %1350 = vmatpush1.msra.mxu0 %v6551_v62 }
 0x1a9   : > { %4922 = vmatprep.subr.mxu1 %v8425_v25  ;;  %1351 = vmatprep.subr.mxu0 %v6558_v0 }
 0x1aa   : > { %4923 = vmatpush3.msra.mxu1 %v6607_v15  ;;  %1352 = vmatpush1.msra.mxu0 %v6561_v1 }
 0x1ab   : > { %4924 = vmatprep.subr.mxu1 %v8425_v25  ;;  %1353 = vmatprep.subr.mxu0 %v6565_v2 }
 0x1ac   : > { %4925 = vmatpush3.msra.mxu1 %v6617_v18  ;;  %1354 = vmatpush1.msra.mxu0 %v6573_v4 }
 0x1ad   : > { %4926 = vmatprep.subr.mxu1 %v8425_v25  ;;  %1355 = vmatprep.subr.mxu0 %v6578_v6 }
 0x1ae   : > { %4927 = vmatpush3.msra.mxu1 %v6623_v19  ;;  %1356 = vmatpush1.msra.mxu0 %v6581_v7 }
 0x1af   : > { %4928 = vmatprep.subr.mxu1 %v8425_v25  ;;  %1357 = vmatprep.subr.mxu0 %v6585_v8 }
 0x1b0   : > { %4929 = vmatpush3.msra.mxu1 %v6630_v20  ;;  %1358 = vmatpush1.msra.mxu0 %v6592_v10 }
 0x1b1   : > { %4930 = vmatprep.subr.mxu1 %v8425_v25  ;;  %1359 = vmatprep.subr.mxu0 %v6597_v12 }
 0x1b2   : > { %4931 = vmatpush3.msra.mxu1 %v6637_v21  ;;  %1360 = vmatpush1.msra.mxu0 %v6600_v13 }
 0x1b3   : > { %4932 = vmatprep.subr.mxu1 %v8425_v25  ;;  %1361 = vmatprep.subr.mxu0 %v6604_v14 }
 0x1b4   : > { %4933 = vmatpush3.msra.mxu1 %v6643_v23  ;;  %1362 = vmatpush1.msra.mxu0 %v6611_v16 }
 0x1b5   : > { %4934 = vmatprep.subr.mxu1 %v8425_v25  ;;  %1395 = vmatprep.mubr.f32.mxu0 %v8425_v25 }
 0x1b6   : > { %4935 = vmatpush3.msra.mxu1 %v6651_v24  ;;  %4940 = vmatprep.mubr.msk.f32.mxu1 %vm6122_vm5, %v8425_v25 }
 0x1b7   : > { %4936 = vmatprep.subr.mxu1 %v8425_v25  ;;  %1500 = vmatprep.subr.mxu0 %v6454_v34 }
 0x1b8   : > { %4937 = vmatpush3.msra.mxu1 %v6656_v26 }
 0x1b9   : > { %4938 = vmatprep.subr.mxu1 %v8425_v25 }
 0x1ba   : > { %4939 = vmatpush3.msra.mxu1 %v6663_v27 }
 0x1bb   : > { %4943 = vmatprep.subr.mxu1 %v8425_v25 }
 0x22b   : > { %v4863_v32 = vpop.f32.mrf.mxu1 }
 0x22c   : > { %v928_v33 = vpop.f32.mrf.mxu0  ;;  %v6745_v36 = vadd.f32 %v4863_v32, %v6741_v30 }
 0x22e   : > { %8533 = vst [vmem:[#allocation37_spill] sm:$0xff] %v6745_v36  ;;  %v930_v51 = vpop.f32.mrf.mxu0 }
 0x230   : > { %v934_v63 = vpop.f32.mrf.mxu0 }
 0x231   : > { %v6752_v11 = vadd.f32 %v934_v63, %v801_v57 }
 0x232   : > { %v936_v28 = vpop.f32.mrf.mxu0 }
 0x233   : > { %8534 = vst [vmem:[#allocation38_spill] sm:$0xff] %v6752_v11  ;;  %v6754_v25 = vadd.f32 %v936_v28, %v805_v5 }
 0x234   : > { %v940_v34 = vpop.f32.mrf.mxu0 }
 0x235   : > { %8535 = vst [vmem:[#allocation39_spill] sm:$0xff] %v6754_v25  ;;  %v6756_v27 = vadd.f32 %v940_v34, %v801_v57 }
 0x236   : > { %v942_v32 = vpop.f32.mrf.mxu0 }
 0x237   : > { %8536 = vst [vmem:[#allocation40_spill] sm:$0xff] %v6756_v27  ;;  %v6758_v36 = vadd.f32 %v942_v32, %v805_v5 }
 0x238   : > { %v946_v16 = vpop.f32.mrf.mxu0 }
 0x239   : > { %8537 = vst [vmem:[#allocation41_spill] sm:$0xff] %v6758_v36  ;;  %v6760_v14 = vadd.f32 %v946_v16, %v801_v57 }
 0x23a   : > { %v948_v26 = vpop.f32.mrf.mxu0 }
 0x23b   : > { %8538 = vst [vmem:[#allocation42_spill] sm:$0xff] %v6760_v14  ;;  %v6762_v31 = vadd.f32 %v948_v26, %v805_v5 }
 0x23c   : > { %v952_v13 = vpop.f32.mrf.mxu0 }
 0x23d   : > { %8539 = vst [vmem:[#allocation43_spill] sm:$0xff] %v6762_v31  ;;  %v6764_v22 = vadd.f32 %v952_v13, %v801_v57 }
 0x23e   : > { %v954_v29 = vpop.f32.mrf.mxu0 }
 0x23f   : > { %8540 = vst [vmem:[#allocation44_spill] sm:$0xff] %v6764_v22  ;;  %v6766_v63 = vadd.f32 %v954_v29, %v805_v5  ;;  %v929_v22 = vadd.f32 %v928_v33, %v801_v57 }
 0x240   : > { %v958_v28 = vpop.f32.mrf.mxu0 }
 0x241   : > { %8541 = vst [vmem:[#allocation45_spill] sm:$0xff] %v6766_v63  ;;  %v6768_v45 = vadd.f32 %v958_v28, %v801_v57  ;;  %v1041_v28 = vpop.f32.mrf.mxu1 }
 0x242   : > { %v960_v34 = vpop.f32.mrf.mxu0 }
 0x243   : > { %8542 = vst [vmem:[#allocation46_spill] sm:$0xff] %v6768_v45  ;;  %v6770_v27 = vadd.f32 %v960_v34, %v805_v5 }
 0x244   : > { %v964_v32 = vpop.f32.mrf.mxu0 }
 0x245   : > { %8543 = vst [vmem:[#allocation47_spill] sm:$0xff] %v6770_v27  ;;  %v6772_v36 = vadd.f32 %v964_v32, %v801_v57  ;;  %v931_v32 = vadd.f32 %v930_v51, %v805_v5 }
 0x246   : > { %v966_v16 = vpop.f32.mrf.mxu0 }
 0x247   : > { %8544 = vst [vmem:[#allocation48_spill] sm:$0xff] %v6772_v36  ;;  %v6774_v14 = vadd.f32 %v966_v16, %v805_v5 }
 0x248   : > { %v970_v26 = vpop.f32.mrf.mxu0 }
 0x249   : > { %8545 = vst [vmem:[#allocation49_spill] sm:$0xff] %v6774_v14  ;;  %v6776_v31 = vadd.f32 %v970_v26, %v801_v57 }
 0x24a   : > { %v972_v13 = vpop.f32.mrf.mxu0 }
 0x24b   : > { %8546 = vst [vmem:[#allocation50_spill] sm:$0xff] %v6776_v31  ;;  %v6778_v25 = vadd.f32 %v972_v13, %v805_v5 }
 0x24c   : > { %v1229_v29 = vpop.f32.mrf.mxu0 }
 0x24d   : > { %8547 = vst [vmem:[#allocation51_spill] sm:$0xff] %v6778_v25  ;;  %v1304_v63 = vadd.f32 %v1229_v29, %v929_v22 }
 0x24e   : > { %v1231_v34 = vpop.f32.mrf.mxu0 }
 0x24f   : > { %v4495_v45 = vmul.f32 -1.442695, %v1304_v63  ;;  %v4866_v11 = vpop.f32.mrf.mxu1  ;;  %v1311_v26 = vadd.f32 %v1231_v34, %v931_v32 }
 0x250   : > { %v6781_v27 = vadd.f32 %v4866_v11, %v6741_v30 }
 0x251   : > { %5621 = vpow2.f32 %v4495_v45  ;;  %v1051_v16 = vpop.f32.mrf.mxu1  ;;  %v4496_v63 = vmul.f32 -1.442695, %v1311_v26 }
 0x252   : > { %8548 = vst [vmem:[#allocation52_spill] sm:$0xff] %v6781_v27  ;;  %v6784_v14 = vadd.f32 %v1051_v16, %v6741_v30  ;;  %v6801_v16 = vld [vmem:[%s8554_s29] ss:$0 sm:$0xff] }
 0x253   : > { %v4869_v31 = vpop.f32.mrf.mxu1  ;;  %5623 = vpow2.f32 %v4496_v63 }
 0x254   : > { %8549 = vst [vmem:[#allocation53_spill] sm:$0xff] %v6784_v14  ;;  %v6787_v33 = vadd.f32 %v4869_v31, %v6741_v30 }
 0x255   : > { %v1061_v57 = vpop.f32.mrf.mxu1 }
 0x256   : > { %8550 = vst [vmem:[#allocation54_spill] sm:$0xff] %v6787_v33  ;;  %v6790_v22 = vadd.f32 %v1061_v57, %v6741_v30 }
 0x257   : > { %v4872_v13 = vpop.f32.mrf.mxu1 }
 0x258   : > { %8551 = vst [vmem:[#allocation55_spill] sm:$0xff] %v6790_v22  ;;  %v6793_v11 = vadd.f32 %v4872_v13, %v6741_v30 }
 0x259   : > { %v1071_v51 = vpop.f32.mrf.mxu1 }
 0x25a   : > { %8552 = vst [vmem:[#allocation56_spill] sm:$0xff] %v6793_v11  ;;  %v6796_v45 = vadd.f32 %v1071_v51, %v6741_v30  ;;  %v1042_v11 = vadd.f32 %v1041_v28, %v6741_v30  ;;  %v8557_v30 = vmov 0.0   ;;  %v8560_v28 = vld [vmem:[#allocation33_spill] sm:$0xff] }
 0x25b   : > { %v1300_v5 = vpop.f32.mrf.mxu1 }
 0x25c   : > { %8553 = vst [vmem:[#allocation57_spill] sm:$0xff] %v6796_v45  ;;  %v1318_v57 = vadd.f32 %v6801_v16, %v1300_v5  ;;  %v8563_v5 = vld [vmem:[#allocation31_spill] sm:$0xff] }
 0x25d   : > { %v4907_v29 = vpop.f32.mrf.mxu1 }
 0x25e   : > { %v5622_v34 = vpop.eup %5621 }
 0x25f   : > { %v1308_v32 = vadd.f32 1.0, %v5622_v34 }
 0x260   : > { %v5624_v31 = vpop.eup %5623 }
 0x261   : > { %5625 = vrcp.f32 %v1308_v32  ;;  %v1315_v26 = vadd.f32 1.0, %v5624_v31 }
 0x263   : > { %5627 = vrcp.f32 %v1315_v26 }
 0x26e   : > { %v5626_v13 = vpop.eup %5625 }
 0x26f   : > { %v1319_v51 = vmul.f32 %v5626_v13, %v1318_v57  ;;  %v8564_v57 = vld [vmem:[#allocation38_spill] sm:$0xff] }
 0x270   : > { %v5628_v29 = vpop.eup %5627 }
 0x271   : > { %v1320_v63 = vadd.f32 %v1319_v51, %v1042_v11  ;;  %v1322_v25 = vsub.f32 1.0, %v5628_v29  ;;  %v1324_v45 = vmul.f32 %v5628_v29, %v6615_v17  ;;  %v8559_v17 = vld [vmem:[#allocation35_spill] sm:$0xff]  ;;  %v8561_v11 = vld [vmem:[#allocation34_spill] sm:$0xff] }
 0x273   : > { %5629 = vtanh.f32 %v1320_v63 }
 0x280   : > { %v5630_v34 = vpop.eup %5629 }
 0x281   : > { %v1323_v32 = vmul.f32 %v5630_v34, %v1322_v25  ;;  %v8558_v25 = vld [vmem:[#allocation32_spill] sm:$0xff]  ;;  %v8565_v34 = vld [vmem:[#allocation39_spill] sm:$0xff] }
 0x283   : > { %v6806_v36 = vadd.f32 %v1324_v45, %v1323_v32  ;;  %v8562_v45 = vld [vmem:[#allocation36_spill] sm:$0xff] }
 0x285   : > { %8556 = vst [vmem:[#allocation58_spill] sm:$0xff] %v6806_v36  ;;  %1396 = vmatmul.mubr.f32.vlgmr.msra.gmra.mxu0 %v6806_v36  ;;  %4941 = vmatmul.mubr.f32.vlgmr.msra.gmra.mxu1 %v6806_v36 }
 0x286   : > { %1501 = vmatpush1.msra.mxu0 %v6456_v35  ;;  %4944 = vmatpush3.msra.mxu1 %v6471_v40 }
 0x287   : > { %1502 = vmatprep.subr.mxu0 %v6460_v37  ;;  %4945 = vmatprep.subr.mxu1 %v8557_v30 }
 0x288   : > { %1503 = vmatpush1.msra.mxu0 %v6465_v38  ;;  %4946 = vmatpush3.msra.mxu1 %v6481_v43 }
 0x289   : > { %1504 = vmatprep.subr.mxu0 %v6469_v39  ;;  %4947 = vmatprep.subr.mxu1 %v8557_v30 }
 0x28a   : > { %1505 = vmatpush1.msra.mxu0 %v6474_v41  ;;  %4948 = vmatpush3.msra.mxu1 %v6502_v49 }
 0x28b   : > { %1506 = vmatprep.subr.mxu0 %v6478_v42  ;;  %4949 = vmatprep.subr.mxu1 %v8557_v30 }
 0x28c   : > { %1507 = vmatpush1.msra.mxu0 %v6485_v44  ;;  %4950 = vmatpush3.msra.mxu1 %v6524_v55 }
 0x28d   : > { %1508 = vmatprep.subr.mxu0 %v6492_v46  ;;  %4951 = vmatprep.subr.mxu1 %v8557_v30 }
 0x28e   : > { %1509 = vmatpush1.msra.mxu0 %v6495_v47  ;;  %4952 = vmatpush3.msra.mxu1 %v6546_v61 }
 0x28f   : > { %1510 = vmatprep.subr.mxu0 %v6499_v48  ;;  %4953 = vmatprep.subr.mxu1 %v8557_v30 }
 0x290   : > { %1511 = vmatpush1.msra.mxu0 %v6507_v50  ;;  %4954 = vmatpush3.msra.mxu1 %v6568_v3 }
 0x291   : > { %1512 = vmatprep.subr.mxu0 %v6514_v52  ;;  %4955 = vmatprep.subr.mxu1 %v8557_v30 }
 0x292   : > { %1513 = vmatpush1.msra.mxu0 %v6517_v53  ;;  %4956 = vmatpush3.msra.mxu1 %v6588_v9 }
 0x293   : > { %1514 = vmatprep.subr.mxu0 %v6521_v54  ;;  %4957 = vmatprep.subr.mxu1 %v8557_v30 }
 0x294   : > { %1515 = vmatpush1.msra.mxu0 %v6529_v56  ;;  %4958 = vmatpush3.msra.mxu1 %v6607_v15 }
 0x295   : > { %1516 = vmatprep.subr.mxu0 %v6536_v58  ;;  %4959 = vmatprep.subr.mxu1 %v8557_v30 }
 0x296   : > { %1517 = vmatpush1.msra.mxu0 %v6539_v59  ;;  %4960 = vmatpush3.msra.mxu1 %v6617_v18 }
 0x297   : > { %1518 = vmatprep.subr.mxu0 %v6543_v60  ;;  %4961 = vmatprep.subr.mxu1 %v8557_v30 }
 0x298   : > { %1519 = vmatpush1.msra.mxu0 %v6551_v62  ;;  %4962 = vmatpush3.msra.mxu1 %v6623_v19 }
 0x299   : > { %1520 = vmatprep.subr.mxu0 %v6558_v0  ;;  %4963 = vmatprep.subr.mxu1 %v8557_v30 }
 0x29a   : > { %1521 = vmatpush1.msra.mxu0 %v6561_v1  ;;  %4964 = vmatpush3.msra.mxu1 %v6630_v20 }
 0x29b   : > { %1522 = vmatprep.subr.mxu0 %v6565_v2  ;;  %4965 = vmatprep.subr.mxu1 %v8557_v30 }
 0x29c   : > { %1523 = vmatpush1.msra.mxu0 %v6573_v4  ;;  %4966 = vmatpush3.msra.mxu1 %v6637_v21 }
 0x29d   : > { %1524 = vmatprep.subr.mxu0 %v6578_v6  ;;  %4967 = vmatprep.subr.mxu1 %v8557_v30 }
 0x29e   : > { %1525 = vmatpush1.msra.mxu0 %v6581_v7  ;;  %4968 = vmatpush3.msra.mxu1 %v6643_v23 }
 0x29f   : > { %1526 = vmatprep.subr.mxu0 %v6585_v8  ;;  %4969 = vmatprep.subr.mxu1 %v8557_v30 }
 0x2a0   : > { %1527 = vmatpush1.msra.mxu0 %v6592_v10  ;;  %4970 = vmatpush3.msra.mxu1 %v6651_v24 }
 0x2a1   : > { %1528 = vmatprep.subr.mxu0 %v6597_v12  ;;  %4971 = vmatprep.subr.mxu1 %v8557_v30 }
 0x2a2   : > { %1529 = vmatpush1.msra.mxu0 %v8558_v25  ;;  %4972 = vmatpush3.msra.mxu1 %v8559_v17  ;;  %v8566_v17 = vld [vmem:[#allocation37_spill] sm:$0xff] }
 0x2a3   : > { %1530 = vmatprep.subr.mxu0 %v8560_v28  ;;  %4973 = vmatprep.subr.mxu1 %v8557_v30 }
 0x2a4   : > { %1531 = vmatpush1.msra.mxu0 %v8561_v11  ;;  %1564 = vmatprep.mubr.f32.mxu0 %v8557_v30 }
 0x2a5   : > { %4974 = vmatpush3.msra.mxu1 %v8562_v45  ;;  %4975 = vmatprep.mubr.msk.f32.mxu1 %vm6122_vm5, %v8557_v30 }
 0x2a6   : > { %1669 = vmatprep.subr.mxu0 %v8563_v5  ;;  %4978 = vmatprep.subr.mxu1 %v8557_v30 }
 0x345   : > { %v1397_v31 = vpop.f32.mrf.mxu0  ;;  %v1468_v26 = vpop.f32.mrf.mxu1 }
 0x346   : > { %v1472_v13 = vadd.f32 %v1397_v31, %v8564_v57  ;;  %v1486_v5 = vadd.f32 %v6801_v16, %v1468_v26 }
 0x347   : > { %v4942_v51 = vpop.f32.mrf.mxu1  ;;  %v1399_v29 = vpop.f32.mrf.mxu0 }
 0x348   : > { %v4497_v63 = vmul.f32 -1.442695, %v1472_v13  ;;  %v1479_v32 = vadd.f32 %v1399_v29, %v8565_v34 }
 0x34a   : > { %5631 = vpow2.f32 %v4497_v63  ;;  %v4498_v33 = vmul.f32 -1.442695, %v1479_v32 }
 0x34c   : > { %5633 = vpow2.f32 %v4498_v33 }
 0x357   : > { %v5632_v22 = vpop.eup %5631 }
 0x358   : > { %v1476_v27 = vadd.f32 1.0, %v5632_v22  ;;  %v8570_v22 = vld [vmem:[#allocation34_spill] sm:$0xff] }
 0x359   : > { %v5634_v14 = vpop.eup %5633 }
 0x35a   : > { %5635 = vrcp.f32 %v1476_v27  ;;  %v1483_v45 = vadd.f32 1.0, %v5634_v14  ;;  %v8568_v14 = vld [vmem:[#allocation35_spill] sm:$0xff]  ;;  %v8569_v27 = vld [vmem:[#allocation33_spill] sm:$0xff] }
 0x35c   : > { %5637 = vrcp.f32 %v1483_v45 }
 0x367   : > { %v5636_v11 = vpop.eup %5635 }
 0x368   : > { %v1487_v28 = vmul.f32 %v5636_v11, %v1486_v5  ;;  %v8573_v5 = vld [vmem:[#allocation40_spill] sm:$0xff] }
 0x369   : > { %v5638_v57 = vpop.eup %5637 }
 0x36a   : > { %v1488_v31 = vadd.f32 %v1487_v28, %v8566_v17  ;;  %v1490_v13 = vsub.f32 1.0, %v5638_v57  ;;  %v1492_v29 = vmul.f32 %v5638_v57, %v6806_v36  ;;  %v8571_v17 = vld [vmem:[#allocation36_spill] sm:$0xff]  ;;  %v8572_v28 = vld [vmem:[#allocation31_spill] sm:$0xff]  ;;  %v8574_v57 = vld [vmem:[#allocation41_spill] sm:$0xff] }
 0x36c   : > { %5639 = vtanh.f32 %v1488_v31 }
 0x379   : > { %v5640_v51 = vpop.eup %5639 }
 0x37a   : > { %v1491_v63 = vmul.f32 %v5640_v51, %v1490_v13 }
 0x37c   : > { %v6882_v33 = vadd.f32 %v1492_v29, %v1491_v63 }
 0x37e   : > { %8567 = vst [vmem:[#allocation32_spill] sm:$0xff] %v6882_v33  ;;  %1565 = vmatmul.mubr.f32.vlgmr.msra.gmra.mxu0 %v6882_v33  ;;  %4976 = vmatmul.mubr.f32.vlgmr.msra.gmra.mxu1 %v6882_v33 }
 0x37f   : > { %1670 = vmatpush1.msra.mxu0 %v6456_v35  ;;  %4979 = vmatpush3.msra.mxu1 %v6471_v40 }
 0x380   : > { %1671 = vmatprep.subr.mxu0 %v6460_v37  ;;  %4980 = vmatprep.subr.mxu1 %v8557_v30 }
 0x381   : > { %1672 = vmatpush1.msra.mxu0 %v6465_v38  ;;  %4981 = vmatpush3.msra.mxu1 %v6481_v43 }
 0x382   : > { %1673 = vmatprep.subr.mxu0 %v6469_v39  ;;  %4982 = vmatprep.subr.mxu1 %v8557_v30 }
 0x383   : > { %1674 = vmatpush1.msra.mxu0 %v6474_v41  ;;  %4983 = vmatpush3.msra.mxu1 %v6502_v49 }
 0x384   : > { %1675 = vmatprep.subr.mxu0 %v6478_v42  ;;  %4984 = vmatprep.subr.mxu1 %v8557_v30 }
 0x385   : > { %1676 = vmatpush1.msra.mxu0 %v6485_v44  ;;  %4985 = vmatpush3.msra.mxu1 %v6524_v55 }
 0x386   : > { %1677 = vmatprep.subr.mxu0 %v6492_v46  ;;  %4986 = vmatprep.subr.mxu1 %v8557_v30 }
 0x387   : > { %1678 = vmatpush1.msra.mxu0 %v6495_v47  ;;  %4987 = vmatpush3.msra.mxu1 %v6546_v61 }
 0x388   : > { %1679 = vmatprep.subr.mxu0 %v6499_v48  ;;  %4988 = vmatprep.subr.mxu1 %v8557_v30 }
 0x389   : > { %1680 = vmatpush1.msra.mxu0 %v6507_v50  ;;  %4989 = vmatpush3.msra.mxu1 %v6568_v3 }
 0x38a   : > { %1681 = vmatprep.subr.mxu0 %v6514_v52  ;;  %4990 = vmatprep.subr.mxu1 %v8557_v30 }
 0x38b   : > { %1682 = vmatpush1.msra.mxu0 %v6517_v53  ;;  %4991 = vmatpush3.msra.mxu1 %v6588_v9 }
 0x38c   : > { %1683 = vmatprep.subr.mxu0 %v6521_v54  ;;  %4992 = vmatprep.subr.mxu1 %v8557_v30 }
 0x38d   : > { %1684 = vmatpush1.msra.mxu0 %v6529_v56  ;;  %4993 = vmatpush3.msra.mxu1 %v6607_v15 }
 0x38e   : > { %1685 = vmatprep.subr.mxu0 %v6536_v58  ;;  %4994 = vmatprep.subr.mxu1 %v8557_v30 }
 0x38f   : > { %1686 = vmatpush1.msra.mxu0 %v6539_v59  ;;  %4995 = vmatpush3.msra.mxu1 %v6617_v18 }
 0x390   : > { %1687 = vmatprep.subr.mxu0 %v6543_v60  ;;  %4996 = vmatprep.subr.mxu1 %v8557_v30 }
 0x391   : > { %1688 = vmatpush1.msra.mxu0 %v6551_v62  ;;  %4997 = vmatpush3.msra.mxu1 %v6623_v19 }
 0x392   : > { %1689 = vmatprep.subr.mxu0 %v6558_v0  ;;  %4998 = vmatprep.subr.mxu1 %v8557_v30 }
 0x393   : > { %1690 = vmatpush1.msra.mxu0 %v6561_v1  ;;  %4999 = vmatpush3.msra.mxu1 %v6630_v20 }
 0x394   : > { %1691 = vmatprep.subr.mxu0 %v6565_v2  ;;  %5000 = vmatprep.subr.mxu1 %v8557_v30 }
 0x395   : > { %1692 = vmatpush1.msra.mxu0 %v6573_v4  ;;  %5001 = vmatpush3.msra.mxu1 %v6637_v21 }
 0x396   : > { %1693 = vmatprep.subr.mxu0 %v6578_v6  ;;  %5002 = vmatprep.subr.mxu1 %v8557_v30 }
 0x397   : > { %1694 = vmatpush1.msra.mxu0 %v6581_v7  ;;  %5003 = vmatpush3.msra.mxu1 %v6643_v23 }
 0x398   : > { %1695 = vmatprep.subr.mxu0 %v6585_v8  ;;  %5004 = vmatprep.subr.mxu1 %v8557_v30 }
 0x399   : > { %1696 = vmatpush1.msra.mxu0 %v6592_v10  ;;  %5005 = vmatpush3.msra.mxu1 %v6651_v24 }
 0x39a   : > { %1697 = vmatprep.subr.mxu0 %v6597_v12  ;;  %5006 = vmatprep.subr.mxu1 %v8557_v30 }
 0x39b   : > { %1698 = vmatpush1.msra.mxu0 %v8558_v25  ;;  %5007 = vmatpush3.msra.mxu1 %v8568_v14  ;;  %v8575_v14 = vld [vmem:[#allocation53_spill] sm:$0xff] }
 0x39c   : > { %1699 = vmatprep.subr.mxu0 %v8569_v27  ;;  %5008 = vmatprep.subr.mxu1 %v8557_v30 }
 0x39d   : > { %1700 = vmatpush1.msra.mxu0 %v8570_v22  ;;  %1733 = vmatprep.mubr.f32.mxu0 %v8557_v30 }
 0x39e   : > { %5009 = vmatpush3.msra.mxu1 %v8571_v17  ;;  %5010 = vmatprep.mubr.msk.f32.mxu1 %vm6122_vm5, %v8557_v30 }
 0x39f   : > { %1838 = vmatprep.subr.mxu0 %v8572_v28  ;;  %5013 = vmatprep.subr.mxu1 %v8557_v30 }
 0x43e   : > { %v1566_v11 = vpop.f32.mrf.mxu0  ;;  %v1637_v45 = vpop.f32.mrf.mxu1 }
 0x43f   : > { %v1641_v26 = vadd.f32 %v1566_v11, %v8573_v5  ;;  %v1655_v28 = vadd.f32 %v6801_v16, %v1637_v45  ;;  %v7076_v45 = vld [vmem:[#allocation8 + $0x110] sm:$0xff] }
 0x440   : > { %v4977_v34 = vpop.f32.mrf.mxu1  ;;  %v1568_v31 = vpop.f32.mrf.mxu0 }
 0x441   : > { %v4499_v32 = vmul.f32 -1.442695, %v1641_v26  ;;  %v1648_v13 = vadd.f32 %v1568_v31, %v8574_v57 }
 0x443   : > { %5641 = vpow2.f32 %v4499_v32  ;;  %v4500_v51 = vmul.f32 -1.442695, %v1648_v13  ;;  %v7080_v13 = vld [vmem:[#allocation8 + $0x108] sm:$0xff] }
 0x445   : > { %5643 = vpow2.f32 %v4500_v51  ;;  %v7083_v51 = vld [vmem:[#allocation8 + $0x118] sm:$0xff] }
 0x450   : > { %v5642_v63 = vpop.eup %5641 }
 0x451   : > { %v1645_v29 = vadd.f32 1.0, %v5642_v63  ;;  %v7086_v63 = vld [vmem:[#allocation8 + $0xf8] sm:$0xff] }
 0x452   : > { %v5644_v36 = vpop.eup %5643 }
 0x453   : > { %5645 = vrcp.f32 %v1645_v29  ;;  %v1652_v17 = vadd.f32 1.0, %v5644_v36  ;;  %v7056_v36 = vld [vmem:[#allocation8 + $0x140] sm:$0xff]  ;;  %v7090_v29 = vld [vmem:[#allocation8 + $0xf0] sm:$0xff] }
 0x455   : > { %5647 = vrcp.f32 %v1652_v17  ;;  %v7073_v17 = vld [vmem:[#allocation8 + $0x130] sm:$0xff] }
 0x460   : > { %v5646_v22 = vpop.eup %5645 }
 0x461   : > { %v1656_v27 = vmul.f32 %v5646_v22, %v1655_v28  ;;  %v7070_v22 = vld [vmem:[#allocation8 + $0x120] sm:$0xff] }
 0x462   : > { %v5648_v5 = vpop.eup %5647  ;;  %v7093_v28 = vld [vmem:[#allocation8 + $0x100] sm:$0xff] }
 0x463   : > { %v1657_v11 = vadd.f32 %v1656_v27, %v8575_v14  ;;  %v1659_v26 = vsub.f32 1.0, %v5648_v5  ;;  %v1661_v31 = vmul.f32 %v5648_v5, %v6882_v33  ;;  %v7063_v14 = vld [vmem:[#allocation8 + $0x148] sm:$0xff]  ;;  %v7100_v5 = vld [vmem:[#allocation8 + $0xd8] sm:$0xff] }
 0x464   : > { %v7066_v27 = vld [vmem:[#allocation8 + $0x128] sm:$0xff] }
 0x465   : > { %5649 = vtanh.f32 %v1657_v11  ;;  %v7096_v11 = vld [vmem:[#allocation8 + $0xe0] sm:$0xff] }
 0x472   : > { %v5650_v34 = vpop.eup %5649 }
 0x473   : > { %v1660_v32 = vmul.f32 %v5650_v34, %v1659_v26  ;;  %v7103_v26 = vld [vmem:[#allocation8 + $0xe8] sm:$0xff] }
 0x474   : > { %v7106_v34 = vld [vmem:[#allocation8 + $0xc8] sm:$0xff] }
 0x475   : > { %v6958_v57 = vadd.f32 %v1661_v31, %v1660_v32  ;;  %v7110_v32 = vld [vmem:[#allocation8 + $0xc0] sm:$0xff]  ;;  %v7114_v31 = vld [vmem:[#allocation8 + $0xb0] sm:$0xff] }
 0x477   : > { %8576 = vst [vmem:[#allocation38_spill] sm:$0xff] %v6958_v57  ;;  %1734 = vmatmul.mubr.f32.vlgmr.msra.gmra.mxu0 %v6958_v57  ;;  %5011 = vmatmul.mubr.f32.vlgmr.msra.gmra.mxu1 %v6958_v57 }
 0x478   : > { %1839 = vmatpush1.msra.mxu0 %v6456_v35  ;;  %5014 = vmatpush3.msra.mxu1 %v6471_v40  ;;  %v8577_v35 = vld [vmem:[#allocation35_spill] sm:$0xff]  ;;  %v7027_v40 = vld [vmem:[#allocation8 + $0x170] sm:$0xff] }
 0x479   : > { %1840 = vmatprep.subr.mxu0 %v6460_v37  ;;  %5015 = vmatprep.subr.mxu1 %v8557_v30  ;;  %v8578_v37 = vld [vmem:[#allocation33_spill] sm:$0xff] }
 0x47a   : > { %1841 = vmatpush1.msra.mxu0 %v6465_v38  ;;  %5016 = vmatpush3.msra.mxu1 %v6481_v43  ;;  %v8579_v38 = vld [vmem:[#allocation34_spill] sm:$0xff] }
 0x47b   : > { %1842 = vmatprep.subr.mxu0 %v6469_v39  ;;  %5017 = vmatprep.subr.mxu1 %v8557_v30  ;;  %v8580_v39 = vld [vmem:[#allocation36_spill] sm:$0xff]  ;;  %v8581_v43 = vld [vmem:[#allocation42_spill] sm:$0xff] }
 0x47c   : > { %1843 = vmatpush1.msra.mxu0 %v6474_v41  ;;  %5018 = vmatpush3.msra.mxu1 %v6502_v49  ;;  %v8582_v49 = vld [vmem:[#allocation43_spill] sm:$0xff] }
 0x47d   : > { %1844 = vmatprep.subr.mxu0 %v6478_v42  ;;  %5019 = vmatprep.subr.mxu1 %v8557_v30 }
 0x47e   : > { %1845 = vmatpush1.msra.mxu0 %v6485_v44  ;;  %5020 = vmatpush3.msra.mxu1 %v6524_v55 }
 0x47f   : > { %1846 = vmatprep.subr.mxu0 %v6492_v46  ;;  %5021 = vmatprep.subr.mxu1 %v8557_v30 }
 0x480   : > { %1847 = vmatpush1.msra.mxu0 %v6495_v47  ;;  %5022 = vmatpush3.msra.mxu1 %v6546_v61  ;;  %v8583_v61 = vld [vmem:[#allocation52_spill] sm:$0xff] }
 0x481   : > { %1848 = vmatprep.subr.mxu0 %v6499_v48  ;;  %5023 = vmatprep.subr.mxu1 %v8557_v30 }
 0x482   : > { %1849 = vmatpush1.msra.mxu0 %v6507_v50  ;;  %5024 = vmatpush3.msra.mxu1 %v6568_v3 }
 0x483   : > { %1850 = vmatprep.subr.mxu0 %v6514_v52  ;;  %5025 = vmatprep.subr.mxu1 %v8557_v30 }
 0x484   : > { %1851 = vmatpush1.msra.mxu0 %v6517_v53  ;;  %5026 = vmatpush3.msra.mxu1 %v6588_v9  ;;  %v7046_v9 = vld [vmem:[#allocation8 + $0x158] sm:$0xff] }
 0x485   : > { %1852 = vmatprep.subr.mxu0 %v6521_v54  ;;  %5027 = vmatprep.subr.mxu1 %v8557_v30 }
 0x486   : > { %1853 = vmatpush1.msra.mxu0 %v6529_v56  ;;  %5028 = vmatpush3.msra.mxu1 %v6607_v15 }
 0x487   : > { %1854 = vmatprep.subr.mxu0 %v6536_v58  ;;  %5029 = vmatprep.subr.mxu1 %v8557_v30 }
 0x488   : > { %1855 = vmatpush1.msra.mxu0 %v6539_v59  ;;  %5030 = vmatpush3.msra.mxu1 %v6617_v18 }
 0x489   : > { %1856 = vmatprep.subr.mxu0 %v6543_v60  ;;  %5031 = vmatprep.subr.mxu1 %v8557_v30 }
 0x48a   : > { %1857 = vmatpush1.msra.mxu0 %v6551_v62  ;;  %5032 = vmatpush3.msra.mxu1 %v6623_v19 }
 0x48b   : > { %1858 = vmatprep.subr.mxu0 %v6558_v0  ;;  %5033 = vmatprep.subr.mxu1 %v8557_v30 }
 0x48c   : > { %1859 = vmatpush1.msra.mxu0 %v6561_v1  ;;  %5034 = vmatpush3.msra.mxu1 %v6630_v20 }
 0x48d   : > { %1860 = vmatprep.subr.mxu0 %v6565_v2  ;;  %5035 = vmatprep.subr.mxu1 %v8557_v30 }
 0x48e   : > { %1861 = vmatpush1.msra.mxu0 %v6573_v4  ;;  %5036 = vmatpush3.msra.mxu1 %v6637_v21 }
 0x48f   : > { %1862 = vmatprep.subr.mxu0 %v6578_v6  ;;  %5037 = vmatprep.subr.mxu1 %v8557_v30 }
 0x490   : > { %1863 = vmatpush1.msra.mxu0 %v6581_v7  ;;  %5038 = vmatpush3.msra.mxu1 %v6643_v23  ;;  %v7040_v7 = vld [vmem:[#allocation8 + $0x168] sm:$0xff] }
 0x491   : > { %1864 = vmatprep.subr.mxu0 %v6585_v8  ;;  %5039 = vmatprep.subr.mxu1 %v8557_v30  ;;  %v7043_v8 = vld [vmem:[#allocation8 + $0x178] sm:$0xff] }
 0x492   : > { %1865 = vmatpush1.msra.mxu0 %v6592_v10  ;;  %5040 = vmatpush3.msra.mxu1 %v6651_v24  ;;  %v7050_v10 = vld [vmem:[#allocation8 + $0x150] sm:$0xff] }
 0x493   : > { %1866 = vmatprep.subr.mxu0 %v6597_v12  ;;  %5041 = vmatprep.subr.mxu1 %v8557_v30  ;;  %v7053_v12 = vld [vmem:[#allocation8 + $0x160] sm:$0xff] }
 0x494   : > { %1867 = vmatpush1.msra.mxu0 %v8558_v25  ;;  %5042 = vmatpush3.msra.mxu1 %v8577_v35  ;;  %v7060_v25 = vld [vmem:[#allocation8 + $0x138] sm:$0xff] }
 0x495   : > { %1868 = vmatprep.subr.mxu0 %v8578_v37  ;;  %5043 = vmatprep.subr.mxu1 %v8557_v30  ;;  %v7118_v37 = vld [vmem:[#allocation8 + $0xa8] sm:$0xff] }
 0x496   : > { %1869 = vmatpush1.msra.mxu0 %v8579_v38  ;;  %1902 = vmatprep.mubr.f32.mxu0 %v8557_v30  ;;  %v7122_v38 = vld [vmem:[#allocation8 + $0x98] sm:$0xff] }
 0x497   : > { %5044 = vmatpush3.msra.mxu1 %v8580_v39  ;;  %5045 = vmatprep.mubr.msk.f32.mxu1 %vm6122_vm5, %v8557_v30 }
 0x498   : > { %2007 = vmatprep.subr.mxu0 %v7027_v40  ;;  %5048 = vmatprep.subr.mxu1 %v8557_v30 }
 0x537   : > { %v1735_v41 = vpop.f32.mrf.mxu0  ;;  %v1806_v42 = vpop.f32.mrf.mxu1 }
 0x538   : > { %v1810_v44 = vadd.f32 %v1735_v41, %v8581_v43  ;;  %v1824_v58 = vadd.f32 %v6801_v16, %v1806_v42  ;;  %v7126_v41 = vld [vmem:[#allocation8 + $0x90] sm:$0xff]  ;;  %v7134_v42 = vld [vmem:[#allocation8 + $0x78] sm:$0xff]  ;;  %v7142_v43 = vld [vmem:[#allocation8 + $0x60] sm:$0xff] }
 0x539   : > { %v5012_v46 = vpop.f32.mrf.mxu1  ;;  %v1737_v48 = vpop.f32.mrf.mxu0 }
 0x53a   : > { %v4501_v47 = vmul.f32 -1.442695, %v1810_v44  ;;  %v1817_v50 = vadd.f32 %v1737_v48, %v8582_v49  ;;  %v7150_v44 = vld [vmem:[#allocation8 + $0x48] sm:$0xff]  ;;  %v7158_v46 = vld [vmem:[#allocation8 + $0x30] sm:$0xff]  ;;  %v7174_v48 = vld [vmem:[#allocation8] sm:$0xff] }
 0x53b   : > { %8586 = vst [vmem:[#allocation31_spill] sm:$0xff] %v7174_v48  ;;  %v8587_v49 = vld [vmem:[#allocation44_spill] sm:$0xff] }
 0x53c   : > { %5651 = vpow2.f32 %v4501_v47  ;;  %v4502_v52 = vmul.f32 -1.442695, %v1817_v50  ;;  %v7166_v47 = vld [vmem:[#allocation8 + $0x18] sm:$0xff] }
 0x53e   : > { %5653 = vpow2.f32 %v4502_v52 }
 0x549   : > { %v5652_v53 = vpop.eup %5651 }
 0x54a   : > { %v1814_v54 = vadd.f32 1.0, %v5652_v53 }
 0x54b   : > { %v5654_v55 = vpop.eup %5653 }
 0x54c   : > { %5655 = vrcp.f32 %v1814_v54  ;;  %v1821_v56 = vadd.f32 1.0, %v5654_v55  ;;  %v8588_v55 = vld [vmem:[#allocation45_spill] sm:$0xff] }
 0x54e   : > { %5657 = vrcp.f32 %v1821_v56 }
 0x559   : > { %v5656_v59 = vpop.eup %5655 }
 0x55a   : > { %v1825_v60 = vmul.f32 %v5656_v59, %v1824_v58 }
 0x55b   : > { %v5658_v0 = vpop.eup %5657 }
 0x55c   : > { %v1826_v62 = vadd.f32 %v1825_v60, %v8583_v61  ;;  %v1828_v1 = vsub.f32 1.0, %v5658_v0  ;;  %v1830_v4 = vmul.f32 %v5658_v0, %v6958_v57 }
 0x55e   : > { %5659 = vtanh.f32 %v1826_v62 }
 0x56b   : > { %v5660_v2 = vpop.eup %5659 }
 0x56c   : > { %v1829_v3 = vmul.f32 %v5660_v2, %v1828_v1  ;;  %v8589_v2 = vld [vmem:[#allocation55_spill] sm:$0xff] }
 0x56e   : > { %v7036_v6 = vadd.f32 %v1830_v4, %v1829_v3 }
 0x570   : > { %8584 = vst [vmem:[#allocation39_spill] sm:$0xff] %v7036_v6  ;;  %1903 = vmatmul.mubr.f32.vlgmr.msra.gmra.mxu0 %v7036_v6  ;;  %5046 = vmatmul.mubr.f32.vlgmr.msra.gmra.mxu1 %v7036_v6 }
 0x571   : > { %2008 = vmatpush1.msra.mxu0 %v7040_v7  ;;  %5049 = vmatpush3.msra.mxu1 %v7043_v8 }
 0x572   : > { %2009 = vmatprep.subr.mxu0 %v7046_v9  ;;  %5050 = vmatprep.subr.mxu1 %v8557_v30 }
 0x573   : > { %2010 = vmatpush1.msra.mxu0 %v7050_v10  ;;  %5051 = vmatpush3.msra.mxu1 %v7053_v12 }
 0x574   : > { %2011 = vmatprep.subr.mxu0 %v7056_v36  ;;  %5052 = vmatprep.subr.mxu1 %v8557_v30 }
 0x575   : > { %2012 = vmatpush1.msra.mxu0 %v7060_v25  ;;  %5053 = vmatpush3.msra.mxu1 %v7063_v14 }
 0x576   : > { %2013 = vmatprep.subr.mxu0 %v7066_v27  ;;  %5054 = vmatprep.subr.mxu1 %v8557_v30 }
 0x577   : > { %2014 = vmatpush1.msra.mxu0 %v7070_v22  ;;  %5055 = vmatpush3.msra.mxu1 %v7073_v17 }
 0x578   : > { %2015 = vmatprep.subr.mxu0 %v7076_v45  ;;  %5056 = vmatprep.subr.mxu1 %v8557_v30 }
 0x579   : > { %2016 = vmatpush1.msra.mxu0 %v7080_v13  ;;  %5057 = vmatpush3.msra.mxu1 %v7083_v51 }
 0x57a   : > { %2017 = vmatprep.subr.mxu0 %v7086_v63  ;;  %5058 = vmatprep.subr.mxu1 %v8557_v30 }
 0x57b   : > { %2018 = vmatpush1.msra.mxu0 %v7090_v29  ;;  %5059 = vmatpush3.msra.mxu1 %v7093_v28 }
 0x57c   : > { %2019 = vmatprep.subr.mxu0 %v7096_v11  ;;  %5060 = vmatprep.subr.mxu1 %v8557_v30 }
 0x57d   : > { %2020 = vmatpush1.msra.mxu0 %v7100_v5  ;;  %5061 = vmatpush3.msra.mxu1 %v7103_v26 }
 0x57e   : > { %2021 = vmatprep.subr.mxu0 %v7106_v34  ;;  %5062 = vmatprep.subr.mxu1 %v8557_v30 }
 0x57f   : > { %2022 = vmatpush1.msra.mxu0 %v7110_v32  ;;  %5063 = vmatpush3.msra.mxu1 %v6607_v15  ;;  %v7130_v15 = vld [vmem:[#allocation8 + $0x80] sm:$0xff] }
 0x580   : > { %2023 = vmatprep.subr.mxu0 %v7114_v31  ;;  %5064 = vmatprep.subr.mxu1 %v8557_v30 }
 0x581   : > { %2024 = vmatpush1.msra.mxu0 %v7118_v37  ;;  %5065 = vmatpush3.msra.mxu1 %v6617_v18  ;;  %v7138_v18 = vld [vmem:[#allocation8 + $0x68] sm:$0xff] }
 0x582   : > { %2025 = vmatprep.subr.mxu0 %v7122_v38  ;;  %5066 = vmatprep.subr.mxu1 %v8557_v30 }
 0x583   : > { %2026 = vmatpush1.msra.mxu0 %v7126_v41  ;;  %5067 = vmatpush3.msra.mxu1 %v6623_v19  ;;  %v7146_v19 = vld [vmem:[#allocation8 + $0x50] sm:$0xff] }
 0x584   : > { %2027 = vmatprep.subr.mxu0 %v7130_v15  ;;  %5068 = vmatprep.subr.mxu1 %v8557_v30 }
 0x585   : > { %2028 = vmatpush1.msra.mxu0 %v7134_v42  ;;  %5069 = vmatpush3.msra.mxu1 %v6630_v20  ;;  %v7154_v20 = vld [vmem:[#allocation8 + $0x38] sm:$0xff] }
 0x586   : > { %2029 = vmatprep.subr.mxu0 %v7138_v18  ;;  %5070 = vmatprep.subr.mxu1 %v8557_v30 }
 0x587   : > { %2030 = vmatpush1.msra.mxu0 %v7142_v43  ;;  %5071 = vmatpush3.msra.mxu1 %v6637_v21  ;;  %v7162_v21 = vld [vmem:[#allocation8 + $0x20] sm:$0xff] }
 0x588   : > { %2031 = vmatprep.subr.mxu0 %v7146_v19  ;;  %5072 = vmatprep.subr.mxu1 %v8557_v30 }
 0x589   : > { %2032 = vmatpush1.msra.mxu0 %v7150_v44  ;;  %5073 = vmatpush3.msra.mxu1 %v6643_v23  ;;  %v7170_v23 = vld [vmem:[#allocation8 + $0x8] sm:$0xff] }
 0x58a   : > { %2033 = vmatprep.subr.mxu0 %v7154_v20  ;;  %5074 = vmatprep.subr.mxu1 %v8557_v30  ;;  %8585 = vst [vmem:[#allocation37_spill] sm:$0xff] %v7170_v23 }
 0x58b   : > { %2034 = vmatpush1.msra.mxu0 %v7158_v46  ;;  %5075 = vmatpush3.msra.mxu1 %v6651_v24 }
 0x58c   : > { %2035 = vmatprep.subr.mxu0 %v7162_v21  ;;  %5076 = vmatprep.subr.mxu1 %v8557_v30 }
 0x58d   : > { %2036 = vmatpush1.msra.mxu0 %v7166_v47  ;;  %5077 = vmatpush3.msra.mxu1 %v8577_v35 }
 0x58e   : > { %2037 = vmatprep.subr.mxu0 %v7170_v23  ;;  %5078 = vmatprep.subr.mxu1 %v8557_v30 }
 0x58f   : > { %2038 = vmatpush1.msra.mxu0 %v7174_v48  ;;  %2071 = vmatprep.mubr.f32.mxu0 %v8557_v30 }
 0x590   : > { %5079 = vmatpush3.msra.mxu1 %v8580_v39  ;;  %5080 = vmatprep.mubr.msk.f32.mxu1 %vm6122_vm5, %v8557_v30 }
 0x591   : > { %2176 = vmatprep.subr.mxu0 %v7027_v40  ;;  %5083 = vmatprep.subr.mxu1 %v8557_v30 }
 0x630   : > { %v1904_v24 = vpop.f32.mrf.mxu0  ;;  %v1975_v35 = vpop.f32.mrf.mxu1 }
 0x631   : > { %v1979_v50 = vadd.f32 %v1904_v24, %v8587_v49  ;;  %v1993_v62 = vadd.f32 %v6801_v16, %v1975_v35  ;;  %v7221_v35 = vld [vmem:[#allocation8 + $0xd0] sm:$0xff] }
 0x632   : > { %v5047_v52 = vpop.f32.mrf.mxu1  ;;  %v1906_v54 = vpop.f32.mrf.mxu0 }
 0x633   : > { %v4503_v53 = vmul.f32 -1.442695, %v1979_v50  ;;  %v1986_v56 = vadd.f32 %v1906_v54, %v8588_v55  ;;  %v7227_v54 = vld [vmem:[#allocation8 + $0xb8] sm:$0xff]  ;;  %v7233_v55 = vld [vmem:[#allocation8 + $0xa0] sm:$0xff] }
 0x635   : > { %5661 = vpow2.f32 %v4503_v53  ;;  %v4504_v58 = vmul.f32 -1.442695, %v1986_v56  ;;  %v7239_v56 = vld [vmem:[#allocation8 + $0x88] sm:$0xff] }
 0x637   : > { %5663 = vpow2.f32 %v4504_v58  ;;  %v7245_v58 = vld [vmem:[#allocation8 + $0x70] sm:$0xff] }
 0x642   : > { %v5662_v39 = vpop.eup %5661 }
 0x643   : > { %v1983_v59 = vadd.f32 1.0, %v5662_v39  ;;  %v7251_v39 = vld [vmem:[#allocation8 + $0x58] sm:$0xff] }
 0x644   : > { %v5664_v60 = vpop.eup %5663 }
 0x645   : > { %5665 = vrcp.f32 %v1983_v59  ;;  %v1990_v61 = vadd.f32 1.0, %v5664_v60  ;;  %v7257_v59 = vld [vmem:[#allocation8 + $0x40] sm:$0xff]  ;;  %v7263_v60 = vld [vmem:[#allocation8 + $0x28] sm:$0xff] }
 0x646   : > { %8590 = vst [vmem:[#allocation40_spill] sm:$0xff] %v7263_v60 }
 0x647   : > { %5667 = vrcp.f32 %v1990_v61  ;;  %v7270_v61 = vld [vmem:[#allocation8 + $0x10] sm:$0xff] }
 0x648   : > { %8591 = vst [vmem:[#allocation41_spill] sm:$0xff] %v7270_v61 }
 0x652   : > { %v5666_v0 = vpop.eup %5665 }
 0x653   : > { %v1994_v1 = vmul.f32 %v5666_v0, %v1993_v62 }
 0x654   : > { %v5668_v4 = vpop.eup %5667 }
 0x655   : > { %v1995_v3 = vadd.f32 %v1994_v1, %v8589_v2  ;;  %v1997_v24 = vsub.f32 1.0, %v5668_v4  ;;  %v1999_v52 = vmul.f32 %v5668_v4, %v7036_v6  ;;  %v8592_v1 = vld [vmem:[#allocation46_spill] sm:$0xff] }
 0x657   : > { %5669 = vtanh.f32 %v1995_v3 }
 0x664   : > { %v5670_v49 = vpop.eup %5669 }
 0x665   : > { %v1998_v50 = vmul.f32 %v5670_v49, %v1997_v24  ;;  %v8593_v49 = vld [vmem:[#allocation47_spill] sm:$0xff] }
 0x667   : > { %v7188_v53 = vadd.f32 %v1999_v52, %v1998_v50 }
 0x669   : > { %2072 = vmatmul.mubr.f32.vlgmr.msra.gmra.mxu0 %v7188_v53  ;;  %5081 = vmatmul.mubr.f32.vlgmr.msra.gmra.mxu1 %v7188_v53 }
 0x66a   : > { %2177 = vmatpush1.msra.mxu0 %v7040_v7  ;;  %5084 = vmatpush3.msra.mxu1 %v7043_v8 }
 0x66b   : > { %2178 = vmatprep.subr.mxu0 %v7046_v9  ;;  %5085 = vmatprep.subr.mxu1 %v8557_v30 }
 0x66c   : > { %2179 = vmatpush1.msra.mxu0 %v7050_v10  ;;  %5086 = vmatpush3.msra.mxu1 %v7053_v12 }
 0x66d   : > { %2180 = vmatprep.subr.mxu0 %v7056_v36  ;;  %5087 = vmatprep.subr.mxu1 %v8557_v30 }
 0x66e   : > { %2181 = vmatpush1.msra.mxu0 %v7060_v25  ;;  %5088 = vmatpush3.msra.mxu1 %v7063_v14 }
 0x66f   : > { %2182 = vmatprep.subr.mxu0 %v7066_v27  ;;  %5089 = vmatprep.subr.mxu1 %v8557_v30 }
 0x670   : > { %2183 = vmatpush1.msra.mxu0 %v7070_v22  ;;  %5090 = vmatpush3.msra.mxu1 %v7073_v17 }
 0x671   : > { %2184 = vmatprep.subr.mxu0 %v7076_v45  ;;  %5091 = vmatprep.subr.mxu1 %v8557_v30 }
 0x672   : > { %2185 = vmatpush1.msra.mxu0 %v7080_v13  ;;  %5092 = vmatpush3.msra.mxu1 %v7083_v51 }
 0x673   : > { %2186 = vmatprep.subr.mxu0 %v7086_v63  ;;  %5093 = vmatprep.subr.mxu1 %v8557_v30 }
 0x674   : > { %2187 = vmatpush1.msra.mxu0 %v7090_v29  ;;  %5094 = vmatpush3.msra.mxu1 %v7093_v28 }
 0x675   : > { %2188 = vmatprep.subr.mxu0 %v7096_v11  ;;  %5095 = vmatprep.subr.mxu1 %v8557_v30 }
 0x676   : > { %2189 = vmatpush1.msra.mxu0 %v7100_v5  ;;  %5096 = vmatpush3.msra.mxu1 %v7103_v26 }
 0x677   : > { %2190 = vmatprep.subr.mxu0 %v7106_v34  ;;  %5097 = vmatprep.subr.mxu1 %v8557_v30 }
 0x678   : > { %2191 = vmatpush1.msra.mxu0 %v7110_v32  ;;  %5098 = vmatpush3.msra.mxu1 %v7221_v35 }
 0x679   : > { %2192 = vmatprep.subr.mxu0 %v7114_v31  ;;  %5099 = vmatprep.subr.mxu1 %v8557_v30 }
 0x67a   : > { %2193 = vmatpush1.msra.mxu0 %v7118_v37  ;;  %5100 = vmatpush3.msra.mxu1 %v7227_v54 }
 0x67b   : > { %2194 = vmatprep.subr.mxu0 %v7122_v38  ;;  %5101 = vmatprep.subr.mxu1 %v8557_v30 }
 0x67c   : > { %2195 = vmatpush1.msra.mxu0 %v7126_v41  ;;  %5102 = vmatpush3.msra.mxu1 %v7233_v55 }
 0x67d   : > { %2196 = vmatprep.subr.mxu0 %v7130_v15  ;;  %5103 = vmatprep.subr.mxu1 %v8557_v30 }
 0x67e   : > { %2197 = vmatpush1.msra.mxu0 %v7134_v42  ;;  %5104 = vmatpush3.msra.mxu1 %v7239_v56 }
 0x67f   : > { %2198 = vmatprep.subr.mxu0 %v7138_v18  ;;  %5105 = vmatprep.subr.mxu1 %v8557_v30 }
 0x680   : > { %2199 = vmatpush1.msra.mxu0 %v7142_v43  ;;  %5106 = vmatpush3.msra.mxu1 %v7245_v58 }
 0x681   : > { %2200 = vmatprep.subr.mxu0 %v7146_v19  ;;  %5107 = vmatprep.subr.mxu1 %v8557_v30 }
 0x682   : > { %2201 = vmatpush1.msra.mxu0 %v7150_v44  ;;  %5108 = vmatpush3.msra.mxu1 %v7251_v39 }
 0x683   : > { %2202 = vmatprep.subr.mxu0 %v7154_v20  ;;  %5109 = vmatprep.subr.mxu1 %v8557_v30 }
 0x684   : > { %2203 = vmatpush1.msra.mxu0 %v7158_v46  ;;  %5110 = vmatpush3.msra.mxu1 %v7257_v59 }
 0x685   : > { %2204 = vmatprep.subr.mxu0 %v7162_v21  ;;  %5111 = vmatprep.subr.mxu1 %v8557_v30 }
 0x686   : > { %2205 = vmatpush1.msra.mxu0 %v7166_v47  ;;  %5112 = vmatpush3.msra.mxu1 %v7263_v60  ;;  %v8594_v60 = vld [vmem:[#allocation54_spill] sm:$0xff] }
 0x687   : > { %2206 = vmatprep.subr.mxu0 %v7170_v23  ;;  %5113 = vmatprep.subr.mxu1 %v8557_v30 }
 0x688   : > { %2207 = vmatpush1.msra.mxu0 %v7174_v48  ;;  %2240 = vmatprep.mubr.f32.mxu0 %v8557_v30 }
 0x689   : > { %5114 = vmatpush3.msra.mxu1 %v7270_v61  ;;  %5115 = vmatprep.mubr.msk.f32.mxu1 %vm6122_vm5, %v8557_v30 }
 0x68a   : > { %2345 = vmatprep.subr.mxu0 %v7027_v40  ;;  %5118 = vmatprep.subr.mxu1 %v8557_v30 }
 0x729   : > { %v2073_v62 = vpop.f32.mrf.mxu0  ;;  %v2144_v0 = vpop.f32.mrf.mxu1 }
 0x72a   : > { %v2148_v2 = vadd.f32 %v2073_v62, %v8592_v1  ;;  %v2162_v40 = vadd.f32 %v6801_v16, %v2144_v0  ;;  %v8595_v16 = vld [vmem:[#allocation40_spill] sm:$0xff]  ;;  %v2546_v0 = vld [vmem:[#allocation11 + $0xd8] sm:$0xff] }
 0x72b   : > { %v5082_v3 = vpop.f32.mrf.mxu1  ;;  %v2075_v24 = vpop.f32.mrf.mxu0 }
 0x72c   : > { %v4505_v4 = vmul.f32 -1.442695, %v2148_v2  ;;  %v2155_v50 = vadd.f32 %v2075_v24, %v8593_v49 }
 0x72e   : > { %5671 = vpow2.f32 %v4505_v4  ;;  %v4506_v52 = vmul.f32 -1.442695, %v2155_v50  ;;  %v2544_v50 = vld [vmem:[#allocation11 + $0xc8] sm:$0xff] }
 0x730   : > { %5673 = vpow2.f32 %v4506_v52  ;;  %v2545_v52 = vld [vmem:[#allocation11 + $0xd0] sm:$0xff] }
 0x73b   : > { %v5672_v6 = vpop.eup %5671 }
 0x73c   : > { %v2152_v57 = vadd.f32 1.0, %v5672_v6  ;;  %v8598_v6 = vld [vmem:[#allocation41_spill] sm:$0xff] }
 0x73d   : > { %v5674_v33 = vpop.eup %5673 }
 0x73e   : > { %5675 = vrcp.f32 %v2152_v57  ;;  %v2159_v61 = vadd.f32 1.0, %v5674_v33  ;;  %v8596_v33 = vld [vmem:[#allocation37_spill] sm:$0xff]  ;;  %v8597_v57 = vld [vmem:[#allocation31_spill] sm:$0xff] }
 0x740   : > { %5677 = vrcp.f32 %v2159_v61  ;;  %v2548_v61 = vld [vmem:[#allocation11 + $0xe8] sm:$0xff] }
 0x74b   : > { %v5676_v48 = vpop.eup %5675 }
 0x74c   : > { %v2163_v23 = vmul.f32 %v5676_v48, %v2162_v40  ;;  %v2557_v48 = vld [vmem:[#allocation11 + $0x130] sm:$0xff]  ;;  %v2543_v40 = vld [vmem:[#allocation11 + $0xc0] sm:$0xff] }
 0x74d   : > { %v5678_v1 = vpop.eup %5677 }
 0x74e   : > { %v2164_v62 = vadd.f32 %v2163_v23, %v8594_v60  ;;  %v2166_v2 = vsub.f32 1.0, %v5678_v1  ;;  %v2168_v24 = vmul.f32 %v5678_v1, %v7188_v53  ;;  %v2556_v23 = vld [vmem:[#allocation11 + $0x128] sm:$0xff]  ;;  %v2547_v60 = vld [vmem:[#allocation11 + $0xe0] sm:$0xff]  ;;  %v2542_v1 = vld [vmem:[#allocation11 + $0xb8] sm:$0xff] }
 0x750   : > { %5679 = vtanh.f32 %v2164_v62  ;;  %v2541_v62 = vld [vmem:[#allocation11 + $0xb0] sm:$0xff] }
 0x75d   : > { %v5680_v3 = vpop.eup %5679 }
 0x75e   : > { %v2167_v4 = vmul.f32 %v5680_v3, %v2166_v2  ;;  %v2540_v2 = vld [vmem:[#allocation11 + $0xa8] sm:$0xff]  ;;  %v2538_v3 = vld [vmem:[#allocation11 + $0x98] sm:$0xff] }
 0x760   : > { %v7282_v49 = vadd.f32 %v2168_v24, %v2167_v4  ;;  %v2539_v4 = vld [vmem:[#allocation11 + $0xa0] sm:$0xff]  ;;  %v2537_v24 = vld [vmem:[#allocation11 + $0x90] sm:$0xff] }
 0x762   : > { %2241 = vmatmul.mubr.f32.vlgmr.msra.gmra.mxu0 %v7282_v49  ;;  %5116 = vmatmul.mubr.f32.vlgmr.msra.gmra.mxu1 %v7282_v49 }
 0x763   : > { %2346 = vmatpush1.msra.mxu0 %v7040_v7  ;;  %5119 = vmatpush3.msra.mxu1 %v7043_v8  ;;  %v2565_v7 = vld [vmem:[#allocation11 + $0x170] sm:$0xff]  ;;  %v2566_v8 = vld [vmem:[#allocation11 + $0x178] sm:$0xff] }
 0x764   : > { %2347 = vmatprep.subr.mxu0 %v7046_v9  ;;  %5120 = vmatprep.subr.mxu1 %v8557_v30 }
 0x765   : > { %2348 = vmatpush1.msra.mxu0 %v7050_v10  ;;  %5121 = vmatpush3.msra.mxu1 %v7053_v12  ;;  %v8599_v12 = vld [vmem:[#allocation48_spill] sm:$0xff] }
 0x766   : > { %2349 = vmatprep.subr.mxu0 %v7056_v36  ;;  %5122 = vmatprep.subr.mxu1 %v8557_v30 }
 0x767   : > { %2350 = vmatpush1.msra.mxu0 %v7060_v25  ;;  %5123 = vmatpush3.msra.mxu1 %v7063_v14 }
 0x768   : > { %2351 = vmatprep.subr.mxu0 %v7066_v27  ;;  %5124 = vmatprep.subr.mxu1 %v8557_v30 }
 0x769   : > { %2352 = vmatpush1.msra.mxu0 %v7070_v22  ;;  %5125 = vmatpush3.msra.mxu1 %v7073_v17  ;;  %v8600_v22 = vld [vmem:[#allocation49_spill] sm:$0xff] }
 0x76a   : > { %2353 = vmatprep.subr.mxu0 %v7076_v45  ;;  %5126 = vmatprep.subr.mxu1 %v8557_v30 }
 0x76b   : > { %2354 = vmatpush1.msra.mxu0 %v7080_v13  ;;  %5127 = vmatpush3.msra.mxu1 %v7083_v51 }
 0x76c   : > { %2355 = vmatprep.subr.mxu0 %v7086_v63  ;;  %5128 = vmatprep.subr.mxu1 %v8557_v30 }
 0x76d   : > { %2356 = vmatpush1.msra.mxu0 %v7090_v29  ;;  %5129 = vmatpush3.msra.mxu1 %v7093_v28  ;;  %v7356_v28 = vld [vmem:[%s8555_s28] ss:$0 sm:$0xff] }
 0x76e   : > { %2357 = vmatprep.subr.mxu0 %v7096_v11  ;;  %5130 = vmatprep.subr.mxu1 %v8557_v30 }
 0x76f   : > { %2358 = vmatpush1.msra.mxu0 %v7100_v5  ;;  %5131 = vmatpush3.msra.mxu1 %v7103_v26 }
 0x770   : > { %2359 = vmatprep.subr.mxu0 %v7106_v34  ;;  %5132 = vmatprep.subr.mxu1 %v8557_v30  ;;  %v8601_v34 = vld [vmem:[#allocation57_spill] sm:$0xff] }
 0x771   : > { %2360 = vmatpush1.msra.mxu0 %v7110_v32  ;;  %5133 = vmatpush3.msra.mxu1 %v7221_v35  ;;  %v2555_v35 = vld [vmem:[#allocation11 + $0x120] sm:$0xff] }
 0x772   : > { %2361 = vmatprep.subr.mxu0 %v7114_v31  ;;  %5134 = vmatprep.subr.mxu1 %v8557_v30 }
 0x773   : > { %2362 = vmatpush1.msra.mxu0 %v7118_v37  ;;  %5135 = vmatpush3.msra.mxu1 %v7227_v54  ;;  %v2553_v54 = vld [vmem:[#allocation11 + $0x110] sm:$0xff] }
 0x774   : > { %2363 = vmatprep.subr.mxu0 %v7122_v38  ;;  %5136 = vmatprep.subr.mxu1 %v8557_v30 }
 0x775   : > { %2364 = vmatpush1.msra.mxu0 %v7126_v41  ;;  %5137 = vmatpush3.msra.mxu1 %v7233_v55  ;;  %v2554_v55 = vld [vmem:[#allocation11 + $0x118] sm:$0xff] }
 0x776   : > { %2365 = vmatprep.subr.mxu0 %v7130_v15  ;;  %5138 = vmatprep.subr.mxu1 %v8557_v30 }
 0x777   : > { %2366 = vmatpush1.msra.mxu0 %v7134_v42  ;;  %5139 = vmatpush3.msra.mxu1 %v7239_v56  ;;  %v2552_v56 = vld [vmem:[#allocation11 + $0x108] sm:$0xff] }
 0x778   : > { %2367 = vmatprep.subr.mxu0 %v7138_v18  ;;  %5140 = vmatprep.subr.mxu1 %v8557_v30  ;;  %v2564_v18 = vld [vmem:[#allocation11 + $0x168] sm:$0xff] }
 0x779   : > { %2368 = vmatpush1.msra.mxu0 %v7142_v43  ;;  %5141 = vmatpush3.msra.mxu1 %v7245_v58  ;;  %v2562_v43 = vld [vmem:[#allocation11 + $0x158] sm:$0xff] }
 0x77a   : > { %2369 = vmatprep.subr.mxu0 %v7146_v19  ;;  %5142 = vmatprep.subr.mxu1 %v8557_v30  ;;  %v2563_v19 = vld [vmem:[#allocation11 + $0x160] sm:$0xff]  ;;  %v2550_v58 = vld [vmem:[#allocation11 + $0xf8] sm:$0xff] }
 0x77b   : > { %2370 = vmatpush1.msra.mxu0 %v7150_v44  ;;  %5143 = vmatpush3.msra.mxu1 %v7251_v39  ;;  %v2561_v44 = vld [vmem:[#allocation11 + $0x150] sm:$0xff]  ;;  %v2551_v39 = vld [vmem:[#allocation11 + $0x100] sm:$0xff] }
 0x77c   : > { %2371 = vmatprep.subr.mxu0 %v7154_v20  ;;  %5144 = vmatprep.subr.mxu1 %v8557_v30  ;;  %v2559_v20 = vld [vmem:[#allocation11 + $0x140] sm:$0xff] }
 0x77d   : > { %2372 = vmatpush1.msra.mxu0 %v7158_v46  ;;  %5145 = vmatpush3.msra.mxu1 %v7257_v59  ;;  %v2560_v46 = vld [vmem:[#allocation11 + $0x148] sm:$0xff]  ;;  %v2549_v59 = vld [vmem:[#allocation11 + $0xf0] sm:$0xff] }
 0x77e   : > { %2373 = vmatprep.subr.mxu0 %v7162_v21  ;;  %5146 = vmatprep.subr.mxu1 %v8557_v30  ;;  %v2558_v21 = vld [vmem:[#allocation11 + $0x138] sm:$0xff] }
 0x77f   : > { %2374 = vmatpush1.msra.mxu0 %v7166_v47  ;;  %5147 = vmatpush3.msra.mxu1 %v8595_v16  ;;  %v8602_v47 = vld [vmem:[#allocation58_spill] sm:$0xff] }
 0x780   : > { %2375 = vmatprep.subr.mxu0 %v8596_v33  ;;  %5148 = vmatprep.subr.mxu1 %v8557_v30  ;;  %v2535_v16 = vld [vmem:[#allocation11 + $0x80] sm:$0xff]  ;;  %v2536_v33 = vld [vmem:[#allocation11 + $0x88] sm:$0xff] }
 0x781   : > { %2376 = vmatpush1.msra.mxu0 %v8597_v57  ;;  %5149 = vmatpush3.msra.mxu1 %v8598_v6  ;;  %v2534_v57 = vld [vmem:[#allocation11 + $0x78] sm:$0xff]  ;;  %v2532_v6 = vld [vmem:[#allocation11 + $0x68] sm:$0xff] }
 0x782   : > { %2409 = vmatprep.mubr.f32.mxu0 %v8557_v30  ;;  %5150 = vmatprep.mubr.msk.f32.mxu1 %vm6122_vm5, %v8557_v30 }
 0x783   : > { %2584 = vmatprep.subr.mxu0 %v2565_v7  ;;  %5153 = vmatprep.subr.mxu1 %v2566_v8  ;;  %v2533_v7 = vld [vmem:[#allocation11 + $0x70] sm:$0xff] }
 0x822   : > { %v2242_v9 = vpop.f32.mrf.mxu0  ;;  %v2313_v10 = vpop.f32.mrf.mxu1 }
 0x823   : > { %v2317_v36 = vadd.f32 %v2242_v9, %v8599_v12  ;;  %v2331_v11 = vadd.f32 %v7356_v28, %v2313_v10  ;;  %v2529_v9 = vld [vmem:[#allocation11 + $0x50] sm:$0xff]  ;;  %v2530_v10 = vld [vmem:[#allocation11 + $0x58] sm:$0xff]  ;;  %v2528_v12 = vld [vmem:[#allocation11 + $0x48] sm:$0xff] }
 0x824   : > { %v5117_v25 = vpop.f32.mrf.mxu1  ;;  %v2244_v27 = vpop.f32.mrf.mxu0 }
 0x825   : > { %v4507_v14 = vmul.f32 -1.442695, %v2317_v36  ;;  %v2324_v17 = vadd.f32 %v2244_v27, %v8600_v22  ;;  %v2526_v36 = vld [vmem:[#allocation11 + $0x38] sm:$0xff]  ;;  %v2527_v25 = vld [vmem:[#allocation11 + $0x40] sm:$0xff]  ;;  %v2524_v22 = vld [vmem:[#allocation11 + $0x28] sm:$0xff] }
 0x826   : > { %v2523_v27 = vld [vmem:[#allocation11 + $0x20] sm:$0xff] }
 0x827   : > { %5681 = vpow2.f32 %v4507_v14  ;;  %v4508_v45 = vmul.f32 -1.442695, %v2324_v17  ;;  %v2525_v14 = vld [vmem:[#allocation11 + $0x30] sm:$0xff]  ;;  %v2522_v17 = vld [vmem:[#allocation11 + $0x18] sm:$0xff] }
 0x829   : > { %5683 = vpow2.f32 %v4508_v45  ;;  %v2520_v45 = vld [vmem:[#allocation11 + $0x8] sm:$0xff] }
 0x834   : > { %v5682_v13 = vpop.eup %5681 }
 0x835   : > { %v2321_v51 = vadd.f32 1.0, %v5682_v13  ;;  %v2521_v13 = vld [vmem:[#allocation11 + $0x10] sm:$0xff] }
 0x836   : > { %v5684_v63 = vpop.eup %5683 }
 0x837   : > { %5685 = vrcp.f32 %v2321_v51  ;;  %v2328_v29 = vadd.f32 1.0, %v5684_v63  ;;  %v2519_v51 = vld [vmem:[#allocation11] sm:$0xff]  ;;  %v8603_v63 = vld [vmem:[#allocation32_spill] sm:$0xff] }
 0x839   : > { %5687 = vrcp.f32 %v2328_v29  ;;  %v8604_v29 = vld [vmem:[#allocation38_spill] sm:$0xff] }
 0x844   : > { %v5686_v5 = vpop.eup %5685 }
 0x845   : > { %v2332_v26 = vmul.f32 %v5686_v5, %v2331_v11  ;;  %v8605_v11 = vld [vmem:[#allocation39_spill] sm:$0xff]  ;;  %v7388_v5 = vld [vmem:[#allocation13 + $0x170] sm:$0xff] }
 0x846   : > { %v5688_v31 = vpop.eup %5687  ;;  %8606 = vst [vmem:[#allocation53_spill] sm:$0xff] %v7388_v5 }
 0x847   : > { %v2333_v32 = vadd.f32 %v2332_v26, %v8601_v34  ;;  %v2335_v37 = vsub.f32 1.0, %v5688_v31  ;;  %v2337_v15 = vmul.f32 %v5688_v31, %v7282_v49  ;;  %v7391_v26 = vld [vmem:[#allocation13 + $0x168] sm:$0xff]  ;;  %v7394_v34 = vld [vmem:[#allocation13 + $0x158] sm:$0xff] }
 0x848   : > { %v7406_v31 = vld [vmem:[#allocation13 + $0x128] sm:$0xff] }
 0x849   : > { %5689 = vtanh.f32 %v2333_v32  ;;  %v7403_v32 = vld [vmem:[#allocation13 + $0x138] sm:$0xff] }
 0x856   : > { %v5690_v38 = vpop.eup %5689 }
 0x857   : > { %v2336_v41 = vmul.f32 %v5690_v38, %v2335_v37  ;;  %v7409_v37 = vld [vmem:[#allocation13 + $0x120] sm:$0xff]  ;;  %v7412_v38 = vld [vmem:[#allocation13 + $0x110] sm:$0xff] }
 0x859   : > { %v7361_v42 = vadd.f32 %v2337_v15, %v2336_v41  ;;  %v7415_v41 = vld [vmem:[#allocation13 + $0x108] sm:$0xff]  ;;  %v7418_v15 = vld [vmem:[#allocation13 + $0xf8] sm:$0xff] }
 0x85b   : > { %2410 = vmatmul.mubr.f32.vlgmr.msra.gmra.mxu0 %v7361_v42  ;;  %5151 = vmatmul.mubr.f32.vlgmr.msra.gmra.mxu1 %v7361_v42 }
 0x85c   : > { %2585 = vmatpush1.msra.mxu0 %v2564_v18  ;;  %5154 = vmatpush3.msra.mxu1 %v2566_v8  ;;  %v2531_v8 = vld [vmem:[#allocation11 + $0x60] sm:$0xff]  ;;  %v7421_v18 = vld [vmem:[#allocation13 + $0xf0] sm:$0xff] }
 0x85d   : > { %2586 = vmatprep.subr.mxu0 %v2562_v43  ;;  %5155 = vmatprep.subr.mxu1 %v2563_v19  ;;  %v7424_v43 = vld [vmem:[#allocation13 + $0xe0] sm:$0xff] }
 0x85e   : > { %5185 = vmatprep.mubr.f32.mxu1 %v8602_v47  ;;  %2587 = vmatpush1.msra.mxu0 %v2561_v44  ;;  %v7430_v44 = vld [vmem:[#allocation13 + $0xc8] sm:$0xff] }
 0x85f   : > { %5156 = vmatpush3.msra.mxu1 %v2563_v19  ;;  %2588 = vmatprep.subr.mxu0 %v2559_v20  ;;  %v7427_v19 = vld [vmem:[#allocation13 + $0xd8] sm:$0xff]  ;;  %v7433_v20 = vld [vmem:[#allocation13 + $0xc0] sm:$0xff] }
 0x860   : > { %5157 = vmatprep.subr.mxu1 %v2560_v46  ;;  %2589 = vmatpush1.msra.mxu0 %v2558_v21  ;;  %v7439_v21 = vld [vmem:[#allocation13 + $0xa8] sm:$0xff] }
 0x861   : > { %5158 = vmatpush3.msra.mxu1 %v2560_v46  ;;  %2590 = vmatprep.subr.mxu0 %v2556_v23  ;;  %v7436_v46 = vld [vmem:[#allocation13 + $0xb0] sm:$0xff] }
 0x862   : > { %5159 = vmatprep.subr.mxu1 %v2557_v48  ;;  %2591 = vmatpush1.msra.mxu0 %v2555_v35  ;;  %v7445_v23 = vld [vmem:[#allocation13 + $0x90] sm:$0xff]  ;;  %v7451_v35 = vld [vmem:[#allocation13 + $0x78] sm:$0xff] }
 0x863   : > { %5160 = vmatpush3.msra.mxu1 %v2557_v48  ;;  %2592 = vmatprep.subr.mxu0 %v2553_v54  ;;  %v7448_v48 = vld [vmem:[#allocation13 + $0x80] sm:$0xff]  ;;  %v7454_v54 = vld [vmem:[#allocation13 + $0x68] sm:$0xff] }
 0x864   : > { %5161 = vmatprep.subr.mxu1 %v2554_v55  ;;  %2593 = vmatpush1.msra.mxu0 %v2552_v56  ;;  %v7460_v56 = vld [vmem:[#allocation13 + $0x50] sm:$0xff] }
 0x865   : > { %5162 = vmatpush3.msra.mxu1 %v2554_v55  ;;  %2594 = vmatprep.subr.mxu0 %v2550_v58  ;;  %v7457_v55 = vld [vmem:[#allocation13 + $0x60] sm:$0xff]  ;;  %v7463_v58 = vld [vmem:[#allocation13 + $0x48] sm:$0xff] }
 0x866   : > { %5163 = vmatprep.subr.mxu1 %v2551_v39  ;;  %2595 = vmatpush1.msra.mxu0 %v2549_v59  ;;  %v7469_v59 = vld [vmem:[#allocation13 + $0x30] sm:$0xff] }
 0x867   : > { %5164 = vmatpush3.msra.mxu1 %v2551_v39  ;;  %2596 = vmatprep.subr.mxu0 %v2547_v60  ;;  %v7466_v39 = vld [vmem:[#allocation13 + $0x38] sm:$0xff]  ;;  %v7472_v60 = vld [vmem:[#allocation13 + $0x20] sm:$0xff] }
 0x868   : > { %5165 = vmatprep.subr.mxu1 %v2548_v61  ;;  %2597 = vmatpush1.msra.mxu0 %v2546_v0  ;;  %v7478_v0 = vld [vmem:[#allocation13 + $0x8] sm:$0xff] }
 0x869   : > { %5166 = vmatpush3.msra.mxu1 %v2548_v61  ;;  %2598 = vmatprep.subr.mxu0 %v2544_v50  ;;  %v7475_v61 = vld [vmem:[#allocation13 + $0x18] sm:$0xff]  ;;  %8608 = vst [vmem:[#allocation33_spill] sm:$0xff] %v7478_v0  ;;  %v7480_v50 = vld [vmem:[#allocation13] sm:$0xff] }
 0x86a   : > { %5167 = vmatprep.subr.mxu1 %v2545_v52  ;;  %2599 = vmatpush1.msra.mxu0 %v2543_v40  ;;  %8607 = vst [vmem:[#allocation35_spill] sm:$0xff] %v7475_v61  ;;  %8609 = vst [vmem:[#allocation34_spill] sm:$0xff] %v7480_v50  ;;  %v7485_v40 = vld [vmem:[#allocation13 + $0x160] sm:$0xff] }
 0x86b   : > { %5168 = vmatpush3.msra.mxu1 %v2545_v52  ;;  %2600 = vmatprep.subr.mxu0 %v2541_v62  ;;  %v7483_v52 = vld [vmem:[#allocation13 + $0x178] sm:$0xff]  ;;  %v7490_v62 = vld [vmem:[#allocation13 + $0x148] sm:$0xff] }
 0x86c   : > { %5169 = vmatprep.subr.mxu1 %v2542_v1  ;;  %2601 = vmatpush1.msra.mxu0 %v2540_v2  ;;  %v7499_v2 = vld [vmem:[#allocation13 + $0x118] sm:$0xff] }
 0x86d   : > { %5170 = vmatpush3.msra.mxu1 %v2542_v1  ;;  %2602 = vmatprep.subr.mxu0 %v2538_v3  ;;  %v7495_v1 = vld [vmem:[#allocation13 + $0x130] sm:$0xff]  ;;  %v7503_v3 = vld [vmem:[#allocation13 + $0x100] sm:$0xff] }
 0x86e   : > { %5171 = vmatprep.subr.mxu1 %v2539_v4  ;;  %2603 = vmatpush1.msra.mxu0 %v2537_v24  ;;  %v7511_v24 = vld [vmem:[#allocation13 + $0xd0] sm:$0xff] }
 0x86f   : > { %5172 = vmatpush3.msra.mxu1 %v2539_v4  ;;  %2604 = vmatprep.subr.mxu0 %v2535_v16  ;;  %v7507_v4 = vld [vmem:[#allocation13 + $0xe8] sm:$0xff]  ;;  %v7515_v16 = vld [vmem:[#allocation13 + $0xb8] sm:$0xff] }
 0x870   : > { %5173 = vmatprep.subr.mxu1 %v2536_v33  ;;  %2605 = vmatpush1.msra.mxu0 %v2534_v57  ;;  %v7523_v57 = vld [vmem:[#allocation13 + $0x88] sm:$0xff] }
 0x871   : > { %5174 = vmatpush3.msra.mxu1 %v2536_v33  ;;  %2606 = vmatprep.subr.mxu0 %v2532_v6  ;;  %v7519_v33 = vld [vmem:[#allocation13 + $0xa0] sm:$0xff]  ;;  %v7527_v6 = vld [vmem:[#allocation13 + $0x70] sm:$0xff] }
 0x872   : > { %5175 = vmatprep.subr.mxu1 %v2533_v7  ;;  %2607 = vmatpush1.msra.mxu0 %v2531_v8  ;;  %v7535_v8 = vld [vmem:[#allocation13 + $0x40] sm:$0xff] }
 0x873   : > { %5176 = vmatpush3.msra.mxu1 %v2533_v7  ;;  %2608 = vmatprep.subr.mxu0 %v2529_v9  ;;  %v7531_v7 = vld [vmem:[#allocation13 + $0x58] sm:$0xff]  ;;  %v7539_v9 = vld [vmem:[#allocation13 + $0x28] sm:$0xff] }
 0x874   : > { %5177 = vmatprep.subr.mxu1 %v2530_v10  ;;  %2609 = vmatpush1.msra.mxu0 %v2528_v12  ;;  %8610 = vst [vmem:[#allocation36_spill] sm:$0xff] %v7539_v9 }
 0x875   : > { %5178 = vmatpush3.msra.mxu1 %v2530_v10  ;;  %2610 = vmatprep.subr.mxu0 %v2526_v36  ;;  %v7543_v10 = vld [vmem:[#allocation13 + $0x10] sm:$0xff] }
 0x876   : > { %5179 = vmatprep.subr.mxu1 %v2527_v25  ;;  %2611 = vmatpush1.msra.mxu0 %v2525_v14  ;;  %8611 = vst [vmem:[#allocation42_spill] sm:$0xff] %v7543_v10 }
 0x877   : > { %5180 = vmatpush3.msra.mxu1 %v2527_v25  ;;  %2612 = vmatprep.subr.mxu0 %v2523_v27  ;;  %v8612_v25 = vld [vmem:[#allocation50_spill] sm:$0xff] }
 0x878   : > { %5181 = vmatprep.subr.mxu1 %v2524_v22  ;;  %2613 = vmatpush1.msra.mxu0 %v2522_v17 }
 0x879   : > { %5182 = vmatpush3.msra.mxu1 %v2524_v22  ;;  %2614 = vmatprep.subr.mxu0 %v2520_v45  ;;  %v8613_v45 = vld [vmem:[#allocation51_spill] sm:$0xff] }
 0x87a   : > { %5183 = vmatprep.subr.mxu1 %v2521_v13  ;;  %2615 = vmatpush1.msra.mxu0 %v2519_v51 }
 0x87b   : > { %2648 = vmatprep.mubr.f32.mxu0 %v8557_v30  ;;  %5184 = vmatpush3.msra.mxu1 %v2521_v13 }
 0x87c   : > { %2649 = vmatmul.mubr.f32.vlgmr.msra.gmra.mxu0 %v8602_v47  ;;  %5186 = vmatmul.mubr.f32.vlgmr.msra.gmra.mxu1 %v8603_v63  ;;  %v7442_v47 = vld [vmem:[#allocation13 + $0x98] sm:$0xff] }
 0x87d   : > { %5188 = vmatprep.mubr.f32.mxu1 %v8604_v29  ;;  %2654 = vmatprep.mubr.f32.mxu0 %v8557_v30 }
 0x87e   : > { %5197 = vmatprep.subr.mxu1 %v8557_v30  ;;  %2886 = vmatprep.subr.mxu0 %v7388_v5 }
 0x87f   : > { %2887 = vmatpush1.msra.mxu0 %v7391_v26  ;;  %5198 = vmatpush3.msra.mxu1 %v7483_v52 }
 0x880   : > { %2655 = vmatmul.mubr.f32.gmra.mxu0 %v8603_v63  ;;  %5189 = vmatmul.mubr.f32.gmra.mxu1 %v8605_v11 }
 0x881   : > { %5191 = vmatprep.mubr.f32.mxu1 %v7188_v53  ;;  %2660 = vmatprep.mubr.f32.mxu0 %v8557_v30 }
 0x882   : > { %2888 = vmatprep.subr.mxu0 %v7394_v34  ;;  %5199 = vmatprep.subr.mxu1 %v8557_v30 }
 0x883   : > { %5200 = vmatpush3.msra.mxu1 %v7485_v40 }
 0x884   : > { %2661 = vmatmul.mubr.f32.gmra.mxu0 %v8604_v29  ;;  %5192 = vmatmul.mubr.f32.gmra.mxu1 %v7282_v49 }
 0x885   : > { %5194 = vmatprep.mubr.f32.mxu1 %v7361_v42  ;;  %2666 = vmatprep.mubr.f32.mxu0 %v8557_v30 }
 0x886   : > { %5201 = vmatprep.subr.mxu1 %v8557_v30 }
 0x887   : > { %5202 = vmatpush3.msra.mxu1 %v7490_v62 }
 0x888   : > { %2667 = vmatmul.mubr.f32.gmra.mxu0 %v8605_v11  ;;  %5203 = vmatprep.subr.mxu1 %v8557_v30 }
 0x889   : > { %2672 = vmatprep.mubr.f32.mxu0 %v8557_v30  ;;  %5204 = vmatpush3.msra.mxu1 %v7495_v1 }
 0x88a   : > { %5205 = vmatprep.subr.mxu1 %v8557_v30 }
 0x88b   : > { %5206 = vmatpush3.msra.mxu1 %v7499_v2 }
 0x88c   : > { %2673 = vmatmul.mubr.f32.gmra.mxu0 %v7188_v53  ;;  %v7397_v53 = vld [vmem:[#allocation13 + $0x150] sm:$0xff]  ;;  %5207 = vmatprep.subr.mxu1 %v8557_v30 }
 0x88d   : > { %2678 = vmatprep.mubr.f32.mxu0 %v8557_v30  ;;  %2889 = vmatpush1.msra.mxu0 %v7397_v53 }
 0x88e   : > { %5208 = vmatpush3.msra.mxu1 %v7503_v3 }
 0x88f   : > { %5209 = vmatprep.subr.mxu1 %v8557_v30 }
 0x890   : > { %2679 = vmatmul.mubr.f32.gmra.mxu0 %v7282_v49  ;;  %v7400_v49 = vld [vmem:[#allocation13 + $0x140] sm:$0xff]  ;;  %5210 = vmatpush3.msra.mxu1 %v7507_v4 }
 0x891   : > { %2684 = vmatprep.mubr.f32.mxu0 %v8557_v30  ;;  %2890 = vmatprep.subr.mxu0 %v7400_v49 }
 0x892   : > { %2891 = vmatpush1.msra.mxu0 %v7403_v32  ;;  %5211 = vmatprep.subr.mxu1 %v8557_v30 }
 0x893   : > { %2892 = vmatprep.subr.mxu0 %v7406_v31  ;;  %5212 = vmatpush3.msra.mxu1 %v7511_v24 }
 0x894   : > { %2685 = vmatmul.mubr.f32.gmra.mxu0 %v7361_v42  ;;  %5213 = vmatprep.subr.mxu1 %v8557_v30 }
 0x895   : > { %2690 = vmatprep.mubr.f32.mxu0 %v8557_v30  ;;  %2893 = vmatpush1.msra.mxu0 %v7409_v37 }
 0x896   : > { %2894 = vmatprep.subr.mxu0 %v7412_v38  ;;  %5214 = vmatpush3.msra.mxu1 %v7515_v16 }
 0x897   : > { %2895 = vmatpush1.msra.mxu0 %v7415_v41  ;;  %5215 = vmatprep.subr.mxu1 %v8557_v30 }
 0x898   : > { %2896 = vmatprep.subr.mxu0 %v7418_v15  ;;  %5216 = vmatpush3.msra.mxu1 %v7519_v33 }
 0x899   : > { %2897 = vmatpush1.msra.mxu0 %v7421_v18  ;;  %5217 = vmatprep.subr.mxu1 %v8557_v30 }
 0x89a   : > { %2898 = vmatprep.subr.mxu0 %v7424_v43  ;;  %5218 = vmatpush3.msra.mxu1 %v7523_v57 }
 0x89b   : > { %2899 = vmatpush1.msra.mxu0 %v7427_v19  ;;  %5219 = vmatprep.subr.mxu1 %v8557_v30 }
 0x89c   : > { %2900 = vmatprep.subr.mxu0 %v7430_v44  ;;  %5220 = vmatpush3.msra.mxu1 %v7527_v6 }
 0x89d   : > { %2901 = vmatpush1.msra.mxu0 %v7433_v20  ;;  %5221 = vmatprep.subr.mxu1 %v8557_v30 }
 0x89e   : > { %2902 = vmatprep.subr.mxu0 %v7436_v46  ;;  %5222 = vmatpush3.msra.mxu1 %v7531_v7 }
 0x89f   : > { %2903 = vmatpush1.msra.mxu0 %v7439_v21  ;;  %5223 = vmatprep.subr.mxu1 %v8557_v30 }
 0x8a0   : > { %2904 = vmatprep.subr.mxu0 %v7442_v47  ;;  %5224 = vmatpush3.msra.mxu1 %v7535_v8 }
 0x8a1   : > { %2905 = vmatpush1.msra.mxu0 %v7445_v23  ;;  %5225 = vmatprep.subr.mxu1 %v8557_v30 }
 0x8a2   : > { %2906 = vmatprep.subr.mxu0 %v7448_v48  ;;  %5226 = vmatpush3.msra.mxu1 %v7539_v9  ;;  %v8614_v9 = vld [vmem:[#allocation56_spill] sm:$0xff] }
 0x8a3   : > { %2907 = vmatpush1.msra.mxu0 %v7451_v35  ;;  %5227 = vmatprep.subr.mxu1 %v8557_v30 }
 0x8a4   : > { %2908 = vmatprep.subr.mxu0 %v7454_v54  ;;  %5228 = vmatpush3.msra.mxu1 %v7543_v10 }
 0x8a5   : > { %2909 = vmatpush1.msra.mxu0 %v7457_v55  ;;  %5232 = vmatprep.subr.mxu1 %v8557_v30 }
 0x8a6   : > { %2910 = vmatprep.subr.mxu0 %v7460_v56 }
 0x8a7   : > { %2911 = vmatpush1.msra.mxu0 %v7463_v58 }
 0x8a8   : > { %2912 = vmatprep.subr.mxu0 %v7466_v39 }
 0x8a9   : > { %2913 = vmatpush1.msra.mxu0 %v7469_v59 }
 0x8aa   : > { %2914 = vmatprep.subr.mxu0 %v7472_v60 }
 0x8ab   : > { %2915 = vmatpush1.msra.mxu0 %v7475_v61 }
 0x8ac   : > { %2916 = vmatprep.subr.mxu0 %v7478_v0 }
 0x8ad   : > { %2917 = vmatpush1.msra.mxu0 %v7480_v50 }
 0x8ae   : > { %3053 = vmatprep.subr.mxu0 %v7388_v5 }
 0x91b   : > { %v2411_v12 = vpop.f32.mrf.mxu0  ;;  %v2482_v36 = vpop.f32.mrf.mxu1 }
 0x91c   : > { %v2486_v14 = vadd.f32 %v2411_v12, %v8612_v25  ;;  %v2500_v10 = vadd.f32 %v7356_v28, %v2482_v36  ;;  %v8615_v28 = vld [vmem:[#allocation36_spill] sm:$0xff] }
 0x91d   : > { %v5152_v27 = vpop.f32.mrf.mxu1  ;;  %v2413_v17 = vpop.f32.mrf.mxu0 }
 0x91e   : > { %v4509_v22 = vmul.f32 -1.442695, %v2486_v14  ;;  %v2493_v13 = vadd.f32 %v2413_v17, %v8613_v45 }
 0x920   : > { %5691 = vpow2.f32 %v4509_v22  ;;  %v4510_v51 = vmul.f32 -1.442695, %v2493_v13  ;;  %v7555_v13 = vld [vmem:[#allocation4 + $0x8] sm:$0xff] }
 0x922   : > { %5693 = vpow2.f32 %v4510_v51 }
 0x92d   : > { %v5692_v63 = vpop.eup %5691 }
 0x92e   : > { %v2490_v29 = vadd.f32 1.0, %v5692_v63 }
 0x92f   : > { %v5694_v11 = vpop.eup %5693 }
 0x930   : > { %5695 = vrcp.f32 %v2490_v29  ;;  %v2497_v5 = vadd.f32 1.0, %v5694_v11 }
 0x932   : > { %5697 = vrcp.f32 %v2497_v5  ;;  %v8617_v5 = vld [vmem:[#allocation34_spill] sm:$0xff] }
 0x93d   : > { %v5696_v50 = vpop.eup %5695 }
 0x93e   : > { %v2501_v0 = vmul.f32 %v5696_v50, %v2500_v10  ;;  %v8619_v50 = vld [vmem:[#allocation53_spill] sm:$0xff] }
 0x93f   : > { %v5698_v25 = vpop.eup %5697 }
 0x940   : > { %v2502_v12 = vadd.f32 %v2501_v0, %v8614_v9  ;;  %v2504_v14 = vsub.f32 1.0, %v5698_v25  ;;  %v2506_v17 = vmul.f32 %v5698_v25, %v7361_v42  ;;  %v8616_v42 = vld [vmem:[#allocation33_spill] sm:$0xff]  ;;  %v8618_v0 = vld [vmem:[#allocation42_spill] sm:$0xff]  ;;  %v2650_v9 = vpop.f32.mrf.mxu0  ;;  %v7640_v25 = vpop.f32.mrf.mxu1 }
 0x941   : > { %8626 = vst [vmem:[#allocation47_spill] sm:$0xff] %v7640_v25 }
 0x942   : > { %5699 = vtanh.f32 %v2502_v12  ;;  %v2652_v10 = vpop.f32.mrf.mxu0 }
 0x944   : > { %v7628_v36 = vpop.f32.mrf.mxu0 }
 0x945   : > { %8620 = vst [vmem:[#allocation43_spill] sm:$0xff] %v7628_v36 }
 0x946   : > { %v7630_v51 = vpop.f32.mrf.mxu0 }
 0x947   : > { %8621 = vst [vmem:[#allocation52_spill] sm:$0xff] %v7630_v51 }
 0x948   : > { %v7632_v63 = vpop.f32.mrf.mxu0 }
 0x949   : > { %8622 = vst [vmem:[#allocation44_spill] sm:$0xff] %v7632_v63 }
 0x94a   : > { %v7634_v29 = vpop.f32.mrf.mxu0 }
 0x94b   : > { %8623 = vst [vmem:[#allocation45_spill] sm:$0xff] %v7634_v29 }
 0x94c   : > { %v7636_v11 = vpop.f32.mrf.mxu0 }
 0x94d   : > { %8624 = vst [vmem:[#allocation55_spill] sm:$0xff] %v7636_v11 }
 0x94e   : > { %v7638_v12 = vpop.f32.mrf.mxu0 }
 0x94f   : > { %v5700_v27 = vpop.eup %5699  ;;  %8625 = vst [vmem:[#allocation46_spill] sm:$0xff] %v7638_v12  ;;  %v2567_v12 = vld [vmem:[%s8635_s27] sm:$0x7] }
 0x950   : > { %v2505_v22 = vmul.f32 %v5700_v27, %v2504_v14  ;;  %v7642_v14 = vpop.f32.mrf.mxu0  ;;  %v2763_v27 = vpop.f32.mrf.mxu1 }
 0x951   : > { %8627 = vst [vmem:[#allocation54_spill] sm:$0xff] %v7642_v14 }
 0x952   : > { %v2507_v45 = vadd.f32 %v2506_v17, %v2505_v22  ;;  %v7644_v22 = vpop.f32.mrf.mxu0  ;;  %v7646_v17 = vpop.f32.mrf.mxu1 }
 0x953   : > { %8628 = vst [vmem:[#allocation40_spill] sm:$0xff] %v7644_v22  ;;  %8629 = vst [vmem:[#allocation37_spill] sm:$0xff] %v7646_v17  ;;  %v8638_v22 = vld [vmem:[#allocation30_spill] sm:$0xff] }
 0x954   : > { %2510 = vst [vmem:[#allocation4] sm:$0xff] %v2507_v45  ;;  %2691 = vmatmul.mubr.f32.gmra.mxu0 %v2507_v45  ;;  %5195 = vmatmul.mubr.f32.gmra.mxu1 %v2507_v45  ;;  %v7648_v45 = vpop.f32.mrf.mxu0  ;;  %v7650_v51 = vpop.f32.mrf.mxu1  ;;  %v8639_v17 = vsub.s32 0, %v8638_v22 }
 0x955   : > { %2950 = vmatprep.mubr.f32.mxu0 %v8557_v30  ;;  %5229 = vmatprep.mubr.msk.f32.mxu1 %vm6122_vm5, %v8557_v30  ;;  %8630 = vst [vmem:[#allocation31_spill] sm:$0xff] %v7648_v45  ;;  %8631 = vst [vmem:[#allocation41_spill] sm:$0xff] %v7650_v51 }
 0x956   : > { %v7652_v63 = vpop.f32.mrf.mxu0  ;;  %v7654_v29 = vpop.f32.mrf.mxu1  ;;  %v7667_v36 = vrot.slane %v2567_v12, %v8639_v17 }
 0x957   : > { %8632 = vst [vmem:[#allocation48_spill] sm:$0xff] %v7652_v63  ;;  %8633 = vst [vmem:[#allocation49_spill] sm:$0xff] %v7654_v29 }
 0x958   : > { %2951 = vmatmul.mubr.f32.vlgmr.msra.gmra.mxu0 %v7555_v13  ;;  %5230 = vmatmul.mubr.f32.vlgmr.msra.gmra.mxu1 %v7555_v13  ;;  %v7656_v11 = vpop.f32.mrf.mxu0  ;;  %v7661_v14 = vpop.f32.mrf.mxu1  ;;  %8640 = vst [vmem:[#allocation38_spill] sm:$0xff] %v7667_v36 }
 0x959   : > { %3054 = vmatpush1.msra.mxu0 %v7391_v26  ;;  %5233 = vmatpush3.msra.mxu1 %v7483_v52  ;;  %8634 = vst [vmem:[#allocation57_spill] sm:$0xff] %v7656_v11  ;;  %8636 = vst [vmem:[#allocation58_spill] sm:$0xff] %v7661_v14  ;;  %v2651_v11 = vadd.f32 %v2650_v9, %v7667_v36  ;;  %v8645_v14 = vsub.s32 1, %v8638_v22  ;;  %v7686_v36 = vld [vmem:[%s8646_s24] ss:$0 sm:$0xff] }
 0x95a   : > { %3055 = vmatprep.subr.mxu0 %v7394_v34  ;;  %5234 = vmatprep.subr.mxu1 %v8557_v30  ;;  %v7663_v25 = vpop.f32.mrf.mxu0 }
 0x95b   : > { %3056 = vmatpush1.msra.mxu0 %v7397_v53  ;;  %5235 = vmatpush3.msra.mxu1 %v7485_v40  ;;  %8637 = vst [vmem:[#allocation32_spill] sm:$0xff] %v7663_v25 }
 0x95c   : > { %3057 = vmatprep.subr.mxu0 %v7400_v49  ;;  %5236 = vmatprep.subr.mxu1 %v8557_v30 }
 0x95d   : > { %3058 = vmatpush1.msra.mxu0 %v7403_v32  ;;  %5237 = vmatpush3.msra.mxu1 %v7490_v62 }
 0x95e   : > { %3059 = vmatprep.subr.mxu0 %v7406_v31  ;;  %5238 = vmatprep.subr.mxu1 %v8557_v30 }
 0x95f   : > { %3060 = vmatpush1.msra.mxu0 %v7409_v37  ;;  %5239 = vmatpush3.msra.mxu1 %v7495_v1 }
 0x960   : > { %3061 = vmatprep.subr.mxu0 %v7412_v38  ;;  %5240 = vmatprep.subr.mxu1 %v8557_v30 }
 0x961   : > { %3062 = vmatpush1.msra.mxu0 %v7415_v41  ;;  %5241 = vmatpush3.msra.mxu1 %v7499_v2 }
 0x962   : > { %3063 = vmatprep.subr.mxu0 %v7418_v15  ;;  %5242 = vmatprep.subr.mxu1 %v8557_v30 }
 0x963   : > { %3064 = vmatpush1.msra.mxu0 %v7421_v18  ;;  %5243 = vmatpush3.msra.mxu1 %v7503_v3 }
 0x964   : > { %3065 = vmatprep.subr.mxu0 %v7424_v43  ;;  %5244 = vmatprep.subr.mxu1 %v8557_v30 }
 0x965   : > { %3066 = vmatpush1.msra.mxu0 %v7427_v19  ;;  %5245 = vmatpush3.msra.mxu1 %v7507_v4 }
 0x966   : > { %3067 = vmatprep.subr.mxu0 %v7430_v44  ;;  %5246 = vmatprep.subr.mxu1 %v8557_v30 }
 0x967   : > { %3068 = vmatpush1.msra.mxu0 %v7433_v20  ;;  %5247 = vmatpush3.msra.mxu1 %v7511_v24 }
 0x968   : > { %3069 = vmatprep.subr.mxu0 %v7436_v46  ;;  %5248 = vmatprep.subr.mxu1 %v8557_v30 }
 0x969   : > { %3070 = vmatpush1.msra.mxu0 %v7439_v21  ;;  %5249 = vmatpush3.msra.mxu1 %v7515_v16 }
 0x96a   : > { %3071 = vmatprep.subr.mxu0 %v7442_v47  ;;  %5250 = vmatprep.subr.mxu1 %v8557_v30 }
 0x96b   : > { %3072 = vmatpush1.msra.mxu0 %v7445_v23  ;;  %5251 = vmatpush3.msra.mxu1 %v7519_v33 }
 0x96c   : > { %3073 = vmatprep.subr.mxu0 %v7448_v48  ;;  %5252 = vmatprep.subr.mxu1 %v8557_v30 }
 0x96d   : > { %3074 = vmatpush1.msra.mxu0 %v7451_v35  ;;  %5253 = vmatpush3.msra.mxu1 %v7523_v57 }
 0x96e   : > { %3075 = vmatprep.subr.mxu0 %v7454_v54  ;;  %5254 = vmatprep.subr.mxu1 %v8557_v30 }
 0x96f   : > { %3076 = vmatpush1.msra.mxu0 %v7457_v55  ;;  %5255 = vmatpush3.msra.mxu1 %v7527_v6 }
 0x970   : > { %3077 = vmatprep.subr.mxu0 %v7460_v56  ;;  %5256 = vmatprep.subr.mxu1 %v8557_v30 }
 0x971   : > { %3078 = vmatpush1.msra.mxu0 %v7463_v58  ;;  %5257 = vmatpush3.msra.mxu1 %v7531_v7 }
 0x972   : > { %3079 = vmatprep.subr.mxu0 %v7466_v39  ;;  %5258 = vmatprep.subr.mxu1 %v8557_v30 }
 0x973   : > { %3080 = vmatpush1.msra.mxu0 %v7469_v59  ;;  %5259 = vmatpush3.msra.mxu1 %v7535_v8 }
 0x974   : > { %3081 = vmatprep.subr.mxu0 %v7472_v60  ;;  %5260 = vmatprep.subr.mxu1 %v8557_v30 }
 0x975   : > { %3082 = vmatpush1.msra.mxu0 %v7475_v61  ;;  %5261 = vmatpush3.msra.mxu1 %v8615_v28 }
 0x976   : > { %3083 = vmatprep.subr.mxu0 %v8616_v42  ;;  %5262 = vmatprep.subr.mxu1 %v8557_v30 }
 0x977   : > { %3084 = vmatpush1.msra.mxu0 %v8617_v5  ;;  %3117 = vmatprep.mubr.f32.mxu0 %v8557_v30  ;;  %v7680_v5 = vrot.slane %v2567_v12, %v8645_v14 }
 0x978   : > { %5263 = vmatpush3.msra.mxu1 %v8618_v0  ;;  %5264 = vmatprep.mubr.msk.f32.mxu1 %vm6122_vm5, %v8557_v30 }
 0x979   : > { %3221 = vmatprep.subr.mxu0 %v8619_v50  ;;  %5267 = vmatprep.subr.mxu1 %v8557_v30 }
 0xa14   : > { %v7669_v45 = vpop.f32.mrf.mxu0  ;;  %v7671_v51 = vpop.f32.mrf.mxu1 }
 0xa15   : > { %8641 = vst [vmem:[#allocation39_spill] sm:$0xff] %v7669_v45  ;;  %8642 = vst [vmem:[#allocation50_spill] sm:$0xff] %v7671_v51  ;;  %v2653_v45 = vadd.f32 %v2652_v10, %v7680_v5 }
 0xa16   : > { %v7673_v63 = vpop.f32.mrf.mxu0  ;;  %v7675_v29 = vpop.f32.mrf.mxu1 }
 0xa17   : > { %8643 = vst [vmem:[#allocation51_spill] sm:$0xff] %v7673_v63  ;;  %8644 = vst [vmem:[#allocation56_spill] sm:$0xff] %v7675_v29 }
 0xa18   : > { %v2952_v50 = vpop.f32.mrf.mxu0  ;;  %v3023_v0 = vpop.f32.mrf.mxu1 }
 0xa19   : > { %v3027_v25 = vadd.f32 %v2952_v50, %v2651_v11  ;;  %v8647_v11 = vsub.s32 2, %v8638_v22  ;;  %v8652_v22 = vld [vmem:[#allocation42_spill] sm:$0xff] }
 0xa1a   : > { %v5231_v42 = vpop.f32.mrf.mxu1  ;;  %v2954_v28 = vpop.f32.mrf.mxu0 }
 0xa1b   : > { %v4512_v17 = vmul.f32 -1.442695, %v3027_v25  ;;  %v3034_v51 = vadd.f32 %v2954_v28, %v2653_v45  ;;  %v3041_v42 = vadd.f32 %v7686_v36, %v3023_v0  ;;  %v7691_v10 = vrot.slane %v2567_v12, %v8647_v11  ;;  %v8649_v0 = vld [vmem:[#allocation36_spill] sm:$0xff]  ;;  %v8650_v12 = vld [vmem:[#allocation33_spill] sm:$0xff]  ;;  %v8655_v11 = vld [vmem:[#allocation43_spill] sm:$0xff] }
 0xa1d   : > { %5701 = vpow2.f32 %v4512_v17  ;;  %v4513_v61 = vmul.f32 -1.442695, %v3034_v51 }
 0xa1f   : > { %5703 = vpow2.f32 %v4513_v61  ;;  %v2764_v61 = vadd.f32 %v2763_v27, %v7691_v10  ;;  %v8651_v27 = vld [vmem:[#allocation34_spill] sm:$0xff] }
 0xa2a   : > { %v5702_v63 = vpop.eup %5701 }
 0xa2b   : > { %v3031_v29 = vadd.f32 1.0, %v5702_v63 }
 0xa2c   : > { %v5704_v9 = vpop.eup %5703 }
 0xa2d   : > { %5705 = vrcp.f32 %v3031_v29  ;;  %v3038_v50 = vadd.f32 1.0, %v5704_v9 }
 0xa2f   : > { %5707 = vrcp.f32 %v3038_v50  ;;  %v8653_v50 = vld [vmem:[#allocation53_spill] sm:$0xff] }
 0xa3a   : > { %v5706_v28 = vpop.eup %5705 }
 0xa3b   : > { %v3042_v51 = vmul.f32 %v5706_v28, %v3041_v42  ;;  %v8654_v42 = vld [vmem:[#allocation38_spill] sm:$0xff] }
 0xa3c   : > { %v5708_v29 = vpop.eup %5707  ;;  %v2657_v28 = vadd.f32 %v8655_v11, %v8654_v42 }
 0xa3d   : > { %v3043_v63 = vadd.f32 %v3042_v51, %v2764_v61  ;;  %v3045_v25 = vsub.f32 1.0, %v5708_v29  ;;  %v3047_v17 = vmul.f32 %v5708_v29, %v7555_v13  ;;  %v8648_v13 = vld [vmem:[#allocation35_spill] sm:$0xff] }
 0xa3f   : > { %5709 = vtanh.f32 %v3043_v63 }
 0xa4c   : > { %v5710_v14 = vpop.eup %5709 }
 0xa4d   : > { %v3046_v45 = vmul.f32 %v5710_v14, %v3045_v25 }
 0xa4f   : > { %v7695_v9 = vadd.f32 %v3047_v17, %v3046_v45  ;;  %v8656_v45 = vld [vmem:[#allocation52_spill] sm:$0xff] }
 0xa50   : > { %v2659_v17 = vadd.f32 %v8656_v45, %v7680_v5  ;;  %v8663_v45 = vld [vmem:[#allocation53_spill] sm:$0xff] }
 0xa51   : > { %3049 = vst [vmem:[%s6426_s13] sm:$0xff] %v7695_v9  ;;  %3118 = vmatmul.mubr.f32.vlgmr.msra.gmra.mxu0 %v7695_v9  ;;  %5265 = vmatmul.mubr.f32.vlgmr.msra.gmra.mxu1 %v7695_v9 }
 0xa52   : > { %3222 = vmatpush1.msra.mxu0 %v7391_v26  ;;  %5268 = vmatpush3.msra.mxu1 %v7483_v52 }
 0xa53   : > { %3223 = vmatprep.subr.mxu0 %v7394_v34  ;;  %5269 = vmatprep.subr.mxu1 %v8557_v30 }
 0xa54   : > { %3224 = vmatpush1.msra.mxu0 %v7397_v53  ;;  %5270 = vmatpush3.msra.mxu1 %v7485_v40 }
 0xa55   : > { %3225 = vmatprep.subr.mxu0 %v7400_v49  ;;  %5271 = vmatprep.subr.mxu1 %v8557_v30 }
 0xa56   : > { %3226 = vmatpush1.msra.mxu0 %v7403_v32  ;;  %5272 = vmatpush3.msra.mxu1 %v7490_v62 }
 0xa57   : > { %3227 = vmatprep.subr.mxu0 %v7406_v31  ;;  %5273 = vmatprep.subr.mxu1 %v8557_v30 }
 0xa58   : > { %3228 = vmatpush1.msra.mxu0 %v7409_v37  ;;  %5274 = vmatpush3.msra.mxu1 %v7495_v1 }
 0xa59   : > { %3229 = vmatprep.subr.mxu0 %v7412_v38  ;;  %5275 = vmatprep.subr.mxu1 %v8557_v30 }
 0xa5a   : > { %3230 = vmatpush1.msra.mxu0 %v7415_v41  ;;  %5276 = vmatpush3.msra.mxu1 %v7499_v2 }
 0xa5b   : > { %3231 = vmatprep.subr.mxu0 %v7418_v15  ;;  %5277 = vmatprep.subr.mxu1 %v8557_v30 }
 0xa5c   : > { %3232 = vmatpush1.msra.mxu0 %v7421_v18  ;;  %5278 = vmatpush3.msra.mxu1 %v7503_v3 }
 0xa5d   : > { %3233 = vmatprep.subr.mxu0 %v7424_v43  ;;  %5279 = vmatprep.subr.mxu1 %v8557_v30 }
 0xa5e   : > { %3234 = vmatpush1.msra.mxu0 %v7427_v19  ;;  %5280 = vmatpush3.msra.mxu1 %v7507_v4 }
 0xa5f   : > { %3235 = vmatprep.subr.mxu0 %v7430_v44  ;;  %5281 = vmatprep.subr.mxu1 %v8557_v30 }
 0xa60   : > { %3236 = vmatpush1.msra.mxu0 %v7433_v20  ;;  %5282 = vmatpush3.msra.mxu1 %v7511_v24 }
 0xa61   : > { %3237 = vmatprep.subr.mxu0 %v7436_v46  ;;  %5283 = vmatprep.subr.mxu1 %v8557_v30 }
 0xa62   : > { %3238 = vmatpush1.msra.mxu0 %v7439_v21  ;;  %5284 = vmatpush3.msra.mxu1 %v7515_v16 }
 0xa63   : > { %3239 = vmatprep.subr.mxu0 %v7442_v47  ;;  %5285 = vmatprep.subr.mxu1 %v8557_v30 }
 0xa64   : > { %3240 = vmatpush1.msra.mxu0 %v7445_v23  ;;  %5286 = vmatpush3.msra.mxu1 %v7519_v33 }
 0xa65   : > { %3241 = vmatprep.subr.mxu0 %v7448_v48  ;;  %5287 = vmatprep.subr.mxu1 %v8557_v30 }
 0xa66   : > { %3242 = vmatpush1.msra.mxu0 %v7451_v35  ;;  %5288 = vmatpush3.msra.mxu1 %v7523_v57 }
 0xa67   : > { %3243 = vmatprep.subr.mxu0 %v7454_v54  ;;  %5289 = vmatprep.subr.mxu1 %v8557_v30 }
 0xa68   : > { %3244 = vmatpush1.msra.mxu0 %v7457_v55  ;;  %5290 = vmatpush3.msra.mxu1 %v7527_v6 }
 0xa69   : > { %3245 = vmatprep.subr.mxu0 %v7460_v56  ;;  %5291 = vmatprep.subr.mxu1 %v8557_v30 }
 0xa6a   : > { %3246 = vmatpush1.msra.mxu0 %v7463_v58  ;;  %5292 = vmatpush3.msra.mxu1 %v7531_v7 }
 0xa6b   : > { %3247 = vmatprep.subr.mxu0 %v7466_v39  ;;  %5293 = vmatprep.subr.mxu1 %v8557_v30 }
 0xa6c   : > { %3248 = vmatpush1.msra.mxu0 %v7469_v59  ;;  %5294 = vmatpush3.msra.mxu1 %v7535_v8 }
 0xa6d   : > { %3249 = vmatprep.subr.mxu0 %v7472_v60  ;;  %5295 = vmatprep.subr.mxu1 %v8557_v30 }
 0xa6e   : > { %3250 = vmatpush1.msra.mxu0 %v8648_v13  ;;  %5296 = vmatpush3.msra.mxu1 %v8649_v0 }
 0xa6f   : > { %3251 = vmatprep.subr.mxu0 %v8650_v12  ;;  %5297 = vmatprep.subr.mxu1 %v8557_v30 }
 0xa70   : > { %3252 = vmatpush1.msra.mxu0 %v8651_v27  ;;  %3285 = vmatprep.mubr.f32.mxu0 %v8557_v30 }
 0xa71   : > { %5298 = vmatpush3.msra.mxu1 %v8652_v22  ;;  %5299 = vmatprep.mubr.msk.f32.mxu1 %vm6122_vm5, %v8557_v30 }
 0xa72   : > { %3389 = vmatprep.subr.mxu0 %v8653_v50  ;;  %5302 = vmatprep.subr.mxu1 %v8557_v30 }
 0xb11   : > { %v3119_v61 = vpop.f32.mrf.mxu0  ;;  %v3190_v51 = vpop.f32.mrf.mxu1 }
 0xb12   : > { %v3194_v63 = vadd.f32 %v3119_v61, %v2657_v28  ;;  %v3208_v11 = vadd.f32 %v7686_v36, %v3190_v51  ;;  %v8657_v28 = vld [vmem:[#allocation47_spill] sm:$0xff]  ;;  %v8662_v51 = vld [vmem:[#allocation42_spill] sm:$0xff] }
 0xb13   : > { %v5266_v29 = vpop.f32.mrf.mxu1  ;;  %v3121_v14 = vpop.f32.mrf.mxu0  ;;  %v2769_v61 = vadd.f32 %v8657_v28, %v7691_v10 }
 0xb14   : > { %v4514_v25 = vmul.f32 -1.442695, %v3194_v63  ;;  %v3201_v22 = vadd.f32 %v3121_v14, %v2659_v17  ;;  %v8664_v17 = vld [vmem:[#allocation38_spill] sm:$0xff] }
 0xb16   : > { %5711 = vpow2.f32 %v4514_v25  ;;  %v4515_v27 = vmul.f32 -1.442695, %v3201_v22 }
 0xb18   : > { %5713 = vpow2.f32 %v4515_v27 }
 0xb23   : > { %v5712_v12 = vpop.eup %5711 }
 0xb24   : > { %v3198_v50 = vadd.f32 1.0, %v5712_v12 }
 0xb25   : > { %v5714_v0 = vpop.eup %5713 }
 0xb26   : > { %5715 = vrcp.f32 %v3198_v50  ;;  %v3205_v13 = vadd.f32 1.0, %v5714_v0  ;;  %v8660_v0 = vld [vmem:[#allocation33_spill] sm:$0xff] }
 0xb28   : > { %5717 = vrcp.f32 %v3205_v13  ;;  %v8659_v13 = vld [vmem:[#allocation36_spill] sm:$0xff] }
 0xb33   : > { %v5716_v42 = vpop.eup %5715 }
 0xb34   : > { %v3209_v63 = vmul.f32 %v5716_v42, %v3208_v11  ;;  %v8661_v42 = vld [vmem:[#allocation34_spill] sm:$0xff]  ;;  %v8665_v11 = vld [vmem:[#allocation44_spill] sm:$0xff] }
 0xb35   : > { %v5718_v25 = vpop.eup %5717  ;;  %v2663_v28 = vadd.f32 %v8665_v11, %v8664_v17 }
 0xb36   : > { %v3210_v29 = vadd.f32 %v3209_v63, %v2769_v61  ;;  %v3212_v14 = vsub.f32 1.0, %v5718_v25  ;;  %v3214_v12 = vmul.f32 %v5718_v25, %v7695_v9  ;;  %v8658_v9 = vld [vmem:[#allocation35_spill] sm:$0xff] }
 0xb38   : > { %5719 = vtanh.f32 %v3210_v29 }
 0xb45   : > { %v5720_v22 = vpop.eup %5719 }
 0xb46   : > { %v3213_v27 = vmul.f32 %v5720_v22, %v3212_v14 }
 0xb48   : > { %v7776_v50 = vadd.f32 %v3214_v12, %v3213_v27  ;;  %v8666_v27 = vld [vmem:[#allocation45_spill] sm:$0xff] }
 0xb49   : > { %v2665_v12 = vadd.f32 %v8666_v27, %v7680_v5 }
 0xb4a   : > { %4516 = vst [vmem:[%s6426_s13 + $0x10] sm:$0xff] %v7776_v50  ;;  %3286 = vmatmul.mubr.f32.vlgmr.msra.gmra.mxu0 %v7776_v50  ;;  %5300 = vmatmul.mubr.f32.vlgmr.msra.gmra.mxu1 %v7776_v50 }
 0xb4b   : > { %3390 = vmatpush1.msra.mxu0 %v7391_v26  ;;  %5303 = vmatpush3.msra.mxu1 %v7483_v52 }
 0xb4c   : > { %3391 = vmatprep.subr.mxu0 %v7394_v34  ;;  %5304 = vmatprep.subr.mxu1 %v8557_v30 }
 0xb4d   : > { %3392 = vmatpush1.msra.mxu0 %v7397_v53  ;;  %5305 = vmatpush3.msra.mxu1 %v7485_v40 }
 0xb4e   : > { %3393 = vmatprep.subr.mxu0 %v7400_v49  ;;  %5306 = vmatprep.subr.mxu1 %v8557_v30 }
 0xb4f   : > { %3394 = vmatpush1.msra.mxu0 %v7403_v32  ;;  %5307 = vmatpush3.msra.mxu1 %v7490_v62 }
 0xb50   : > { %3395 = vmatprep.subr.mxu0 %v7406_v31  ;;  %5308 = vmatprep.subr.mxu1 %v8557_v30 }
 0xb51   : > { %3396 = vmatpush1.msra.mxu0 %v7409_v37  ;;  %5309 = vmatpush3.msra.mxu1 %v7495_v1 }
 0xb52   : > { %3397 = vmatprep.subr.mxu0 %v7412_v38  ;;  %5310 = vmatprep.subr.mxu1 %v8557_v30 }
 0xb53   : > { %3398 = vmatpush1.msra.mxu0 %v7415_v41  ;;  %5311 = vmatpush3.msra.mxu1 %v7499_v2 }
 0xb54   : > { %3399 = vmatprep.subr.mxu0 %v7418_v15  ;;  %5312 = vmatprep.subr.mxu1 %v8557_v30 }
 0xb55   : > { %3400 = vmatpush1.msra.mxu0 %v7421_v18  ;;  %5313 = vmatpush3.msra.mxu1 %v7503_v3 }
 0xb56   : > { %3401 = vmatprep.subr.mxu0 %v7424_v43  ;;  %5314 = vmatprep.subr.mxu1 %v8557_v30 }
 0xb57   : > { %3402 = vmatpush1.msra.mxu0 %v7427_v19  ;;  %5315 = vmatpush3.msra.mxu1 %v7507_v4 }
 0xb58   : > { %3403 = vmatprep.subr.mxu0 %v7430_v44  ;;  %5316 = vmatprep.subr.mxu1 %v8557_v30 }
 0xb59   : > { %3404 = vmatpush1.msra.mxu0 %v7433_v20  ;;  %5317 = vmatpush3.msra.mxu1 %v7511_v24 }
 0xb5a   : > { %3405 = vmatprep.subr.mxu0 %v7436_v46  ;;  %5318 = vmatprep.subr.mxu1 %v8557_v30 }
 0xb5b   : > { %3406 = vmatpush1.msra.mxu0 %v7439_v21  ;;  %5319 = vmatpush3.msra.mxu1 %v7515_v16 }
 0xb5c   : > { %3407 = vmatprep.subr.mxu0 %v7442_v47  ;;  %5320 = vmatprep.subr.mxu1 %v8557_v30 }
 0xb5d   : > { %3408 = vmatpush1.msra.mxu0 %v7445_v23  ;;  %5321 = vmatpush3.msra.mxu1 %v7519_v33 }
 0xb5e   : > { %3409 = vmatprep.subr.mxu0 %v7448_v48  ;;  %5322 = vmatprep.subr.mxu1 %v8557_v30 }
 0xb5f   : > { %3410 = vmatpush1.msra.mxu0 %v7451_v35  ;;  %5323 = vmatpush3.msra.mxu1 %v7523_v57 }
 0xb60   : > { %3411 = vmatprep.subr.mxu0 %v7454_v54  ;;  %5324 = vmatprep.subr.mxu1 %v8557_v30 }
 0xb61   : > { %3412 = vmatpush1.msra.mxu0 %v7457_v55  ;;  %5325 = vmatpush3.msra.mxu1 %v7527_v6 }
 0xb62   : > { %3413 = vmatprep.subr.mxu0 %v7460_v56  ;;  %5326 = vmatprep.subr.mxu1 %v8557_v30 }
 0xb63   : > { %3414 = vmatpush1.msra.mxu0 %v7463_v58  ;;  %5327 = vmatpush3.msra.mxu1 %v7531_v7 }
 0xb64   : > { %3415 = vmatprep.subr.mxu0 %v7466_v39  ;;  %5328 = vmatprep.subr.mxu1 %v8557_v30 }
 0xb65   : > { %3416 = vmatpush1.msra.mxu0 %v7469_v59  ;;  %5329 = vmatpush3.msra.mxu1 %v7535_v8 }
 0xb66   : > { %3417 = vmatprep.subr.mxu0 %v7472_v60  ;;  %5330 = vmatprep.subr.mxu1 %v8557_v30 }
 0xb67   : > { %3418 = vmatpush1.msra.mxu0 %v8658_v9  ;;  %5331 = vmatpush3.msra.mxu1 %v8659_v13 }
 0xb68   : > { %3419 = vmatprep.subr.mxu0 %v8660_v0  ;;  %5332 = vmatprep.subr.mxu1 %v8557_v30 }
 0xb69   : > { %3420 = vmatpush1.msra.mxu0 %v8661_v42  ;;  %3453 = vmatprep.mubr.f32.mxu0 %v8557_v30 }
 0xb6a   : > { %5333 = vmatpush3.msra.mxu1 %v8662_v51  ;;  %5334 = vmatprep.mubr.msk.f32.mxu1 %vm6122_vm5, %v8557_v30 }
 0xb6b   : > { %3557 = vmatprep.subr.mxu0 %v8663_v45  ;;  %5337 = vmatprep.subr.mxu1 %v8557_v30 }
 0xc0a   : > { %v3287_v61 = vpop.f32.mrf.mxu0  ;;  %v3358_v63 = vpop.f32.mrf.mxu1 }
 0xc0b   : > { %v3362_v29 = vadd.f32 %v3287_v61, %v2663_v28  ;;  %v3376_v11 = vadd.f32 %v7686_v36, %v3358_v63  ;;  %v8667_v28 = vld [vmem:[#allocation41_spill] sm:$0xff]  ;;  %v7984_v63 = vld [vmem:[#allocation13 + $0x108] sm:$0xff] }
 0xc0c   : > { %v5301_v25 = vpop.f32.mrf.mxu1  ;;  %v3289_v22 = vpop.f32.mrf.mxu0  ;;  %v2774_v61 = vadd.f32 %v8667_v28, %v7691_v10  ;;  %v7997_v28 = vld [vmem:[#allocation13 + $0x100] sm:$0xff] }
 0xc0d   : > { %v4517_v14 = vmul.f32 -1.442695, %v3362_v29  ;;  %v3369_v51 = vadd.f32 %v3289_v22, %v2665_v12  ;;  %v7987_v12 = vld [vmem:[#allocation13 + $0x118] sm:$0xff] }
 0xc0f   : > { %5721 = vpow2.f32 %v4517_v14  ;;  %v4518_v42 = vmul.f32 -1.442695, %v3369_v51 }
 0xc11   : > { %5723 = vpow2.f32 %v4518_v42 }
 0xc1c   : > { %v5722_v0 = vpop.eup %5721 }
 0xc1d   : > { %v3366_v45 = vadd.f32 1.0, %v5722_v0 }
 0xc1e   : > { %v5724_v13 = vpop.eup %5723 }
 0xc1f   : > { %5725 = vrcp.f32 %v3366_v45  ;;  %v3373_v9 = vadd.f32 1.0, %v5724_v13  ;;  %v7977_v13 = vld [vmem:[#allocation13 + $0x130] sm:$0xff]  ;;  %v7990_v45 = vld [vmem:[#allocation13 + $0xf8] sm:$0xff] }
 0xc21   : > { %5727 = vrcp.f32 %v3373_v9  ;;  %v7974_v9 = vld [vmem:[#allocation13 + $0x120] sm:$0xff] }
 0xc2c   : > { %v5726_v17 = vpop.eup %5725 }
 0xc2d   : > { %v3377_v29 = vmul.f32 %v5726_v17, %v3376_v11  ;;  %v7980_v17 = vld [vmem:[#allocation13 + $0x110] sm:$0xff] }
 0xc2e   : > { %v5728_v14 = vpop.eup %5727  ;;  %v7994_v11 = vld [vmem:[#allocation13 + $0xf0] sm:$0xff] }
 0xc2f   : > { %v3378_v25 = vadd.f32 %v3377_v29, %v2774_v61  ;;  %v3380_v22 = vsub.f32 1.0, %v5728_v14  ;;  %v3382_v0 = vmul.f32 %v5728_v14, %v7776_v50  ;;  %v7970_v50 = vld [vmem:[#allocation13 + $0x128] sm:$0xff]  ;;  %v8000_v61 = vld [vmem:[#allocation13 + $0xe0] sm:$0xff]  ;;  %v8004_v29 = vld [vmem:[#allocation13 + $0xd8] sm:$0xff] }
 0xc30   : > { %v8010_v14 = vld [vmem:[#allocation13 + $0xc8] sm:$0xff] }
 0xc31   : > { %5729 = vtanh.f32 %v3378_v25  ;;  %v8007_v25 = vld [vmem:[#allocation13 + $0xe8] sm:$0xff] }
 0xc3e   : > { %v5730_v51 = vpop.eup %5729 }
 0xc3f   : > { %v3381_v42 = vmul.f32 %v5730_v51, %v3380_v22  ;;  %v8014_v22 = vld [vmem:[#allocation13 + $0xc0] sm:$0xff]  ;;  %v8017_v51 = vld [vmem:[#allocation13 + $0xd0] sm:$0xff] }
 0xc41   : > { %v7857_v27 = vadd.f32 %v3382_v0, %v3381_v42  ;;  %v8020_v42 = vld [vmem:[#allocation13 + $0xb0] sm:$0xff]  ;;  %v8024_v0 = vld [vmem:[#allocation13 + $0xa8] sm:$0xff] }
 0xc43   : > { %4519 = vst [vmem:[%s6426_s13 + $0x20] sm:$0xff] %v7857_v27  ;;  %3454 = vmatmul.mubr.f32.vlgmr.msra.gmra.mxu0 %v7857_v27  ;;  %5335 = vmatmul.mubr.f32.vlgmr.msra.gmra.mxu1 %v7857_v27 }
 0xc44   : > { %3558 = vmatpush1.msra.mxu0 %v7391_v26  ;;  %5338 = vmatpush3.msra.mxu1 %v7483_v52  ;;  %v8668_v26 = vld [vmem:[#allocation35_spill] sm:$0xff] }
 0xc45   : > { %3559 = vmatprep.subr.mxu0 %v7394_v34  ;;  %5339 = vmatprep.subr.mxu1 %v8557_v30  ;;  %v8669_v34 = vld [vmem:[#allocation36_spill] sm:$0xff] }
 0xc46   : > { %3560 = vmatpush1.msra.mxu0 %v7397_v53  ;;  %5340 = vmatpush3.msra.mxu1 %v7485_v40  ;;  %v8670_v53 = vld [vmem:[#allocation33_spill] sm:$0xff] }
 0xc47   : > { %3561 = vmatprep.subr.mxu0 %v7400_v49  ;;  %5341 = vmatprep.subr.mxu1 %v8557_v30  ;;  %v8671_v49 = vld [vmem:[#allocation34_spill] sm:$0xff] }
 0xc48   : > { %3562 = vmatpush1.msra.mxu0 %v7403_v32  ;;  %5342 = vmatpush3.msra.mxu1 %v7490_v62  ;;  %v8672_v32 = vld [vmem:[#allocation42_spill] sm:$0xff] }
 0xc49   : > { %3563 = vmatprep.subr.mxu0 %v7406_v31  ;;  %5343 = vmatprep.subr.mxu1 %v8557_v30  ;;  %v7928_v31 = vld [vmem:[#allocation13 + $0x170] sm:$0xff] }
 0xc4a   : > { %3564 = vmatpush1.msra.mxu0 %v7409_v37  ;;  %5344 = vmatpush3.msra.mxu1 %v7495_v1  ;;  %8673 = vst [vmem:[#allocation30_spill] sm:$0xff] %v7928_v31  ;;  %v8674_v37 = vld [vmem:[#allocation38_spill] sm:$0xff] }
 0xc4b   : > { %3565 = vmatprep.subr.mxu0 %v7412_v38  ;;  %5345 = vmatprep.subr.mxu1 %v8557_v30  ;;  %v8675_v38 = vld [vmem:[#allocation55_spill] sm:$0xff] }
 0xc4c   : > { %3566 = vmatpush1.msra.mxu0 %v7415_v41  ;;  %5346 = vmatpush3.msra.mxu1 %v7499_v2  ;;  %v2669_v41 = vadd.f32 %v8675_v38, %v8674_v37  ;;  %v8047_v38 = vld [vmem:[#allocation13 + $0x88] sm:$0xff] }
 0xc4d   : > { %3567 = vmatprep.subr.mxu0 %v7418_v15  ;;  %5347 = vmatprep.subr.mxu1 %v8557_v30 }
 0xc4e   : > { %3568 = vmatpush1.msra.mxu0 %v7421_v18  ;;  %5348 = vmatpush3.msra.mxu1 %v7503_v3 }
 0xc4f   : > { %3569 = vmatprep.subr.mxu0 %v7424_v43  ;;  %5349 = vmatprep.subr.mxu1 %v8557_v30 }
 0xc50   : > { %3570 = vmatpush1.msra.mxu0 %v7427_v19  ;;  %5350 = vmatpush3.msra.mxu1 %v7507_v4 }
 0xc51   : > { %3571 = vmatprep.subr.mxu0 %v7430_v44  ;;  %5351 = vmatprep.subr.mxu1 %v8557_v30 }
 0xc52   : > { %3572 = vmatpush1.msra.mxu0 %v7433_v20  ;;  %5352 = vmatpush3.msra.mxu1 %v7511_v24 }
 0xc53   : > { %3573 = vmatprep.subr.mxu0 %v7436_v46  ;;  %5353 = vmatprep.subr.mxu1 %v8557_v30  ;;  %v8676_v46 = vld [vmem:[#allocation46_spill] sm:$0xff] }
 0xc54   : > { %3574 = vmatpush1.msra.mxu0 %v7439_v21  ;;  %5354 = vmatpush3.msra.mxu1 %v7515_v16  ;;  %v2671_v21 = vadd.f32 %v8676_v46, %v7680_v5  ;;  %v7946_v16 = vld [vmem:[#allocation13 + $0x168] sm:$0xff]  ;;  %v8074_v46 = vld [vmem:[#allocation13 + $0x30] sm:$0xff] }
 0xc55   : > { %3575 = vmatprep.subr.mxu0 %v7442_v47  ;;  %5355 = vmatprep.subr.mxu1 %v8557_v30 }
 0xc56   : > { %3576 = vmatpush1.msra.mxu0 %v7445_v23  ;;  %5356 = vmatpush3.msra.mxu1 %v7519_v33  ;;  %v7950_v33 = vld [vmem:[#allocation13 + $0x158] sm:$0xff] }
 0xc57   : > { %3577 = vmatprep.subr.mxu0 %v7448_v48  ;;  %5357 = vmatprep.subr.mxu1 %v8557_v30 }
 0xc58   : > { %3578 = vmatpush1.msra.mxu0 %v7451_v35  ;;  %5358 = vmatpush3.msra.mxu1 %v7523_v57  ;;  %v7954_v57 = vld [vmem:[#allocation13 + $0x150] sm:$0xff] }
 0xc59   : > { %3579 = vmatprep.subr.mxu0 %v7454_v54  ;;  %5359 = vmatprep.subr.mxu1 %v8557_v30 }
 0xc5a   : > { %3580 = vmatpush1.msra.mxu0 %v7457_v55  ;;  %5360 = vmatpush3.msra.mxu1 %v7527_v6  ;;  %v7957_v6 = vld [vmem:[#allocation13 + $0x160] sm:$0xff] }
 0xc5b   : > { %3581 = vmatprep.subr.mxu0 %v7460_v56  ;;  %5361 = vmatprep.subr.mxu1 %v8557_v30 }
 0xc5c   : > { %3582 = vmatpush1.msra.mxu0 %v7463_v58  ;;  %5362 = vmatpush3.msra.mxu1 %v7531_v7  ;;  %v7960_v7 = vld [vmem:[#allocation13 + $0x140] sm:$0xff] }
 0xc5d   : > { %3583 = vmatprep.subr.mxu0 %v7466_v39  ;;  %5363 = vmatprep.subr.mxu1 %v8557_v30  ;;  %v8677_v39 = vld [vmem:[#allocation37_spill] sm:$0xff] }
 0xc5e   : > { %3584 = vmatpush1.msra.mxu0 %v7469_v59  ;;  %5364 = vmatpush3.msra.mxu1 %v7535_v8  ;;  %v2779_v59 = vadd.f32 %v8677_v39, %v7691_v10  ;;  %v7967_v8 = vld [vmem:[#allocation13 + $0x148] sm:$0xff] }
 0xc5f   : > { %3585 = vmatprep.subr.mxu0 %v7472_v60  ;;  %5365 = vmatprep.subr.mxu1 %v8557_v30 }
 0xc60   : > { %3586 = vmatpush1.msra.mxu0 %v8668_v26  ;;  %5366 = vmatpush3.msra.mxu1 %v8669_v34  ;;  %v8030_v26 = vld [vmem:[#allocation13 + $0x98] sm:$0xff]  ;;  %v8034_v34 = vld [vmem:[#allocation13 + $0x90] sm:$0xff] }
 0xc61   : > { %3587 = vmatprep.subr.mxu0 %v8670_v53  ;;  %5367 = vmatprep.subr.mxu1 %v8557_v30  ;;  %v8037_v53 = vld [vmem:[#allocation13 + $0xa0] sm:$0xff] }
 0xc62   : > { %3588 = vmatpush1.msra.mxu0 %v8671_v49  ;;  %3621 = vmatprep.mubr.f32.mxu0 %v8557_v30  ;;  %v8040_v49 = vld [vmem:[#allocation13 + $0x80] sm:$0xff] }
 0xc63   : > { %5368 = vmatpush3.msra.mxu1 %v8672_v32  ;;  %5369 = vmatprep.mubr.msk.f32.mxu1 %vm6122_vm5, %v8557_v30  ;;  %v8044_v32 = vld [vmem:[#allocation13 + $0x78] sm:$0xff] }
 0xc64   : > { %3725 = vmatprep.subr.mxu0 %v7928_v31  ;;  %5372 = vmatprep.subr.mxu1 %v8557_v30 }
 0xd03   : > { %v3455_v15 = vpop.f32.mrf.mxu0  ;;  %v3526_v18 = vpop.f32.mrf.mxu1 }
 0xd04   : > { %v3530_v43 = vadd.f32 %v3455_v15, %v2669_v41  ;;  %v3544_v56 = vadd.f32 %v7686_v36, %v3526_v18  ;;  %v8050_v41 = vld [vmem:[#allocation13 + $0x68] sm:$0xff]  ;;  %v8054_v15 = vld [vmem:[#allocation13 + $0x60] sm:$0xff]  ;;  %v8057_v18 = vld [vmem:[#allocation13 + $0x70] sm:$0xff] }
 0xd05   : > { %v5336_v19 = vpop.f32.mrf.mxu1  ;;  %v3457_v20 = vpop.f32.mrf.mxu0 }
 0xd06   : > { %v4520_v44 = vmul.f32 -1.442695, %v3530_v43  ;;  %v3537_v47 = vadd.f32 %v3457_v20, %v2671_v21  ;;  %v8060_v43 = vld [vmem:[#allocation13 + $0x50] sm:$0xff]  ;;  %v8064_v19 = vld [vmem:[#allocation13 + $0x48] sm:$0xff]  ;;  %v8070_v20 = vld [vmem:[#allocation13 + $0x38] sm:$0xff] }
 0xd07   : > { %v8077_v21 = vld [vmem:[#allocation13 + $0x40] sm:$0xff] }
 0xd08   : > { %5731 = vpow2.f32 %v4520_v44  ;;  %v4521_v23 = vmul.f32 -1.442695, %v3537_v47  ;;  %v8067_v44 = vld [vmem:[#allocation13 + $0x58] sm:$0xff]  ;;  %v8080_v47 = vld [vmem:[#allocation13 + $0x20] sm:$0xff] }
 0xd0a   : > { %5733 = vpow2.f32 %v4521_v23  ;;  %v8084_v23 = vld [vmem:[#allocation13 + $0x18] sm:$0xff] }
 0xd0b   : > { %8678 = vst [vmem:[#allocation43_spill] sm:$0xff] %v8084_v23 }
 0xd15   : > { %v5732_v48 = vpop.eup %5731 }
 0xd16   : > { %v3534_v35 = vadd.f32 1.0, %v5732_v48  ;;  %v8087_v48 = vld [vmem:[#allocation13 + $0x28] sm:$0xff] }
 0xd17   : > { %v5734_v54 = vpop.eup %5733  ;;  %8679 = vst [vmem:[#allocation52_spill] sm:$0xff] %v8087_v48 }
 0xd18   : > { %5735 = vrcp.f32 %v3534_v35  ;;  %v3541_v55 = vadd.f32 1.0, %v5734_v54  ;;  %v8090_v35 = vld [vmem:[#allocation13 + $0x8] sm:$0xff]  ;;  %v8094_v54 = vld [vmem:[#allocation13] sm:$0xff] }
 0xd19   : > { %8680 = vst [vmem:[#allocation47_spill] sm:$0xff] %v8090_v35  ;;  %8681 = vst [vmem:[#allocation53_spill] sm:$0xff] %v8094_v54 }
 0xd1a   : > { %5737 = vrcp.f32 %v3541_v55  ;;  %v8098_v55 = vld [vmem:[#allocation13 + $0x10] sm:$0xff] }
 0xd1b   : > { %8682 = vst [vmem:[#allocation44_spill] sm:$0xff] %v8098_v55 }
 0xd25   : > { %v5736_v58 = vpop.eup %5735 }
 0xd26   : > { %v3545_v60 = vmul.f32 %v5736_v58, %v3544_v56  ;;  %v8683_v56 = vld [vmem:[#allocation54_spill] sm:$0xff] }
 0xd27   : > { %v5738_v62 = vpop.eup %5737  ;;  %v2675_v58 = vadd.f32 %v8683_v56, %v8674_v37 }
 0xd28   : > { %v3546_v40 = vadd.f32 %v3545_v60, %v2779_v59  ;;  %v3548_v1 = vsub.f32 1.0, %v5738_v62  ;;  %v3550_v4 = vmul.f32 %v5738_v62, %v7857_v27  ;;  %v8027_v27 = vld [vmem:[#allocation13 + $0xb8] sm:$0xff] }
 0xd2a   : > { %5739 = vtanh.f32 %v3546_v40 }
 0xd37   : > { %v5740_v2 = vpop.eup %5739 }
 0xd38   : > { %v3549_v3 = vmul.f32 %v5740_v2, %v3548_v1  ;;  %v8684_v2 = vld [vmem:[#allocation40_spill] sm:$0xff] }
 0xd3a   : > { %v7940_v24 = vadd.f32 %v3550_v4, %v3549_v3  ;;  %v2677_v3 = vadd.f32 %v8684_v2, %v7680_v5 }
 0xd3c   : > { %4522 = vst [vmem:[%s6426_s13 + $0x30] sm:$0xff] %v7940_v24  ;;  %3622 = vmatmul.mubr.f32.vlgmr.msra.gmra.mxu0 %v7940_v24  ;;  %5370 = vmatmul.mubr.f32.vlgmr.msra.gmra.mxu1 %v7940_v24 }
 0xd3d   : > { %3726 = vmatpush1.msra.mxu0 %v7946_v16  ;;  %5373 = vmatpush3.msra.mxu1 %v7483_v52  ;;  %v7964_v52 = vld [vmem:[#allocation13 + $0x138] sm:$0xff] }
 0xd3e   : > { %3727 = vmatprep.subr.mxu0 %v7950_v33  ;;  %5374 = vmatprep.subr.mxu1 %v8557_v30 }
 0xd3f   : > { %3728 = vmatpush1.msra.mxu0 %v7954_v57  ;;  %5375 = vmatpush3.msra.mxu1 %v7957_v6 }
 0xd40   : > { %3729 = vmatprep.subr.mxu0 %v7960_v7  ;;  %5376 = vmatprep.subr.mxu1 %v8557_v30 }
 0xd41   : > { %3730 = vmatpush1.msra.mxu0 %v7964_v52  ;;  %5377 = vmatpush3.msra.mxu1 %v7967_v8 }
 0xd42   : > { %3731 = vmatprep.subr.mxu0 %v7970_v50  ;;  %5378 = vmatprep.subr.mxu1 %v8557_v30 }
 0xd43   : > { %3732 = vmatpush1.msra.mxu0 %v7974_v9  ;;  %5379 = vmatpush3.msra.mxu1 %v7977_v13 }
 0xd44   : > { %3733 = vmatprep.subr.mxu0 %v7980_v17  ;;  %5380 = vmatprep.subr.mxu1 %v8557_v30 }
 0xd45   : > { %3734 = vmatpush1.msra.mxu0 %v7984_v63  ;;  %5381 = vmatpush3.msra.mxu1 %v7987_v12 }
 0xd46   : > { %3735 = vmatprep.subr.mxu0 %v7990_v45  ;;  %5382 = vmatprep.subr.mxu1 %v8557_v30 }
 0xd47   : > { %3736 = vmatpush1.msra.mxu0 %v7994_v11  ;;  %5383 = vmatpush3.msra.mxu1 %v7997_v28 }
 0xd48   : > { %3737 = vmatprep.subr.mxu0 %v8000_v61  ;;  %5384 = vmatprep.subr.mxu1 %v8557_v30 }
 0xd49   : > { %3738 = vmatpush1.msra.mxu0 %v8004_v29  ;;  %5385 = vmatpush3.msra.mxu1 %v8007_v25 }
 0xd4a   : > { %3739 = vmatprep.subr.mxu0 %v8010_v14  ;;  %5386 = vmatprep.subr.mxu1 %v8557_v30 }
 0xd4b   : > { %3740 = vmatpush1.msra.mxu0 %v8014_v22  ;;  %5387 = vmatpush3.msra.mxu1 %v8017_v51 }
 0xd4c   : > { %3741 = vmatprep.subr.mxu0 %v8020_v42  ;;  %5388 = vmatprep.subr.mxu1 %v8557_v30 }
 0xd4d   : > { %3742 = vmatpush1.msra.mxu0 %v8024_v0  ;;  %5389 = vmatpush3.msra.mxu1 %v8027_v27 }
 0xd4e   : > { %3743 = vmatprep.subr.mxu0 %v8030_v26  ;;  %5390 = vmatprep.subr.mxu1 %v8557_v30 }
 0xd4f   : > { %3744 = vmatpush1.msra.mxu0 %v8034_v34  ;;  %5391 = vmatpush3.msra.mxu1 %v8037_v53 }
 0xd50   : > { %3745 = vmatprep.subr.mxu0 %v8040_v49  ;;  %5392 = vmatprep.subr.mxu1 %v8557_v30 }
 0xd51   : > { %3746 = vmatpush1.msra.mxu0 %v8044_v32  ;;  %5393 = vmatpush3.msra.mxu1 %v8047_v38 }
 0xd52   : > { %3747 = vmatprep.subr.mxu0 %v8050_v41  ;;  %5394 = vmatprep.subr.mxu1 %v8557_v30 }
 0xd53   : > { %3748 = vmatpush1.msra.mxu0 %v8054_v15  ;;  %5395 = vmatpush3.msra.mxu1 %v8057_v18 }
 0xd54   : > { %3749 = vmatprep.subr.mxu0 %v8060_v43  ;;  %5396 = vmatprep.subr.mxu1 %v8557_v30 }
 0xd55   : > { %3750 = vmatpush1.msra.mxu0 %v8064_v19  ;;  %5397 = vmatpush3.msra.mxu1 %v8067_v44 }
 0xd56   : > { %3751 = vmatprep.subr.mxu0 %v8070_v20  ;;  %5398 = vmatprep.subr.mxu1 %v8557_v30 }
 0xd57   : > { %3752 = vmatpush1.msra.mxu0 %v8074_v46  ;;  %5399 = vmatpush3.msra.mxu1 %v8077_v21 }
 0xd58   : > { %3753 = vmatprep.subr.mxu0 %v8080_v47  ;;  %5400 = vmatprep.subr.mxu1 %v8557_v30 }
 0xd59   : > { %3754 = vmatpush1.msra.mxu0 %v8084_v23  ;;  %5401 = vmatpush3.msra.mxu1 %v8087_v48 }
 0xd5a   : > { %3755 = vmatprep.subr.mxu0 %v8090_v35  ;;  %5402 = vmatprep.subr.mxu1 %v8557_v30 }
 0xd5b   : > { %3756 = vmatpush1.msra.mxu0 %v8094_v54  ;;  %3789 = vmatprep.mubr.f32.mxu0 %v8557_v30 }
 0xd5c   : > { %5403 = vmatpush3.msra.mxu1 %v8098_v55  ;;  %5404 = vmatprep.mubr.msk.f32.mxu1 %vm6122_vm5, %v8557_v30 }
 0xd5d   : > { %3893 = vmatprep.subr.mxu0 %v7928_v31  ;;  %5407 = vmatprep.subr.mxu1 %v8557_v30 }
 0xdfc   : > { %v3623_v39 = vpop.f32.mrf.mxu0  ;;  %v3694_v59 = vpop.f32.mrf.mxu1 }
 0xdfd   : > { %v3698_v60 = vadd.f32 %v3623_v39, %v2675_v58  ;;  %v3712_v56 = vadd.f32 %v7686_v36, %v3694_v59  ;;  %v8685_v58 = vld [vmem:[#allocation58_spill] sm:$0xff]  ;;  %v8689_v59 = vld [vmem:[#allocation44_spill] sm:$0xff] }
 0xdfe   : > { %v5371_v40 = vpop.f32.mrf.mxu1  ;;  %v3625_v1 = vpop.f32.mrf.mxu0  ;;  %v2784_v39 = vadd.f32 %v8685_v58, %v7691_v10 }
 0xdff   : > { %v4523_v62 = vmul.f32 -1.442695, %v3698_v60  ;;  %v3705_v4 = vadd.f32 %v3625_v1, %v2677_v3  ;;  %v8690_v3 = vld [vmem:[#allocation30_spill] sm:$0xff] }
 0xe01   : > { %5741 = vpow2.f32 %v4523_v62  ;;  %v4524_v55 = vmul.f32 -1.442695, %v3705_v4  ;;  %v8691_v4 = vld [vmem:[#allocation38_spill] sm:$0xff] }
 0xe03   : > { %5743 = vpow2.f32 %v4524_v55 }
 0xe0e   : > { %v5742_v54 = vpop.eup %5741 }
 0xe0f   : > { %v3702_v31 = vadd.f32 1.0, %v5742_v54 }
 0xe10   : > { %v5744_v35 = vpop.eup %5743 }
 0xe11   : > { %5745 = vrcp.f32 %v3702_v31  ;;  %v3709_v48 = vadd.f32 1.0, %v5744_v35  ;;  %v8688_v35 = vld [vmem:[#allocation53_spill] sm:$0xff] }
 0xe13   : > { %5747 = vrcp.f32 %v3709_v48  ;;  %v8687_v48 = vld [vmem:[#allocation47_spill] sm:$0xff] }
 0xe1e   : > { %v5746_v37 = vpop.eup %5745 }
 0xe1f   : > { %v3713_v60 = vmul.f32 %v5746_v37, %v3712_v56  ;;  %v8120_v37 = vld [vmem:[#allocation13 + $0x178] sm:$0xff]  ;;  %v8692_v56 = vld [vmem:[#allocation31_spill] sm:$0xff] }
 0xe20   : > { %v5748_v62 = vpop.eup %5747  ;;  %v2681_v58 = vadd.f32 %v8692_v56, %v8691_v4 }
 0xe21   : > { %v3714_v40 = vadd.f32 %v3713_v60, %v2784_v39  ;;  %v3716_v1 = vsub.f32 1.0, %v5748_v62  ;;  %v3718_v54 = vmul.f32 %v5748_v62, %v7940_v24  ;;  %v8686_v24 = vld [vmem:[#allocation52_spill] sm:$0xff] }
 0xe23   : > { %5749 = vtanh.f32 %v3714_v40 }
 0xe30   : > { %v5750_v2 = vpop.eup %5749 }
 0xe31   : > { %v3717_v55 = vmul.f32 %v5750_v2, %v3716_v1 }
 0xe33   : > { %v8113_v31 = vadd.f32 %v3718_v54, %v3717_v55  ;;  %v8693_v55 = vld [vmem:[#allocation48_spill] sm:$0xff] }
 0xe34   : > { %v2683_v54 = vadd.f32 %v8693_v55, %v7680_v5 }
 0xe35   : > { %4525 = vst [vmem:[%s6426_s13 + $0x40] sm:$0xff] %v8113_v31  ;;  %3790 = vmatmul.mubr.f32.vlgmr.msra.gmra.mxu0 %v8113_v31  ;;  %5405 = vmatmul.mubr.f32.vlgmr.msra.gmra.mxu1 %v8113_v31 }
 0xe36   : > { %3894 = vmatpush1.msra.mxu0 %v7946_v16  ;;  %5408 = vmatpush3.msra.mxu1 %v8120_v37 }
 0xe37   : > { %3895 = vmatprep.subr.mxu0 %v7950_v33  ;;  %5409 = vmatprep.subr.mxu1 %v8557_v30 }
 0xe38   : > { %3896 = vmatpush1.msra.mxu0 %v7954_v57  ;;  %5410 = vmatpush3.msra.mxu1 %v7957_v6 }
 0xe39   : > { %3897 = vmatprep.subr.mxu0 %v7960_v7  ;;  %5411 = vmatprep.subr.mxu1 %v8557_v30 }
 0xe3a   : > { %3898 = vmatpush1.msra.mxu0 %v7964_v52  ;;  %5412 = vmatpush3.msra.mxu1 %v7967_v8 }
 0xe3b   : > { %3899 = vmatprep.subr.mxu0 %v7970_v50  ;;  %5413 = vmatprep.subr.mxu1 %v8557_v30 }
 0xe3c   : > { %3900 = vmatpush1.msra.mxu0 %v7974_v9  ;;  %5414 = vmatpush3.msra.mxu1 %v7977_v13 }
 0xe3d   : > { %3901 = vmatprep.subr.mxu0 %v7980_v17  ;;  %5415 = vmatprep.subr.mxu1 %v8557_v30 }
 0xe3e   : > { %3902 = vmatpush1.msra.mxu0 %v7984_v63  ;;  %5416 = vmatpush3.msra.mxu1 %v7987_v12 }
 0xe3f   : > { %3903 = vmatprep.subr.mxu0 %v7990_v45  ;;  %5417 = vmatprep.subr.mxu1 %v8557_v30 }
 0xe40   : > { %3904 = vmatpush1.msra.mxu0 %v7994_v11  ;;  %5418 = vmatpush3.msra.mxu1 %v7997_v28 }
 0xe41   : > { %3905 = vmatprep.subr.mxu0 %v8000_v61  ;;  %5419 = vmatprep.subr.mxu1 %v8557_v30 }
 0xe42   : > { %3906 = vmatpush1.msra.mxu0 %v8004_v29  ;;  %5420 = vmatpush3.msra.mxu1 %v8007_v25 }
 0xe43   : > { %3907 = vmatprep.subr.mxu0 %v8010_v14  ;;  %5421 = vmatprep.subr.mxu1 %v8557_v30 }
 0xe44   : > { %3908 = vmatpush1.msra.mxu0 %v8014_v22  ;;  %5422 = vmatpush3.msra.mxu1 %v8017_v51 }
 0xe45   : > { %3909 = vmatprep.subr.mxu0 %v8020_v42  ;;  %5423 = vmatprep.subr.mxu1 %v8557_v30 }
 0xe46   : > { %3910 = vmatpush1.msra.mxu0 %v8024_v0  ;;  %5424 = vmatpush3.msra.mxu1 %v8027_v27 }
 0xe47   : > { %3911 = vmatprep.subr.mxu0 %v8030_v26  ;;  %5425 = vmatprep.subr.mxu1 %v8557_v30 }
 0xe48   : > { %3912 = vmatpush1.msra.mxu0 %v8034_v34  ;;  %5426 = vmatpush3.msra.mxu1 %v8037_v53 }
 0xe49   : > { %3913 = vmatprep.subr.mxu0 %v8040_v49  ;;  %5427 = vmatprep.subr.mxu1 %v8557_v30 }
 0xe4a   : > { %3914 = vmatpush1.msra.mxu0 %v8044_v32  ;;  %5428 = vmatpush3.msra.mxu1 %v8047_v38 }
 0xe4b   : > { %3915 = vmatprep.subr.mxu0 %v8050_v41  ;;  %5429 = vmatprep.subr.mxu1 %v8557_v30 }
 0xe4c   : > { %3916 = vmatpush1.msra.mxu0 %v8054_v15  ;;  %5430 = vmatpush3.msra.mxu1 %v8057_v18 }
 0xe4d   : > { %3917 = vmatprep.subr.mxu0 %v8060_v43  ;;  %5431 = vmatprep.subr.mxu1 %v8557_v30 }
 0xe4e   : > { %3918 = vmatpush1.msra.mxu0 %v8064_v19  ;;  %5432 = vmatpush3.msra.mxu1 %v8067_v44 }
 0xe4f   : > { %3919 = vmatprep.subr.mxu0 %v8070_v20  ;;  %5433 = vmatprep.subr.mxu1 %v8557_v30 }
 0xe50   : > { %3920 = vmatpush1.msra.mxu0 %v8074_v46  ;;  %5434 = vmatpush3.msra.mxu1 %v8077_v21 }
 0xe51   : > { %3921 = vmatprep.subr.mxu0 %v8080_v47  ;;  %5435 = vmatprep.subr.mxu1 %v8557_v30 }
 0xe52   : > { %3922 = vmatpush1.msra.mxu0 %v8084_v23  ;;  %5436 = vmatpush3.msra.mxu1 %v8686_v24 }
 0xe53   : > { %3923 = vmatprep.subr.mxu0 %v8687_v48  ;;  %5437 = vmatprep.subr.mxu1 %v8557_v30 }
 0xe54   : > { %3924 = vmatpush1.msra.mxu0 %v8688_v35  ;;  %3957 = vmatprep.mubr.f32.mxu0 %v8557_v30 }
 0xe55   : > { %5438 = vmatpush3.msra.mxu1 %v8689_v59  ;;  %5439 = vmatprep.mubr.msk.f32.mxu1 %vm6122_vm5, %v8557_v30 }
 0xe56   : > { %4061 = vmatprep.subr.mxu0 %v8690_v3  ;;  %5442 = vmatprep.subr.mxu1 %v8557_v30 }
 0xef5   : > { %v3791_v39 = vpop.f32.mrf.mxu0  ;;  %v3862_v60 = vpop.f32.mrf.mxu1 }
 0xef6   : > { %v3866_v40 = vadd.f32 %v3791_v39, %v2681_v58  ;;  %v3880_v56 = vadd.f32 %v7686_v36, %v3862_v60  ;;  %v8694_v58 = vld [vmem:[#allocation49_spill] sm:$0xff]  ;;  %v8695_v36 = vld [vmem:[#allocation43_spill] sm:$0xff] }
 0xef7   : > { %v5406_v62 = vpop.f32.mrf.mxu1  ;;  %v3793_v2 = vpop.f32.mrf.mxu0  ;;  %v2789_v39 = vadd.f32 %v8694_v58, %v7691_v10 }
 0xef8   : > { %v4526_v1 = vmul.f32 -1.442695, %v3866_v40  ;;  %v3873_v59 = vadd.f32 %v3793_v2, %v2683_v54 }
 0xefa   : > { %5751 = vpow2.f32 %v4526_v1  ;;  %v4527_v35 = vmul.f32 -1.442695, %v3873_v59 }
 0xefc   : > { %5753 = vpow2.f32 %v4527_v35 }
 0xf07   : > { %v5752_v48 = vpop.eup %5751 }
 0xf08   : > { %v3870_v3 = vadd.f32 1.0, %v5752_v48 }
 0xf09   : > { %v5754_v24 = vpop.eup %5753 }
 0xf0a   : > { %5755 = vrcp.f32 %v3870_v3  ;;  %v3877_v23 = vadd.f32 1.0, %v5754_v24 }
 0xf0c   : > { %5757 = vrcp.f32 %v3877_v23  ;;  %v8705_v23 = vld [vmem:[#allocation51_spill] sm:$0xff] }
 0xf17   : > { %v5756_v4 = vpop.eup %5755 }
 0xf18   : > { %v3881_v40 = vmul.f32 %v5756_v4, %v3880_v56 }
 0xf19   : > { %v5758_v1 = vpop.eup %5757 }
 0xf1a   : > { %v3882_v62 = vadd.f32 %v3881_v40, %v2789_v39  ;;  %v3884_v2 = vsub.f32 1.0, %v5758_v1  ;;  %v3886_v48 = vmul.f32 %v5758_v1, %v8113_v31  ;;  %v2695_v31 = vadd.f32 %v8705_v23, %v7680_v5  ;;  %v8706_v39 = vld [vmem:[#allocation50_spill] sm:$0xff] }
 0xf1b   : > { %v2799_v40 = vadd.f32 %v8706_v39, %v7691_v10 }
 0xf1c   : > { %5759 = vtanh.f32 %v3882_v62 }
 0xf29   : > { %v5760_v59 = vpop.eup %5759 }
 0xf2a   : > { %v3885_v35 = vmul.f32 %v5760_v59, %v3884_v2 }
 0xf2c   : > { %v8196_v55 = vadd.f32 %v3886_v48, %v3885_v35 }
 0xf2e   : > { %4528 = vst [vmem:[%s6426_s13 + $0x50] sm:$0xff] %v8196_v55  ;;  %3958 = vmatmul.mubr.f32.vlgmr.msra.gmra.mxu0 %v8196_v55  ;;  %5440 = vmatmul.mubr.f32.vlgmr.msra.gmra.mxu1 %v8196_v55 }
 0xf2f   : > { %4062 = vmatpush1.msra.mxu0 %v7946_v16  ;;  %5443 = vmatpush3.msra.mxu1 %v8120_v37  ;;  %v8696_v16 = vld [vmem:[#allocation52_spill] sm:$0xff] }
 0xf30   : > { %4063 = vmatprep.subr.mxu0 %v7950_v33  ;;  %5444 = vmatprep.subr.mxu1 %v8557_v30  ;;  %v8697_v33 = vld [vmem:[#allocation47_spill] sm:$0xff] }
 0xf31   : > { %4064 = vmatpush1.msra.mxu0 %v7954_v57  ;;  %5445 = vmatpush3.msra.mxu1 %v7957_v6  ;;  %v8698_v57 = vld [vmem:[#allocation53_spill] sm:$0xff]  ;;  %v8699_v6 = vld [vmem:[#allocation44_spill] sm:$0xff] }
 0xf32   : > { %4065 = vmatprep.subr.mxu0 %v7960_v7  ;;  %5446 = vmatprep.subr.mxu1 %v8557_v30  ;;  %v8700_v7 = vld [vmem:[#allocation38_spill] sm:$0xff] }
 0xf33   : > { %4066 = vmatpush1.msra.mxu0 %v7964_v52  ;;  %5447 = vmatpush3.msra.mxu1 %v7967_v8  ;;  %v8701_v52 = vld [vmem:[#allocation57_spill] sm:$0xff] }
 0xf34   : > { %4067 = vmatprep.subr.mxu0 %v7970_v50  ;;  %5448 = vmatprep.subr.mxu1 %v8557_v30  ;;  %v2687_v8 = vadd.f32 %v8701_v52, %v8700_v7 }
 0xf35   : > { %4068 = vmatpush1.msra.mxu0 %v7974_v9  ;;  %5449 = vmatpush3.msra.mxu1 %v7977_v13 }
 0xf36   : > { %4069 = vmatprep.subr.mxu0 %v7980_v17  ;;  %5450 = vmatprep.subr.mxu1 %v8557_v30 }
 0xf37   : > { %4070 = vmatpush1.msra.mxu0 %v7984_v63  ;;  %5451 = vmatpush3.msra.mxu1 %v7987_v12 }
 0xf38   : > { %4071 = vmatprep.subr.mxu0 %v7990_v45  ;;  %5452 = vmatprep.subr.mxu1 %v8557_v30  ;;  %v8702_v45 = vld [vmem:[#allocation32_spill] sm:$0xff] }
 0xf39   : > { %4072 = vmatpush1.msra.mxu0 %v7994_v11  ;;  %5453 = vmatpush3.msra.mxu1 %v7997_v28  ;;  %v2689_v11 = vadd.f32 %v8702_v45, %v7680_v5 }
 0xf3a   : > { %4073 = vmatprep.subr.mxu0 %v8000_v61  ;;  %5454 = vmatprep.subr.mxu1 %v8557_v30 }
 0xf3b   : > { %4074 = vmatpush1.msra.mxu0 %v8004_v29  ;;  %5455 = vmatpush3.msra.mxu1 %v8007_v25 }
 0xf3c   : > { %4075 = vmatprep.subr.mxu0 %v8010_v14  ;;  %5456 = vmatprep.subr.mxu1 %v8557_v30 }
 0xf3d   : > { %4076 = vmatpush1.msra.mxu0 %v8014_v22  ;;  %5457 = vmatpush3.msra.mxu1 %v8017_v51  ;;  %v5878_v22 = vld [vmem:[%s8646_s24] ss:$0 sm:$0xff] }
 0xf3e   : > { %4077 = vmatprep.subr.mxu0 %v8020_v42  ;;  %5458 = vmatprep.subr.mxu1 %v8557_v30 }
 0xf3f   : > { %4078 = vmatpush1.msra.mxu0 %v8024_v0  ;;  %5459 = vmatpush3.msra.mxu1 %v8027_v27  ;;  %v8703_v0 = vld [vmem:[#allocation56_spill] sm:$0xff] }
 0xf40   : > { %4079 = vmatprep.subr.mxu0 %v8030_v26  ;;  %5460 = vmatprep.subr.mxu1 %v8557_v30  ;;  %v2794_v27 = vadd.f32 %v8703_v0, %v7691_v10 }
 0xf41   : > { %4080 = vmatpush1.msra.mxu0 %v8034_v34  ;;  %5461 = vmatpush3.msra.mxu1 %v8037_v53 }
 0xf42   : > { %4081 = vmatprep.subr.mxu0 %v8040_v49  ;;  %5462 = vmatprep.subr.mxu1 %v8557_v30 }
 0xf43   : > { %4082 = vmatpush1.msra.mxu0 %v8044_v32  ;;  %5463 = vmatpush3.msra.mxu1 %v8047_v38 }
 0xf44   : > { %4083 = vmatprep.subr.mxu0 %v8050_v41  ;;  %5464 = vmatprep.subr.mxu1 %v8557_v30 }
 0xf45   : > { %4084 = vmatpush1.msra.mxu0 %v8054_v15  ;;  %5465 = vmatpush3.msra.mxu1 %v8057_v18  ;;  %v8704_v18 = vld [vmem:[#allocation39_spill] sm:$0xff] }
 0xf46   : > { %4085 = vmatprep.subr.mxu0 %v8060_v43  ;;  %5466 = vmatprep.subr.mxu1 %v8557_v30  ;;  %v2693_v43 = vadd.f32 %v8704_v18, %v8700_v7 }
 0xf47   : > { %4086 = vmatpush1.msra.mxu0 %v8064_v19  ;;  %5467 = vmatpush3.msra.mxu1 %v8067_v44 }
 0xf48   : > { %4087 = vmatprep.subr.mxu0 %v8070_v20  ;;  %5468 = vmatprep.subr.mxu1 %v8557_v30 }
 0xf49   : > { %4088 = vmatpush1.msra.mxu0 %v8074_v46  ;;  %5469 = vmatpush3.msra.mxu1 %v8077_v21 }
 0xf4a   : > { %4089 = vmatprep.subr.mxu0 %v8080_v47  ;;  %5470 = vmatprep.subr.mxu1 %v8557_v30 }
 0xf4b   : > { %4090 = vmatpush1.msra.mxu0 %v8695_v36  ;;  %5471 = vmatpush3.msra.mxu1 %v8696_v16 }
 0xf4c   : > { %4091 = vmatprep.subr.mxu0 %v8697_v33  ;;  %5472 = vmatprep.subr.mxu1 %v8557_v30 }
 0xf4d   : > { %4092 = vmatpush1.msra.mxu0 %v8698_v57  ;;  %4125 = vmatprep.mubr.f32.mxu0 %v8557_v30 }
 0xf4e   : > { %5473 = vmatpush3.msra.mxu1 %v8699_v6  ;;  %5474 = vmatprep.mubr.msk.f32.mxu1 %vm6122_vm5, %v8557_v30 }
 0xfee   : > { %v3959_v50 = vpop.f32.mrf.mxu0  ;;  %v4030_v9 = vpop.f32.mrf.mxu1 }
 0xfef   : > { %v4034_v13 = vadd.f32 %v3959_v50, %v2687_v8  ;;  %v4048_v51 = vadd.f32 %v5878_v22, %v4030_v9 }
 0xff0   : > { %v5441_v17 = vpop.f32.mrf.mxu1  ;;  %v3961_v12 = vpop.f32.mrf.mxu0 }
 0xff1   : > { %v4529_v63 = vmul.f32 -1.442695, %v4034_v13  ;;  %v4041_v28 = vadd.f32 %v3961_v12, %v2689_v11 }
 0xff3   : > { %5761 = vpow2.f32 %v4529_v63  ;;  %v4530_v61 = vmul.f32 -1.442695, %v4041_v28 }
 0xff5   : > { %5763 = vpow2.f32 %v4530_v61 }
0x1000   : > { %v5762_v29 = vpop.eup %5761 }
0x1001   : > { %v4038_v25 = vadd.f32 1.0, %v5762_v29 }
0x1002   : > { %v5764_v30 = vpop.eup %5763 }
0x1003   : > { %5765 = vrcp.f32 %v4038_v25  ;;  %v4045_v14 = vadd.f32 1.0, %v5764_v30 }
0x1005   : > { %5767 = vrcp.f32 %v4045_v14 }
0x1010   : > { %v5766_v42 = vpop.eup %5765 }
0x1011   : > { %v4049_v26 = vmul.f32 %v5766_v42, %v4048_v51 }
0x1012   : > { %v5768_v53 = vpop.eup %5767 }
0x1013   : > { %v4050_v34 = vadd.f32 %v4049_v26, %v2794_v27  ;;  %v4052_v49 = vsub.f32 1.0, %v5768_v53  ;;  %v4054_v41 = vmul.f32 %v5768_v53, %v8196_v55 }
0x1015   : > { %5769 = vtanh.f32 %v4050_v34 }
0x1022   : > { %v5770_v32 = vpop.eup %5769 }
0x1023   : > { %v4053_v38 = vmul.f32 %v5770_v32, %v4052_v49 }
0x1025   : > { %v4055_v15 = vadd.f32 %v4054_v41, %v4053_v38 }
0x1027   : > { %4531 = vst [vmem:[%s6426_s13 + $0x60] sm:$0xff] %v4055_v15  ;;  %4126 = vmatmul.mubr.f32.vlgmr.msra.gmra.mxu0 %v4055_v15  ;;  %5475 = vmatmul.mubr.f32.vlgmr.msra.gmra.mxu1 %v4055_v15 }
0x10e7   : > { %v4127_v19 = vpop.f32.mrf.mxu0  ;;  %v4198_v44 = vpop.f32.mrf.mxu1 }
0x10e8   : > { %v4202_v20 = vadd.f32 %v4127_v19, %v2693_v43  ;;  %v4216_v56 = vadd.f32 %v5878_v22, %v4198_v44 }
0x10e9   : > { %v5476_v46 = vpop.f32.mrf.mxu1  ;;  %v4129_v47 = vpop.f32.mrf.mxu0 }
0x10ea   : > { %v4532_v21 = vmul.f32 -1.442695, %v4202_v20  ;;  %v4209_v37 = vadd.f32 %v4129_v47, %v2695_v31 }
0x10ec   : > { %5771 = vpow2.f32 %v4532_v21  ;;  %v4533_v24 = vmul.f32 -1.442695, %v4209_v37 }
0x10ee   : > { %5773 = vpow2.f32 %v4533_v24 }
0x10f9   : > { %v5772_v4 = vpop.eup %5771 }
0x10fa   : > { %v4206_v60 = vadd.f32 1.0, %v5772_v4 }
0x10fb   : > { %v5774_v54 = vpop.eup %5773 }
0x10fc   : > { %5775 = vrcp.f32 %v4206_v60  ;;  %v4213_v3 = vadd.f32 1.0, %v5774_v54 }
0x10fe   : > { %5777 = vrcp.f32 %v4213_v3 }
0x1109   : > { %v5776_v58 = vpop.eup %5775 }
0x110a   : > { %v4217_v62 = vmul.f32 %v5776_v58, %v4216_v56 }
0x110b   : > { %v5778_v5 = vpop.eup %5777 }
0x110c   : > { %v4218_v1 = vadd.f32 %v4217_v62, %v2799_v40  ;;  %v4220_v2 = vsub.f32 1.0, %v5778_v5  ;;  %v4222_v48 = vmul.f32 %v5778_v5, %v4055_v15 }
0x110e   : > { %5779 = vtanh.f32 %v4218_v1 }
0x111b   : > { %v5780_v59 = vpop.eup %5779 }
0x111c   : > { %v4221_v35 = vmul.f32 %v5780_v59, %v4220_v2  ;;  %4230 = sbr.rel (%p4535_p10) target bundleno = 4393 (0x1129), region = 168 }
0x111e   : > { %v4223_v55 = vadd.f32 %v4222_v48, %v4221_v35 }
0x1120   : > { %4534 = vst [vmem:[%s6426_s13 + $0x70] sm:$0xff] %v4223_v55  ;;  %4226 = vst [vmem:[#allocation4 + $0x8] sm:$0xff] %v4223_v55 }
0x1121   : > { %v4231_v36 = vld [vmem:[#allocation4] sm:$0xff] }
0x1122   : > { %4233 = vst [vmem:[%s6428_s30] sm:$0xff] %v4231_v36 }
0x1127   : > { %v4232_v16 = vld [vmem:[#allocation4 + $0x8] sm:$0xff] }
0x1128   : > { %4234 = vst [vmem:[%s6428_s30 + $0x8] sm:$0xff] %v4232_v16 }
0x1129 PF: > { %s8708_s29 = sld [smem:[#allocation23_spill]]  ;;  %s4539_s3 = sshll.u32 %s6099_s20, 1 }
0x112a   : > { %s4257_s2 = sshll.u32 %s6426_s13, 4  ;;  %s8709_s11 = sld [smem:[#allocation71_spill]]  ;;  %s8291_s2 = int_to_ptr.vmem [resolvable:$true] %s4257_s2 }
0x112b   : > { %s4236_s14 = scalar_lea.sflag [#allocation10], %s6404_s9  ;;  %s5957_s26 = scalar_lea.vmem %s8291_s2, 2048 }
0x112c   : > { %p5958_p9 = scmp.ne.s32.totalorder %s8291_s2, %s5957_s26  ;;  %p8710_p6 = scmp.ne.s32.totalorder %s8504_s8, 0 }
0x112e   : > { %p5959_p11 = pnand %p5958_p9, %p8710_p6 }
0x112f   : > { %s4546_s25 = sshll.u32 %s8708_s29, 5  ;;  %s6123_s29 = smov [#allocation14]  }
0x1130   : > { %s4254_s5 = sadd.s32 %s4546_s25, %s4539_s3  ;;  %p5960_p4 = pneg %p5959_p11 }
0x1131   : > { %s4541_s27 = sshll.u32 %s4254_s5, 7  ;;  %s5961_s13 = sshll.u32 %s6123_s29, 4  ;;  %s5962_s13 = int_to_ptr.vmem [resolvable:$false] %s5961_s13 }
0x1132   : > { %s8296_s7 = scalar_lea.hbm %s8709_s11, %s4541_s27  ;;  %s5963_s3 = scalar_lea.vmem %s5962_s13, 4096 }
0x1133   : > { %p5964_p8 = scmp.lt.s32.totalorder %s8291_s2, %s5962_s13  ;;  %p5965_p13 = scmp.lt.s32.totalorder %s5963_s3, %s5957_s26 }
0x1135   : > { %p5966_p5 = por %p5965_p13, %p5964_p8 }
0x1137   : > { %p5967_p0 = pnand %p5966_p5, %p5960_p4 }
0x1139   : > { %5970 = shalt.err (!%p5967_p0)
}
0x113a   : > { %s5971_s25 = scalar_lea.hbm %s8296_s7, 2048  ;;  %s5975_s6 = scalar_lea.hbm %s8709_s11, 8192 }
0x113b   : > { %p5972_p12 = scmp.ne.s32.totalorder %s8296_s7, %s5971_s25  ;;  %p5976_p3 = scmp.lt.s32.totalorder %s8296_s7, %s8709_s11 }
0x113c   : > { %p5977_p7 = scmp.lt.s32.totalorder %s5975_s6, %s5971_s25 }
0x113d   : > { %p5973_p1 = pnand %p5972_p12, %p8710_p6 }
0x113e   : > { %p5978_p10 = por %p5977_p7, %p5976_p3 }
0x113f   : > { %p5974_p2 = pneg %p5973_p1 }
0x1141   : > { %p5979_p9 = pnand %p5978_p10, %p5974_p2 }
0x1143   : > { %5982 = shalt.err (!%p5979_p9)
}
0x1144   : > { %s6124_s26 = smov 256   ;;  %s6125_s13 = smov 512  }
0x1145   : > { %s6126_s3 = smov 16   ;;  %s4542_s5 = sshll.u32 %s6099_s20, 7 }
0x1146   : > { %5489 = dma.vmem_to_hbm [thread:$0]  (%p8710_p6), %s8291_s2, 2048, %s8296_s7, %s4236_s14, %s6124_s26, %s6125_s13, %s6126_s3  }
0x1147   : > { %s4272_s25 = sshll.u32 %s6428_s30, 4  ;;  %s8711_s12 = sld [smem:[#allocation72_spill]]  ;;  %s8329_s25 = int_to_ptr.vmem [resolvable:$true] %s4272_s25 }
0x1148   : > { %s8712_s0 = sand.u32 1, %s6079_s15   ;;  %s5983_s4 = scalar_lea.vmem %s8329_s25, 256 }
0x1149   : > { %s8333_s1 = scalar_lea.sflag [#allocation16], %s8712_s0  ;;  %p5984_p11 = scmp.ne.s32.totalorder %s8329_s25, %s5983_s4 }
0x114a   : > { %p8713_p4 = scmp.ne.s32.totalorder %s8509_s19, 0  ;;  %s6127_s8 = smov [#allocation15]  }
0x114b   : > { %s5987_s20 = sshll.u32 %s6127_s8, 4  ;;  %s5988_s20 = int_to_ptr.vmem [resolvable:$false] %s5987_s20 }
0x114c   : > { %p5985_p8 = pnand %p5984_p11, %p8713_p4  ;;  %s5989_s9 = scalar_lea.vmem %s5988_s20, 512 }
0x114d   : > { %s8327_s29 = scalar_lea.hbm %s8711_s12, %s4542_s5  ;;  %p5990_p13 = scmp.lt.s32.totalorder %s8329_s25, %s5988_s20 }
0x114e   : > { %p5986_p6 = pneg %p5985_p8  ;;  %p5991_p5 = scmp.lt.s32.totalorder %s5989_s9, %s5983_s4 }
0x1150   : > { %p5992_p0 = por %p5991_p5, %p5990_p13 }
0x1152   : > { %p5993_p12 = pnand %p5992_p0, %p5986_p6 }
0x1154   : > { %5996 = shalt.err (!%p5993_p12)
}
0x1155   : > { %s5997_s0 = scalar_lea.hbm %s8327_s29, 256  ;;  %s6001_s7 = scalar_lea.hbm %s8711_s12, 512 }
0x1156   : > { %p5998_p1 = scmp.ne.s32.totalorder %s8327_s29, %s5997_s0  ;;  %p6002_p7 = scmp.lt.s32.totalorder %s8327_s29, %s8711_s12 }
0x1157   : > { %p6003_p10 = scmp.lt.s32.totalorder %s6001_s7, %s5997_s0 }
0x1158   : > { %p5999_p2 = pnand %p5998_p1, %p8713_p4 }
0x1159   : > { %p6004_p9 = por %p6003_p10, %p6002_p7 }
0x115a   : > { %p6000_p3 = pneg %p5999_p2 }
0x115c   : > { %p6005_p11 = pnand %p6004_p9, %p6000_p3 }
0x115e   : > { %6008 = shalt.err (!%p6005_p11)
}
0x115f   : > { %s6128_s4 = smov 128   ;;  %s6129_s3 = smov 8  }
0x1160   : > { %5490 = dma.vmem_to_hbm [thread:$0]  (%p8713_p4), %s8329_s25, 256, %s8327_s29, %s8333_s1, %s6128_s4, %s6124_s26, %s6129_s3  }
0x1161 PF: > { %s8714_s5 = sld [smem:[#allocation22_spill]]  ;;  %p5516_p8 = scmp.ge.s32.totalorder %s6111_s23, 2 }
0x1162   : > { %s8715_s27 = sld [smem:[#allocation28_spill]] }
0x1167   : > { %s4287_s6 = sand.u32 1, %s8714_s5  }
0x1168   : > { %p8716_p6 = scmp.ne.s32.totalorder %s8715_s27, 0  ;;  %s4288_s8 = scalar_lea.sflag [#allocation10], %s4287_s6 }
0x116a   : > { %p5504_p13 = pnand %p5516_p8, %p8716_p6 }
0x116c   : > { %p5505_p5 = pneg %p5504_p13 }
0x116e   : > { %6062 = dma.done.wait (%p5505_p5), %s4288_s8, 2048  }
0x116f   : > { %6064 = vsyncadd (%p5505_p5), %s4288_s8, 4294965248  ;;  %s8717_s20 = sld [smem:[#allocation21_spill]] }
0x1170   : > { %s8718_s9 = sld [smem:[#allocation29_spill]] }
0x1175   : > { %s4296_s0 = sand.u32 1, %s8717_s20  }
0x1176   : > { %p8719_p0 = scmp.ne.s32.totalorder %s8718_s9, 0  ;;  %s4297_s19 = scalar_lea.sflag [#allocation16], %s4296_s0 }
0x1178   : > { %p5507_p12 = pnand %p5516_p8, %p8719_p0 }
0x117a   : > { %p5508_p1 = pneg %p5507_p12 }
0x117c   : > { %6066 = dma.done.wait (%p5508_p1), %s4297_s19, 256  }
0x117d   : > { %6068 = vsyncadd (%p5508_p1), %s4297_s19, 4294967040  ;;  %s33_s23 = sadd.s32 1, %s6111_s23   ;;  %s8720_s1 = sld [smem:[#allocation26_spill]] }
0x117e   : > { %p30_p4 = scmp.ge.s32.totalorder %s33_s23, 6   ;;  %s8721_s26 = sld [smem:[#allocation27_spill]] }
0x117f   : > { %s8722_s25 = sld [smem:[#allocation24_spill]]  ;;  %s8724_s29 = smov %s6079_s15 }
0x1180   : > { %s8723_s2 = sld [smem:[#allocation25_spill]]  ;;  %s8725_s30 = smov %s6087_s17 }
0x1181   : > { %s8726_s15 = smov %s6083_s16  ;;  %s8728_s17 = smov %s6091_s18 }
0x1182   : > { %s8730_s19 = smov %s6103_s21  ;;  %s8731_s20 = smov %s6107_s22 }
0x1183   : > { %s8727_s16 = smov %s8720_s1  ;;  %32 = sbr.rel (!%p30_p4) target bundleno = 26 (0x1a), region = 259 }
0x1184   : > { %s8729_s18 = smov %s8721_s26 }
0x1185   : > { %s8732_s21 = smov %s8722_s25 }
0x1186   : > { %s8733_s22 = smov %s8723_s2 }
0x1188   :  { %4302 = vsyncpa [#allocation9], 1 }
0x1189   :  { %4304 = vsyncpa [#allocation9 + $0x1], 1 }
0x118a   :  { %4305 = vsyncpa [#allocation12], 1 }
0x118b   :  { %4306 = vsyncpa [#allocation10], 1 }
0x118c   :  { %4308 = vsyncpa [#allocation10 + $0x1], 1 }
0x118d   :  { %4309 = vsyncpa [#allocation16], 1 }
0x118e   :  { %4311 = vsyncpa [#allocation16 + $0x1], 1 }

// kernel: tpu_custom_call.1
= control target key start
LH: loop header
LB: loop body
LE: loop exit
PB: predicated region body
PF: predicated region fallthrough
CT: control target
= control target key end

     0   :  { %s8397_s0 = inlined_call_operand.vmem [shape: f32[16,16,2], index: 0, kind: input, shape index: {}]   ;;  %s8398_s1 = inlined_call_operand.vmem [shape: f32[16,4], index: 1, kind: input, shape index: {}]   ;;  %s8399_s2 = inlined_call_operand.vmem [shape: f32[4,128], index: 2, kind: input, shape index: {}]   ;;  %s8400_s3 = inlined_call_operand.vmem [shape: f32[1,128], index: 3, kind: input, shape index: {}]   ;;  %s8401_s4 = inlined_call_operand.vmem [shape: f32[2,16,128], index: 4, kind: input, shape index: {}]   ;;  %s8402_s5 = inlined_call_operand.vmem [shape: f32[2,384], index: 5, kind: input, shape index: {}]   ;;  %s8403_s6 = inlined_call_operand.hbm [shape: f32[128,384], index: 6, kind: input, shape index: {}]   ;;  %s8404_s7 = inlined_call_operand.vmem [shape: f32[1,384], index: 7, kind: input, shape index: {}]   ;;  %s8405_s8 = inlined_call_operand.vmem [shape: f32[1,128], index: 8, kind: input, shape index: {}]   ;;  %s8406_s9 = inlined_call_operand.hbm [shape: f32[128,384], index: 9, kind: input, shape index: {}]   ;;  %s8407_s10 = inlined_call_operand.hbm [shape: f32[128,384], index: 10, kind: input, shape index: {}]   ;;  %s8408_s11 = inlined_call_operand.vmem [shape: f32[1,384], index: 11, kind: input, shape index: {}]   ;;  %s8409_s12 = inlined_call_operand.vmem [shape: f32[1,128], index: 12, kind: input, shape index: {}]   ;;  %s8410_s13 = inlined_call_operand.hbm [shape: f32[16,16,256], index: 13, kind: output, shape index: {0}]   ;;  %s8411_s14 = inlined_call_operand.hbm [shape: f32[2,16,128], index: 14, kind: output, shape index: {1}]  }
   0x1   :  { %8481 = sst [smem:[#allocation59_spill]] %s8397_s0 }
   0x2   :  { %8482 = sst [smem:[#allocation60_spill]] %s8398_s1 }
   0x3   :  { %8483 = sst [smem:[#allocation61_spill]] %s8399_s2 }
   0x4   :  { %8484 = sst [smem:[#allocation62_spill]] %s8400_s3 }
   0x5   :  { %8485 = sst [smem:[#allocation63_spill]] %s8401_s4 }
   0x6   :  { %8486 = sst [smem:[#allocation64_spill]] %s8402_s5 }
   0x7   :  { %8487 = sst [smem:[#allocation65_spill]] %s8403_s6 }
   0x8   :  { %8488 = sst [smem:[#allocation66_spill]] %s8404_s7 }
   0x9   :  { %8489 = sst [smem:[#allocation67_spill]] %s8405_s8 }
   0xa   :  { %8490 = sst [smem:[#allocation68_spill]] %s8406_s9 }
   0xb   :  { %8491 = sst [smem:[#allocation69_spill]] %s8408_s11 }
   0xc   :  { %8492 = sst [smem:[#allocation70_spill]] %s8409_s12 }
   0xd   :  { %8493 = sst [smem:[#allocation71_spill]] %s8410_s13 }
   0xe   :  { %8494 = sst [smem:[#allocation72_spill]] %s8411_s14 }
   0xf   :  { %20 = vsyncpa [#allocation9], 0 }
  0x10   :  { %21 = vsyncpa [#allocation12], 0 }
  0x11   :  { %22 = vsyncpa [#allocation10], 0 }
  0x12   :  { %24 = vsyncpa [#allocation10 + $0x1], 0 }
  0x13   :  { %25 = vsyncpa [#allocation16], 0 }
  0x14   :  { %27 = vsyncpa [#allocation16 + $0x1], 0  ;;  %s6205_s29 = smov 0   ;;  %s6207_s30 = smov 0  }
  0x15   :  { %s6209_s15 = smov 0   ;;  %s6211_s16 = smov 0  }
  0x16   :  { %s6213_s17 = smov 0   ;;  %s6215_s18 = smov 0  }
  0x17   :  { %s6217_s19 = smov 0   ;;  %s6219_s20 = smov 0  }
  0x18   :  { %s6221_s21 = smov 0   ;;  %s6223_s22 = smov 0  }
  0x19   :  { %s6225_s23 = smov 0  }
  0x1a LB: > { %8495 = sst [smem:[#allocation21_spill]] %s6071_s29  ;;  %s4450_s25 = sadd.s32 4294967294, %s6111_s23   ;;  %s6111_s23 = sphi %s6225_s23, %s33_s23   ;;  %s6107_s22 = sphi %s6223_s22, %s8733_s22   ;;  %s6103_s21 = sphi %s6221_s21, %s8732_s21   ;;  %s6099_s20 = sphi %s6219_s20, %s8731_s20   ;;  %s6095_s19 = sphi %s6217_s19, %s8730_s19   ;;  %s6091_s18 = sphi %s6215_s18, %s8729_s18   ;;  %s6087_s17 = sphi %s6213_s17, %s8728_s17   ;;  %s6083_s16 = sphi %s6211_s16, %s8727_s16   ;;  %s6079_s15 = sphi %s6209_s15, %s8726_s15   ;;  %s6075_s30 = sphi %s6207_s30, %s8725_s30   ;;  %s6071_s29 = sphi %s6205_s29, %s8724_s29  }
  0x1b   : > { %8496 = sst [smem:[#allocation22_spill]] %s6075_s30  ;;  %s42_s26 = sadd.s32 1, %s6103_s21 }
  0x1c   : > { %8497 = sst [smem:[#allocation23_spill]] %s6095_s19  ;;  %s45_s27 = sadd.s32 1, %s6107_s22 }
  0x1d   : > { %p43_p0 = scmp.ge.s32.totalorder %s42_s26, 2  ;;  %s54_s28 = sadd.s32 1, %s6091_s18 }
  0x1e   : > { %p61_p1 = scmp.ne.s32.totalorder %s6091_s18, %s6087_s17  ;;  %p62_p2 = scmp.eq.s32.totalorder %s6111_s23, 0 }
  0x1f   : > { %s8735_s26 = smov (%p43_p0, %s42_s26), 0  ;;  %s8737_s27 = smov (!%p43_p0, %s45_s27), %s6107_s22 }
  0x20   : > { %8498 = sst [smem:[#allocation24_spill]] %s8735_s26  ;;  %s49_s14 = ssub.s32 %s6103_s21, %s8735_s26 }
  0x21   : > { %p6273_p3 = por %p62_p2, %p61_p1  ;;  %p47_p4 = scmp.ge.s32.totalorder %s8737_s27, 2 }
  0x22   : > { %s148_s13 = sadd.s32 1, %s6083_s16  ;;  %p155_p5 = scmp.ne.s32.totalorder %s6083_s16, %s6079_s15 }
  0x23   : > { %s8500_s12 = sadd.s32 4294967295, %s6111_s23   ;;  %s8739_s27 = smov (%p47_p4, %s8737_s27), 0 }
  0x24   : > { %p6282_p6 = scmp.eq.s32.totalorder %s8500_s12, 3  ;;  %8502 = sst [smem:[#allocation25_spill]] %s8739_s27 }
  0x25   : > { %p6291_p7 = por %p155_p5, %p62_p2  ;;  %s50_s12 = ssub.s32 %s6107_s22, %s8739_s27 }
  0x26   : > { %p6297_p8 = por %p6282_p6, %p61_p1  ;;  %p360_p9 = scmp.ne.s32.totalorder %s6087_s17, %s6075_s30 }
  0x27   : > { %s51_s7 = sor.u32 %s50_s12, %s49_s14  ;;  %p146_p10 = scmp.eq.s32.totalorder %s50_s12, 0 }
  0x28   : > { %s8504_s8 = scalar_select %p6297_p8, 1, 0 }
  0x29   : > { %p52_p11 = scmp.eq.s32.totalorder %s51_s7, 0  ;;  %p361_p12 = scmp.eq.s32.totalorder %s4450_s25, 3 }
  0x2a   : > { %s6306_s5 = scalar_select %p146_p10, %s6083_s16, %s148_s13  }
  0x2b   : > { %s6309_s3 = scalar_select %p52_p11, %s6091_s18, %s54_s28  }
  0x2c   : > { %8505 = sst [smem:[#allocation26_spill]] %s6306_s5  ;;  %p6311_p13 = por %p361_p12, %p360_p9 }
  0x2d   : > { %8506 = sst [smem:[#allocation27_spill]] %s6309_s3  ;;  %p6320_p0 = por %p6282_p6, %p155_p5 }
  0x2e   : > { %s8507_s2 = scalar_select %p6311_p13, 1, 0 }
  0x2f   : > { %s8509_s19 = scalar_select %p6320_p0, 1, 0 }
  0x30   : > { %8508 = sst [smem:[#allocation28_spill]] %s8507_s2  ;;  %p386_p1 = scmp.ne.s32.totalorder %s6079_s15, %s6071_s29 }
  0x31   : > { %p4451_p2 = scmp.ge.s32.totalorder %s6111_s23, 1  ;;  %p394_p4 = scmp.lt.s32.totalorder %s6111_s23, 5 }
  0x32   : > { %p6328_p8 = por %p386_p1, %p361_p12  ;;  %s8512_s13 = sadd.s32 4294967295, %s6111_s23  }
  0x33   : > { %p6334_p10 = scmp.eq.s32.totalorder %s8512_s13, 0  ;;  %p6338_p9 = pnand %p4451_p2, %p394_p4 }
  0x34   : > { %s8510_s7 = scalar_select %p6328_p8, 1, 0 }
  0x35   : > { %p5493_p5 = pneg %p6338_p9  ;;  %s6113_s11 = smov [#allocation11]  }
  0x36   : > { %8511 = sst [smem:[#allocation29_spill]] %s8510_s7  ;;  %s434_s28 = sshll.u32 %s6113_s11, 4  ;;  %s435_s28 = int_to_ptr.vmem [resolvable:$true] %s434_s28 }
  0x37   : > { %p6346_p6 = pnand %p6334_p10, %p5493_p5  ;;  %s5890_s13 = scalar_lea.vmem %s435_s28, 6144 }
  0x38   : > { %p5891_p12 = scmp.ne.s32.totalorder %s435_s28, %s5890_s13  ;;  %p5898_p4 = scmp.lt.s32.totalorder %s435_s28, %s435_s28 }
  0x39   : > { %p5881_p11 = pneg %p6346_p6  ;;  %p5899_p8 = scmp.lt.s32.totalorder %s5890_s13, %s5890_s13 }
  0x3b   : > { %p5893_p1 = pnand %p5891_p12, %p5881_p11  ;;  %p5900_p13 = por %p5899_p8, %p5898_p4 }
  0x3d   : > { %p5894_p2 = pneg %p5893_p1 }
  0x3f   : > { %p5901_p0 = pnand %p5900_p13, %p5894_p2 }
  0x41   : > { %5904 = shalt.err (!%p5901_p0)
}
  0x42   : > { %s6114_s11 = smov 384   ;;  %s6115_s27 = smov 24  }
  0x43   : > { %s8516_s9 = sld [smem:[#allocation68_spill]]  ;;  %s6116_s7 = smov [#allocation8]  }
  0x44   : > { %s415_s29 = sshll.u32 %s6116_s7, 4  ;;  %s6117_s2 = smov [#allocation13]   ;;  %s416_s29 = int_to_ptr.vmem [resolvable:$true] %s415_s29 }
  0x45   : > { %s447_s13 = sshll.u32 %s6117_s2, 4  ;;  %s5916_s30 = scalar_lea.vmem %s416_s29, 6144  ;;  %s448_s13 = int_to_ptr.vmem [resolvable:$true] %s447_s13 }
  0x46   : > { %p5917_p8 = scmp.ne.s32.totalorder %s416_s29, %s5916_s30  ;;  %p5924_p5 = scmp.lt.s32.totalorder %s416_s29, %s416_s29 }
  0x47   : > { %p5925_p12 = scmp.lt.s32.totalorder %s5916_s30, %s5916_s30 }
  0x48   : > { %p5919_p13 = pnand %p5917_p8, %p5881_p11 }
  0x49   : > { %5499 = dma.hbm_to_vmem [thread:$0]  (!%p6346_p6), %s8516_s9, 6144, %s435_s28, [#allocation12], %s6114_s11, %s6114_s11, %s6115_s27  }
  0x4a   : > { %p5920_p0 = pneg %p5919_p13  ;;  %p5926_p1 = por %p5925_p12, %p5924_p5 }
  0x4c   : > { %p5927_p2 = pnand %p5926_p1, %p5920_p0 }
  0x4e   : > { %5930 = shalt.err (!%p5927_p2)
}
  0x4f   : > { %s8517_s6 = sld [smem:[#allocation65_spill]]  ;;  %s5942_s2 = scalar_lea.vmem %s448_s13, 6144 }
  0x50   : > { %p5943_p4 = scmp.ne.s32.totalorder %s448_s13, %s5942_s2  ;;  %p5950_p5 = scmp.lt.s32.totalorder %s448_s13, %s448_s13 }
  0x51   : > { %p5951_p0 = scmp.lt.s32.totalorder %s5942_s2, %s5942_s2 }
  0x52   : > { %p5945_p8 = pnand %p5943_p4, %p5881_p11 }
  0x53   : > { %p5952_p12 = por %p5951_p0, %p5950_p5 }
  0x54   : > { %p5946_p13 = pneg %p5945_p8 }
  0x55   : > { %5496 = dma.hbm_to_vmem [thread:$0]  (!%p6346_p6), %s8517_s6, 6144, %s416_s29, [#allocation9], %s6114_s11, %s6114_s11, %s6115_s27  }
  0x56   : > { %p5953_p1 = pnand %p5952_p12, %p5946_p13 }
  0x58   : > { %5956 = shalt.err (!%p5953_p1)
}
  0x59   : > { %5502 = dma.hbm_to_vmem [thread:$0]  (!%p6346_p6), %s8407_s10, 6144, %s448_s13, [#allocation12], %s6114_s11, %s6114_s11, %s6115_s27  }
  0x5a   : > { %p4455_p2 = scmp.ge.s32.totalorder %s6111_s23, 4 }
  0x5c   : > { %463 = sbr.rel (%p4455_p2) target bundleno = 122 (0x7a), region = 56 }
  0x61   : > { %466 = sbr.rel (!%p6273_p3) target bundleno = 111 (0x6f), region = 60  ;;  %s468_s29 = sand.u32 (%p6273_p3), 1, %s6091_s18  }
  0x62   : > { %s4545_s28 = sshll.u32 (%p6273_p3), %s6103_s21, 4  ;;  %s4456_s3 = sshll.u32 (%p6273_p3), %s468_s29, 6 }
  0x63   : > { %s473_s12 = sadd.s32 (%p6273_p3), %s6107_s22, %s4545_s28  ;;  %s8518_s0 = sld [smem:[#allocation59_spill]] (%p6273_p3) }
  0x64   : > { %s4459_s5 = sshll.u32 (%p6273_p3), %s473_s12, 3  ;;  %s470_s27 = scalar_lea.vmem (%p6273_p3), [#allocation6], %s4456_s3 }
  0x69   : > { %s475_s9 = scalar_lea.vmem %s8518_s0, %s4459_s5 }
  0x6a   : > { %v518_v0 = vld [vmem:[%s475_s9] sm:$0xff]  ;;  %v520_v1 = vld [vmem:[%s475_s9 + $0x10] sm:$0xff] }
  0x6b   : > { %v522_v2 = vld [vmem:[%s475_s9 + $0x20] sm:$0xff]  ;;  %519 = vst [vmem:[%s470_s27] sm:$0xff] %v518_v0  ;;  %521 = vst [vmem:[%s470_s27 + $0x8] sm:$0xff] %v520_v1  ;;  %v524_v3 = vld [vmem:[%s475_s9 + $0x30] sm:$0xff] }
  0x6c   : > { %523 = vst [vmem:[%s470_s27 + $0x10] sm:$0xff] %v522_v2  ;;  %v526_v4 = vld [vmem:[%s475_s9 + $0x40] sm:$0xff]  ;;  %v528_v5 = vld [vmem:[%s475_s9 + $0x50] sm:$0xff]  ;;  %525 = vst [vmem:[%s470_s27 + $0x18] sm:$0xff] %v524_v3 }
  0x6d   : > { %527 = vst [vmem:[%s470_s27 + $0x20] sm:$0xff] %v526_v4  ;;  %529 = vst [vmem:[%s470_s27 + $0x28] sm:$0xff] %v528_v5  ;;  %v530_v6 = vld [vmem:[%s475_s9 + $0x60] sm:$0xff]  ;;  %v532_v7 = vld [vmem:[%s475_s9 + $0x70] sm:$0xff] }
  0x6e   : > { %531 = vst [vmem:[%s470_s27 + $0x30] sm:$0xff] %v530_v6  ;;  %533 = vst [vmem:[%s470_s27 + $0x38] sm:$0xff] %v532_v7 }
  0x6f PF: > { %546 = sbr.rel (!%p6291_p7) target bundleno = 122 (0x7a), region = 102  ;;  %s548_s6 = sand.u32 (%p6291_p7), 1, %s6083_s16  }
  0x70   : > { %s4461_s24 = sshll.u32 (%p6291_p7), %s6107_s22, 3  ;;  %s4460_s11 = sshll.u32 (%p6291_p7), %s548_s6, 4 }
  0x71   : > { %s8519_s4 = sld [smem:[#allocation63_spill]] (%p6291_p7)  ;;  %s550_s29 = scalar_lea.vmem (%p6291_p7), [#allocation7], %s4460_s11 }
  0x77   : > { %s552_s7 = scalar_lea.vmem %s8519_s4, %s4461_s24 }
  0x78   : > { %v583_v8 = vld [vmem:[%s552_s7] sm:$0xff]  ;;  %v585_v9 = vld [vmem:[%s552_s7 + $0x10] sm:$0xff] }
  0x79   : > { %584 = vst [vmem:[%s550_s29] sm:$0xff] %v583_v8  ;;  %586 = vst [vmem:[%s550_s29 + $0x8] sm:$0xff] %v585_v9 }
  0x7a PF: > { %595 = sbr.rel (%p6338_p9) target bundleno = 4449 (0x1161), region = 140 }
  0x7f   : > { %s6404_s9 = sand.u32 1, %s6087_s17   ;;  %s8480_s26 = sand.u32 1, %s6079_s15  }
  0x80   : > { %s4463_s28 = sshll.u32 %s6404_s9, 6  ;;  %s4464_s3 = sshll.u32 %s8480_s26, 4 }
  0x81   : > { %s6410_s12 = scalar_lea.vmem [#allocation6], %s4463_s28  ;;  %s607_s5 = scalar_lea.vmem [#allocation7], %s4464_s3 }
  0x82   : > { %6054 = dma.done.wait (%p6334_p10), [#allocation9], 6144  }
  0x83   : > { %6056 = vsyncadd (%p6334_p10), [#allocation9], 4294961152 }
  0x84   : > { %6058 = dma.done.wait (%p6334_p10), [#allocation12], 12288  }
  0x85   : > { %6060 = vsyncadd (%p6334_p10), [#allocation12], 4294955008  ;;  %s4468_s25 = sshll.u32 %s6404_s9, 7  ;;  %p676_p3 = scmp.lt.s32.totalorder %s6099_s20, 1 }
  0x86   : > { %s8520_s1 = sld [smem:[#allocation60_spill]]  ;;  %s6426_s13 = scalar_lea.vmem [#allocation14], %s4468_s25 }
  0x87   : > { %s677_s2 = scalar_select %p676_p3, %s6099_s20, 1 }
  0x88   : > { %s6428_s30 = scalar_lea.vmem [#allocation15], %s4464_s3  ;;  %s8521_s7 = sld [smem:[#allocation23_spill]] }
  0x89   : > { %s4470_s27 = sshll.u32 %s677_s2, 3 }
  0x8c   : > { %s679_s11 = scalar_lea.vmem %s8520_s1, %s4470_s27 }
  0x8e   : > { %p4471_p7 = scmp.ne.s32.totalorder %s8521_s7, 0 }
  0x8f   : > { %s8522_s28 = sld [smem:[#allocation61_spill]] (!%p4471_p7) }
  0x90   : > { %684 = sbr.rel (%p4471_p7) target bundleno = 350 (0x15e), region = 164  ;;  %s8523_s2 = sld [smem:[#allocation62_spill]] (!%p4471_p7) }
  0x95   : > { %v685_v10 = vld [vmem:[%s607_s5] sm:$0xff]  ;;  %v686_v11 = vld [vmem:[%s607_s5 + $0x8] sm:$0xff]  ;;  %vm702_vm0 = vcmask 1043456   ;;  %v6118_v13 = vmov 0.0   ;;  %vm698_vm1 = vcmask 31744   ;;  %vm6119_vm2 = vmmov 0  }
  0x96   : > { %v690_v12 = vld [vmem:[%s8522_s28] sm:$0xf]  ;;  %687 = vst [vmem:[#allocation4] sm:$0xff] %v685_v10  ;;  %688 = vst [vmem:[#allocation4 + $0x8] sm:$0xff] %v686_v11  ;;  %4854 = vmatprep.subr.mxu0 %v6118_v13  ;;  %4856 = vmatprep.mubr.msk.f32.mxu0 %vm6119_vm2, %v6118_v13 }
  0x97   : > { %v689_v14 = vld [vmem:[%s679_s11] sm:$0xff]  ;;  %4855 = vmatpush3.msk.msra.mxu0 %vm702_vm0, %v690_v12 }
  0x98   : > { %4857 = vmatmul.mubr.msk.f32.vlgmr.msra.gmra.mxu0 %vm698_vm1, %v689_v14  ;;  %v4472_v15 = vld [vmem:[%s8523_s2] ss:$0 sm:$0xff] }
 0x158   : > { %v772_v16 = vpop.f32.mrf.mxu0 }
 0x159   : > { %v773_v17 = vadd.f32 %v4472_v15, %v772_v16 }
 0x15a   : > { %v4858_v18 = vpop.f32.mrf.mxu0 }
 0x15b   : > { %v776_v19 = vmax.f32 %v773_v17, 0.0 }
 0x15d   : > { %777 = vst [vmem:[#allocation5] sm:$0xff] %v776_v19 }
 0x15e PF: > { %v798_v21 = vlaneseq  ;;  %v6120_v23 = vmov 1983009808   ;;  %v8425_v25 = vmov 0.0   ;;  %v787_v26 = vld [vmem:[%s6410_s12] sm:$0xff]  ;;  %vm830_vm3 = vcmask 15360   ;;  %s8525_s6 = sld [smem:[#allocation64_spill]] }
 0x15f   : > { %v816_v24 = vunpack.c.l.s4 %v6120_v23  ;;  %926 = vmatprep.mubr.f32.mxu0 %v8425_v25  ;;  %4861 = vmatprep.mubr.msk.f32.mxu1 %vm830_vm3, %v787_v26  ;;  %vm855_vm4 = vcmask 1041408   ;;  %v6454_v34 = vld [vmem:[#allocation8 + $0x170] sm:$0xff]  ;;  %v6456_v35 = vld [vmem:[#allocation8 + $0x168] sm:$0xff]  ;;  %v6460_v37 = vld [vmem:[#allocation8 + $0x158] sm:$0xff]  ;;  %vm6122_vm5 = vmmov 0   ;;  %s8532_s11 = sld [smem:[#allocation66_spill]] }
 0x160   : > { %v6445_v22 = vshrl.u32 %v798_v21, 7  ;;  %8526 = vst [vmem:[#allocation31_spill] sm:$0xff] %v6454_v34  ;;  %v788_v36 = vld [vmem:[%s6410_s12 + $0x8] sm:$0xff]  ;;  %v6465_v38 = vld [vmem:[#allocation8 + $0x150] sm:$0xff]  ;;  %v6469_v39 = vld [vmem:[#allocation8 + $0x140] sm:$0xff]  ;;  %s8554_s29 = sld [smem:[#allocation67_spill]] }
 0x161   : > { %v817_v28 = vunpack.c.0.s8 %v816_v24  ;;  %v6471_v40 = vld [vmem:[#allocation8 + $0x178] sm:$0xff]  ;;  %v6478_v42 = vld [vmem:[#allocation8 + $0x128] sm:$0xff]  ;;  %v6481_v43 = vld [vmem:[#allocation8 + $0x160] sm:$0xff]  ;;  %s8635_s27 = sld [smem:[#allocation69_spill]] }
 0x162   : > { %8524 = vst [vmem:[#allocation30_spill] sm:$0xff] %v6445_v22  ;;  %v6474_v41 = vld [vmem:[#allocation8 + $0x138] sm:$0xff]  ;;  %v6485_v44 = vld [vmem:[#allocation8 + $0x120] sm:$0xff]  ;;  %v6490_v45 = vld [vmem:[%s6410_s12 + $0x10] sm:$0xff]  ;;  %s8646_s24 = sld [smem:[#allocation70_spill]] }
 0x163   : > { %v820_v30 = vsub.s32 %v817_v28, %v6445_v22  ;;  %v6492_v46 = vld [vmem:[#allocation8 + $0x110] sm:$0xff]  ;;  %v6495_v47 = vld [vmem:[#allocation8 + $0x108] sm:$0xff]  ;;  %v6499_v48 = vld [vmem:[#allocation8 + $0xf8] sm:$0xff]  ;;  %v8424_v28 = vsub.s32 2, %v6445_v22  ;;  %s8707_s14 = sld [smem:[#allocation23_spill]] }
 0x164   : > { %v778_v20 = vld [vmem:[#allocation5] sm:$0xff]  ;;  %v795_v27 = vld [vmem:[%s8525_s6] sm:$0x3f]  ;;  %v6507_v50 = vld [vmem:[#allocation8 + $0xf0] sm:$0xff] }
 0x165   : > { %779 = vst [vmem:[%s6426_s13 + $0x8] sm:$0xff] %v778_v20  ;;  %780 = vst [vmem:[%s6426_s13 + $0x18] sm:$0xff] %v778_v20  ;;  %v814_v29 = vcombine.high %v795_v27, %v795_v27  ;;  %v821_v31 = vrot.slane %v795_v27, %v820_v30  ;;  %v6502_v49 = vld [vmem:[#allocation8 + $0x148] sm:$0xff]  ;;  %v6512_v51 = vld [vmem:[%s6410_s12 + $0x18] sm:$0xff] }
 0x166   : > { %781 = vst [vmem:[%s6426_s13 + $0x28] sm:$0xff] %v778_v20  ;;  %782 = vst [vmem:[%s6426_s13 + $0x38] sm:$0xff] %v778_v20  ;;  %v6514_v52 = vld [vmem:[#allocation8 + $0xe0] sm:$0xff]  ;;  %v6517_v53 = vld [vmem:[#allocation8 + $0xd8] sm:$0xff]  ;;  %s8555_s28 = smov %s8554_s29 }
 0x167   : > { %783 = vst [vmem:[%s6426_s13 + $0x48] sm:$0xff] %v778_v20  ;;  %784 = vst [vmem:[%s6426_s13 + $0x58] sm:$0xff] %v778_v20  ;;  %v828_v32 = vrot.slane %v814_v29, %v820_v30  ;;  %v829_v33 = vcombine.high %v821_v31, %v821_v31  ;;  %v6521_v54 = vld [vmem:[#allocation8 + $0xc8] sm:$0xff]  ;;  %v6524_v55 = vld [vmem:[#allocation8 + $0x130] sm:$0xff] }
 0x168   : > { %785 = vst [vmem:[%s6426_s13 + $0x68] sm:$0xff] %v778_v20  ;;  %786 = vst [vmem:[%s6426_s13 + $0x78] sm:$0xff] %v778_v20  ;;  %v6529_v56 = vld [vmem:[#allocation8 + $0xc0] sm:$0xff]  ;;  %v6536_v58 = vld [vmem:[#allocation8 + $0xb0] sm:$0xff] }
 0x169   : > { %4859 = vmatprep.subr.msk.mxu1 %vm855_vm4, %v828_v32  ;;  %4475 = vmatprep.subr.msk.mxu0 %vm855_vm4, %v829_v33  ;;  %v6534_v57 = vld [vmem:[%s6410_s12 + $0x20] sm:$0xff]  ;;  %v6539_v59 = vld [vmem:[#allocation8 + $0xa8] sm:$0xff]  ;;  %v6543_v60 = vld [vmem:[#allocation8 + $0x98] sm:$0xff]  ;;  %p4535_p10 = scmp.ne.s32.totalorder %s8707_s14, 1 }
 0x16a   : > { %4860 = vmatpush3.msk.msra.mxu1 %vm855_vm4, %v828_v32  ;;  %4476 = vmatpush1.msk.msra.mxu0 %vm855_vm4, %v821_v31  ;;  %v6546_v61 = vld [vmem:[#allocation8 + $0x118] sm:$0xff]  ;;  %v6551_v62 = vld [vmem:[#allocation8 + $0x90] sm:$0xff]  ;;  %v6556_v63 = vld [vmem:[%s6410_s12 + $0x28] sm:$0xff]  ;;  %v8437_v31 = vsub.s32 0, %v6445_v22 }
 0x16b   : > { %4873 = vmatprep.subr.mxu1 %v8425_v25  ;;  %4862 = vmatmul.mubr.msk.f32.vlgmr.msra.gmra.mxu1 %vm830_vm3, %v788_v36  ;;  %v6558_v0 = vld [vmem:[#allocation8 + $0x80] sm:$0xff]  ;;  %v6561_v1 = vld [vmem:[#allocation8 + $0x78] sm:$0xff]  ;;  %v6565_v2 = vld [vmem:[#allocation8 + $0x68] sm:$0xff] }
 0x16c   : > { %4477 = vmatmul.mubr.msk.f32.vlgmr.msra.gmra.mxu0 %vm830_vm3, %v787_v26  ;;  %1163 = vmatprep.subr.mxu0 %v6454_v34  ;;  %v6568_v3 = vld [vmem:[#allocation8 + $0x100] sm:$0xff]  ;;  %v793_v5 = vld [vmem:[%s6410_s12 + $0x30] sm:$0xff]  ;;  %v6581_v7 = vld [vmem:[#allocation8 + $0x48] sm:$0xff] }
 0x16d   : > { %1164 = vmatpush1.msra.mxu0 %v6456_v35  ;;  %932 = vmatprep.mubr.f32.mxu0 %v8425_v25  ;;  %v6573_v4 = vld [vmem:[#allocation8 + $0x60] sm:$0xff]  ;;  %v6578_v6 = vld [vmem:[#allocation8 + $0x50] sm:$0xff]  ;;  %v6585_v8 = vld [vmem:[#allocation8 + $0x38] sm:$0xff] }
 0x16e   : > { %1165 = vmatprep.subr.mxu0 %v6460_v37  ;;  %4874 = vmatpush3.msra.mxu1 %v6471_v40  ;;  %v6588_v9 = vld [vmem:[#allocation8 + $0xe8] sm:$0xff]  ;;  %v6592_v10 = vld [vmem:[#allocation8 + $0x30] sm:$0xff]  ;;  %v794_v11 = vld [vmem:[%s6410_s12 + $0x38] sm:$0xff] }
 0x16f   : > { %1166 = vmatpush1.msra.mxu0 %v6465_v38  ;;  %4875 = vmatprep.subr.mxu1 %v8425_v25  ;;  %v6597_v12 = vld [vmem:[#allocation8 + $0x20] sm:$0xff]  ;;  %v6600_v13 = vld [vmem:[#allocation8 + $0x18] sm:$0xff]  ;;  %v6604_v14 = vld [vmem:[#allocation8 + $0x8] sm:$0xff] }
 0x170   : > { %4478 = vmatmul.mubr.msk.f32.gmra.mxu0 %vm830_vm3, %v788_v36  ;;  %1167 = vmatprep.subr.mxu0 %v6469_v39  ;;  %8527 = vst [vmem:[#allocation32_spill] sm:$0xff] %v6600_v13  ;;  %8528 = vst [vmem:[#allocation33_spill] sm:$0xff] %v6604_v14  ;;  %v6607_v15 = vld [vmem:[#allocation8 + $0xd0] sm:$0xff]  ;;  %v6611_v16 = vld [vmem:[#allocation8] sm:$0xff] }
 0x171   : > { %1168 = vmatpush1.msra.mxu0 %v6474_v41  ;;  %938 = vmatprep.mubr.f32.mxu0 %v8425_v25  ;;  %8529 = vst [vmem:[#allocation34_spill] sm:$0xff] %v6611_v16  ;;  %v6615_v17 = vld [vmem:[#allocation4] sm:$0xff]  ;;  %v6617_v18 = vld [vmem:[#allocation8 + $0xb8] sm:$0xff]  ;;  %v6623_v19 = vld [vmem:[#allocation8 + $0xa0] sm:$0xff] }
 0x172   : > { %1169 = vmatprep.subr.mxu0 %v6478_v42  ;;  %4876 = vmatpush3.msra.mxu1 %v6481_v43  ;;  %v6630_v20 = vld [vmem:[#allocation8 + $0x88] sm:$0xff]  ;;  %v6637_v21 = vld [vmem:[#allocation8 + $0x70] sm:$0xff]  ;;  %v6643_v23 = vld [vmem:[#allocation8 + $0x58] sm:$0xff] }
 0x173   : > { %1170 = vmatpush1.msra.mxu0 %v6485_v44  ;;  %4877 = vmatprep.subr.mxu1 %v8425_v25  ;;  %v6651_v24 = vld [vmem:[#allocation8 + $0x40] sm:$0xff]  ;;  %v6656_v26 = vld [vmem:[#allocation8 + $0x28] sm:$0xff]  ;;  %v6663_v27 = vld [vmem:[#allocation8 + $0x10] sm:$0xff] }
 0x174   : > { %4479 = vmatmul.mubr.msk.f32.gmra.mxu0 %vm830_vm3, %v6490_v45  ;;  %1171 = vmatprep.subr.mxu0 %v6492_v46  ;;  %8530 = vst [vmem:[#allocation35_spill] sm:$0xff] %v6656_v26  ;;  %8531 = vst [vmem:[#allocation36_spill] sm:$0xff] %v6663_v27  ;;  %v796_v29 = vld [vmem:[%s8532_s11] sm:$0x7] }
 0x175   : > { %1172 = vmatpush1.msra.mxu0 %v6495_v47  ;;  %944 = vmatprep.mubr.f32.mxu0 %v8425_v25  ;;  %v6741_v30 = vrot.slane %v796_v29, %v8424_v28 }
 0x176   : > { %1173 = vmatprep.subr.mxu0 %v6499_v48  ;;  %4878 = vmatpush3.msra.mxu1 %v6502_v49 }
 0x177   : > { %1174 = vmatpush1.msra.mxu0 %v6507_v50  ;;  %4879 = vmatprep.subr.mxu1 %v8425_v25 }
 0x178   : > { %4480 = vmatmul.mubr.msk.f32.gmra.mxu0 %vm830_vm3, %v6512_v51  ;;  %1175 = vmatprep.subr.mxu0 %v6514_v52 }
 0x179   : > { %1176 = vmatpush1.msra.mxu0 %v6517_v53  ;;  %950 = vmatprep.mubr.f32.mxu0 %v8425_v25 }
 0x17a   : > { %1177 = vmatprep.subr.mxu0 %v6521_v54  ;;  %4880 = vmatpush3.msra.mxu1 %v6524_v55 }
 0x17b   : > { %1178 = vmatpush1.msra.mxu0 %v6529_v56  ;;  %4881 = vmatprep.subr.mxu1 %v8425_v25 }
 0x17c   : > { %4481 = vmatmul.mubr.msk.f32.gmra.mxu0 %vm830_vm3, %v6534_v57  ;;  %1179 = vmatprep.subr.mxu0 %v6536_v58 }
 0x17d   : > { %1180 = vmatpush1.msra.mxu0 %v6539_v59  ;;  %956 = vmatprep.mubr.f32.mxu0 %v8425_v25 }
 0x17e   : > { %1181 = vmatprep.subr.mxu0 %v6543_v60  ;;  %4882 = vmatpush3.msra.mxu1 %v6546_v61 }
 0x17f   : > { %1182 = vmatpush1.msra.mxu0 %v6551_v62  ;;  %4883 = vmatprep.subr.mxu1 %v8425_v25 }
 0x180   : > { %4482 = vmatmul.mubr.msk.f32.gmra.mxu0 %vm830_vm3, %v6556_v63  ;;  %1183 = vmatprep.subr.mxu0 %v6558_v0 }
 0x181   : > { %1184 = vmatpush1.msra.mxu0 %v6561_v1  ;;  %962 = vmatprep.mubr.f32.mxu0 %v8425_v25 }
 0x182   : > { %1185 = vmatprep.subr.mxu0 %v6565_v2  ;;  %4884 = vmatpush3.msra.mxu1 %v6568_v3 }
 0x183   : > { %1186 = vmatpush1.msra.mxu0 %v6573_v4  ;;  %4885 = vmatprep.subr.mxu1 %v8425_v25 }
 0x184   : > { %4483 = vmatmul.mubr.msk.f32.gmra.mxu0 %vm830_vm3, %v793_v5  ;;  %1187 = vmatprep.subr.mxu0 %v6578_v6 }
 0x185   : > { %1188 = vmatpush1.msra.mxu0 %v6581_v7  ;;  %968 = vmatprep.mubr.f32.mxu0 %v8425_v25 }
 0x186   : > { %1189 = vmatprep.subr.mxu0 %v6585_v8  ;;  %4886 = vmatpush3.msra.mxu1 %v6588_v9 }
 0x187   : > { %1190 = vmatpush1.msra.mxu0 %v6592_v10  ;;  %4887 = vmatprep.subr.mxu1 %v8425_v25 }
 0x188   : > { %4484 = vmatmul.mubr.msk.f32.gmra.mxu0 %vm830_vm3, %v794_v11  ;;  %1191 = vmatprep.subr.mxu0 %v6597_v12 }
 0x189   : > { %1192 = vmatpush1.msra.mxu0 %v6600_v13  ;;  %1227 = vmatprep.mubr.f32.mxu0 %v8425_v25 }
 0x18a   : > { %1193 = vmatprep.subr.mxu0 %v6604_v14  ;;  %4888 = vmatpush3.msra.mxu1 %v6607_v15 }
 0x18b   : > { %1194 = vmatpush1.msra.mxu0 %v6611_v16  ;;  %4889 = vmatprep.subr.mxu1 %v8425_v25 }
 0x18c   : > { %1228 = vmatmul.mubr.f32.vlgmr.msra.gmra.mxu0 %v6615_v17  ;;  %4890 = vmatpush3.msra.mxu1 %v6617_v18 }
 0x18d   : > { %4891 = vmatprep.subr.mxu1 %v8425_v25  ;;  %4864 = vmatprep.mubr.msk.f32.mxu1 %vm830_vm3, %v6490_v45  ;;  %v8442_v45 = vsub.s32 1, %v6445_v22 }
 0x18e   : > { %4892 = vmatpush3.msra.mxu1 %v6623_v19  ;;  %1331 = vmatprep.subr.mxu0 %v6454_v34 }
 0x18f   : > { %4865 = vmatmul.mubr.msk.f32.gmra.mxu1 %vm830_vm3, %v6512_v51  ;;  %4893 = vmatprep.subr.mxu1 %v8425_v25 }
 0x190   : > { %4894 = vmatpush3.msra.mxu1 %v6630_v20  ;;  %4867 = vmatprep.mubr.msk.f32.mxu1 %vm830_vm3, %v6534_v57  ;;  %v801_v57 = vrot.slane %v796_v29, %v8437_v31 }
 0x191   : > { %4895 = vmatprep.subr.mxu1 %v8425_v25  ;;  %1332 = vmatpush1.msra.mxu0 %v6456_v35 }
 0x192   : > { %4896 = vmatpush3.msra.mxu1 %v6637_v21  ;;  %1333 = vmatprep.subr.mxu0 %v6460_v37 }
 0x193   : > { %4868 = vmatmul.mubr.msk.f32.gmra.mxu1 %vm830_vm3, %v6556_v63  ;;  %4897 = vmatprep.subr.mxu1 %v8425_v25 }
 0x194   : > { %4898 = vmatpush3.msra.mxu1 %v6643_v23  ;;  %4870 = vmatprep.mubr.msk.f32.mxu1 %vm830_vm3, %v793_v5  ;;  %v805_v5 = vrot.slane %v796_v29, %v8442_v45 }
 0x195   : > { %4899 = vmatprep.subr.mxu1 %v8425_v25  ;;  %1334 = vmatpush1.msra.mxu0 %v6465_v38 }
 0x196   : > { %4900 = vmatpush3.msra.mxu1 %v6651_v24  ;;  %1335 = vmatprep.subr.mxu0 %v6469_v39 }
 0x197   : > { %4871 = vmatmul.mubr.msk.f32.gmra.mxu1 %vm830_vm3, %v794_v11  ;;  %4901 = vmatprep.subr.mxu1 %v8425_v25 }
 0x198   : > { %4902 = vmatpush3.msra.mxu1 %v6656_v26  ;;  %4905 = vmatprep.mubr.msk.f32.mxu1 %vm6122_vm5, %v8425_v25 }
 0x199   : > { %4903 = vmatprep.subr.mxu1 %v8425_v25  ;;  %1336 = vmatpush1.msra.mxu0 %v6474_v41 }
 0x19a   : > { %4904 = vmatpush3.msra.mxu1 %v6663_v27  ;;  %1337 = vmatprep.subr.mxu0 %v6478_v42 }
 0x19b   : > { %4906 = vmatmul.mubr.f32.vlgmr.msra.gmra.mxu1 %v6615_v17  ;;  %4908 = vmatprep.subr.mxu1 %v8425_v25 }
 0x19c   : > { %4909 = vmatpush3.msra.mxu1 %v6471_v40  ;;  %1338 = vmatpush1.msra.mxu0 %v6485_v44 }
 0x19d   : > { %4910 = vmatprep.subr.mxu1 %v8425_v25  ;;  %1339 = vmatprep.subr.mxu0 %v6492_v46 }
 0x19e   : > { %4911 = vmatpush3.msra.mxu1 %v6481_v43  ;;  %1340 = vmatpush1.msra.mxu0 %v6495_v47 }
 0x19f   : > { %4912 = vmatprep.subr.mxu1 %v8425_v25  ;;  %1341 = vmatprep.subr.mxu0 %v6499_v48 }
 0x1a0   : > { %4913 = vmatpush3.msra.mxu1 %v6502_v49  ;;  %1342 = vmatpush1.msra.mxu0 %v6507_v50 }
 0x1a1   : > { %4914 = vmatprep.subr.mxu1 %v8425_v25  ;;  %1343 = vmatprep.subr.mxu0 %v6514_v52 }
 0x1a2   : > { %4915 = vmatpush3.msra.mxu1 %v6524_v55  ;;  %1344 = vmatpush1.msra.mxu0 %v6517_v53 }
 0x1a3   : > { %4916 = vmatprep.subr.mxu1 %v8425_v25  ;;  %1345 = vmatprep.subr.mxu0 %v6521_v54 }
 0x1a4   : > { %4917 = vmatpush3.msra.mxu1 %v6546_v61  ;;  %1346 = vmatpush1.msra.mxu0 %v6529_v56 }
 0x1a5   : > { %4918 = vmatprep.subr.mxu1 %v8425_v25  ;;  %1347 = vmatprep.subr.mxu0 %v6536_v58 }
 0x1a6   : > { %4919 = vmatpush3.msra.mxu1 %v6568_v3  ;;  %1348 = vmatpush1.msra.mxu0 %v6539_v59 }
 0x1a7   : > { %4920 = vmatprep.subr.mxu1 %v8425_v25  ;;  %1349 = vmatprep.subr.mxu0 %v6543_v60 }
 0x1a8   : > { %4921 = vmatpush3.msra.mxu1 %v6588_v9  ;;  %1350 = vmatpush1.msra.mxu0 %v6551_v62 }
 0x1a9   : > { %4922 = vmatprep.subr.mxu1 %v8425_v25  ;;  %1351 = vmatprep.subr.mxu0 %v6558_v0 }
 0x1aa   : > { %4923 = vmatpush3.msra.mxu1 %v6607_v15  ;;  %1352 = vmatpush1.msra.mxu0 %v6561_v1 }
 0x1ab   : > { %4924 = vmatprep.subr.mxu1 %v8425_v25  ;;  %1353 = vmatprep.subr.mxu0 %v6565_v2 }
 0x1ac   : > { %4925 = vmatpush3.msra.mxu1 %v6617_v18  ;;  %1354 = vmatpush1.msra.mxu0 %v6573_v4 }
 0x1ad   : > { %4926 = vmatprep.subr.mxu1 %v8425_v25  ;;  %1355 = vmatprep.subr.mxu0 %v6578_v6 }
 0x1ae   : > { %4927 = vmatpush3.msra.mxu1 %v6623_v19  ;;  %1356 = vmatpush1.msra.mxu0 %v6581_v7 }
 0x1af   : > { %4928 = vmatprep.subr.mxu1 %v8425_v25  ;;  %1357 = vmatprep.subr.mxu0 %v6585_v8 }
 0x1b0   : > { %4929 = vmatpush3.msra.mxu1 %v6630_v20  ;;  %1358 = vmatpush1.msra.mxu0 %v6592_v10 }
 0x1b1   : > { %4930 = vmatprep.subr.mxu1 %v8425_v25  ;;  %1359 = vmatprep.subr.mxu0 %v6597_v12 }
 0x1b2   : > { %4931 = vmatpush3.msra.mxu1 %v6637_v21  ;;  %1360 = vmatpush1.msra.mxu0 %v6600_v13 }
 0x1b3   : > { %4932 = vmatprep.subr.mxu1 %v8425_v25  ;;  %1361 = vmatprep.subr.mxu0 %v6604_v14 }
 0x1b4   : > { %4933 = vmatpush3.msra.mxu1 %v6643_v23  ;;  %1362 = vmatpush1.msra.mxu0 %v6611_v16 }
 0x1b5   : > { %4934 = vmatprep.subr.mxu1 %v8425_v25  ;;  %1395 = vmatprep.mubr.f32.mxu0 %v8425_v25 }
 0x1b6   : > { %4935 = vmatpush3.msra.mxu1 %v6651_v24  ;;  %4940 = vmatprep.mubr.msk.f32.mxu1 %vm6122_vm5, %v8425_v25 }
 0x1b7   : > { %4936 = vmatprep.subr.mxu1 %v8425_v25  ;;  %1500 = vmatprep.subr.mxu0 %v6454_v34 }
 0x1b8   : > { %4937 = vmatpush3.msra.mxu1 %v6656_v26 }
 0x1b9   : > { %4938 = vmatprep.subr.mxu1 %v8425_v25 }
 0x1ba   : > { %4939 = vmatpush3.msra.mxu1 %v6663_v27 }
 0x1bb   : > { %4943 = vmatprep.subr.mxu1 %v8425_v25 }
 0x22b   : > { %v4863_v32 = vpop.f32.mrf.mxu1 }
 0x22c   : > { %v928_v33 = vpop.f32.mrf.mxu0  ;;  %v6745_v36 = vadd.f32 %v4863_v32, %v6741_v30 }
 0x22e   : > { %8533 = vst [vmem:[#allocation37_spill] sm:$0xff] %v6745_v36  ;;  %v930_v51 = vpop.f32.mrf.mxu0 }
 0x230   : > { %v934_v63 = vpop.f32.mrf.mxu0 }
 0x231   : > { %v6752_v11 = vadd.f32 %v934_v63, %v801_v57 }
 0x232   : > { %v936_v28 = vpop.f32.mrf.mxu0 }
 0x233   : > { %8534 = vst [vmem:[#allocation38_spill] sm:$0xff] %v6752_v11  ;;  %v6754_v25 = vadd.f32 %v936_v28, %v805_v5 }
 0x234   : > { %v940_v34 = vpop.f32.mrf.mxu0 }
 0x235   : > { %8535 = vst [vmem:[#allocation39_spill] sm:$0xff] %v6754_v25  ;;  %v6756_v27 = vadd.f32 %v940_v34, %v801_v57 }
 0x236   : > { %v942_v32 = vpop.f32.mrf.mxu0 }
 0x237   : > { %8536 = vst [vmem:[#allocation40_spill] sm:$0xff] %v6756_v27  ;;  %v6758_v36 = vadd.f32 %v942_v32, %v805_v5 }
 0x238   : > { %v946_v16 = vpop.f32.mrf.mxu0 }
 0x239   : > { %8537 = vst [vmem:[#allocation41_spill] sm:$0xff] %v6758_v36  ;;  %v6760_v14 = vadd.f32 %v946_v16, %v801_v57 }
 0x23a   : > { %v948_v26 = vpop.f32.mrf.mxu0 }
 0x23b   : > { %8538 = vst [vmem:[#allocation42_spill] sm:$0xff] %v6760_v14  ;;  %v6762_v31 = vadd.f32 %v948_v26, %v805_v5 }
 0x23c   : > { %v952_v13 = vpop.f32.mrf.mxu0 }
 0x23d   : > { %8539 = vst [vmem:[#allocation43_spill] sm:$0xff] %v6762_v31  ;;  %v6764_v22 = vadd.f32 %v952_v13, %v801_v57 }
 0x23e   : > { %v954_v29 = vpop.f32.mrf.mxu0 }
 0x23f   : > { %8540 = vst [vmem:[#allocation44_spill] sm:$0xff] %v6764_v22  ;;  %v6766_v63 = vadd.f32 %v954_v29, %v805_v5  ;;  %v929_v22 = vadd.f32 %v928_v33, %v801_v57 }
 0x240   : > { %v958_v28 = vpop.f32.mrf.mxu0 }
 0x241   : > { %8541 = vst [vmem:[#allocation45_spill] sm:$0xff] %v6766_v63  ;;  %v6768_v45 = vadd.f32 %v958_v28, %v801_v57  ;;  %v1041_v28 = vpop.f32.mrf.mxu1 }
 0x242   : > { %v960_v34 = vpop.f32.mrf.mxu0 }
 0x243   : > { %8542 = vst [vmem:[#allocation46_spill] sm:$0xff] %v6768_v45  ;;  %v6770_v27 = vadd.f32 %v960_v34, %v805_v5 }
 0x244   : > { %v964_v32 = vpop.f32.mrf.mxu0 }
 0x245   : > { %8543 = vst [vmem:[#allocation47_spill] sm:$0xff] %v6770_v27  ;;  %v6772_v36 = vadd.f32 %v964_v32, %v801_v57  ;;  %v931_v32 = vadd.f32 %v930_v51, %v805_v5 }
 0x246   : > { %v966_v16 = vpop.f32.mrf.mxu0 }
 0x247   : > { %8544 = vst [vmem:[#allocation48_spill] sm:$0xff] %v6772_v36  ;;  %v6774_v14 = vadd.f32 %v966_v16, %v805_v5 }
 0x248   : > { %v970_v26 = vpop.f32.mrf.mxu0 }
 0x249   : > { %8545 = vst [vmem:[#allocation49_spill] sm:$0xff] %v6774_v14  ;;  %v6776_v31 = vadd.f32 %v970_v26, %v801_v57 }
 0x24a   : > { %v972_v13 = vpop.f32.mrf.mxu0 }
 0x24b   : > { %8546 = vst [vmem:[#allocation50_spill] sm:$0xff] %v6776_v31  ;;  %v6778_v25 = vadd.f32 %v972_v13, %v805_v5 }
 0x24c   : > { %v1229_v29 = vpop.f32.mrf.mxu0 }
 0x24d   : > { %8547 = vst [vmem:[#allocation51_spill] sm:$0xff] %v6778_v25  ;;  %v1304_v63 = vadd.f32 %v1229_v29, %v929_v22 }
 0x24e   : > { %v1231_v34 = vpop.f32.mrf.mxu0 }
 0x24f   : > { %v4495_v45 = vmul.f32 -1.442695, %v1304_v63  ;;  %v4866_v11 = vpop.f32.mrf.mxu1  ;;  %v1311_v26 = vadd.f32 %v1231_v34, %v931_v32 }
 0x250   : > { %v6781_v27 = vadd.f32 %v4866_v11, %v6741_v30 }
 0x251   : > { %5621 = vpow2.f32 %v4495_v45  ;;  %v1051_v16 = vpop.f32.mrf.mxu1  ;;  %v4496_v63 = vmul.f32 -1.442695, %v1311_v26 }
 0x252   : > { %8548 = vst [vmem:[#allocation52_spill] sm:$0xff] %v6781_v27  ;;  %v6784_v14 = vadd.f32 %v1051_v16, %v6741_v30  ;;  %v6801_v16 = vld [vmem:[%s8554_s29] ss:$0 sm:$0xff] }
 0x253   : > { %v4869_v31 = vpop.f32.mrf.mxu1  ;;  %5623 = vpow2.f32 %v4496_v63 }
 0x254   : > { %8549 = vst [vmem:[#allocation53_spill] sm:$0xff] %v6784_v14  ;;  %v6787_v33 = vadd.f32 %v4869_v31, %v6741_v30 }
 0x255   : > { %v1061_v57 = vpop.f32.mrf.mxu1 }
 0x256   : > { %8550 = vst [vmem:[#allocation54_spill] sm:$0xff] %v6787_v33  ;;  %v6790_v22 = vadd.f32 %v1061_v57, %v6741_v30 }
 0x257   : > { %v4872_v13 = vpop.f32.mrf.mxu1 }
 0x258   : > { %8551 = vst [vmem:[#allocation55_spill] sm:$0xff] %v6790_v22  ;;  %v6793_v11 = vadd.f32 %v4872_v13, %v6741_v30 }
 0x259   : > { %v1071_v51 = vpop.f32.mrf.mxu1 }
 0x25a   : > { %8552 = vst [vmem:[#allocation56_spill] sm:$0xff] %v6793_v11  ;;  %v6796_v45 = vadd.f32 %v1071_v51, %v6741_v30  ;;  %v1042_v11 = vadd.f32 %v1041_v28, %v6741_v30  ;;  %v8557_v30 = vmov 0.0   ;;  %v8560_v28 = vld [vmem:[#allocation33_spill] sm:$0xff] }
 0x25b   : > { %v1300_v5 = vpop.f32.mrf.mxu1 }
 0x25c   : > { %8553 = vst [vmem:[#allocation57_spill] sm:$0xff] %v6796_v45  ;;  %v1318_v57 = vadd.f32 %v6801_v16, %v1300_v5  ;;  %v8563_v5 = vld [vmem:[#allocation31_spill] sm:$0xff] }
 0x25d   : > { %v4907_v29 = vpop.f32.mrf.mxu1 }
 0x25e   : > { %v5622_v34 = vpop.eup %5621 }
 0x25f   : > { %v1308_v32 = vadd.f32 1.0, %v5622_v34 }
 0x260   : > { %v5624_v31 = vpop.eup %5623 }
 0x261   : > { %5625 = vrcp.f32 %v1308_v32  ;;  %v1315_v26 = vadd.f32 1.0, %v5624_v31 }
 0x263   : > { %5627 = vrcp.f32 %v1315_v26 }
 0x26e   : > { %v5626_v13 = vpop.eup %5625 }
 0x26f   : > { %v1319_v51 = vmul.f32 %v5626_v13, %v1318_v57  ;;  %v8564_v57 = vld [vmem:[#allocation38_spill] sm:$0xff] }
 0x270   : > { %v5628_v29 = vpop.eup %5627 }
 0x271   : > { %v1320_v63 = vadd.f32 %v1319_v51, %v1042_v11  ;;  %v1322_v25 = vsub.f32 1.0, %v5628_v29  ;;  %v1324_v45 = vmul.f32 %v5628_v29, %v6615_v17  ;;  %v8559_v17 = vld [vmem:[#allocation35_spill] sm:$0xff]  ;;  %v8561_v11 = vld [vmem:[#allocation34_spill] sm:$0xff] }
 0x273   : > { %5629 = vtanh.f32 %v1320_v63 }
 0x280   : > { %v5630_v34 = vpop.eup %5629 }
 0x281   : > { %v1323_v32 = vmul.f32 %v5630_v34, %v1322_v25  ;;  %v8558_v25 = vld [vmem:[#allocation32_spill] sm:$0xff]  ;;  %v8565_v34 = vld [vmem:[#allocation39_spill] sm:$0xff] }
 0x283   : > { %v6806_v36 = vadd.f32 %v1324_v45, %v1323_v32  ;;  %v8562_v45 = vld [vmem:[#allocation36_spill] sm:$0xff] }
 0x285   : > { %8556 = vst [vmem:[#allocation58_spill] sm:$0xff] %v6806_v36  ;;  %1396 = vmatmul.mubr.f32.vlgmr.msra.gmra.mxu0 %v6806_v36  ;;  %4941 = vmatmul.mubr.f32.vlgmr.msra.gmra.mxu1 %v6806_v36 }
 0x286   : > { %1501 = vmatpush1.msra.mxu0 %v6456_v35  ;;  %4944 = vmatpush3.msra.mxu1 %v6471_v40 }
 0x287   : > { %1502 = vmatprep.subr.mxu0 %v6460_v37  ;;  %4945 = vmatprep.subr.mxu1 %v8557_v30 }
 0x288   : > { %1503 = vmatpush1.msra.mxu0 %v6465_v38  ;;  %4946 = vmatpush3.msra.mxu1 %v6481_v43 }
 0x289   : > { %1504 = vmatprep.subr.mxu0 %v6469_v39  ;;  %4947 = vmatprep.subr.mxu1 %v8557_v30 }
 0x28a   : > { %1505 = vmatpush1.msra.mxu0 %v6474_v41  ;;  %4948 = vmatpush3.msra.mxu1 %v6502_v49 }
 0x28b   : > { %1506 = vmatprep.subr.mxu0 %v6478_v42  ;;  %4949 = vmatprep.subr.mxu1 %v8557_v30 }
 0x28c   : > { %1507 = vmatpush1.msra.mxu0 %v6485_v44  ;;  %4950 = vmatpush3.msra.mxu1 %v6524_v55 }
 0x28d   : > { %1508 = vmatprep.subr.mxu0 %v6492_v46  ;;  %4951 = vmatprep.subr.mxu1 %v8557_v30 }
 0x28e   : > { %1509 = vmatpush1.msra.mxu0 %v6495_v47  ;;  %4952 = vmatpush3.msra.mxu1 %v6546_v61 }
 0x28f   : > { %1510 = vmatprep.subr.mxu0 %v6499_v48  ;;  %4953 = vmatprep.subr.mxu1 %v8557_v30 }
 0x290   : > { %1511 = vmatpush1.msra.mxu0 %v6507_v50  ;;  %4954 = vmatpush3.msra.mxu1 %v6568_v3 }
 0x291   : > { %1512 = vmatprep.subr.mxu0 %v6514_v52  ;;  %4955 = vmatprep.subr.mxu1 %v8557_v30 }
 0x292   : > { %1513 = vmatpush1.msra.mxu0 %v6517_v53  ;;  %4956 = vmatpush3.msra.mxu1 %v6588_v9 }
 0x293   : > { %1514 = vmatprep.subr.mxu0 %v6521_v54  ;;  %4957 = vmatprep.subr.mxu1 %v8557_v30 }
 0x294   : > { %1515 = vmatpush1.msra.mxu0 %v6529_v56  ;;  %4958 = vmatpush3.msra.mxu1 %v6607_v15 }
 0x295   : > { %1516 = vmatprep.subr.mxu0 %v6536_v58  ;;  %4959 = vmatprep.subr.mxu1 %v8557_v30 }
 0x296   : > { %1517 = vmatpush1.msra.mxu0 %v6539_v59  ;;  %4960 = vmatpush3.msra.mxu1 %v6617_v18 }
 0x297   : > { %1518 = vmatprep.subr.mxu0 %v6543_v60  ;;  %4961 = vmatprep.subr.mxu1 %v8557_v30 }
 0x298   : > { %1519 = vmatpush1.msra.mxu0 %v6551_v62  ;;  %4962 = vmatpush3.msra.mxu1 %v6623_v19 }
 0x299   : > { %1520 = vmatprep.subr.mxu0 %v6558_v0  ;;  %4963 = vmatprep.subr.mxu1 %v8557_v30 }
 0x29a   : > { %1521 = vmatpush1.msra.mxu0 %v6561_v1  ;;  %4964 = vmatpush3.msra.mxu1 %v6630_v20 }
 0x29b   : > { %1522 = vmatprep.subr.mxu0 %v6565_v2  ;;  %4965 = vmatprep.subr.mxu1 %v8557_v30 }
 0x29c   : > { %1523 = vmatpush1.msra.mxu0 %v6573_v4  ;;  %4966 = vmatpush3.msra.mxu1 %v6637_v21 }
 0x29d   : > { %1524 = vmatprep.subr.mxu0 %v6578_v6  ;;  %4967 = vmatprep.subr.mxu1 %v8557_v30 }
 0x29e   : > { %1525 = vmatpush1.msra.mxu0 %v6581_v7  ;;  %4968 = vmatpush3.msra.mxu1 %v6643_v23 }
 0x29f   : > { %1526 = vmatprep.subr.mxu0 %v6585_v8  ;;  %4969 = vmatprep.subr.mxu1 %v8557_v30 }
 0x2a0   : > { %1527 = vmatpush1.msra.mxu0 %v6592_v10  ;;  %4970 = vmatpush3.msra.mxu1 %v6651_v24 }
 0x2a1   : > { %1528 = vmatprep.subr.mxu0 %v6597_v12  ;;  %4971 = vmatprep.subr.mxu1 %v8557_v30 }
 0x2a2   : > { %1529 = vmatpush1.msra.mxu0 %v8558_v25  ;;  %4972 = vmatpush3.msra.mxu1 %v8559_v17  ;;  %v8566_v17 = vld [vmem:[#allocation37_spill] sm:$0xff] }
 0x2a3   : > { %1530 = vmatprep.subr.mxu0 %v8560_v28  ;;  %4973 = vmatprep.subr.mxu1 %v8557_v30 }
 0x2a4   : > { %1531 = vmatpush1.msra.mxu0 %v8561_v11  ;;  %1564 = vmatprep.mubr.f32.mxu0 %v8557_v30 }
 0x2a5   : > { %4974 = vmatpush3.msra.mxu1 %v8562_v45  ;;  %4975 = vmatprep.mubr.msk.f32.mxu1 %vm6122_vm5, %v8557_v30 }
 0x2a6   : > { %1669 = vmatprep.subr.mxu0 %v8563_v5  ;;  %4978 = vmatprep.subr.mxu1 %v8557_v30 }
 0x345   : > { %v1397_v31 = vpop.f32.mrf.mxu0  ;;  %v1468_v26 = vpop.f32.mrf.mxu1 }
 0x346   : > { %v1472_v13 = vadd.f32 %v1397_v31, %v8564_v57  ;;  %v1486_v5 = vadd.f32 %v6801_v16, %v1468_v26 }
 0x347   : > { %v4942_v51 = vpop.f32.mrf.mxu1  ;;  %v1399_v29 = vpop.f32.mrf.mxu0 }
 0x348   : > { %v4497_v63 = vmul.f32 -1.442695, %v1472_v13  ;;  %v1479_v32 = vadd.f32 %v1399_v29, %v8565_v34 }
 0x34a   : > { %5631 = vpow2.f32 %v4497_v63  ;;  %v4498_v33 = vmul.f32 -1.442695, %v1479_v32 }
 0x34c   : > { %5633 = vpow2.f32 %v4498_v33 }
 0x357   : > { %v5632_v22 = vpop.eup %5631 }
 0x358   : > { %v1476_v27 = vadd.f32 1.0, %v5632_v22  ;;  %v8570_v22 = vld [vmem:[#allocation34_spill] sm:$0xff] }
 0x359   : > { %v5634_v14 = vpop.eup %5633 }
 0x35a   : > { %5635 = vrcp.f32 %v1476_v27  ;;  %v1483_v45 = vadd.f32 1.0, %v5634_v14  ;;  %v8568_v14 = vld [vmem:[#allocation35_spill] sm:$0xff]  ;;  %v8569_v27 = vld [vmem:[#allocation33_spill] sm:$0xff] }
 0x35c   : > { %5637 = vrcp.f32 %v1483_v45 }
 0x367   : > { %v5636_v11 = vpop.eup %5635 }
 0x368   : > { %v1487_v28 = vmul.f32 %v5636_v11, %v1486_v5  ;;  %v8573_v5 = vld [vmem:[#allocation40_spill] sm:$0xff] }
 0x369   : > { %v5638_v57 = vpop.eup %5637 }
 0x36a   : > { %v1488_v31 = vadd.f32 %v1487_v28, %v8566_v17  ;;  %v1490_v13 = vsub.f32 1.0, %v5638_v57  ;;  %v1492_v29 = vmul.f32 %v5638_v57, %v6806_v36  ;;  %v8571_v17 = vld [vmem:[#allocation36_spill] sm:$0xff]  ;;  %v8572_v28 = vld [vmem:[#allocation31_spill] sm:$0xff]  ;;  %v8574_v57 = vld [vmem:[#allocation41_spill] sm:$0xff] }
 0x36c   : > { %5639 = vtanh.f32 %v1488_v31 }
 0x379   : > { %v5640_v51 = vpop.eup %5639 }
 0x37a   : > { %v1491_v63 = vmul.f32 %v5640_v51, %v1490_v13 }
 0x37c   : > { %v6882_v33 = vadd.f32 %v1492_v29, %v1491_v63 }
 0x37e   : > { %8567 = vst [vmem:[#allocation32_spill] sm:$0xff] %v6882_v33  ;;  %1565 = vmatmul.mubr.f32.vlgmr.msra.gmra.mxu0 %v6882_v33  ;;  %4976 = vmatmul.mubr.f32.vlgmr.msra.gmra.mxu1 %v6882_v33 }
 0x37f   : > { %1670 = vmatpush1.msra.mxu0 %v6456_v35  ;;  %4979 = vmatpush3.msra.mxu1 %v6471_v40 }
 0x380   : > { %1671 = vmatprep.subr.mxu0 %v6460_v37  ;;  %4980 = vmatprep.subr.mxu1 %v8557_v30 }
 0x381   : > { %1672 = vmatpush1.msra.mxu0 %v6465_v38  ;;  %4981 = vmatpush3.msra.mxu1 %v6481_v43 }
 0x382   : > { %1673 = vmatprep.subr.mxu0 %v6469_v39  ;;  %4982 = vmatprep.subr.mxu1 %v8557_v30 }
 0x383   : > { %1674 = vmatpush1.msra.mxu0 %v6474_v41  ;;  %4983 = vmatpush3.msra.mxu1 %v6502_v49 }
 0x384   : > { %1675 = vmatprep.subr.mxu0 %v6478_v42  ;;  %4984 = vmatprep.subr.mxu1 %v8557_v30 }
 0x385   : > { %1676 = vmatpush1.msra.mxu0 %v6485_v44  ;;  %4985 = vmatpush3.msra.mxu1 %v6524_v55 }
 0x386   : > { %1677 = vmatprep.subr.mxu0 %v6492_v46  ;;  %4986 = vmatprep.subr.mxu1 %v8557_v30 }
 0x387   : > { %1678 = vmatpush1.msra.mxu0 %v6495_v47  ;;  %4987 = vmatpush3.msra.mxu1 %v6546_v61 }
 0x388   : > { %1679 = vmatprep.subr.mxu0 %v6499_v48  ;;  %4988 = vmatprep.subr.mxu1 %v8557_v30 }
 0x389   : > { %1680 = vmatpush1.msra.mxu0 %v6507_v50  ;;  %4989 = vmatpush3.msra.mxu1 %v6568_v3 }
 0x38a   : > { %1681 = vmatprep.subr.mxu0 %v6514_v52  ;;  %4990 = vmatprep.subr.mxu1 %v8557_v30 }
 0x38b   : > { %1682 = vmatpush1.msra.mxu0 %v6517_v53  ;;  %4991 = vmatpush3.msra.mxu1 %v6588_v9 }
 0x38c   : > { %1683 = vmatprep.subr.mxu0 %v6521_v54  ;;  %4992 = vmatprep.subr.mxu1 %v8557_v30 }
 0x38d   : > { %1684 = vmatpush1.msra.mxu0 %v6529_v56  ;;  %4993 = vmatpush3.msra.mxu1 %v6607_v15 }
 0x38e   : > { %1685 = vmatprep.subr.mxu0 %v6536_v58  ;;  %4994 = vmatprep.subr.mxu1 %v8557_v30 }
 0x38f   : > { %1686 = vmatpush1.msra.mxu0 %v6539_v59  ;;  %4995 = vmatpush3.msra.mxu1 %v6617_v18 }
 0x390   : > { %1687 = vmatprep.subr.mxu0 %v6543_v60  ;;  %4996 = vmatprep.subr.mxu1 %v8557_v30 }
 0x391   : > { %1688 = vmatpush1.msra.mxu0 %v6551_v62  ;;  %4997 = vmatpush3.msra.mxu1 %v6623_v19 }
 0x392   : > { %1689 = vmatprep.subr.mxu0 %v6558_v0  ;;  %4998 = vmatprep.subr.mxu1 %v8557_v30 }
 0x393   : > { %1690 = vmatpush1.msra.mxu0 %v6561_v1  ;;  %4999 = vmatpush3.msra.mxu1 %v6630_v20 }
 0x394   : > { %1691 = vmatprep.subr.mxu0 %v6565_v2  ;;  %5000 = vmatprep.subr.mxu1 %v8557_v30 }
 0x395   : > { %1692 = vmatpush1.msra.mxu0 %v6573_v4  ;;  %5001 = vmatpush3.msra.mxu1 %v6637_v21 }
 0x396   : > { %1693 = vmatprep.subr.mxu0 %v6578_v6  ;;  %5002 = vmatprep.subr.mxu1 %v8557_v30 }
 0x397   : > { %1694 = vmatpush1.msra.mxu0 %v6581_v7  ;;  %5003 = vmatpush3.msra.mxu1 %v6643_v23 }
 0x398   : > { %1695 = vmatprep.subr.mxu0 %v6585_v8  ;;  %5004 = vmatprep.subr.mxu1 %v8557_v30 }
 0x399   : > { %1696 = vmatpush1.msra.mxu0 %v6592_v10  ;;  %5005 = vmatpush3.msra.mxu1 %v6651_v24 }
 0x39a   : > { %1697 = vmatprep.subr.mxu0 %v6597_v12  ;;  %5006 = vmatprep.subr.mxu1 %v8557_v30 }
 0x39b   : > { %1698 = vmatpush1.msra.mxu0 %v8558_v25  ;;  %5007 = vmatpush3.msra.mxu1 %v8568_v14  ;;  %v8575_v14 = vld [vmem:[#allocation53_spill] sm:$0xff] }
 0x39c   : > { %1699 = vmatprep.subr.mxu0 %v8569_v27  ;;  %5008 = vmatprep.subr.mxu1 %v8557_v30 }
 0x39d   : > { %1700 = vmatpush1.msra.mxu0 %v8570_v22  ;;  %1733 = vmatprep.mubr.f32.mxu0 %v8557_v30 }
 0x39e   : > { %5009 = vmatpush3.msra.mxu1 %v8571_v17  ;;  %5010 = vmatprep.mubr.msk.f32.mxu1 %vm6122_vm5, %v8557_v30 }
 0x39f   : > { %1838 = vmatprep.subr.mxu0 %v8572_v28  ;;  %5013 = vmatprep.subr.mxu1 %v8557_v30 }
 0x43e   : > { %v1566_v11 = vpop.f32.mrf.mxu0  ;;  %v1637_v45 = vpop.f32.mrf.mxu1 }
 0x43f   : > { %v1641_v26 = vadd.f32 %v1566_v11, %v8573_v5  ;;  %v1655_v28 = vadd.f32 %v6801_v16, %v1637_v45  ;;  %v7076_v45 = vld [vmem:[#allocation8 + $0x110] sm:$0xff] }
 0x440   : > { %v4977_v34 = vpop.f32.mrf.mxu1  ;;  %v1568_v31 = vpop.f32.mrf.mxu0 }
 0x441   : > { %v4499_v32 = vmul.f32 -1.442695, %v1641_v26  ;;  %v1648_v13 = vadd.f32 %v1568_v31, %v8574_v57 }
 0x443   : > { %5641 = vpow2.f32 %v4499_v32  ;;  %v4500_v51 = vmul.f32 -1.442695, %v1648_v13  ;;  %v7080_v13 = vld [vmem:[#allocation8 + $0x108] sm:$0xff] }
 0x445   : > { %5643 = vpow2.f32 %v4500_v51  ;;  %v7083_v51 = vld [vmem:[#allocation8 + $0x118] sm:$0xff] }
 0x450   : > { %v5642_v63 = vpop.eup %5641 }
 0x451   : > { %v1645_v29 = vadd.f32 1.0, %v5642_v63  ;;  %v7086_v63 = vld [vmem:[#allocation8 + $0xf8] sm:$0xff] }
 0x452   : > { %v5644_v36 = vpop.eup %5643 }
 0x453   : > { %5645 = vrcp.f32 %v1645_v29  ;;  %v1652_v17 = vadd.f32 1.0, %v5644_v36  ;;  %v7056_v36 = vld [vmem:[#allocation8 + $0x140] sm:$0xff]  ;;  %v7090_v29 = vld [vmem:[#allocation8 + $0xf0] sm:$0xff] }
 0x455   : > { %5647 = vrcp.f32 %v1652_v17  ;;  %v7073_v17 = vld [vmem:[#allocation8 + $0x130] sm:$0xff] }
 0x460   : > { %v5646_v22 = vpop.eup %5645 }
 0x461   : > { %v1656_v27 = vmul.f32 %v5646_v22, %v1655_v28  ;;  %v7070_v22 = vld [vmem:[#allocation8 + $0x120] sm:$0xff] }
 0x462   : > { %v5648_v5 = vpop.eup %5647  ;;  %v7093_v28 = vld [vmem:[#allocation8 + $0x100] sm:$0xff] }
 0x463   : > { %v1657_v11 = vadd.f32 %v1656_v27, %v8575_v14  ;;  %v1659_v26 = vsub.f32 1.0, %v5648_v5  ;;  %v1661_v31 = vmul.f32 %v5648_v5, %v6882_v33  ;;  %v7063_v14 = vld [vmem:[#allocation8 + $0x148] sm:$0xff]  ;;  %v7100_v5 = vld [vmem:[#allocation8 + $0xd8] sm:$0xff] }
 0x464   : > { %v7066_v27 = vld [vmem:[#allocation8 + $0x128] sm:$0xff] }
 0x465   : > { %5649 = vtanh.f32 %v1657_v11  ;;  %v7096_v11 = vld [vmem:[#allocation8 + $0xe0] sm:$0xff] }
 0x472   : > { %v5650_v34 = vpop.eup %5649 }
 0x473   : > { %v1660_v32 = vmul.f32 %v5650_v34, %v1659_v26  ;;  %v7103_v26 = vld [vmem:[#allocation8 + $0xe8] sm:$0xff] }
 0x474   : > { %v7106_v34 = vld [vmem:[#allocation8 + $0xc8] sm:$0xff] }
 0x475   : > { %v6958_v57 = vadd.f32 %v1661_v31, %v1660_v32  ;;  %v7110_v32 = vld [vmem:[#allocation8 + $0xc0] sm:$0xff]  ;;  %v7114_v31 = vld [vmem:[#allocation8 + $0xb0] sm:$0xff] }
 0x477   : > { %8576 = vst [vmem:[#allocation38_spill] sm:$0xff] %v6958_v57  ;;  %1734 = vmatmul.mubr.f32.vlgmr.msra.gmra.mxu0 %v6958_v57  ;;  %5011 = vmatmul.mubr.f32.vlgmr.msra.gmra.mxu1 %v6958_v57 }
 0x478   : > { %1839 = vmatpush1.msra.mxu0 %v6456_v35  ;;  %5014 = vmatpush3.msra.mxu1 %v6471_v40  ;;  %v8577_v35 = vld [vmem:[#allocation35_spill] sm:$0xff]  ;;  %v7027_v40 = vld [vmem:[#allocation8 + $0x170] sm:$0xff] }
 0x479   : > { %1840 = vmatprep.subr.mxu0 %v6460_v37  ;;  %5015 = vmatprep.subr.mxu1 %v8557_v30  ;;  %v8578_v37 = vld [vmem:[#allocation33_spill] sm:$0xff] }
 0x47a   : > { %1841 = vmatpush1.msra.mxu0 %v6465_v38  ;;  %5016 = vmatpush3.msra.mxu1 %v6481_v43  ;;  %v8579_v38 = vld [vmem:[#allocation34_spill] sm:$0xff] }
 0x47b   : > { %1842 = vmatprep.subr.mxu0 %v6469_v39  ;;  %5017 = vmatprep.subr.mxu1 %v8557_v30  ;;  %v8580_v39 = vld [vmem:[#allocation36_spill] sm:$0xff]  ;;  %v8581_v43 = vld [vmem:[#allocation42_spill] sm:$0xff] }
 0x47c   : > { %1843 = vmatpush1.msra.mxu0 %v6474_v41  ;;  %5018 = vmatpush3.msra.mxu1 %v6502_v49  ;;  %v8582_v49 = vld [vmem:[#allocation43_spill] sm:$0xff] }
 0x47d   : > { %1844 = vmatprep.subr.mxu0 %v6478_v42  ;;  %5019 = vmatprep.subr.mxu1 %v8557_v30 }
 0x47e   : > { %1845 = vmatpush1.msra.mxu0 %v6485_v44  ;;  %5020 = vmatpush3.msra.mxu1 %v6524_v55 }
 0x47f   : > { %1846 = vmatprep.subr.mxu0 %v6492_v46  ;;  %5021 = vmatprep.subr.mxu1 %v8557_v30 }
 0x480   : > { %1847 = vmatpush1.msra.mxu0 %v6495_v47  ;;  %5022 = vmatpush3.msra.mxu1 %v6546_v61  ;;  %v8583_v61 = vld [vmem:[#allocation52_spill] sm:$0xff] }
 0x481   : > { %1848 = vmatprep.subr.mxu0 %v6499_v48  ;;  %5023 = vmatprep.subr.mxu1 %v8557_v30 }
 0x482   : > { %1849 = vmatpush1.msra.mxu0 %v6507_v50  ;;  %5024 = vmatpush3.msra.mxu1 %v6568_v3 }
 0x483   : > { %1850 = vmatprep.subr.mxu0 %v6514_v52  ;;  %5025 = vmatprep.subr.mxu1 %v8557_v30 }
 0x484   : > { %1851 = vmatpush1.msra.mxu0 %v6517_v53  ;;  %5026 = vmatpush3.msra.mxu1 %v6588_v9  ;;  %v7046_v9 = vld [vmem:[#allocation8 + $0x158] sm:$0xff] }
 0x485   : > { %1852 = vmatprep.subr.mxu0 %v6521_v54  ;;  %5027 = vmatprep.subr.mxu1 %v8557_v30 }
 0x486   : > { %1853 = vmatpush1.msra.mxu0 %v6529_v56  ;;  %5028 = vmatpush3.msra.mxu1 %v6607_v15 }
 0x487   : > { %1854 = vmatprep.subr.mxu0 %v6536_v58  ;;  %5029 = vmatprep.subr.mxu1 %v8557_v30 }
 0x488   : > { %1855 = vmatpush1.msra.mxu0 %v6539_v59  ;;  %5030 = vmatpush3.msra.mxu1 %v6617_v18 }
 0x489   : > { %1856 = vmatprep.subr.mxu0 %v6543_v60  ;;  %5031 = vmatprep.subr.mxu1 %v8557_v30 }
 0x48a   : > { %1857 = vmatpush1.msra.mxu0 %v6551_v62  ;;  %5032 = vmatpush3.msra.mxu1 %v6623_v19 }
 0x48b   : > { %1858 = vmatprep.subr.mxu0 %v6558_v0  ;;  %5033 = vmatprep.subr.mxu1 %v8557_v30 }
 0x48c   : > { %1859 = vmatpush1.msra.mxu0 %v6561_v1  ;;  %5034 = vmatpush3.msra.mxu1 %v6630_v20 }
 0x48d   : > { %1860 = vmatprep.subr.mxu0 %v6565_v2  ;;  %5035 = vmatprep.subr.mxu1 %v8557_v30 }
 0x48e   : > { %1861 = vmatpush1.msra.mxu0 %v6573_v4  ;;  %5036 = vmatpush3.msra.mxu1 %v6637_v21 }
 0x48f   : > { %1862 = vmatprep.subr.mxu0 %v6578_v6  ;;  %5037 = vmatprep.subr.mxu1 %v8557_v30 }
 0x490   : > { %1863 = vmatpush1.msra.mxu0 %v6581_v7  ;;  %5038 = vmatpush3.msra.mxu1 %v6643_v23  ;;  %v7040_v7 = vld [vmem:[#allocation8 + $0x168] sm:$0xff] }
 0x491   : > { %1864 = vmatprep.subr.mxu0 %v6585_v8  ;;  %5039 = vmatprep.subr.mxu1 %v8557_v30  ;;  %v7043_v8 = vld [vmem:[#allocation8 + $0x178] sm:$0xff] }
 0x492   : > { %1865 = vmatpush1.msra.mxu0 %v6592_v10  ;;  %5040 = vmatpush3.msra.mxu1 %v6651_v24  ;;  %v7050_v10 = vld [vmem:[#allocation8 + $0x150] sm:$0xff] }
 0x493   : > { %1866 = vmatprep.subr.mxu0 %v6597_v12  ;;  %5041 = vmatprep.subr.mxu1 %v8557_v30  ;;  %v7053_v12 = vld [vmem:[#allocation8 + $0x160] sm:$0xff] }
 0x494   : > { %1867 = vmatpush1.msra.mxu0 %v8558_v25  ;;  %5042 = vmatpush3.msra.mxu1 %v8577_v35  ;;  %v7060_v25 = vld [vmem:[#allocation8 + $0x138] sm:$0xff] }
 0x495   : > { %1868 = vmatprep.subr.mxu0 %v8578_v37  ;;  %5043 = vmatprep.subr.mxu1 %v8557_v30  ;;  %v7118_v37 = vld [vmem:[#allocation8 + $0xa8] sm:$0xff] }
 0x496   : > { %1869 = vmatpush1.msra.mxu0 %v8579_v38  ;;  %1902 = vmatprep.mubr.f32.mxu0 %v8557_v30  ;;  %v7122_v38 = vld [vmem:[#allocation8 + $0x98] sm:$0xff] }
 0x497   : > { %5044 = vmatpush3.msra.mxu1 %v8580_v39  ;;  %5045 = vmatprep.mubr.msk.f32.mxu1 %vm6122_vm5, %v8557_v30 }
 0x498   : > { %2007 = vmatprep.subr.mxu0 %v7027_v40  ;;  %5048 = vmatprep.subr.mxu1 %v8557_v30 }
 0x537   : > { %v1735_v41 = vpop.f32.mrf.mxu0  ;;  %v1806_v42 = vpop.f32.mrf.mxu1 }
 0x538   : > { %v1810_v44 = vadd.f32 %v1735_v41, %v8581_v43  ;;  %v1824_v58 = vadd.f32 %v6801_v16, %v1806_v42  ;;  %v7126_v41 = vld [vmem:[#allocation8 + $0x90] sm:$0xff]  ;;  %v7134_v42 = vld [vmem:[#allocation8 + $0x78] sm:$0xff]  ;;  %v7142_v43 = vld [vmem:[#allocation8 + $0x60] sm:$0xff] }
 0x539   : > { %v5012_v46 = vpop.f32.mrf.mxu1  ;;  %v1737_v48 = vpop.f32.mrf.mxu0 }
 0x53a   : > { %v4501_v47 = vmul.f32 -1.442695, %v1810_v44  ;;  %v1817_v50 = vadd.f32 %v1737_v48, %v8582_v49  ;;  %v7150_v44 = vld [vmem:[#allocation8 + $0x48] sm:$0xff]  ;;  %v7158_v46 = vld [vmem:[#allocation8 + $0x30] sm:$0xff]  ;;  %v7174_v48 = vld [vmem:[#allocation8] sm:$0xff] }
 0x53b   : > { %8586 = vst [vmem:[#allocation31_spill] sm:$0xff] %v7174_v48  ;;  %v8587_v49 = vld [vmem:[#allocation44_spill] sm:$0xff] }
 0x53c   : > { %5651 = vpow2.f32 %v4501_v47  ;;  %v4502_v52 = vmul.f32 -1.442695, %v1817_v50  ;;  %v7166_v47 = vld [vmem:[#allocation8 + $0x18] sm:$0xff] }
 0x53e   : > { %5653 = vpow2.f32 %v4502_v52 }
 0x549   : > { %v5652_v53 = vpop.eup %5651 }
 0x54a   : > { %v1814_v54 = vadd.f32 1.0, %v5652_v53 }
 0x54b   : > { %v5654_v55 = vpop.eup %5653 }
 0x54c   : > { %5655 = vrcp.f32 %v1814_v54  ;;  %v1821_v56 = vadd.f32 1.0, %v5654_v55  ;;  %v8588_v55 = vld [vmem:[#allocation45_spill] sm:$0xff] }
 0x54e   : > { %5657 = vrcp.f32 %v1821_v56 }
 0x559   : > { %v5656_v59 = vpop.eup %5655 }
 0x55a   : > { %v1825_v60 = vmul.f32 %v5656_v59, %v1824_v58 }
 0x55b   : > { %v5658_v0 = vpop.eup %5657 }
 0x55c   : > { %v1826_v62 = vadd.f32 %v1825_v60, %v8583_v61  ;;  %v1828_v1 = vsub.f32 1.0, %v5658_v0  ;;  %v1830_v4 = vmul.f32 %v5658_v0, %v6958_v57 }
 0x55e   : > { %5659 = vtanh.f32 %v1826_v62 }
 0x56b   : > { %v5660_v2 = vpop.eup %5659 }
 0x56c   : > { %v1829_v3 = vmul.f32 %v5660_v2, %v1828_v1  ;;  %v8589_v2 = vld [vmem:[#allocation55_spill] sm:$0xff] }
 0x56e   : > { %v7036_v6 = vadd.f32 %v1830_v4, %v1829_v3 }
 0x570   : > { %8584 = vst [vmem:[#allocation39_spill] sm:$0xff] %v7036_v6  ;;  %1903 = vmatmul.mubr.f32.vlgmr.msra.gmra.mxu0 %v7036_v6  ;;  %5046 = vmatmul.mubr.f32.vlgmr.msra.gmra.mxu1 %v7036_v6 }
 0x571   : > { %2008 = vmatpush1.msra.mxu0 %v7040_v7  ;;  %5049 = vmatpush3.msra.mxu1 %v7043_v8 }
 0x572   : > { %2009 = vmatprep.subr.mxu0 %v7046_v9  ;;  %5050 = vmatprep.subr.mxu1 %v8557_v30 }
 0x573   : > { %2010 = vmatpush1.msra.mxu0 %v7050_v10  ;;  %5051 = vmatpush3.msra.mxu1 %v7053_v12 }
 0x574   : > { %2011 = vmatprep.subr.mxu0 %v7056_v36  ;;  %5052 = vmatprep.subr.mxu1 %v8557_v30 }
 0x575   : > { %2012 = vmatpush1.msra.mxu0 %v7060_v25  ;;  %5053 = vmatpush3.msra.mxu1 %v7063_v14 }
 0x576   : > { %2013 = vmatprep.subr.mxu0 %v7066_v27  ;;  %5054 = vmatprep.subr.mxu1 %v8557_v30 }
 0x577   : > { %2014 = vmatpush1.msra.mxu0 %v7070_v22  ;;  %5055 = vmatpush3.msra.mxu1 %v7073_v17 }
 0x578   : > { %2015 = vmatprep.subr.mxu0 %v7076_v45  ;;  %5056 = vmatprep.subr.mxu1 %v8557_v30 }
 0x579   : > { %2016 = vmatpush1.msra.mxu0 %v7080_v13  ;;  %5057 = vmatpush3.msra.mxu1 %v7083_v51 }
 0x57a   : > { %2017 = vmatprep.subr.mxu0 %v7086_v63  ;;  %5058 = vmatprep.subr.mxu1 %v8557_v30 }
 0x57b   : > { %2018 = vmatpush1.msra.mxu0 %v7090_v29  ;;  %5059 = vmatpush3.msra.mxu1 %v7093_v28 }
 0x57c   : > { %2019 = vmatprep.subr.mxu0 %v7096_v11  ;;  %5060 = vmatprep.subr.mxu1 %v8557_v30 }
 0x57d   : > { %2020 = vmatpush1.msra.mxu0 %v7100_v5  ;;  %5061 = vmatpush3.msra.mxu1 %v7103_v26 }
 0x57e   : > { %2021 = vmatprep.subr.mxu0 %v7106_v34  ;;  %5062 = vmatprep.subr.mxu1 %v8557_v30 }
 0x57f   : > { %2022 = vmatpush1.msra.mxu0 %v7110_v32  ;;  %5063 = vmatpush3.msra.mxu1 %v6607_v15  ;;  %v7130_v15 = vld [vmem:[#allocation8 + $0x80] sm:$0xff] }
 0x580   : > { %2023 = vmatprep.subr.mxu0 %v7114_v31  ;;  %5064 = vmatprep.subr.mxu1 %v8557_v30 }
 0x581   : > { %2024 = vmatpush1.msra.mxu0 %v7118_v37  ;;  %5065 = vmatpush3.msra.mxu1 %v6617_v18  ;;  %v7138_v18 = vld [vmem:[#allocation8 + $0x68] sm:$0xff] }
 0x582   : > { %2025 = vmatprep.subr.mxu0 %v7122_v38  ;;  %5066 = vmatprep.subr.mxu1 %v8557_v30 }
 0x583   : > { %2026 = vmatpush1.msra.mxu0 %v7126_v41  ;;  %5067 = vmatpush3.msra.mxu1 %v6623_v19  ;;  %v7146_v19 = vld [vmem:[#allocation8 + $0x50] sm:$0xff] }
 0x584   : > { %2027 = vmatprep.subr.mxu0 %v7130_v15  ;;  %5068 = vmatprep.subr.mxu1 %v8557_v30 }
 0x585   : > { %2028 = vmatpush1.msra.mxu0 %v7134_v42  ;;  %5069 = vmatpush3.msra.mxu1 %v6630_v20  ;;  %v7154_v20 = vld [vmem:[#allocation8 + $0x38] sm:$0xff] }
 0x586   : > { %2029 = vmatprep.subr.mxu0 %v7138_v18  ;;  %5070 = vmatprep.subr.mxu1 %v8557_v30 }
 0x587   : > { %2030 = vmatpush1.msra.mxu0 %v7142_v43  ;;  %5071 = vmatpush3.msra.mxu1 %v6637_v21  ;;  %v7162_v21 = vld [vmem:[#allocation8 + $0x20] sm:$0xff] }
 0x588   : > { %2031 = vmatprep.subr.mxu0 %v7146_v19  ;;  %5072 = vmatprep.subr.mxu1 %v8557_v30 }
 0x589   : > { %2032 = vmatpush1.msra.mxu0 %v7150_v44  ;;  %5073 = vmatpush3.msra.mxu1 %v6643_v23  ;;  %v7170_v23 = vld [vmem:[#allocation8 + $0x8] sm:$0xff] }
 0x58a   : > { %2033 = vmatprep.subr.mxu0 %v7154_v20  ;;  %5074 = vmatprep.subr.mxu1 %v8557_v30  ;;  %8585 = vst [vmem:[#allocation37_spill] sm:$0xff] %v7170_v23 }
 0x58b   : > { %2034 = vmatpush1.msra.mxu0 %v7158_v46  ;;  %5075 = vmatpush3.msra.mxu1 %v6651_v24 }
 0x58c   : > { %2035 = vmatprep.subr.mxu0 %v7162_v21  ;;  %5076 = vmatprep.subr.mxu1 %v8557_v30 }
 0x58d   : > { %2036 = vmatpush1.msra.mxu0 %v7166_v47  ;;  %5077 = vmatpush3.msra.mxu1 %v8577_v35 }
 0x58e   : > { %2037 = vmatprep.subr.mxu0 %v7170_v23  ;;  %5078 = vmatprep.subr.mxu1 %v8557_v30 }
 0x58f   : > { %2038 = vmatpush1.msra.mxu0 %v7174_v48  ;;  %2071 = vmatprep.mubr.f32.mxu0 %v8557_v30 }
 0x590   : > { %5079 = vmatpush3.msra.mxu1 %v8580_v39  ;;  %5080 = vmatprep.mubr.msk.f32.mxu1 %vm6122_vm5, %v8557_v30 }
 0x591   : > { %2176 = vmatprep.subr.mxu0 %v7027_v40  ;;  %5083 = vmatprep.subr.mxu1 %v8557_v30 }
 0x630   : > { %v1904_v24 = vpop.f32.mrf.mxu0  ;;  %v1975_v35 = vpop.f32.mrf.mxu1 }
 0x631   : > { %v1979_v50 = vadd.f32 %v1904_v24, %v8587_v49  ;;  %v1993_v62 = vadd.f32 %v6801_v16, %v1975_v35  ;;  %v7221_v35 = vld [vmem:[#allocation8 + $0xd0] sm:$0xff] }
 0x632   : > { %v5047_v52 = vpop.f32.mrf.mxu1  ;;  %v1906_v54 = vpop.f32.mrf.mxu0 }
 0x633   : > { %v4503_v53 = vmul.f32 -1.442695, %v1979_v50  ;;  %v1986_v56 = vadd.f32 %v1906_v54, %v8588_v55  ;;  %v7227_v54 = vld [vmem:[#allocation8 + $0xb8] sm:$0xff]  ;;  %v7233_v55 = vld [vmem:[#allocation8 + $0xa0] sm:$0xff] }
 0x635   : > { %5661 = vpow2.f32 %v4503_v53  ;;  %v4504_v58 = vmul.f32 -1.442695, %v1986_v56  ;;  %v7239_v56 = vld [vmem:[#allocation8 + $0x88] sm:$0xff] }
 0x637   : > { %5663 = vpow2.f32 %v4504_v58  ;;  %v7245_v58 = vld [vmem:[#allocation8 + $0x70] sm:$0xff] }
 0x642   : > { %v5662_v39 = vpop.eup %5661 }
 0x643   : > { %v1983_v59 = vadd.f32 1.0, %v5662_v39  ;;  %v7251_v39 = vld [vmem:[#allocation8 + $0x58] sm:$0xff] }
 0x644   : > { %v5664_v60 = vpop.eup %5663 }
 0x645   : > { %5665 = vrcp.f32 %v1983_v59  ;;  %v1990_v61 = vadd.f32 1.0, %v5664_v60  ;;  %v7257_v59 = vld [vmem:[#allocation8 + $0x40] sm:$0xff]  ;;  %v7263_v60 = vld [vmem:[#allocation8 + $0x28] sm:$0xff] }
 0x646   : > { %8590 = vst [vmem:[#allocation40_spill] sm:$0xff] %v7263_v60 }
 0x647   : > { %5667 = vrcp.f32 %v1990_v61  ;;  %v7270_v61 = vld [vmem:[#allocation8 + $0x10] sm:$0xff] }
 0x648   : > { %8591 = vst [vmem:[#allocation41_spill] sm:$0xff] %v7270_v61 }
 0x652   : > { %v5666_v0 = vpop.eup %5665 }
 0x653   : > { %v1994_v1 = vmul.f32 %v5666_v0, %v1993_v62 }
 0x654   : > { %v5668_v4 = vpop.eup %5667 }
 0x655   : > { %v1995_v3 = vadd.f32 %v1994_v1, %v8589_v2  ;;  %v1997_v24 = vsub.f32 1.0, %v5668_v4  ;;  %v1999_v52 = vmul.f32 %v5668_v4, %v7036_v6  ;;  %v8592_v1 = vld [vmem:[#allocation46_spill] sm:$0xff] }
 0x657   : > { %5669 = vtanh.f32 %v1995_v3 }
 0x664   : > { %v5670_v49 = vpop.eup %5669 }
 0x665   : > { %v1998_v50 = vmul.f32 %v5670_v49, %v1997_v24  ;;  %v8593_v49 = vld [vmem:[#allocation47_spill] sm:$0xff] }
 0x667   : > { %v7188_v53 = vadd.f32 %v1999_v52, %v1998_v50 }
 0x669   : > { %2072 = vmatmul.mubr.f32.vlgmr.msra.gmra.mxu0 %v7188_v53  ;;  %5081 = vmatmul.mubr.f32.vlgmr.msra.gmra.mxu1 %v7188_v53 }
 0x66a   : > { %2177 = vmatpush1.msra.mxu0 %v7040_v7  ;;  %5084 = vmatpush3.msra.mxu1 %v7043_v8 }
 0x66b   : > { %2178 = vmatprep.subr.mxu0 %v7046_v9  ;;  %5085 = vmatprep.subr.mxu1 %v8557_v30 }
 0x66c   : > { %2179 = vmatpush1.msra.mxu0 %v7050_v10  ;;  %5086 = vmatpush3.msra.mxu1 %v7053_v12 }
 0x66d   : > { %2180 = vmatprep.subr.mxu0 %v7056_v36  ;;  %5087 = vmatprep.subr.mxu1 %v8557_v30 }
 0x66e   : > { %2181 = vmatpush1.msra.mxu0 %v7060_v25  ;;  %5088 = vmatpush3.msra.mxu1 %v7063_v14 }
 0x66f   : > { %2182 = vmatprep.subr.mxu0 %v7066_v27  ;;  %5089 = vmatprep.subr.mxu1 %v8557_v30 }
 0x670   : > { %2183 = vmatpush1.msra.mxu0 %v7070_v22  ;;  %5090 = vmatpush3.msra.mxu1 %v7073_v17 }
 0x671   : > { %2184 = vmatprep.subr.mxu0 %v7076_v45  ;;  %5091 = vmatprep.subr.mxu1 %v8557_v30 }
 0x672   : > { %2185 = vmatpush1.msra.mxu0 %v7080_v13  ;;  %5092 = vmatpush3.msra.mxu1 %v7083_v51 }
 0x673   : > { %2186 = vmatprep.subr.mxu0 %v7086_v63  ;;  %5093 = vmatprep.subr.mxu1 %v8557_v30 }
 0x674   : > { %2187 = vmatpush1.msra.mxu0 %v7090_v29  ;;  %5094 = vmatpush3.msra.mxu1 %v7093_v28 }
 0x675   : > { %2188 = vmatprep.subr.mxu0 %v7096_v11  ;;  %5095 = vmatprep.subr.mxu1 %v8557_v30 }
 0x676   : > { %2189 = vmatpush1.msra.mxu0 %v7100_v5  ;;  %5096 = vmatpush3.msra.mxu1 %v7103_v26 }
 0x677   : > { %2190 = vmatprep.subr.mxu0 %v7106_v34  ;;  %5097 = vmatprep.subr.mxu1 %v8557_v30 }
 0x678   : > { %2191 = vmatpush1.msra.mxu0 %v7110_v32  ;;  %5098 = vmatpush3.msra.mxu1 %v7221_v35 }
 0x679   : > { %2192 = vmatprep.subr.mxu0 %v7114_v31  ;;  %5099 = vmatprep.subr.mxu1 %v8557_v30 }
 0x67a   : > { %2193 = vmatpush1.msra.mxu0 %v7118_v37  ;;  %5100 = vmatpush3.msra.mxu1 %v7227_v54 }
 0x67b   : > { %2194 = vmatprep.subr.mxu0 %v7122_v38  ;;  %5101 = vmatprep.subr.mxu1 %v8557_v30 }
 0x67c   : > { %2195 = vmatpush1.msra.mxu0 %v7126_v41  ;;  %5102 = vmatpush3.msra.mxu1 %v7233_v55 }
 0x67d   : > { %2196 = vmatprep.subr.mxu0 %v7130_v15  ;;  %5103 = vmatprep.subr.mxu1 %v8557_v30 }
 0x67e   : > { %2197 = vmatpush1.msra.mxu0 %v7134_v42  ;;  %5104 = vmatpush3.msra.mxu1 %v7239_v56 }
 0x67f   : > { %2198 = vmatprep.subr.mxu0 %v7138_v18  ;;  %5105 = vmatprep.subr.mxu1 %v8557_v30 }
 0x680   : > { %2199 = vmatpush1.msra.mxu0 %v7142_v43  ;;  %5106 = vmatpush3.msra.mxu1 %v7245_v58 }
 0x681   : > { %2200 = vmatprep.subr.mxu0 %v7146_v19  ;;  %5107 = vmatprep.subr.mxu1 %v8557_v30 }
 0x682   : > { %2201 = vmatpush1.msra.mxu0 %v7150_v44  ;;  %5108 = vmatpush3.msra.mxu1 %v7251_v39 }
 0x683   : > { %2202 = vmatprep.subr.mxu0 %v7154_v20  ;;  %5109 = vmatprep.subr.mxu1 %v8557_v30 }
 0x684   : > { %2203 = vmatpush1.msra.mxu0 %v7158_v46  ;;  %5110 = vmatpush3.msra.mxu1 %v7257_v59 }
 0x685   : > { %2204 = vmatprep.subr.mxu0 %v7162_v21  ;;  %5111 = vmatprep.subr.mxu1 %v8557_v30 }
 0x686   : > { %2205 = vmatpush1.msra.mxu0 %v7166_v47  ;;  %5112 = vmatpush3.msra.mxu1 %v7263_v60  ;;  %v8594_v60 = vld [vmem:[#allocation54_spill] sm:$0xff] }
 0x687   : > { %2206 = vmatprep.subr.mxu0 %v7170_v23  ;;  %5113 = vmatprep.subr.mxu1 %v8557_v30 }
 0x688   : > { %2207 = vmatpush1.msra.mxu0 %v7174_v48  ;;  %2240 = vmatprep.mubr.f32.mxu0 %v8557_v30 }
 0x689   : > { %5114 = vmatpush3.msra.mxu1 %v7270_v61  ;;  %5115 = vmatprep.mubr.msk.f32.mxu1 %vm6122_vm5, %v8557_v30 }
 0x68a   : > { %2345 = vmatprep.subr.mxu0 %v7027_v40  ;;  %5118 = vmatprep.subr.mxu1 %v8557_v30 }
 0x729   : > { %v2073_v62 = vpop.f32.mrf.mxu0  ;;  %v2144_v0 = vpop.f32.mrf.mxu1 }
 0x72a   : > { %v2148_v2 = vadd.f32 %v2073_v62, %v8592_v1  ;;  %v2162_v40 = vadd.f32 %v6801_v16, %v2144_v0  ;;  %v8595_v16 = vld [vmem:[#allocation40_spill] sm:$0xff]  ;;  %v2546_v0 = vld [vmem:[#allocation11 + $0xd8] sm:$0xff] }
 0x72b   : > { %v5082_v3 = vpop.f32.mrf.mxu1  ;;  %v2075_v24 = vpop.f32.mrf.mxu0 }
 0x72c   : > { %v4505_v4 = vmul.f32 -1.442695, %v2148_v2  ;;  %v2155_v50 = vadd.f32 %v2075_v24, %v8593_v49 }
 0x72e   : > { %5671 = vpow2.f32 %v4505_v4  ;;  %v4506_v52 = vmul.f32 -1.442695, %v2155_v50  ;;  %v2544_v50 = vld [vmem:[#allocation11 + $0xc8] sm:$0xff] }
 0x730   : > { %5673 = vpow2.f32 %v4506_v52  ;;  %v2545_v52 = vld [vmem:[#allocation11 + $0xd0] sm:$0xff] }
 0x73b   : > { %v5672_v6 = vpop.eup %5671 }
 0x73c   : > { %v2152_v57 = vadd.f32 1.0, %v5672_v6  ;;  %v8598_v6 = vld [vmem:[#allocation41_spill] sm:$0xff] }
 0x73d   : > { %v5674_v33 = vpop.eup %5673 }
 0x73e   : > { %5675 = vrcp.f32 %v2152_v57  ;;  %v2159_v61 = vadd.f32 1.0, %v5674_v33  ;;  %v8596_v33 = vld [vmem:[#allocation37_spill] sm:$0xff]  ;;  %v8597_v57 = vld [vmem:[#allocation31_spill] sm:$0xff] }
 0x740   : > { %5677 = vrcp.f32 %v2159_v61  ;;  %v2548_v61 = vld [vmem:[#allocation11 + $0xe8] sm:$0xff] }
 0x74b   : > { %v5676_v48 = vpop.eup %5675 }
 0x74c   : > { %v2163_v23 = vmul.f32 %v5676_v48, %v2162_v40  ;;  %v2557_v48 = vld [vmem:[#allocation11 + $0x130] sm:$0xff]  ;;  %v2543_v40 = vld [vmem:[#allocation11 + $0xc0] sm:$0xff] }
 0x74d   : > { %v5678_v1 = vpop.eup %5677 }
 0x74e   : > { %v2164_v62 = vadd.f32 %v2163_v23, %v8594_v60  ;;  %v2166_v2 = vsub.f32 1.0, %v5678_v1  ;;  %v2168_v24 = vmul.f32 %v5678_v1, %v7188_v53  ;;  %v2556_v23 = vld [vmem:[#allocation11 + $0x128] sm:$0xff]  ;;  %v2547_v60 = vld [vmem:[#allocation11 + $0xe0] sm:$0xff]  ;;  %v2542_v1 = vld [vmem:[#allocation11 + $0xb8] sm:$0xff] }
 0x750   : > { %5679 = vtanh.f32 %v2164_v62  ;;  %v2541_v62 = vld [vmem:[#allocation11 + $0xb0] sm:$0xff] }
 0x75d   : > { %v5680_v3 = vpop.eup %5679 }
 0x75e   : > { %v2167_v4 = vmul.f32 %v5680_v3, %v2166_v2  ;;  %v2540_v2 = vld [vmem:[#allocation11 + $0xa8] sm:$0xff]  ;;  %v2538_v3 = vld [vmem:[#allocation11 + $0x98] sm:$0xff] }
 0x760   : > { %v7282_v49 = vadd.f32 %v2168_v24, %v2167_v4  ;;  %v2539_v4 = vld [vmem:[#allocation11 + $0xa0] sm:$0xff]  ;;  %v2537_v24 = vld [vmem:[#allocation11 + $0x90] sm:$0xff] }
 0x762   : > { %2241 = vmatmul.mubr.f32.vlgmr.msra.gmra.mxu0 %v7282_v49  ;;  %5116 = vmatmul.mubr.f32.vlgmr.msra.gmra.mxu1 %v7282_v49 }
 0x763   : > { %2346 = vmatpush1.msra.mxu0 %v7040_v7  ;;  %5119 = vmatpush3.msra.mxu1 %v7043_v8  ;;  %v2565_v7 = vld [vmem:[#allocation11 + $0x170] sm:$0xff]  ;;  %v2566_v8 = vld [vmem:[#allocation11 + $0x178] sm:$0xff] }
 0x764   : > { %2347 = vmatprep.subr.mxu0 %v7046_v9  ;;  %5120 = vmatprep.subr.mxu1 %v8557_v30 }
 0x765   : > { %2348 = vmatpush1.msra.mxu0 %v7050_v10  ;;  %5121 = vmatpush3.msra.mxu1 %v7053_v12  ;;  %v8599_v12 = vld [vmem:[#allocation48_spill] sm:$0xff] }
 0x766   : > { %2349 = vmatprep.subr.mxu0 %v7056_v36  ;;  %5122 = vmatprep.subr.mxu1 %v8557_v30 }
 0x767   : > { %2350 = vmatpush1.msra.mxu0 %v7060_v25  ;;  %5123 = vmatpush3.msra.mxu1 %v7063_v14 }
 0x768   : > { %2351 = vmatprep.subr.mxu0 %v7066_v27  ;;  %5124 = vmatprep.subr.mxu1 %v8557_v30 }
 0x769   : > { %2352 = vmatpush1.msra.mxu0 %v7070_v22  ;;  %5125 = vmatpush3.msra.mxu1 %v7073_v17  ;;  %v8600_v22 = vld [vmem:[#allocation49_spill] sm:$0xff] }
 0x76a   : > { %2353 = vmatprep.subr.mxu0 %v7076_v45  ;;  %5126 = vmatprep.subr.mxu1 %v8557_v30 }
 0x76b   : > { %2354 = vmatpush1.msra.mxu0 %v7080_v13  ;;  %5127 = vmatpush3.msra.mxu1 %v7083_v51 }
 0x76c   : > { %2355 = vmatprep.subr.mxu0 %v7086_v63  ;;  %5128 = vmatprep.subr.mxu1 %v8557_v30 }
 0x76d   : > { %2356 = vmatpush1.msra.mxu0 %v7090_v29  ;;  %5129 = vmatpush3.msra.mxu1 %v7093_v28  ;;  %v7356_v28 = vld [vmem:[%s8555_s28] ss:$0 sm:$0xff] }
 0x76e   : > { %2357 = vmatprep.subr.mxu0 %v7096_v11  ;;  %5130 = vmatprep.subr.mxu1 %v8557_v30 }
 0x76f   : > { %2358 = vmatpush1.msra.mxu0 %v7100_v5  ;;  %5131 = vmatpush3.msra.mxu1 %v7103_v26 }
 0x770   : > { %2359 = vmatprep.subr.mxu0 %v7106_v34  ;;  %5132 = vmatprep.subr.mxu1 %v8557_v30  ;;  %v8601_v34 = vld [vmem:[#allocation57_spill] sm:$0xff] }
 0x771   : > { %2360 = vmatpush1.msra.mxu0 %v7110_v32  ;;  %5133 = vmatpush3.msra.mxu1 %v7221_v35  ;;  %v2555_v35 = vld [vmem:[#allocation11 + $0x120] sm:$0xff] }
 0x772   : > { %2361 = vmatprep.subr.mxu0 %v7114_v31  ;;  %5134 = vmatprep.subr.mxu1 %v8557_v30 }
 0x773   : > { %2362 = vmatpush1.msra.mxu0 %v7118_v37  ;;  %5135 = vmatpush3.msra.mxu1 %v7227_v54  ;;  %v2553_v54 = vld [vmem:[#allocation11 + $0x110] sm:$0xff] }
 0x774   : > { %2363 = vmatprep.subr.mxu0 %v7122_v38  ;;  %5136 = vmatprep.subr.mxu1 %v8557_v30 }
 0x775   : > { %2364 = vmatpush1.msra.mxu0 %v7126_v41  ;;  %5137 = vmatpush3.msra.mxu1 %v7233_v55  ;;  %v2554_v55 = vld [vmem:[#allocation11 + $0x118] sm:$0xff] }
 0x776   : > { %2365 = vmatprep.subr.mxu0 %v7130_v15  ;;  %5138 = vmatprep.subr.mxu1 %v8557_v30 }
 0x777   : > { %2366 = vmatpush1.msra.mxu0 %v7134_v42  ;;  %5139 = vmatpush3.msra.mxu1 %v7239_v56  ;;  %v2552_v56 = vld [vmem:[#allocation11 + $0x108] sm:$0xff] }
 0x778   : > { %2367 = vmatprep.subr.mxu0 %v7138_v18  ;;  %5140 = vmatprep.subr.mxu1 %v8557_v30  ;;  %v2564_v18 = vld [vmem:[#allocation11 + $0x168] sm:$0xff] }
 0x779   : > { %2368 = vmatpush1.msra.mxu0 %v7142_v43  ;;  %5141 = vmatpush3.msra.mxu1 %v7245_v58  ;;  %v2562_v43 = vld [vmem:[#allocation11 + $0x158] sm:$0xff] }
 0x77a   : > { %2369 = vmatprep.subr.mxu0 %v7146_v19  ;;  %5142 = vmatprep.subr.mxu1 %v8557_v30  ;;  %v2563_v19 = vld [vmem:[#allocation11 + $0x160] sm:$0xff]  ;;  %v2550_v58 = vld [vmem:[#allocation11 + $0xf8] sm:$0xff] }
 0x77b   : > { %2370 = vmatpush1.msra.mxu0 %v7150_v44  ;;  %5143 = vmatpush3.msra.mxu1 %v7251_v39  ;;  %v2561_v44 = vld [vmem:[#allocation11 + $0x150] sm:$0xff]  ;;  %v2551_v39 = vld [vmem:[#allocation11 + $0x100] sm:$0xff] }
 0x77c   : > { %2371 = vmatprep.subr.mxu0 %v7154_v20  ;;  %5144 = vmatprep.subr.mxu1 %v8557_v30  ;;  %v2559_v20 = vld [vmem:[#allocation11 + $0x140] sm:$0xff] }
 0x77d   : > { %2372 = vmatpush1.msra.mxu0 %v7158_v46  ;;  %5145 = vmatpush3.msra.mxu1 %v7257_v59  ;;  %v2560_v46 = vld [vmem:[#allocation11 + $0x148] sm:$0xff]  ;;  %v2549_v59 = vld [vmem:[#allocation11 + $0xf0] sm:$0xff] }
 0x77e   : > { %2373 = vmatprep.subr.mxu0 %v7162_v21  ;;  %5146 = vmatprep.subr.mxu1 %v8557_v30  ;;  %v2558_v21 = vld [vmem:[#allocation11 + $0x138] sm:$0xff] }
 0x77f   : > { %2374 = vmatpush1.msra.mxu0 %v7166_v47  ;;  %5147 = vmatpush3.msra.mxu1 %v8595_v16  ;;  %v8602_v47 = vld [vmem:[#allocation58_spill] sm:$0xff] }
 0x780   : > { %2375 = vmatprep.subr.mxu0 %v8596_v33  ;;  %5148 = vmatprep.subr.mxu1 %v8557_v30  ;;  %v2535_v16 = vld [vmem:[#allocation11 + $0x80] sm:$0xff]  ;;  %v2536_v33 = vld [vmem:[#allocation11 + $0x88] sm:$0xff] }
 0x781   : > { %2376 = vmatpush1.msra.mxu0 %v8597_v57  ;;  %5149 = vmatpush3.msra.mxu1 %v8598_v6  ;;  %v2534_v57 = vld [vmem:[#allocation11 + $0x78] sm:$0xff]  ;;  %v2532_v6 = vld [vmem:[#allocation11 + $0x68] sm:$0xff] }
 0x782   : > { %2409 = vmatprep.mubr.f32.mxu0 %v8557_v30  ;;  %5150 = vmatprep.mubr.msk.f32.mxu1 %vm6122_vm5, %v8557_v30 }
 0x783   : > { %2584 = vmatprep.subr.mxu0 %v2565_v7  ;;  %5153 = vmatprep.subr.mxu1 %v2566_v8  ;;  %v2533_v7 = vld [vmem:[#allocation11 + $0x70] sm:$0xff] }
 0x822   : > { %v2242_v9 = vpop.f32.mrf.mxu0  ;;  %v2313_v10 = vpop.f32.mrf.mxu1 }
 0x823   : > { %v2317_v36 = vadd.f32 %v2242_v9, %v8599_v12  ;;  %v2331_v11 = vadd.f32 %v7356_v28, %v2313_v10  ;;  %v2529_v9 = vld [vmem:[#allocation11 + $0x50] sm:$0xff]  ;;  %v2530_v10 = vld [vmem:[#allocation11 + $0x58] sm:$0xff]  ;;  %v2528_v12 = vld [vmem:[#allocation11 + $0x48] sm:$0xff] }
 0x824   : > { %v5117_v25 = vpop.f32.mrf.mxu1  ;;  %v2244_v27 = vpop.f32.mrf.mxu0 }
 0x825   : > { %v4507_v14 = vmul.f32 -1.442695, %v2317_v36  ;;  %v2324_v17 = vadd.f32 %v2244_v27, %v8600_v22  ;;  %v2526_v36 = vld [vmem:[#allocation11 + $0x38] sm:$0xff]  ;;  %v2527_v25 = vld [vmem:[#allocation11 + $0x40] sm:$0xff]  ;;  %v2524_v22 = vld [vmem:[#allocation11 + $0x28] sm:$0xff] }
 0x826   : > { %v2523_v27 = vld [vmem:[#allocation11 + $0x20] sm:$0xff] }
 0x827   : > { %5681 = vpow2.f32 %v4507_v14  ;;  %v4508_v45 = vmul.f32 -1.442695, %v2324_v17  ;;  %v2525_v14 = vld [vmem:[#allocation11 + $0x30] sm:$0xff]  ;;  %v2522_v17 = vld [vmem:[#allocation11 + $0x18] sm:$0xff] }
 0x829   : > { %5683 = vpow2.f32 %v4508_v45  ;;  %v2520_v45 = vld [vmem:[#allocation11 + $0x8] sm:$0xff] }
 0x834   : > { %v5682_v13 = vpop.eup %5681 }
 0x835   : > { %v2321_v51 = vadd.f32 1.0, %v5682_v13  ;;  %v2521_v13 = vld [vmem:[#allocation11 + $0x10] sm:$0xff] }
 0x836   : > { %v5684_v63 = vpop.eup %5683 }
 0x837   : > { %5685 = vrcp.f32 %v2321_v51  ;;  %v2328_v29 = vadd.f32 1.0, %v5684_v63  ;;  %v2519_v51 = vld [vmem:[#allocation11] sm:$0xff]  ;;  %v8603_v63 = vld [vmem:[#allocation32_spill] sm:$0xff] }
 0x839   : > { %5687 = vrcp.f32 %v2328_v29  ;;  %v8604_v29 = vld [vmem:[#allocation38_spill] sm:$0xff] }
 0x844   : > { %v5686_v5 = vpop.eup %5685 }
 0x845   : > { %v2332_v26 = vmul.f32 %v5686_v5, %v2331_v11  ;;  %v8605_v11 = vld [vmem:[#allocation39_spill] sm:$0xff]  ;;  %v7388_v5 = vld [vmem:[#allocation13 + $0x170] sm:$0xff] }
 0x846   : > { %v5688_v31 = vpop.eup %5687  ;;  %8606 = vst [vmem:[#allocation53_spill] sm:$0xff] %v7388_v5 }
 0x847   : > { %v2333_v32 = vadd.f32 %v2332_v26, %v8601_v34  ;;  %v2335_v37 = vsub.f32 1.0, %v5688_v31  ;;  %v2337_v15 = vmul.f32 %v5688_v31, %v7282_v49  ;;  %v7391_v26 = vld [vmem:[#allocation13 + $0x168] sm:$0xff]  ;;  %v7394_v34 = vld [vmem:[#allocation13 + $0x158] sm:$0xff] }
 0x848   : > { %v7406_v31 = vld [vmem:[#allocation13 + $0x128] sm:$0xff] }
 0x849   : > { %5689 = vtanh.f32 %v2333_v32  ;;  %v7403_v32 = vld [vmem:[#allocation13 + $0x138] sm:$0xff] }
 0x856   : > { %v5690_v38 = vpop.eup %5689 }
 0x857   : > { %v2336_v41 = vmul.f32 %v5690_v38, %v2335_v37  ;;  %v7409_v37 = vld [vmem:[#allocation13 + $0x120] sm:$0xff]  ;;  %v7412_v38 = vld [vmem:[#allocation13 + $0x110] sm:$0xff] }
 0x859   : > { %v7361_v42 = vadd.f32 %v2337_v15, %v2336_v41  ;;  %v7415_v41 = vld [vmem:[#allocation13 + $0x108] sm:$0xff]  ;;  %v7418_v15 = vld [vmem:[#allocation13 + $0xf8] sm:$0xff] }
 0x85b   : > { %2410 = vmatmul.mubr.f32.vlgmr.msra.gmra.mxu0 %v7361_v42  ;;  %5151 = vmatmul.mubr.f32.vlgmr.msra.gmra.mxu1 %v7361_v42 }
 0x85c   : > { %2585 = vmatpush1.msra.mxu0 %v2564_v18  ;;  %5154 = vmatpush3.msra.mxu1 %v2566_v8  ;;  %v2531_v8 = vld [vmem:[#allocation11 + $0x60] sm:$0xff]  ;;  %v7421_v18 = vld [vmem:[#allocation13 + $0xf0] sm:$0xff] }
 0x85d   : > { %2586 = vmatprep.subr.mxu0 %v2562_v43  ;;  %5155 = vmatprep.subr.mxu1 %v2563_v19  ;;  %v7424_v43 = vld [vmem:[#allocation13 + $0xe0] sm:$0xff] }
 0x85e   : > { %5185 = vmatprep.mubr.f32.mxu1 %v8602_v47  ;;  %2587 = vmatpush1.msra.mxu0 %v2561_v44  ;;  %v7430_v44 = vld [vmem:[#allocation13 + $0xc8] sm:$0xff] }
 0x85f   : > { %5156 = vmatpush3.msra.mxu1 %v2563_v19  ;;  %2588 = vmatprep.subr.mxu0 %v2559_v20  ;;  %v7427_v19 = vld [vmem:[#allocation13 + $0xd8] sm:$0xff]  ;;  %v7433_v20 = vld [vmem:[#allocation13 + $0xc0] sm:$0xff] }
 0x860   : > { %5157 = vmatprep.subr.mxu1 %v2560_v46  ;;  %2589 = vmatpush1.msra.mxu0 %v2558_v21  ;;  %v7439_v21 = vld [vmem:[#allocation13 + $0xa8] sm:$0xff] }
 0x861   : > { %5158 = vmatpush3.msra.mxu1 %v2560_v46  ;;  %2590 = vmatprep.subr.mxu0 %v2556_v23  ;;  %v7436_v46 = vld [vmem:[#allocation13 + $0xb0] sm:$0xff] }
 0x862   : > { %5159 = vmatprep.subr.mxu1 %v2557_v48  ;;  %2591 = vmatpush1.msra.mxu0 %v2555_v35  ;;  %v7445_v23 = vld [vmem:[#allocation13 + $0x90] sm:$0xff]  ;;  %v7451_v35 = vld [vmem:[#allocation13 + $0x78] sm:$0xff] }
 0x863   : > { %5160 = vmatpush3.msra.mxu1 %v2557_v48  ;;  %2592 = vmatprep.subr.mxu0 %v2553_v54  ;;  %v7448_v48 = vld [vmem:[#allocation13 + $0x80] sm:$0xff]  ;;  %v7454_v54 = vld [vmem:[#allocation13 + $0x68] sm:$0xff] }
 0x864   : > { %5161 = vmatprep.subr.mxu1 %v2554_v55  ;;  %2593 = vmatpush1.msra.mxu0 %v2552_v56  ;;  %v7460_v56 = vld [vmem:[#allocation13 + $0x50] sm:$0xff] }
 0x865   : > { %5162 = vmatpush3.msra.mxu1 %v2554_v55  ;;  %2594 = vmatprep.subr.mxu0 %v2550_v58  ;;  %v7457_v55 = vld [vmem:[#allocation13 + $0x60] sm:$0xff]  ;;  %v7463_v58 = vld [vmem:[#allocation13 + $0x48] sm:$0xff] }
 0x866   : > { %5163 = vmatprep.subr.mxu1 %v2551_v39  ;;  %2595 = vmatpush1.msra.mxu0 %v2549_v59  ;;  %v7469_v59 = vld [vmem:[#allocation13 + $0x30] sm:$0xff] }
 0x867   : > { %5164 = vmatpush3.msra.mxu1 %v2551_v39  ;;  %2596 = vmatprep.subr.mxu0 %v2547_v60  ;;  %v7466_v39 = vld [vmem:[#allocation13 + $0x38] sm:$0xff]  ;;  %v7472_v60 = vld [vmem:[#allocation13 + $0x20] sm:$0xff] }
 0x868   : > { %5165 = vmatprep.subr.mxu1 %v2548_v61  ;;  %2597 = vmatpush1.msra.mxu0 %v2546_v0  ;;  %v7478_v0 = vld [vmem:[#allocation13 + $0x8] sm:$0xff] }
 0x869   : > { %5166 = vmatpush3.msra.mxu1 %v2548_v61  ;;  %2598 = vmatprep.subr.mxu0 %v2544_v50  ;;  %v7475_v61 = vld [vmem:[#allocation13 + $0x18] sm:$0xff]  ;;  %8608 = vst [vmem:[#allocation33_spill] sm:$0xff] %v7478_v0  ;;  %v7480_v50 = vld [vmem:[#allocation13] sm:$0xff] }
 0x86a   : > { %5167 = vmatprep.subr.mxu1 %v2545_v52  ;;  %2599 = vmatpush1.msra.mxu0 %v2543_v40  ;;  %8607 = vst [vmem:[#allocation35_spill] sm:$0xff] %v7475_v61  ;;  %8609 = vst [vmem:[#allocation34_spill] sm:$0xff] %v7480_v50  ;;  %v7485_v40 = vld [vmem:[#allocation13 + $0x160] sm:$0xff] }
 0x86b   : > { %5168 = vmatpush3.msra.mxu1 %v2545_v52  ;;  %2600 = vmatprep.subr.mxu0 %v2541_v62  ;;  %v7483_v52 = vld [vmem:[#allocation13 + $0x178] sm:$0xff]  ;;  %v7490_v62 = vld [vmem:[#allocation13 + $0x148] sm:$0xff] }
 0x86c   : > { %5169 = vmatprep.subr.mxu1 %v2542_v1  ;;  %2601 = vmatpush1.msra.mxu0 %v2540_v2  ;;  %v7499_v2 = vld [vmem:[#allocation13 + $0x118] sm:$0xff] }
 0x86d   : > { %5170 = vmatpush3.msra.mxu1 %v2542_v1  ;;  %2602 = vmatprep.subr.mxu0 %v2538_v3  ;;  %v7495_v1 = vld [vmem:[#allocation13 + $0x130] sm:$0xff]  ;;  %v7503_v3 = vld [vmem:[#allocation13 + $0x100] sm:$0xff] }
 0x86e   : > { %5171 = vmatprep.subr.mxu1 %v2539_v4  ;;  %2603 = vmatpush1.msra.mxu0 %v2537_v24  ;;  %v7511_v24 = vld [vmem:[#allocation13 + $0xd0] sm:$0xff] }
 0x86f   : > { %5172 = vmatpush3.msra.mxu1 %v2539_v4  ;;  %2604 = vmatprep.subr.mxu0 %v2535_v16  ;;  %v7507_v4 = vld [vmem:[#allocation13 + $0xe8] sm:$0xff]  ;;  %v7515_v16 = vld [vmem:[#allocation13 + $0xb8] sm:$0xff] }
 0x870   : > { %5173 = vmatprep.subr.mxu1 %v2536_v33  ;;  %2605 = vmatpush1.msra.mxu0 %v2534_v57  ;;  %v7523_v57 = vld [vmem:[#allocation13 + $0x88] sm:$0xff] }
 0x871   : > { %5174 = vmatpush3.msra.mxu1 %v2536_v33  ;;  %2606 = vmatprep.subr.mxu0 %v2532_v6  ;;  %v7519_v33 = vld [vmem:[#allocation13 + $0xa0] sm:$0xff]  ;;  %v7527_v6 = vld [vmem:[#allocation13 + $0x70] sm:$0xff] }
 0x872   : > { %5175 = vmatprep.subr.mxu1 %v2533_v7  ;;  %2607 = vmatpush1.msra.mxu0 %v2531_v8  ;;  %v7535_v8 = vld [vmem:[#allocation13 + $0x40] sm:$0xff] }
 0x873   : > { %5176 = vmatpush3.msra.mxu1 %v2533_v7  ;;  %2608 = vmatprep.subr.mxu0 %v2529_v9  ;;  %v7531_v7 = vld [vmem:[#allocation13 + $0x58] sm:$0xff]  ;;  %v7539_v9 = vld [vmem:[#allocation13 + $0x28] sm:$0xff] }
 0x874   : > { %5177 = vmatprep.subr.mxu1 %v2530_v10  ;;  %2609 = vmatpush1.msra.mxu0 %v2528_v12  ;;  %8610 = vst [vmem:[#allocation36_spill] sm:$0xff] %v7539_v9 }
 0x875   : > { %5178 = vmatpush3.msra.mxu1 %v2530_v10  ;;  %2610 = vmatprep.subr.mxu0 %v2526_v36  ;;  %v7543_v10 = vld [vmem:[#allocation13 + $0x10] sm:$0xff] }
 0x876   : > { %5179 = vmatprep.subr.mxu1 %v2527_v25  ;;  %2611 = vmatpush1.msra.mxu0 %v2525_v14  ;;  %8611 = vst [vmem:[#allocation42_spill] sm:$0xff] %v7543_v10 }
 0x877   : > { %5180 = vmatpush3.msra.mxu1 %v2527_v25  ;;  %2612 = vmatprep.subr.mxu0 %v2523_v27  ;;  %v8612_v25 = vld [vmem:[#allocation50_spill] sm:$0xff] }
 0x878   : > { %5181 = vmatprep.subr.mxu1 %v2524_v22  ;;  %2613 = vmatpush1.msra.mxu0 %v2522_v17 }
 0x879   : > { %5182 = vmatpush3.msra.mxu1 %v2524_v22  ;;  %2614 = vmatprep.subr.mxu0 %v2520_v45  ;;  %v8613_v45 = vld [vmem:[#allocation51_spill] sm:$0xff] }
 0x87a   : > { %5183 = vmatprep.subr.mxu1 %v2521_v13  ;;  %2615 = vmatpush1.msra.mxu0 %v2519_v51 }
 0x87b   : > { %2648 = vmatprep.mubr.f32.mxu0 %v8557_v30  ;;  %5184 = vmatpush3.msra.mxu1 %v2521_v13 }
 0x87c   : > { %2649 = vmatmul.mubr.f32.vlgmr.msra.gmra.mxu0 %v8602_v47  ;;  %5186 = vmatmul.mubr.f32.vlgmr.msra.gmra.mxu1 %v8603_v63  ;;  %v7442_v47 = vld [vmem:[#allocation13 + $0x98] sm:$0xff] }
 0x87d   : > { %5188 = vmatprep.mubr.f32.mxu1 %v8604_v29  ;;  %2654 = vmatprep.mubr.f32.mxu0 %v8557_v30 }
 0x87e   : > { %5197 = vmatprep.subr.mxu1 %v8557_v30  ;;  %2886 = vmatprep.subr.mxu0 %v7388_v5 }
 0x87f   : > { %2887 = vmatpush1.msra.mxu0 %v7391_v26  ;;  %5198 = vmatpush3.msra.mxu1 %v7483_v52 }
 0x880   : > { %2655 = vmatmul.mubr.f32.gmra.mxu0 %v8603_v63  ;;  %5189 = vmatmul.mubr.f32.gmra.mxu1 %v8605_v11 }
 0x881   : > { %5191 = vmatprep.mubr.f32.mxu1 %v7188_v53  ;;  %2660 = vmatprep.mubr.f32.mxu0 %v8557_v30 }
 0x882   : > { %2888 = vmatprep.subr.mxu0 %v7394_v34  ;;  %5199 = vmatprep.subr.mxu1 %v8557_v30 }
 0x883   : > { %5200 = vmatpush3.msra.mxu1 %v7485_v40 }
 0x884   : > { %2661 = vmatmul.mubr.f32.gmra.mxu0 %v8604_v29  ;;  %5192 = vmatmul.mubr.f32.gmra.mxu1 %v7282_v49 }
 0x885   : > { %5194 = vmatprep.mubr.f32.mxu1 %v7361_v42  ;;  %2666 = vmatprep.mubr.f32.mxu0 %v8557_v30 }
 0x886   : > { %5201 = vmatprep.subr.mxu1 %v8557_v30 }
 0x887   : > { %5202 = vmatpush3.msra.mxu1 %v7490_v62 }
 0x888   : > { %2667 = vmatmul.mubr.f32.gmra.mxu0 %v8605_v11  ;;  %5203 = vmatprep.subr.mxu1 %v8557_v30 }
 0x889   : > { %2672 = vmatprep.mubr.f32.mxu0 %v8557_v30  ;;  %5204 = vmatpush3.msra.mxu1 %v7495_v1 }
 0x88a   : > { %5205 = vmatprep.subr.mxu1 %v8557_v30 }
 0x88b   : > { %5206 = vmatpush3.msra.mxu1 %v7499_v2 }
 0x88c   : > { %2673 = vmatmul.mubr.f32.gmra.mxu0 %v7188_v53  ;;  %v7397_v53 = vld [vmem:[#allocation13 + $0x150] sm:$0xff]  ;;  %5207 = vmatprep.subr.mxu1 %v8557_v30 }
 0x88d   : > { %2678 = vmatprep.mubr.f32.mxu0 %v8557_v30  ;;  %2889 = vmatpush1.msra.mxu0 %v7397_v53 }
 0x88e   : > { %5208 = vmatpush3.msra.mxu1 %v7503_v3 }
 0x88f   : > { %5209 = vmatprep.subr.mxu1 %v8557_v30 }
 0x890   : > { %2679 = vmatmul.mubr.f32.gmra.mxu0 %v7282_v49  ;;  %v7400_v49 = vld [vmem:[#allocation13 + $0x140] sm:$0xff]  ;;  %5210 = vmatpush3.msra.mxu1 %v7507_v4 }
 0x891   : > { %2684 = vmatprep.mubr.f32.mxu0 %v8557_v30  ;;  %2890 = vmatprep.subr.mxu0 %v7400_v49 }
 0x892   : > { %2891 = vmatpush1.msra.mxu0 %v7403_v32  ;;  %5211 = vmatprep.subr.mxu1 %v8557_v30 }
 0x893   : > { %2892 = vmatprep.subr.mxu0 %v7406_v31  ;;  %5212 = vmatpush3.msra.mxu1 %v7511_v24 }
 0x894   : > { %2685 = vmatmul.mubr.f32.gmra.mxu0 %v7361_v42  ;;  %5213 = vmatprep.subr.mxu1 %v8557_v30 }
 0x895   : > { %2690 = vmatprep.mubr.f32.mxu0 %v8557_v30  ;;  %2893 = vmatpush1.msra.mxu0 %v7409_v37 }
 0x896   : > { %2894 = vmatprep.subr.mxu0 %v7412_v38  ;;  %5214 = vmatpush3.msra.mxu1 %v7515_v16 }
 0x897   : > { %2895 = vmatpush1.msra.mxu0 %v7415_v41  ;;  %5215 = vmatprep.subr.mxu1 %v8557_v30 }
 0x898   : > { %2896 = vmatprep.subr.mxu0 %v7418_v15  ;;  %5216 = vmatpush3.msra.mxu1 %v7519_v33 }
 0x899   : > { %2897 = vmatpush1.msra.mxu0 %v7421_v18  ;;  %5217 = vmatprep.subr.mxu1 %v8557_v30 }
 0x89a   : > { %2898 = vmatprep.subr.mxu0 %v7424_v43  ;;  %5218 = vmatpush3.msra.mxu1 %v7523_v57 }
 0x89b   : > { %2899 = vmatpush1.msra.mxu0 %v7427_v19  ;;  %5219 = vmatprep.subr.mxu1 %v8557_v30 }
 0x89c   : > { %2900 = vmatprep.subr.mxu0 %v7430_v44  ;;  %5220 = vmatpush3.msra.mxu1 %v7527_v6 }
 0x89d   : > { %2901 = vmatpush1.msra.mxu0 %v7433_v20  ;;  %5221 = vmatprep.subr.mxu1 %v8557_v30 }
 0x89e   : > { %2902 = vmatprep.subr.mxu0 %v7436_v46  ;;  %5222 = vmatpush3.msra.mxu1 %v7531_v7 }
 0x89f   : > { %2903 = vmatpush1.msra.mxu0 %v7439_v21  ;;  %5223 = vmatprep.subr.mxu1 %v8557_v30 }
 0x8a0   : > { %2904 = vmatprep.subr.mxu0 %v7442_v47  ;;  %5224 = vmatpush3.msra.mxu1 %v7535_v8 }
 0x8a1   : > { %2905 = vmatpush1.msra.mxu0 %v7445_v23  ;;  %5225 = vmatprep.subr.mxu1 %v8557_v30 }
 0x8a2   : > { %2906 = vmatprep.subr.mxu0 %v7448_v48  ;;  %5226 = vmatpush3.msra.mxu1 %v7539_v9  ;;  %v8614_v9 = vld [vmem:[#allocation56_spill] sm:$0xff] }
 0x8a3   : > { %2907 = vmatpush1.msra.mxu0 %v7451_v35  ;;  %5227 = vmatprep.subr.mxu1 %v8557_v30 }
 0x8a4   : > { %2908 = vmatprep.subr.mxu0 %v7454_v54  ;;  %5228 = vmatpush3.msra.mxu1 %v7543_v10 }
 0x8a5   : > { %2909 = vmatpush1.msra.mxu0 %v7457_v55  ;;  %5232 = vmatprep.subr.mxu1 %v8557_v30 }
 0x8a6   : > { %2910 = vmatprep.subr.mxu0 %v7460_v56 }
 0x8a7   : > { %2911 = vmatpush1.msra.mxu0 %v7463_v58 }
 0x8a8   : > { %2912 = vmatprep.subr.mxu0 %v7466_v39 }
 0x8a9   : > { %2913 = vmatpush1.msra.mxu0 %v7469_v59 }
 0x8aa   : > { %2914 = vmatprep.subr.mxu0 %v7472_v60 }
 0x8ab   : > { %2915 = vmatpush1.msra.mxu0 %v7475_v61 }
 0x8ac   : > { %2916 = vmatprep.subr.mxu0 %v7478_v0 }
 0x8ad   : > { %2917 = vmatpush1.msra.mxu0 %v7480_v50 }
 0x8ae   : > { %3053 = vmatprep.subr.mxu0 %v7388_v5 }
 0x91b   : > { %v2411_v12 = vpop.f32.mrf.mxu0  ;;  %v2482_v36 = vpop.f32.mrf.mxu1 }
 0x91c   : > { %v2486_v14 = vadd.f32 %v2411_v12, %v8612_v25  ;;  %v2500_v10 = vadd.f32 %v7356_v28, %v2482_v36  ;;  %v8615_v28 = vld [vmem:[#allocation36_spill] sm:$0xff] }
 0x91d   : > { %v5152_v27 = vpop.f32.mrf.mxu1  ;;  %v2413_v17 = vpop.f32.mrf.mxu0 }
 0x91e   : > { %v4509_v22 = vmul.f32 -1.442695, %v2486_v14  ;;  %v2493_v13 = vadd.f32 %v2413_v17, %v8613_v45 }
 0x920   : > { %5691 = vpow2.f32 %v4509_v22  ;;  %v4510_v51 = vmul.f32 -1.442695, %v2493_v13  ;;  %v7555_v13 = vld [vmem:[#allocation4 + $0x8] sm:$0xff] }
 0x922   : > { %5693 = vpow2.f32 %v4510_v51 }
 0x92d   : > { %v5692_v63 = vpop.eup %5691 }
 0x92e   : > { %v2490_v29 = vadd.f32 1.0, %v5692_v63 }
 0x92f   : > { %v5694_v11 = vpop.eup %5693 }
 0x930   : > { %5695 = vrcp.f32 %v2490_v29  ;;  %v2497_v5 = vadd.f32 1.0, %v5694_v11 }
 0x932   : > { %5697 = vrcp.f32 %v2497_v5  ;;  %v8617_v5 = vld [vmem:[#allocation34_spill] sm:$0xff] }
 0x93d   : > { %v5696_v50 = vpop.eup %5695 }
 0x93e   : > { %v2501_v0 = vmul.f32 %v5696_v50, %v2500_v10  ;;  %v8619_v50 = vld [vmem:[#allocation53_spill] sm:$0xff] }
 0x93f   : > { %v5698_v25 = vpop.eup %5697 }
 0x940   : > { %v2502_v12 = vadd.f32 %v2501_v0, %v8614_v9  ;;  %v2504_v14 = vsub.f32 1.0, %v5698_v25  ;;  %v2506_v17 = vmul.f32 %v5698_v25, %v7361_v42  ;;  %v8616_v42 = vld [vmem:[#allocation33_spill] sm:$0xff]  ;;  %v8618_v0 = vld [vmem:[#allocation42_spill] sm:$0xff]  ;;  %v2650_v9 = vpop.f32.mrf.mxu0  ;;  %v7640_v25 = vpop.f32.mrf.mxu1 }
 0x941   : > { %8626 = vst [vmem:[#allocation47_spill] sm:$0xff] %v7640_v25 }
 0x942   : > { %5699 = vtanh.f32 %v2502_v12  ;;  %v2652_v10 = vpop.f32.mrf.mxu0 }
 0x944   : > { %v7628_v36 = vpop.f32.mrf.mxu0 }
 0x945   : > { %8620 = vst [vmem:[#allocation43_spill] sm:$0xff] %v7628_v36 }
 0x946   : > { %v7630_v51 = vpop.f32.mrf.mxu0 }
 0x947   : > { %8621 = vst [vmem:[#allocation52_spill] sm:$0xff] %v7630_v51 }
 0x948   : > { %v7632_v63 = vpop.f32.mrf.mxu0 }
 0x949   : > { %8622 = vst [vmem:[#allocation44_spill] sm:$0xff] %v7632_v63 }
 0x94a   : > { %v7634_v29 = vpop.f32.mrf.mxu0 }
 0x94b   : > { %8623 = vst [vmem:[#allocation45_spill] sm:$0xff] %v7634_v29 }
 0x94c   : > { %v7636_v11 = vpop.f32.mrf.mxu0 }
 0x94d   : > { %8624 = vst [vmem:[#allocation55_spill] sm:$0xff] %v7636_v11 }
 0x94e   : > { %v7638_v12 = vpop.f32.mrf.mxu0 }
 0x94f   : > { %v5700_v27 = vpop.eup %5699  ;;  %8625 = vst [vmem:[#allocation46_spill] sm:$0xff] %v7638_v12  ;;  %v2567_v12 = vld [vmem:[%s8635_s27] sm:$0x7] }
 0x950   : > { %v2505_v22 = vmul.f32 %v5700_v27, %v2504_v14  ;;  %v7642_v14 = vpop.f32.mrf.mxu0  ;;  %v2763_v27 = vpop.f32.mrf.mxu1 }
 0x951   : > { %8627 = vst [vmem:[#allocation54_spill] sm:$0xff] %v7642_v14 }
 0x952   : > { %v2507_v45 = vadd.f32 %v2506_v17, %v2505_v22  ;;  %v7644_v22 = vpop.f32.mrf.mxu0  ;;  %v7646_v17 = vpop.f32.mrf.mxu1 }
 0x953   : > { %8628 = vst [vmem:[#allocation40_spill] sm:$0xff] %v7644_v22  ;;  %8629 = vst [vmem:[#allocation37_spill] sm:$0xff] %v7646_v17  ;;  %v8638_v22 = vld [vmem:[#allocation30_spill] sm:$0xff] }
 0x954   : > { %2510 = vst [vmem:[#allocation4] sm:$0xff] %v2507_v45  ;;  %2691 = vmatmul.mubr.f32.gmra.mxu0 %v2507_v45  ;;  %5195 = vmatmul.mubr.f32.gmra.mxu1 %v2507_v45  ;;  %v7648_v45 = vpop.f32.mrf.mxu0  ;;  %v7650_v51 = vpop.f32.mrf.mxu1  ;;  %v8639_v17 = vsub.s32 0, %v8638_v22 }
 0x955   : > { %2950 = vmatprep.mubr.f32.mxu0 %v8557_v30  ;;  %5229 = vmatprep.mubr.msk.f32.mxu1 %vm6122_vm5, %v8557_v30  ;;  %8630 = vst [vmem:[#allocation31_spill] sm:$0xff] %v7648_v45  ;;  %8631 = vst [vmem:[#allocation41_spill] sm:$0xff] %v7650_v51 }
 0x956   : > { %v7652_v63 = vpop.f32.mrf.mxu0  ;;  %v7654_v29 = vpop.f32.mrf.mxu1  ;;  %v7667_v36 = vrot.slane %v2567_v12, %v8639_v17 }
 0x957   : > { %8632 = vst [vmem:[#allocation48_spill] sm:$0xff] %v7652_v63  ;;  %8633 = vst [vmem:[#allocation49_spill] sm:$0xff] %v7654_v29 }
 0x958   : > { %2951 = vmatmul.mubr.f32.vlgmr.msra.gmra.mxu0 %v7555_v13  ;;  %5230 = vmatmul.mubr.f32.vlgmr.msra.gmra.mxu1 %v7555_v13  ;;  %v7656_v11 = vpop.f32.mrf.mxu0  ;;  %v7661_v14 = vpop.f32.mrf.mxu1  ;;  %8640 = vst [vmem:[#allocation38_spill] sm:$0xff] %v7667_v36 }
 0x959   : > { %3054 = vmatpush1.msra.mxu0 %v7391_v26  ;;  %5233 = vmatpush3.msra.mxu1 %v7483_v52  ;;  %8634 = vst [vmem:[#allocation57_spill] sm:$0xff] %v7656_v11  ;;  %8636 = vst [vmem:[#allocation58_spill] sm:$0xff] %v7661_v14  ;;  %v2651_v11 = vadd.f32 %v2650_v9, %v7667_v36  ;;  %v8645_v14 = vsub.s32 1, %v8638_v22  ;;  %v7686_v36 = vld [vmem:[%s8646_s24] ss:$0 sm:$0xff] }
 0x95a   : > { %3055 = vmatprep.subr.mxu0 %v7394_v34  ;;  %5234 = vmatprep.subr.mxu1 %v8557_v30  ;;  %v7663_v25 = vpop.f32.mrf.mxu0 }
 0x95b   : > { %3056 = vmatpush1.msra.mxu0 %v7397_v53  ;;  %5235 = vmatpush3.msra.mxu1 %v7485_v40  ;;  %8637 = vst [vmem:[#allocation32_spill] sm:$0xff] %v7663_v25 }
 0x95c   : > { %3057 = vmatprep.subr.mxu0 %v7400_v49  ;;  %5236 = vmatprep.subr.mxu1 %v8557_v30 }
 0x95d   : > { %3058 = vmatpush1.msra.mxu0 %v7403_v32  ;;  %5237 = vmatpush3.msra.mxu1 %v7490_v62 }
 0x95e   : > { %3059 = vmatprep.subr.mxu0 %v7406_v31  ;;  %5238 = vmatprep.subr.mxu1 %v8557_v30 }
 0x95f   : > { %3060 = vmatpush1.msra.mxu0 %v7409_v37  ;;  %5239 = vmatpush3.msra.mxu1 %v7495_v1 }
 0x960   : > { %3061 = vmatprep.subr.mxu0 %v7412_v38  ;;  %5240 = vmatprep.subr.mxu1 %v8557_v30 }
 0x961   : > { %3062 = vmatpush1.msra.mxu0 %v7415_v41  ;;  %5241 = vmatpush3.msra.mxu1 %v7499_v2 }
 0x962   : > { %3063 = vmatprep.subr.mxu0 %v7418_v15  ;;  %5242 = vmatprep.subr.mxu1 %v8557_v30 }
 0x963   : > { %3064 = vmatpush1.msra.mxu0 %v7421_v18  ;;  %5243 = vmatpush3.msra.mxu1 %v7503_v3 }
 0x964   : > { %3065 = vmatprep.subr.mxu0 %v7424_v43  ;;  %5244 = vmatprep.subr.mxu1 %v8557_v30 }
 0x965   : > { %3066 = vmatpush1.msra.mxu0 %v7427_v19  ;;  %5245 = vmatpush3.msra.mxu1 %v7507_v4 }
 0x966   : > { %3067 = vmatprep.subr.mxu0 %v7430_v44  ;;  %5246 = vmatprep.subr.mxu1 %v8557_v30 }
 0x967   : > { %3068 = vmatpush1.msra.mxu0 %v7433_v20  ;;  %5247 = vmatpush3.msra.mxu1 %v7511_v24 }
 0x968   : > { %3069 = vmatprep.subr.mxu0 %v7436_v46  ;;  %5248 = vmatprep.subr.mxu1 %v8557_v30 }
 0x969   : > { %3070 = vmatpush1.msra.mxu0 %v7439_v21  ;;  %5249 = vmatpush3.msra.mxu1 %v7515_v16 }
 0x96a   : > { %3071 = vmatprep.subr.mxu0 %v7442_v47  ;;  %5250 = vmatprep.subr.mxu1 %v8557_v30 }
 0x96b   : > { %3072 = vmatpush1.msra.mxu0 %v7445_v23  ;;  %5251 = vmatpush3.msra.mxu1 %v7519_v33 }
 0x96c   : > { %3073 = vmatprep.subr.mxu0 %v7448_v48  ;;  %5252 = vmatprep.subr.mxu1 %v8557_v30 }
 0x96d   : > { %3074 = vmatpush1.msra.mxu0 %v7451_v35  ;;  %5253 = vmatpush3.msra.mxu1 %v7523_v57 }
 0x96e   : > { %3075 = vmatprep.subr.mxu0 %v7454_v54  ;;  %5254 = vmatprep.subr.mxu1 %v8557_v30 }
 0x96f   : > { %3076 = vmatpush1.msra.mxu0 %v7457_v55  ;;  %5255 = vmatpush3.msra.mxu1 %v7527_v6 }
 0x970   : > { %3077 = vmatprep.subr.mxu0 %v7460_v56  ;;  %5256 = vmatprep.subr.mxu1 %v8557_v30 }
 0x971   : > { %3078 = vmatpush1.msra.mxu0 %v7463_v58  ;;  %5257 = vmatpush3.msra.mxu1 %v7531_v7 }
 0x972   : > { %3079 = vmatprep.subr.mxu0 %v7466_v39  ;;  %5258 = vmatprep.subr.mxu1 %v8557_v30 }
 0x973   : > { %3080 = vmatpush1.msra.mxu0 %v7469_v59  ;;  %5259 = vmatpush3.msra.mxu1 %v7535_v8 }
 0x974   : > { %3081 = vmatprep.subr.mxu0 %v7472_v60  ;;  %5260 = vmatprep.subr.mxu1 %v8557_v30 }
 0x975   : > { %3082 = vmatpush1.msra.mxu0 %v7475_v61  ;;  %5261 = vmatpush3.msra.mxu1 %v8615_v28 }
 0x976   : > { %3083 = vmatprep.subr.mxu0 %v8616_v42  ;;  %5262 = vmatprep.subr.mxu1 %v8557_v30 }
 0x977   : > { %3084 = vmatpush1.msra.mxu0 %v8617_v5  ;;  %3117 = vmatprep.mubr.f32.mxu0 %v8557_v30  ;;  %v7680_v5 = vrot.slane %v2567_v12, %v8645_v14 }
 0x978   : > { %5263 = vmatpush3.msra.mxu1 %v8618_v0  ;;  %5264 = vmatprep.mubr.msk.f32.mxu1 %vm6122_vm5, %v8557_v30 }
 0x979   : > { %3221 = vmatprep.subr.mxu0 %v8619_v50  ;;  %5267 = vmatprep.subr.mxu1 %v8557_v30 }
 0xa14   : > { %v7669_v45 = vpop.f32.mrf.mxu0  ;;  %v7671_v51 = vpop.f32.mrf.mxu1 }
 0xa15   : > { %8641 = vst [vmem:[#allocation39_spill] sm:$0xff] %v7669_v45  ;;  %8642 = vst [vmem:[#allocation50_spill] sm:$0xff] %v7671_v51  ;;  %v2653_v45 = vadd.f32 %v2652_v10, %v7680_v5 }
 0xa16   : > { %v7673_v63 = vpop.f32.mrf.mxu0  ;;  %v7675_v29 = vpop.f32.mrf.mxu1 }
 0xa17   : > { %8643 = vst [vmem:[#allocation51_spill] sm:$0xff] %v7673_v63  ;;  %8644 = vst [vmem:[#allocation56_spill] sm:$0xff] %v7675_v29 }
 0xa18   : > { %v2952_v50 = vpop.f32.mrf.mxu0  ;;  %v3023_v0 = vpop.f32.mrf.mxu1 }
 0xa19   : > { %v3027_v25 = vadd.f32 %v2952_v50, %v2651_v11  ;;  %v8647_v11 = vsub.s32 2, %v8638_v22  ;;  %v8652_v22 = vld [vmem:[#allocation42_spill] sm:$0xff] }
 0xa1a   : > { %v5231_v42 = vpop.f32.mrf.mxu1  ;;  %v2954_v28 = vpop.f32.mrf.mxu0 }
 0xa1b   : > { %v4512_v17 = vmul.f32 -1.442695, %v3027_v25  ;;  %v3034_v51 = vadd.f32 %v2954_v28, %v2653_v45  ;;  %v3041_v42 = vadd.f32 %v7686_v36, %v3023_v0  ;;  %v7691_v10 = vrot.slane %v2567_v12, %v8647_v11  ;;  %v8649_v0 = vld [vmem:[#allocation36_spill] sm:$0xff]  ;;  %v8650_v12 = vld [vmem:[#allocation33_spill] sm:$0xff]  ;;  %v8655_v11 = vld [vmem:[#allocation43_spill] sm:$0xff] }
 0xa1d   : > { %5701 = vpow2.f32 %v4512_v17  ;;  %v4513_v61 = vmul.f32 -1.442695, %v3034_v51 }
 0xa1f   : > { %5703 = vpow2.f32 %v4513_v61  ;;  %v2764_v61 = vadd.f32 %v2763_v27, %v7691_v10  ;;  %v8651_v27 = vld [vmem:[#allocation34_spill] sm:$0xff] }
 0xa2a   : > { %v5702_v63 = vpop.eup %5701 }
 0xa2b   : > { %v3031_v29 = vadd.f32 1.0, %v5702_v63 }
 0xa2c   : > { %v5704_v9 = vpop.eup %5703 }
 0xa2d   : > { %5705 = vrcp.f32 %v3031_v29  ;;  %v3038_v50 = vadd.f32 1.0, %v5704_v9 }
 0xa2f   : > { %5707 = vrcp.f32 %v3038_v50  ;;  %v8653_v50 = vld [vmem:[#allocation53_spill] sm:$0xff] }
 0xa3a   : > { %v5706_v28 = vpop.eup %5705 }
 0xa3b   : > { %v3042_v51 = vmul.f32 %v5706_v28, %v3041_v42  ;;  %v8654_v42 = vld [vmem:[#allocation38_spill] sm:$0xff] }
 0xa3c   : > { %v5708_v29 = vpop.eup %5707  ;;  %v2657_v28 = vadd.f32 %v8655_v11, %v8654_v42 }
 0xa3d   : > { %v3043_v63 = vadd.f32 %v3042_v51, %v2764_v61  ;;  %v3045_v25 = vsub.f32 1.0, %v5708_v29  ;;  %v3047_v17 = vmul.f32 %v5708_v29, %v7555_v13  ;;  %v8648_v13 = vld [vmem:[#allocation35_spill] sm:$0xff] }
 0xa3f   : > { %5709 = vtanh.f32 %v3043_v63 }
 0xa4c   : > { %v5710_v14 = vpop.eup %5709 }
 0xa4d   : > { %v3046_v45 = vmul.f32 %v5710_v14, %v3045_v25 }
 0xa4f   : > { %v7695_v9 = vadd.f32 %v3047_v17, %v3046_v45  ;;  %v8656_v45 = vld [vmem:[#allocation52_spill] sm:$0xff] }
 0xa50   : > { %v2659_v17 = vadd.f32 %v8656_v45, %v7680_v5  ;;  %v8663_v45 = vld [vmem:[#allocation53_spill] sm:$0xff] }
 0xa51   : > { %3049 = vst [vmem:[%s6426_s13] sm:$0xff] %v7695_v9  ;;  %3118 = vmatmul.mubr.f32.vlgmr.msra.gmra.mxu0 %v7695_v9  ;;  %5265 = vmatmul.mubr.f32.vlgmr.msra.gmra.mxu1 %v7695_v9 }
 0xa52   : > { %3222 = vmatpush1.msra.mxu0 %v7391_v26  ;;  %5268 = vmatpush3.msra.mxu1 %v7483_v52 }
 0xa53   : > { %3223 = vmatprep.subr.mxu0 %v7394_v34  ;;  %5269 = vmatprep.subr.mxu1 %v8557_v30 }
 0xa54   : > { %3224 = vmatpush1.msra.mxu0 %v7397_v53  ;;  %5270 = vmatpush3.msra.mxu1 %v7485_v40 }
 0xa55   : > { %3225 = vmatprep.subr.mxu0 %v7400_v49  ;;  %5271 = vmatprep.subr.mxu1 %v8557_v30 }
 0xa56   : > { %3226 = vmatpush1.msra.mxu0 %v7403_v32  ;;  %5272 = vmatpush3.msra.mxu1 %v7490_v62 }
 0xa57   : > { %3227 = vmatprep.subr.mxu0 %v7406_v31  ;;  %5273 = vmatprep.subr.mxu1 %v8557_v30 }
 0xa58   : > { %3228 = vmatpush1.msra.mxu0 %v7409_v37  ;;  %5274 = vmatpush3.msra.mxu1 %v7495_v1 }
 0xa59   : > { %3229 = vmatprep.subr.mxu0 %v7412_v38  ;;  %5275 = vmatprep.subr.mxu1 %v8557_v30 }
 0xa5a   : > { %3230 = vmatpush1.msra.mxu0 %v7415_v41  ;;  %5276 = vmatpush3.msra.mxu1 %v7499_v2 }
 0xa5b   : > { %3231 = vmatprep.subr.mxu0 %v7418_v15  ;;  %5277 = vmatprep.subr.mxu1 %v8557_v30 }
 0xa5c   : > { %3232 = vmatpush1.msra.mxu0 %v7421_v18  ;;  %5278 = vmatpush3.msra.mxu1 %v7503_v3 }
 0xa5d   : > { %3233 = vmatprep.subr.mxu0 %v7424_v43  ;;  %5279 = vmatprep.subr.mxu1 %v8557_v30 }
 0xa5e   : > { %3234 = vmatpush1.msra.mxu0 %v7427_v19  ;;  %5280 = vmatpush3.msra.mxu1 %v7507_v4 }
 0xa5f   : > { %3235 = vmatprep.subr.mxu0 %v7430_v44  ;;  %5281 = vmatprep.subr.mxu1 %v8557_v30 }
 0xa60   : > { %3236 = vmatpush1.msra.mxu0 %v7433_v20  ;;  %5282 = vmatpush3.msra.mxu1 %v7511_v24 }
 0xa61   : > { %3237 = vmatprep.subr.mxu0 %v7436_v46  ;;  %5283 = vmatprep.subr.mxu1 %v8557_v30 }
 0xa62   : > { %3238 = vmatpush1.msra.mxu0 %v7439_v21  ;;  %5284 = vmatpush3.msra.mxu1 %v7515_v16 }
 0xa63   : > { %3239 = vmatprep.subr.mxu0 %v7442_v47  ;;  %5285 = vmatprep.subr.mxu1 %v8557_v30 }
 0xa64   : > { %3240 = vmatpush1.msra.mxu0 %v7445_v23  ;;  %5286 = vmatpush3.msra.mxu1 %v7519_v33 }
 0xa65   : > { %3241 = vmatprep.subr.mxu0 %v7448_v48  ;;  %5287 = vmatprep.subr.mxu1 %v8557_v30 }
 0xa66   : > { %3242 = vmatpush1.msra.mxu0 %v7451_v35  ;;  %5288 = vmatpush3.msra.mxu1 %v7523_v57 }
 0xa67   : > { %3243 = vmatprep.subr.mxu0 %v7454_v54  ;;  %5289 = vmatprep.subr.mxu1 %v8557_v30 }
 0xa68   : > { %3244 = vmatpush1.msra.mxu0 %v7457_v55  ;;  %5290 = vmatpush3.msra.mxu1 %v7527_v6 }
 0xa69   : > { %3245 = vmatprep.subr.mxu0 %v7460_v56  ;;  %5291 = vmatprep.subr.mxu1 %v8557_v30 }
 0xa6a   : > { %3246 = vmatpush1.msra.mxu0 %v7463_v58  ;;  %5292 = vmatpush3.msra.mxu1 %v7531_v7 }
 0xa6b   : > { %3247 = vmatprep.subr.mxu0 %v7466_v39  ;;  %5293 = vmatprep.subr.mxu1 %v8557_v30 }
 0xa6c   : > { %3248 = vmatpush1.msra.mxu0 %v7469_v59  ;;  %5294 = vmatpush3.msra.mxu1 %v7535_v8 }
 0xa6d   : > { %3249 = vmatprep.subr.mxu0 %v7472_v60  ;;  %5295 = vmatprep.subr.mxu1 %v8557_v30 }
 0xa6e   : > { %3250 = vmatpush1.msra.mxu0 %v8648_v13  ;;  %5296 = vmatpush3.msra.mxu1 %v8649_v0 }
 0xa6f   : > { %3251 = vmatprep.subr.mxu0 %v8650_v12  ;;  %5297 = vmatprep.subr.mxu1 %v8557_v30 }
 0xa70   : > { %3252 = vmatpush1.msra.mxu0 %v8651_v27  ;;  %3285 = vmatprep.mubr.f32.mxu0 %v8557_v30 }
 0xa71   : > { %5298 = vmatpush3.msra.mxu1 %v8652_v22  ;;  %5299 = vmatprep.mubr.msk.f32.mxu1 %vm6122_vm5, %v8557_v30 }
 0xa72   : > { %3389 = vmatprep.subr.mxu0 %v8653_v50  ;;  %5302 = vmatprep.subr.mxu1 %v8557_v30 }
 0xb11   : > { %v3119_v61 = vpop.f32.mrf.mxu0  ;;  %v3190_v51 = vpop.f32.mrf.mxu1 }
 0xb12   : > { %v3194_v63 = vadd.f32 %v3119_v61, %v2657_v28  ;;  %v3208_v11 = vadd.f32 %v7686_v36, %v3190_v51  ;;  %v8657_v28 = vld [vmem:[#allocation47_spill] sm:$0xff]  ;;  %v8662_v51 = vld [vmem:[#allocation42_spill] sm:$0xff] }
 0xb13   : > { %v5266_v29 = vpop.f32.mrf.mxu1  ;;  %v3121_v14 = vpop.f32.mrf.mxu0  ;;  %v2769_v61 = vadd.f32 %v8657_v28, %v7691_v10 }
 0xb14   : > { %v4514_v25 = vmul.f32 -1.442695, %v3194_v63  ;;  %v3201_v22 = vadd.f32 %v3121_v14, %v2659_v17  ;;  %v8664_v17 = vld [vmem:[#allocation38_spill] sm:$0xff] }
 0xb16   : > { %5711 = vpow2.f32 %v4514_v25  ;;  %v4515_v27 = vmul.f32 -1.442695, %v3201_v22 }
 0xb18   : > { %5713 = vpow2.f32 %v4515_v27 }
 0xb23   : > { %v5712_v12 = vpop.eup %5711 }
 0xb24   : > { %v3198_v50 = vadd.f32 1.0, %v5712_v12 }
 0xb25   : > { %v5714_v0 = vpop.eup %5713 }
 0xb26   : > { %5715 = vrcp.f32 %v3198_v50  ;;  %v3205_v13 = vadd.f32 1.0, %v5714_v0  ;;  %v8660_v0 = vld [vmem:[#allocation33_spill] sm:$0xff] }
 0xb28   : > { %5717 = vrcp.f32 %v3205_v13  ;;  %v8659_v13 = vld [vmem:[#allocation36_spill] sm:$0xff] }
 0xb33   : > { %v5716_v42 = vpop.eup %5715 }
 0xb34   : > { %v3209_v63 = vmul.f32 %v5716_v42, %v3208_v11  ;;  %v8661_v42 = vld [vmem:[#allocation34_spill] sm:$0xff]  ;;  %v8665_v11 = vld [vmem:[#allocation44_spill] sm:$0xff] }
 0xb35   : > { %v5718_v25 = vpop.eup %5717  ;;  %v2663_v28 = vadd.f32 %v8665_v11, %v8664_v17 }
 0xb36   : > { %v3210_v29 = vadd.f32 %v3209_v63, %v2769_v61  ;;  %v3212_v14 = vsub.f32 1.0, %v5718_v25  ;;  %v3214_v12 = vmul.f32 %v5718_v25, %v7695_v9  ;;  %v8658_v9 = vld [vmem:[#allocation35_spill] sm:$0xff] }
 0xb38   : > { %5719 = vtanh.f32 %v3210_v29 }
 0xb45   : > { %v5720_v22 = vpop.eup %5719 }
 0xb46   : > { %v3213_v27 = vmul.f32 %v5720_v22, %v3212_v14 }
 0xb48   : > { %v7776_v50 = vadd.f32 %v3214_v12, %v3213_v27  ;;  %v8666_v27 = vld [vmem:[#allocation45_spill] sm:$0xff] }
 0xb49   : > { %v2665_v12 = vadd.f32 %v8666_v27, %v7680_v5 }
 0xb4a   : > { %4516 = vst [vmem:[%s6426_s13 + $0x10] sm:$0xff] %v7776_v50  ;;  %3286 = vmatmul.mubr.f32.vlgmr.msra.gmra.mxu0 %v7776_v50  ;;  %5300 = vmatmul.mubr.f32.vlgmr.msra.gmra.mxu1 %v7776_v50 }
 0xb4b   : > { %3390 = vmatpush1.msra.mxu0 %v7391_v26  ;;  %5303 = vmatpush3.msra.mxu1 %v7483_v52 }
 0xb4c   : > { %3391 = vmatprep.subr.mxu0 %v7394_v34  ;;  %5304 = vmatprep.subr.mxu1 %v8557_v30 }
 0xb4d   : > { %3392 = vmatpush1.msra.mxu0 %v7397_v53  ;;  %5305 = vmatpush3.msra.mxu1 %v7485_v40 }
 0xb4e   : > { %3393 = vmatprep.subr.mxu0 %v7400_v49  ;;  %5306 = vmatprep.subr.mxu1 %v8557_v30 }
 0xb4f   : > { %3394 = vmatpush1.msra.mxu0 %v7403_v32  ;;  %5307 = vmatpush3.msra.mxu1 %v7490_v62 }
 0xb50   : > { %3395 = vmatprep.subr.mxu0 %v7406_v31  ;;  %5308 = vmatprep.subr.mxu1 %v8557_v30 }
 0xb51   : > { %3396 = vmatpush1.msra.mxu0 %v7409_v37  ;;  %5309 = vmatpush3.msra.mxu1 %v7495_v1 }
 0xb52   : > { %3397 = vmatprep.subr.mxu0 %v7412_v38  ;;  %5310 = vmatprep.subr.mxu1 %v8557_v30 }
 0xb53   : > { %3398 = vmatpush1.msra.mxu0 %v7415_v41  ;;  %5311 = vmatpush3.msra.mxu1 %v7499_v2 }
 0xb54   : > { %3399 = vmatprep.subr.mxu0 %v7418_v15  ;;  %5312 = vmatprep.subr.mxu1 %v8557_v30 }
 0xb55   : > { %3400 = vmatpush1.msra.mxu0 %v7421_v18  ;;  %5313 = vmatpush3.msra.mxu1 %v7503_v3 }
 0xb56   : > { %3401 = vmatprep.subr.mxu0 %v7424_v43  ;;  %5314 = vmatprep.subr.mxu1 %v8557_v30 }
 0xb57   : > { %3402 = vmatpush1.msra.mxu0 %v7427_v19  ;;  %5315 = vmatpush3.msra.mxu1 %v7507_v4 }
 0xb58   : > { %3403 = vmatprep.subr.mxu0 %v7430_v44  ;;  %5316 = vmatprep.subr.mxu1 %v8557_v30 }
 0xb59   : > { %3404 = vmatpush1.msra.mxu0 %v7433_v20  ;;  %5317 = vmatpush3.msra.mxu1 %v7511_v24 }
 0xb5a   : > { %3405 = vmatprep.subr.mxu0 %v7436_v46  ;;  %5318 = vmatprep.subr.mxu1 %v8557_v30 }
 0xb5b   : > { %3406 = vmatpush1.msra.mxu0 %v7439_v21  ;;  %5319 = vmatpush3.msra.mxu1 %v7515_v16 }
 0xb5c   : > { %3407 = vmatprep.subr.mxu0 %v7442_v47  ;;  %5320 = vmatprep.subr.mxu1 %v8557_v30 }
 0xb5d   : > { %3408 = vmatpush1.msra.mxu0 %v7445_v23  ;;  %5321 = vmatpush3.msra.mxu1 %v7519_v33 }
 0xb5e   : > { %3409 = vmatprep.subr.mxu0 %v7448_v48  ;;  %5322 = vmatprep.subr.mxu1 %v8557_v30 }
 0xb5f   : > { %3410 = vmatpush1.msra.mxu0 %v7451_v35  ;;  %5323 = vmatpush3.msra.mxu1 %v7523_v57 }
 0xb60   : > { %3411 = vmatprep.subr.mxu0 %v7454_v54  ;;  %5324 = vmatprep.subr.mxu1 %v8557_v30 }
 0xb61   : > { %3412 = vmatpush1.msra.mxu0 %v7457_v55  ;;  %5325 = vmatpush3.msra.mxu1 %v7527_v6 }
 0xb62   : > { %3413 = vmatprep.subr.mxu0 %v7460_v56  ;;  %5326 = vmatprep.subr.mxu1 %v8557_v30 }
 0xb63   : > { %3414 = vmatpush1.msra.mxu0 %v7463_v58  ;;  %5327 = vmatpush3.msra.mxu1 %v7531_v7 }
 0xb64   : > { %3415 = vmatprep.subr.mxu0 %v7466_v39  ;;  %5328 = vmatprep.subr.mxu1 %v8557_v30 }
 0xb65   : > { %3416 = vmatpush1.msra.mxu0 %v7469_v59  ;;  %5329 = vmatpush3.msra.mxu1 %v7535_v8 }
 0xb66   : > { %3417 = vmatprep.subr.mxu0 %v7472_v60  ;;  %5330 = vmatprep.subr.mxu1 %v8557_v30 }
 0xb67   : > { %3418 = vmatpush1.msra.mxu0 %v8658_v9  ;;  %5331 = vmatpush3.msra.mxu1 %v8659_v13 }
 0xb68   : > { %3419 = vmatprep.subr.mxu0 %v8660_v0  ;;  %5332 = vmatprep.subr.mxu1 %v8557_v30 }
 0xb69   : > { %3420 = vmatpush1.msra.mxu0 %v8661_v42  ;;  %3453 = vmatprep.mubr.f32.mxu0 %v8557_v30 }
 0xb6a   : > { %5333 = vmatpush3.msra.mxu1 %v8662_v51  ;;  %5334 = vmatprep.mubr.msk.f32.mxu1 %vm6122_vm5, %v8557_v30 }
 0xb6b   : > { %3557 = vmatprep.subr.mxu0 %v8663_v45  ;;  %5337 = vmatprep.subr.mxu1 %v8557_v30 }
 0xc0a   : > { %v3287_v61 = vpop.f32.mrf.mxu0  ;;  %v3358_v63 = vpop.f32.mrf.mxu1 }
 0xc0b   : > { %v3362_v29 = vadd.f32 %v3287_v61, %v2663_v28  ;;  %v3376_v11 = vadd.f32 %v7686_v36, %v3358_v63  ;;  %v8667_v28 = vld [vmem:[#allocation41_spill] sm:$0xff]  ;;  %v7984_v63 = vld [vmem:[#allocation13 + $0x108] sm:$0xff] }
 0xc0c   : > { %v5301_v25 = vpop.f32.mrf.mxu1  ;;  %v3289_v22 = vpop.f32.mrf.mxu0  ;;  %v2774_v61 = vadd.f32 %v8667_v28, %v7691_v10  ;;  %v7997_v28 = vld [vmem:[#allocation13 + $0x100] sm:$0xff] }
 0xc0d   : > { %v4517_v14 = vmul.f32 -1.442695, %v3362_v29  ;;  %v3369_v51 = vadd.f32 %v3289_v22, %v2665_v12  ;;  %v7987_v12 = vld [vmem:[#allocation13 + $0x118] sm:$0xff] }
 0xc0f   : > { %5721 = vpow2.f32 %v4517_v14  ;;  %v4518_v42 = vmul.f32 -1.442695, %v3369_v51 }
 0xc11   : > { %5723 = vpow2.f32 %v4518_v42 }
 0xc1c   : > { %v5722_v0 = vpop.eup %5721 }
 0xc1d   : > { %v3366_v45 = vadd.f32 1.0, %v5722_v0 }
 0xc1e   : > { %v5724_v13 = vpop.eup %5723 }
 0xc1f   : > { %5725 = vrcp.f32 %v3366_v45  ;;  %v3373_v9 = vadd.f32 1.0, %v5724_v13  ;;  %v7977_v13 = vld [vmem:[#allocation13 + $0x130] sm:$0xff]  ;;  %v7990_v45 = vld [vmem:[#allocation13 + $0xf8] sm:$0xff] }
 0xc21   : > { %5727 = vrcp.f32 %v3373_v9  ;;  %v7974_v9 = vld [vmem:[#allocation13 + $0x120] sm:$0xff] }
 0xc2c   : > { %v5726_v17 = vpop.eup %5725 }
 0xc2d   : > { %v3377_v29 = vmul.f32 %v5726_v17, %v3376_v11  ;;  %v7980_v17 = vld [vmem:[#allocation13 + $0x110] sm:$0xff] }
 0xc2e   : > { %v5728_v14 = vpop.eup %5727  ;;  %v7994_v11 = vld [vmem:[#allocation13 + $0xf0] sm:$0xff] }
 0xc2f   : > { %v3378_v25 = vadd.f32 %v3377_v29, %v2774_v61  ;;  %v3380_v22 = vsub.f32 1.0, %v5728_v14  ;;  %v3382_v0 = vmul.f32 %v5728_v14, %v7776_v50  ;;  %v7970_v50 = vld [vmem:[#allocation13 + $0x128] sm:$0xff]  ;;  %v8000_v61 = vld [vmem:[#allocation13 + $0xe0] sm:$0xff]  ;;  %v8004_v29 = vld [vmem:[#allocation13 + $0xd8] sm:$0xff] }
 0xc30   : > { %v8010_v14 = vld [vmem:[#allocation13 + $0xc8] sm:$0xff] }
 0xc31   : > { %5729 = vtanh.f32 %v3378_v25  ;;  %v8007_v25 = vld [vmem:[#allocation13 + $0xe8] sm:$0xff] }
 0xc3e   : > { %v5730_v51 = vpop.eup %5729 }
 0xc3f   : > { %v3381_v42 = vmul.f32 %v5730_v51, %v3380_v22  ;;  %v8014_v22 = vld [vmem:[#allocation13 + $0xc0] sm:$0xff]  ;;  %v8017_v51 = vld [vmem:[#allocation13 + $0xd0] sm:$0xff] }
 0xc41   : > { %v7857_v27 = vadd.f32 %v3382_v0, %v3381_v42  ;;  %v8020_v42 = vld [vmem:[#allocation13 + $0xb0] sm:$0xff]  ;;  %v8024_v0 = vld [vmem:[#allocation13 + $0xa8] sm:$0xff] }
 0xc43   : > { %4519 = vst [vmem:[%s6426_s13 + $0x20] sm:$0xff] %v7857_v27  ;;  %3454 = vmatmul.mubr.f32.vlgmr.msra.gmra.mxu0 %v7857_v27  ;;  %5335 = vmatmul.mubr.f32.vlgmr.msra.gmra.mxu1 %v7857_v27 }
 0xc44   : > { %3558 = vmatpush1.msra.mxu0 %v7391_v26  ;;  %5338 = vmatpush3.msra.mxu1 %v7483_v52  ;;  %v8668_v26 = vld [vmem:[#allocation35_spill] sm:$0xff] }
 0xc45   : > { %3559 = vmatprep.subr.mxu0 %v7394_v34  ;;  %5339 = vmatprep.subr.mxu1 %v8557_v30  ;;  %v8669_v34 = vld [vmem:[#allocation36_spill] sm:$0xff] }
 0xc46   : > { %3560 = vmatpush1.msra.mxu0 %v7397_v53  ;;  %5340 = vmatpush3.msra.mxu1 %v7485_v40  ;;  %v8670_v53 = vld [vmem:[#allocation33_spill] sm:$0xff] }
 0xc47   : > { %3561 = vmatprep.subr.mxu0 %v7400_v49  ;;  %5341 = vmatprep.subr.mxu1 %v8557_v30  ;;  %v8671_v49 = vld [vmem:[#allocation34_spill] sm:$0xff] }
 0xc48   : > { %3562 = vmatpush1.msra.mxu0 %v7403_v32  ;;  %5342 = vmatpush3.msra.mxu1 %v7490_v62  ;;  %v8672_v32 = vld [vmem:[#allocation42_spill] sm:$0xff] }
 0xc49   : > { %3563 = vmatprep.subr.mxu0 %v7406_v31  ;;  %5343 = vmatprep.subr.mxu1 %v8557_v30  ;;  %v7928_v31 = vld [vmem:[#allocation13 + $0x170] sm:$0xff] }
 0xc4a   : > { %3564 = vmatpush1.msra.mxu0 %v7409_v37  ;;  %5344 = vmatpush3.msra.mxu1 %v7495_v1  ;;  %8673 = vst [vmem:[#allocation30_spill] sm:$0xff] %v7928_v31  ;;  %v8674_v37 = vld [vmem:[#allocation38_spill] sm:$0xff] }
 0xc4b   : > { %3565 = vmatprep.subr.mxu0 %v7412_v38  ;;  %5345 = vmatprep.subr.mxu1 %v8557_v30  ;;  %v8675_v38 = vld [vmem:[#allocation55_spill] sm:$0xff] }
 0xc4c   : > { %3566 = vmatpush1.msra.mxu0 %v7415_v41  ;;  %5346 = vmatpush3.msra.mxu1 %v7499_v2  ;;  %v2669_v41 = vadd.f32 %v8675_v38, %v8674_v37  ;;  %v8047_v38 = vld [vmem:[#allocation13 + $0x88] sm:$0xff] }
 0xc4d   : > { %3567 = vmatprep.subr.mxu0 %v7418_v15  ;;  %5347 = vmatprep.subr.mxu1 %v8557_v30 }
 0xc4e   : > { %3568 = vmatpush1.msra.mxu0 %v7421_v18  ;;  %5348 = vmatpush3.msra.mxu1 %v7503_v3 }
 0xc4f   : > { %3569 = vmatprep.subr.mxu0 %v7424_v43  ;;  %5349 = vmatprep.subr.mxu1 %v8557_v30 }
 0xc50   : > { %3570 = vmatpush1.msra.mxu0 %v7427_v19  ;;  %5350 = vmatpush3.msra.mxu1 %v7507_v4 }
 0xc51   : > { %3571 = vmatprep.subr.mxu0 %v7430_v44  ;;  %5351 = vmatprep.subr.mxu1 %v8557_v30 }
 0xc52   : > { %3572 = vmatpush1.msra.mxu0 %v7433_v20  ;;  %5352 = vmatpush3.msra.mxu1 %v7511_v24 }
 0xc53   : > { %3573 = vmatprep.subr.mxu0 %v7436_v46  ;;  %5353 = vmatprep.subr.mxu1 %v8557_v30  ;;  %v8676_v46 = vld [vmem:[#allocation46_spill] sm:$0xff] }
 0xc54   : > { %3574 = vmatpush1.msra.mxu0 %v7439_v21  ;;  %5354 = vmatpush3.msra.mxu1 %v7515_v16  ;;  %v2671_v21 = vadd.f32 %v8676_v46, %v7680_v5  ;;  %v7946_v16 = vld [vmem:[#allocation13 + $0x168] sm:$0xff]  ;;  %v8074_v46 = vld [vmem:[#allocation13 + $0x30] sm:$0xff] }
 0xc55   : > { %3575 = vmatprep.subr.mxu0 %v7442_v47  ;;  %5355 = vmatprep.subr.mxu1 %v8557_v30 }
 0xc56   : > { %3576 = vmatpush1.msra.mxu0 %v7445_v23  ;;  %5356 = vmatpush3.msra.mxu1 %v7519_v33  ;;  %v7950_v33 = vld [vmem:[#allocation13 + $0x158] sm:$0xff] }
 0xc57   : > { %3577 = vmatprep.subr.mxu0 %v7448_v48  ;;  %5357 = vmatprep.subr.mxu1 %v8557_v30 }
 0xc58   : > { %3578 = vmatpush1.msra.mxu0 %v7451_v35  ;;  %5358 = vmatpush3.msra.mxu1 %v7523_v57  ;;  %v7954_v57 = vld [vmem:[#allocation13 + $0x150] sm:$0xff] }
 0xc59   : > { %3579 = vmatprep.subr.mxu0 %v7454_v54  ;;  %5359 = vmatprep.subr.mxu1 %v8557_v30 }
 0xc5a   : > { %3580 = vmatpush1.msra.mxu0 %v7457_v55  ;;  %5360 = vmatpush3.msra.mxu1 %v7527_v6  ;;  %v7957_v6 = vld [vmem:[#allocation13 + $0x160] sm:$0xff] }
 0xc5b   : > { %3581 = vmatprep.subr.mxu0 %v7460_v56  ;;  %5361 = vmatprep.subr.mxu1 %v8557_v30 }
 0xc5c   : > { %3582 = vmatpush1.msra.mxu0 %v7463_v58  ;;  %5362 = vmatpush3.msra.mxu1 %v7531_v7  ;;  %v7960_v7 = vld [vmem:[#allocation13 + $0x140] sm:$0xff] }
 0xc5d   : > { %3583 = vmatprep.subr.mxu0 %v7466_v39  ;;  %5363 = vmatprep.subr.mxu1 %v8557_v30  ;;  %v8677_v39 = vld [vmem:[#allocation37_spill] sm:$0xff] }
 0xc5e   : > { %3584 = vmatpush1.msra.mxu0 %v7469_v59  ;;  %5364 = vmatpush3.msra.mxu1 %v7535_v8  ;;  %v2779_v59 = vadd.f32 %v8677_v39, %v7691_v10  ;;  %v7967_v8 = vld [vmem:[#allocation13 + $0x148] sm:$0xff] }
 0xc5f   : > { %3585 = vmatprep.subr.mxu0 %v7472_v60  ;;  %5365 = vmatprep.subr.mxu1 %v8557_v30 }
 0xc60   : > { %3586 = vmatpush1.msra.mxu0 %v8668_v26  ;;  %5366 = vmatpush3.msra.mxu1 %v8669_v34  ;;  %v8030_v26 = vld [vmem:[#allocation13 + $0x98] sm:$0xff]  ;;  %v8034_v34 = vld [vmem:[#allocation13 + $0x90] sm:$0xff] }
 0xc61   : > { %3587 = vmatprep.subr.mxu0 %v8670_v53  ;;  %5367 = vmatprep.subr.mxu1 %v8557_v30  ;;  %v8037_v53 = vld [vmem:[#allocation13 + $0xa0] sm:$0xff] }
 0xc62   : > { %3588 = vmatpush1.msra.mxu0 %v8671_v49  ;;  %3621 = vmatprep.mubr.f32.mxu0 %v8557_v30  ;;  %v8040_v49 = vld [vmem:[#allocation13 + $0x80] sm:$0xff] }
 0xc63   : > { %5368 = vmatpush3.msra.mxu1 %v8672_v32  ;;  %5369 = vmatprep.mubr.msk.f32.mxu1 %vm6122_vm5, %v8557_v30  ;;  %v8044_v32 = vld [vmem:[#allocation13 + $0x78] sm:$0xff] }
 0xc64   : > { %3725 = vmatprep.subr.mxu0 %v7928_v31  ;;  %5372 = vmatprep.subr.mxu1 %v8557_v30 }
 0xd03   : > { %v3455_v15 = vpop.f32.mrf.mxu0  ;;  %v3526_v18 = vpop.f32.mrf.mxu1 }
 0xd04   : > { %v3530_v43 = vadd.f32 %v3455_v15, %v2669_v41  ;;  %v3544_v56 = vadd.f32 %v7686_v36, %v3526_v18  ;;  %v8050_v41 = vld [vmem:[#allocation13 + $0x68] sm:$0xff]  ;;  %v8054_v15 = vld [vmem:[#allocation13 + $0x60] sm:$0xff]  ;;  %v8057_v18 = vld [vmem:[#allocation13 + $0x70] sm:$0xff] }
 0xd05   : > { %v5336_v19 = vpop.f32.mrf.mxu1  ;;  %v3457_v20 = vpop.f32.mrf.mxu0 }
 0xd06   : > { %v4520_v44 = vmul.f32 -1.442695, %v3530_v43  ;;  %v3537_v47 = vadd.f32 %v3457_v20, %v2671_v21  ;;  %v8060_v43 = vld [vmem:[#allocation13 + $0x50] sm:$0xff]  ;;  %v8064_v19 = vld [vmem:[#allocation13 + $0x48] sm:$0xff]  ;;  %v8070_v20 = vld [vmem:[#allocation13 + $0x38] sm:$0xff] }
 0xd07   : > { %v8077_v21 = vld [vmem:[#allocation13 + $0x40] sm:$0xff] }
 0xd08   : > { %5731 = vpow2.f32 %v4520_v44  ;;  %v4521_v23 = vmul.f32 -1.442695, %v3537_v47  ;;  %v8067_v44 = vld [vmem:[#allocation13 + $0x58] sm:$0xff]  ;;  %v8080_v47 = vld [vmem:[#allocation13 + $0x20] sm:$0xff] }
 0xd0a   : > { %5733 = vpow2.f32 %v4521_v23  ;;  %v8084_v23 = vld [vmem:[#allocation13 + $0x18] sm:$0xff] }
 0xd0b   : > { %8678 = vst [vmem:[#allocation43_spill] sm:$0xff] %v8084_v23 }
 0xd15   : > { %v5732_v48 = vpop.eup %5731 }
 0xd16   : > { %v3534_v35 = vadd.f32 1.0, %v5732_v48  ;;  %v8087_v48 = vld [vmem:[#allocation13 + $0x28] sm:$0xff] }
 0xd17   : > { %v5734_v54 = vpop.eup %5733  ;;  %8679 = vst [vmem:[#allocation52_spill] sm:$0xff] %v8087_v48 }
 0xd18   : > { %5735 = vrcp.f32 %v3534_v35  ;;  %v3541_v55 = vadd.f32 1.0, %v5734_v54  ;;  %v8090_v35 = vld [vmem:[#allocation13 + $0x8] sm:$0xff]  ;;  %v8094_v54 = vld [vmem:[#allocation13] sm:$0xff] }
 0xd19   : > { %8680 = vst [vmem:[#allocation47_spill] sm:$0xff] %v8090_v35  ;;  %8681 = vst [vmem:[#allocation53_spill] sm:$0xff] %v8094_v54 }
 0xd1a   : > { %5737 = vrcp.f32 %v3541_v55  ;;  %v8098_v55 = vld [vmem:[#allocation13 + $0x10] sm:$0xff] }
 0xd1b   : > { %8682 = vst [vmem:[#allocation44_spill] sm:$0xff] %v8098_v55 }
 0xd25   : > { %v5736_v58 = vpop.eup %5735 }
 0xd26   : > { %v3545_v60 = vmul.f32 %v5736_v58, %v3544_v56  ;;  %v8683_v56 = vld [vmem:[#allocation54_spill] sm:$0xff] }
 0xd27   : > { %v5738_v62 = vpop.eup %5737  ;;  %v2675_v58 = vadd.f32 %v8683_v56, %v8674_v37 }
 0xd28   : > { %v3546_v40 = vadd.f32 %v3545_v60, %v2779_v59  ;;  %v3548_v1 = vsub.f32 1.0, %v5738_v62  ;;  %v3550_v4 = vmul.f32 %v5738_v62, %v7857_v27  ;;  %v8027_v27 = vld [vmem:[#allocation13 + $0xb8] sm:$0xff] }
 0xd2a   : > { %5739 = vtanh.f32 %v3546_v40 }
 0xd37   : > { %v5740_v2 = vpop.eup %5739 }
 0xd38   : > { %v3549_v3 = vmul.f32 %v5740_v2, %v3548_v1  ;;  %v8684_v2 = vld [vmem:[#allocation40_spill] sm:$0xff] }
 0xd3a   : > { %v7940_v24 = vadd.f32 %v3550_v4, %v3549_v3  ;;  %v2677_v3 = vadd.f32 %v8684_v2, %v7680_v5 }
 0xd3c   : > { %4522 = vst [vmem:[%s6426_s13 + $0x30] sm:$0xff] %v7940_v24  ;;  %3622 = vmatmul.mubr.f32.vlgmr.msra.gmra.mxu0 %v7940_v24  ;;  %5370 = vmatmul.mubr.f32.vlgmr.msra.gmra.mxu1 %v7940_v24 }
 0xd3d   : > { %3726 = vmatpush1.msra.mxu0 %v7946_v16  ;;  %5373 = vmatpush3.msra.mxu1 %v7483_v52  ;;  %v7964_v52 = vld [vmem:[#allocation13 + $0x138] sm:$0xff] }
 0xd3e   : > { %3727 = vmatprep.subr.mxu0 %v7950_v33  ;;  %5374 = vmatprep.subr.mxu1 %v8557_v30 }
 0xd3f   : > { %3728 = vmatpush1.msra.mxu0 %v7954_v57  ;;  %5375 = vmatpush3.msra.mxu1 %v7957_v6 }
 0xd40   : > { %3729 = vmatprep.subr.mxu0 %v7960_v7  ;;  %5376 = vmatprep.subr.mxu1 %v8557_v30 }
 0xd41   : > { %3730 = vmatpush1.msra.mxu0 %v7964_v52  ;;  %5377 = vmatpush3.msra.mxu1 %v7967_v8 }
 0xd42   : > { %3731 = vmatprep.subr.mxu0 %v7970_v50  ;;  %5378 = vmatprep.subr.mxu1 %v8557_v30 }
 0xd43   : > { %3732 = vmatpush1.msra.mxu0 %v7974_v9  ;;  %5379 = vmatpush3.msra.mxu1 %v7977_v13 }
 0xd44   : > { %3733 = vmatprep.subr.mxu0 %v7980_v17  ;;  %5380 = vmatprep.subr.mxu1 %v8557_v30 }
 0xd45   : > { %3734 = vmatpush1.msra.mxu0 %v7984_v63  ;;  %5381 = vmatpush3.msra.mxu1 %v7987_v12 }
 0xd46   : > { %3735 = vmatprep.subr.mxu0 %v7990_v45  ;;  %5382 = vmatprep.subr.mxu1 %v8557_v30 }
 0xd47   : > { %3736 = vmatpush1.msra.mxu0 %v7994_v11  ;;  %5383 = vmatpush3.msra.mxu1 %v7997_v28 }
 0xd48   : > { %3737 = vmatprep.subr.mxu0 %v8000_v61  ;;  %5384 = vmatprep.subr.mxu1 %v8557_v30 }
 0xd49   : > { %3738 = vmatpush1.msra.mxu0 %v8004_v29  ;;  %5385 = vmatpush3.msra.mxu1 %v8007_v25 }
 0xd4a   : > { %3739 = vmatprep.subr.mxu0 %v8010_v14  ;;  %5386 = vmatprep.subr.mxu1 %v8557_v30 }
 0xd4b   : > { %3740 = vmatpush1.msra.mxu0 %v8014_v22  ;;  %5387 = vmatpush3.msra.mxu1 %v8017_v51 }
 0xd4c   : > { %3741 = vmatprep.subr.mxu0 %v8020_v42  ;;  %5388 = vmatprep.subr.mxu1 %v8557_v30 }
 0xd4d   : > { %3742 = vmatpush1.msra.mxu0 %v8024_v0  ;;  %5389 = vmatpush3.msra.mxu1 %v8027_v27 }
 0xd4e   : > { %3743 = vmatprep.subr.mxu0 %v8030_v26  ;;  %5390 = vmatprep.subr.mxu1 %v8557_v30 }
 0xd4f   : > { %3744 = vmatpush1.msra.mxu0 %v8034_v34  ;;  %5391 = vmatpush3.msra.mxu1 %v8037_v53 }
 0xd50   : > { %3745 = vmatprep.subr.mxu0 %v8040_v49  ;;  %5392 = vmatprep.subr.mxu1 %v8557_v30 }
 0xd51   : > { %3746 = vmatpush1.msra.mxu0 %v8044_v32  ;;  %5393 = vmatpush3.msra.mxu1 %v8047_v38 }
 0xd52   : > { %3747 = vmatprep.subr.mxu0 %v8050_v41  ;;  %5394 = vmatprep.subr.mxu1 %v8557_v30 }
 0xd53   : > { %3748 = vmatpush1.msra.mxu0 %v8054_v15  ;;  %5395 = vmatpush3.msra.mxu1 %v8057_v18 }
 0xd54   : > { %3749 = vmatprep.subr.mxu0 %v8060_v43  ;;  %5396 = vmatprep.subr.mxu1 %v8557_v30 }
 0xd55   : > { %3750 = vmatpush1.msra.mxu0 %v8064_v19  ;;  %5397 = vmatpush3.msra.mxu1 %v8067_v44 }
 0xd56   : > { %3751 = vmatprep.subr.mxu0 %v8070_v20  ;;  %5398 = vmatprep.subr.mxu1 %v8557_v30 }
 0xd57   : > { %3752 = vmatpush1.msra.mxu0 %v8074_v46  ;;  %5399 = vmatpush3.msra.mxu1 %v8077_v21 }
 0xd58   : > { %3753 = vmatprep.subr.mxu0 %v8080_v47  ;;  %5400 = vmatprep.subr.mxu1 %v8557_v30 }
 0xd59   : > { %3754 = vmatpush1.msra.mxu0 %v8084_v23  ;;  %5401 = vmatpush3.msra.mxu1 %v8087_v48 }
 0xd5a   : > { %3755 = vmatprep.subr.mxu0 %v8090_v35  ;;  %5402 = vmatprep.subr.mxu1 %v8557_v30 }
 0xd5b   : > { %3756 = vmatpush1.msra.mxu0 %v8094_v54  ;;  %3789 = vmatprep.mubr.f32.mxu0 %v8557_v30 }
 0xd5c   : > { %5403 = vmatpush3.msra.mxu1 %v8098_v55  ;;  %5404 = vmatprep.mubr.msk.f32.mxu1 %vm6122_vm5, %v8557_v30 }
 0xd5d   : > { %3893 = vmatprep.subr.mxu0 %v7928_v31  ;;  %5407 = vmatprep.subr.mxu1 %v8557_v30 }
 0xdfc   : > { %v3623_v39 = vpop.f32.mrf.mxu0  ;;  %v3694_v59 = vpop.f32.mrf.mxu1 }
 0xdfd   : > { %v3698_v60 = vadd.f32 %v3623_v39, %v2675_v58  ;;  %v3712_v56 = vadd.f32 %v7686_v36, %v3694_v59  ;;  %v8685_v58 = vld [vmem:[#allocation58_spill] sm:$0xff]  ;;  %v8689_v59 = vld [vmem:[#allocation44_spill] sm:$0xff] }
 0xdfe   : > { %v5371_v40 = vpop.f32.mrf.mxu1  ;;  %v3625_v1 = vpop.f32.mrf.mxu0  ;;  %v2784_v39 = vadd.f32 %v8685_v58, %v7691_v10 }
 0xdff   : > { %v4523_v62 = vmul.f32 -1.442695, %v3698_v60  ;;  %v3705_v4 = vadd.f32 %v3625_v1, %v2677_v3  ;;  %v8690_v3 = vld [vmem:[#allocation30_spill] sm:$0xff] }
 0xe01   : > { %5741 = vpow2.f32 %v4523_v62  ;;  %v4524_v55 = vmul.f32 -1.442695, %v3705_v4  ;;  %v8691_v4 = vld [vmem:[#allocation38_spill] sm:$0xff] }
 0xe03   : > { %5743 = vpow2.f32 %v4524_v55 }
 0xe0e   : > { %v5742_v54 = vpop.eup %5741 }
 0xe0f   : > { %v3702_v31 = vadd.f32 1.0, %v5742_v54 }
 0xe10   : > { %v5744_v35 = vpop.eup %5743 }
 0xe11   : > { %5745 = vrcp.f32 %v3702_v31  ;;  %v3709_v48 = vadd.f32 1.0, %v5744_v35  ;;  %v8688_v35 = vld [vmem:[#allocation53_spill] sm:$0xff] }
 0xe13   : > { %5747 = vrcp.f32 %v3709_v48  ;;  %v8687_v48 = vld [vmem:[#allocation47_spill] sm:$0xff] }
 0xe1e   : > { %v5746_v37 = vpop.eup %5745 }
 0xe1f   : > { %v3713_v60 = vmul.f32 %v5746_v37, %v3712_v56  ;;  %v8120_v37 = vld [vmem:[#allocation13 + $0x178] sm:$0xff]  ;;  %v8692_v56 = vld [vmem:[#allocation31_spill] sm:$0xff] }
 0xe20   : > { %v5748_v62 = vpop.eup %5747  ;;  %v2681_v58 = vadd.f32 %v8692_v56, %v8691_v4 }
 0xe21   : > { %v3714_v40 = vadd.f32 %v3713_v60, %v2784_v39  ;;  %v3716_v1 = vsub.f32 1.0, %v5748_v62  ;;  %v3718_v54 = vmul.f32 %v5748_v62, %v7940_v24  ;;  %v8686_v24 = vld [vmem:[#allocation52_spill] sm:$0xff] }
 0xe23   : > { %5749 = vtanh.f32 %v3714_v40 }
 0xe30   : > { %v5750_v2 = vpop.eup %5749 }
 0xe31   : > { %v3717_v55 = vmul.f32 %v5750_v2, %v3716_v1 }
 0xe33   : > { %v8113_v31 = vadd.f32 %v3718_v54, %v3717_v55  ;;  %v8693_v55 = vld [vmem:[#allocation48_spill] sm:$0xff] }
 0xe34   : > { %v2683_v54 = vadd.f32 %v8693_v55, %v7680_v5 }
 0xe35   : > { %4525 = vst [vmem:[%s6426_s13 + $0x40] sm:$0xff] %v8113_v31  ;;  %3790 = vmatmul.mubr.f32.vlgmr.msra.gmra.mxu0 %v8113_v31  ;;  %5405 = vmatmul.mubr.f32.vlgmr.msra.gmra.mxu1 %v8113_v31 }
 0xe36   : > { %3894 = vmatpush1.msra.mxu0 %v7946_v16  ;;  %5408 = vmatpush3.msra.mxu1 %v8120_v37 }
 0xe37   : > { %3895 = vmatprep.subr.mxu0 %v7950_v33  ;;  %5409 = vmatprep.subr.mxu1 %v8557_v30 }
 0xe38   : > { %3896 = vmatpush1.msra.mxu0 %v7954_v57  ;;  %5410 = vmatpush3.msra.mxu1 %v7957_v6 }
 0xe39   : > { %3897 = vmatprep.subr.mxu0 %v7960_v7  ;;  %5411 = vmatprep.subr.mxu1 %v8557_v30 }
 0xe3a   : > { %3898 = vmatpush1.msra.mxu0 %v7964_v52  ;;  %5412 = vmatpush3.msra.mxu1 %v7967_v8 }
 0xe3b   : > { %3899 = vmatprep.subr.mxu0 %v7970_v50  ;;  %5413 = vmatprep.subr.mxu1 %v8557_v30 }
 0xe3c   : > { %3900 = vmatpush1.msra.mxu0 %v7974_v9  ;;  %5414 = vmatpush3.msra.mxu1 %v7977_v13 }
 0xe3d   : > { %3901 = vmatprep.subr.mxu0 %v7980_v17  ;;  %5415 = vmatprep.subr.mxu1 %v8557_v30 }
 0xe3e   : > { %3902 = vmatpush1.msra.mxu0 %v7984_v63  ;;  %5416 = vmatpush3.msra.mxu1 %v7987_v12 }
 0xe3f   : > { %3903 = vmatprep.subr.mxu0 %v7990_v45  ;;  %5417 = vmatprep.subr.mxu1 %v8557_v30 }
 0xe40   : > { %3904 = vmatpush1.msra.mxu0 %v7994_v11  ;;  %5418 = vmatpush3.msra.mxu1 %v7997_v28 }
 0xe41   : > { %3905 = vmatprep.subr.mxu0 %v8000_v61  ;;  %5419 = vmatprep.subr.mxu1 %v8557_v30 }
 0xe42   : > { %3906 = vmatpush1.msra.mxu0 %v8004_v29  ;;  %5420 = vmatpush3.msra.mxu1 %v8007_v25 }
 0xe43   : > { %3907 = vmatprep.subr.mxu0 %v8010_v14  ;;  %5421 = vmatprep.subr.mxu1 %v8557_v30 }
 0xe44   : > { %3908 = vmatpush1.msra.mxu0 %v8014_v22  ;;  %5422 = vmatpush3.msra.mxu1 %v8017_v51 }
 0xe45   : > { %3909 = vmatprep.subr.mxu0 %v8020_v42  ;;  %5423 = vmatprep.subr.mxu1 %v8557_v30 }
 0xe46   : > { %3910 = vmatpush1.msra.mxu0 %v8024_v0  ;;  %5424 = vmatpush3.msra.mxu1 %v8027_v27 }
 0xe47   : > { %3911 = vmatprep.subr.mxu0 %v8030_v26  ;;  %5425 = vmatprep.subr.mxu1 %v8557_v30 }
 0xe48   : > { %3912 = vmatpush1.msra.mxu0 %v8034_v34  ;;  %5426 = vmatpush3.msra.mxu1 %v8037_v53 }
 0xe49   : > { %3913 = vmatprep.subr.mxu0 %v8040_v49  ;;  %5427 = vmatprep.subr.mxu1 %v8557_v30 }
 0xe4a   : > { %3914 = vmatpush1.msra.mxu0 %v8044_v32  ;;  %5428 = vmatpush3.msra.mxu1 %v8047_v38 }
 0xe4b   : > { %3915 = vmatprep.subr.mxu0 %v8050_v41  ;;  %5429 = vmatprep.subr.mxu1 %v8557_v30 }
 0xe4c   : > { %3916 = vmatpush1.msra.mxu0 %v8054_v15  ;;  %5430 = vmatpush3.msra.mxu1 %v8057_v18 }
 0xe4d   : > { %3917 = vmatprep.subr.mxu0 %v8060_v43  ;;  %5431 = vmatprep.subr.mxu1 %v8557_v30 }
 0xe4e   : > { %3918 = vmatpush1.msra.mxu0 %v8064_v19  ;;  %5432 = vmatpush3.msra.mxu1 %v8067_v44 }
 0xe4f   : > { %3919 = vmatprep.subr.mxu0 %v8070_v20  ;;  %5433 = vmatprep.subr.mxu1 %v8557_v30 }
 0xe50   : > { %3920 = vmatpush1.msra.mxu0 %v8074_v46  ;;  %5434 = vmatpush3.msra.mxu1 %v8077_v21 }
 0xe51   : > { %3921 = vmatprep.subr.mxu0 %v8080_v47  ;;  %5435 = vmatprep.subr.mxu1 %v8557_v30 }
 0xe52   : > { %3922 = vmatpush1.msra.mxu0 %v8084_v23  ;;  %5436 = vmatpush3.msra.mxu1 %v8686_v24 }
 0xe53   : > { %3923 = vmatprep.subr.mxu0 %v8687_v48  ;;  %5437 = vmatprep.subr.mxu1 %v8557_v30 }
 0xe54   : > { %3924 = vmatpush1.msra.mxu0 %v8688_v35  ;;  %3957 = vmatprep.mubr.f32.mxu0 %v8557_v30 }
 0xe55   : > { %5438 = vmatpush3.msra.mxu1 %v8689_v59  ;;  %5439 = vmatprep.mubr.msk.f32.mxu1 %vm6122_vm5, %v8557_v30 }
 0xe56   : > { %4061 = vmatprep.subr.mxu0 %v8690_v3  ;;  %5442 = vmatprep.subr.mxu1 %v8557_v30 }
 0xef5   : > { %v3791_v39 = vpop.f32.mrf.mxu0  ;;  %v3862_v60 = vpop.f32.mrf.mxu1 }
 0xef6   : > { %v3866_v40 = vadd.f32 %v3791_v39, %v2681_v58  ;;  %v3880_v56 = vadd.f32 %v7686_v36, %v3862_v60  ;;  %v8694_v58 = vld [vmem:[#allocation49_spill] sm:$0xff]  ;;  %v8695_v36 = vld [vmem:[#allocation43_spill] sm:$0xff] }
 0xef7   : > { %v5406_v62 = vpop.f32.mrf.mxu1  ;;  %v3793_v2 = vpop.f32.mrf.mxu0  ;;  %v2789_v39 = vadd.f32 %v8694_v58, %v7691_v10 }
 0xef8   : > { %v4526_v1 = vmul.f32 -1.442695, %v3866_v40  ;;  %v3873_v59 = vadd.f32 %v3793_v2, %v2683_v54 }
 0xefa   : > { %5751 = vpow2.f32 %v4526_v1  ;;  %v4527_v35 = vmul.f32 -1.442695, %v3873_v59 }
 0xefc   : > { %5753 = vpow2.f32 %v4527_v35 }
 0xf07   : > { %v5752_v48 = vpop.eup %5751 }
 0xf08   : > { %v3870_v3 = vadd.f32 1.0, %v5752_v48 }
 0xf09   : > { %v5754_v24 = vpop.eup %5753 }
 0xf0a   : > { %5755 = vrcp.f32 %v3870_v3  ;;  %v3877_v23 = vadd.f32 1.0, %v5754_v24 }
 0xf0c   : > { %5757 = vrcp.f32 %v3877_v23  ;;  %v8705_v23 = vld [vmem:[#allocation51_spill] sm:$0xff] }
 0xf17   : > { %v5756_v4 = vpop.eup %5755 }
 0xf18   : > { %v3881_v40 = vmul.f32 %v5756_v4, %v3880_v56 }
 0xf19   : > { %v5758_v1 = vpop.eup %5757 }
 0xf1a   : > { %v3882_v62 = vadd.f32 %v3881_v40, %v2789_v39  ;;  %v3884_v2 = vsub.f32 1.0, %v5758_v1  ;;  %v3886_v48 = vmul.f32 %v5758_v1, %v8113_v31  ;;  %v2695_v31 = vadd.f32 %v8705_v23, %v7680_v5  ;;  %v8706_v39 = vld [vmem:[#allocation50_spill] sm:$0xff] }
 0xf1b   : > { %v2799_v40 = vadd.f32 %v8706_v39, %v7691_v10 }
 0xf1c   : > { %5759 = vtanh.f32 %v3882_v62 }
 0xf29   : > { %v5760_v59 = vpop.eup %5759 }
 0xf2a   : > { %v3885_v35 = vmul.f32 %v5760_v59, %v3884_v2 }
 0xf2c   : > { %v8196_v55 = vadd.f32 %v3886_v48, %v3885_v35 }
 0xf2e   : > { %4528 = vst [vmem:[%s6426_s13 + $0x50] sm:$0xff] %v8196_v55  ;;  %3958 = vmatmul.mubr.f32.vlgmr.msra.gmra.mxu0 %v8196_v55  ;;  %5440 = vmatmul.mubr.f32.vlgmr.msra.gmra.mxu1 %v8196_v55 }
 0xf2f   : > { %4062 = vmatpush1.msra.mxu0 %v7946_v16  ;;  %5443 = vmatpush3.msra.mxu1 %v8120_v37  ;;  %v8696_v16 = vld [vmem:[#allocation52_spill] sm:$0xff] }
 0xf30   : > { %4063 = vmatprep.subr.mxu0 %v7950_v33  ;;  %5444 = vmatprep.subr.mxu1 %v8557_v30  ;;  %v8697_v33 = vld [vmem:[#allocation47_spill] sm:$0xff] }
 0xf31   : > { %4064 = vmatpush1.msra.mxu0 %v7954_v57  ;;  %5445 = vmatpush3.msra.mxu1 %v7957_v6  ;;  %v8698_v57 = vld [vmem:[#allocation53_spill] sm:$0xff]  ;;  %v8699_v6 = vld [vmem:[#allocation44_spill] sm:$0xff] }
 0xf32   : > { %4065 = vmatprep.subr.mxu0 %v7960_v7  ;;  %5446 = vmatprep.subr.mxu1 %v8557_v30  ;;  %v8700_v7 = vld [vmem:[#allocation38_spill] sm:$0xff] }
 0xf33   : > { %4066 = vmatpush1.msra.mxu0 %v7964_v52  ;;  %5447 = vmatpush3.msra.mxu1 %v7967_v8  ;;  %v8701_v52 = vld [vmem:[#allocation57_spill] sm:$0xff] }
 0xf34   : > { %4067 = vmatprep.subr.mxu0 %v7970_v50  ;;  %5448 = vmatprep.subr.mxu1 %v8557_v30  ;;  %v2687_v8 = vadd.f32 %v8701_v52, %v8700_v7 }
 0xf35   : > { %4068 = vmatpush1.msra.mxu0 %v7974_v9  ;;  %5449 = vmatpush3.msra.mxu1 %v7977_v13 }
 0xf36   : > { %4069 = vmatprep.subr.mxu0 %v7980_v17  ;;  %5450 = vmatprep.subr.mxu1 %v8557_v30 }
 0xf37   : > { %4070 = vmatpush1.msra.mxu0 %v7984_v63  ;;  %5451 = vmatpush3.msra.mxu1 %v7987_v12 }
 0xf38   : > { %4071 = vmatprep.subr.mxu0 %v7990_v45  ;;  %5452 = vmatprep.subr.mxu1 %v8557_v30  ;;  %v8702_v45 = vld [vmem:[#allocation32_spill] sm:$0xff] }
 0xf39   : > { %4072 = vmatpush1.msra.mxu0 %v7994_v11  ;;  %5453 = vmatpush3.msra.mxu1 %v7997_v28  ;;  %v2689_v11 = vadd.f32 %v8702_v45, %v7680_v5 }
 0xf3a   : > { %4073 = vmatprep.subr.mxu0 %v8000_v61  ;;  %5454 = vmatprep.subr.mxu1 %v8557_v30 }
 0xf3b   : > { %4074 = vmatpush1.msra.mxu0 %v8004_v29  ;;  %5455 = vmatpush3.msra.mxu1 %v8007_v25 }
 0xf3c   : > { %4075 = vmatprep.subr.mxu0 %v8010_v14  ;;  %5456 = vmatprep.subr.mxu1 %v8557_v30 }
 0xf3d   : > { %4076 = vmatpush1.msra.mxu0 %v8014_v22  ;;  %5457 = vmatpush3.msra.mxu1 %v8017_v51  ;;  %v5878_v22 = vld [vmem:[%s8646_s24] ss:$0 sm:$0xff] }
 0xf3e   : > { %4077 = vmatprep.subr.mxu0 %v8020_v42  ;;  %5458 = vmatprep.subr.mxu1 %v8557_v30 }
 0xf3f   : > { %4078 = vmatpush1.msra.mxu0 %v8024_v0  ;;  %5459 = vmatpush3.msra.mxu1 %v8027_v27  ;;  %v8703_v0 = vld [vmem:[#allocation56_spill] sm:$0xff] }
 0xf40   : > { %4079 = vmatprep.subr.mxu0 %v8030_v26  ;;  %5460 = vmatprep.subr.mxu1 %v8557_v30  ;;  %v2794_v27 = vadd.f32 %v8703_v0, %v7691_v10 }
 0xf41   : > { %4080 = vmatpush1.msra.mxu0 %v8034_v34  ;;  %5461 = vmatpush3.msra.mxu1 %v8037_v53 }
 0xf42   : > { %4081 = vmatprep.subr.mxu0 %v8040_v49  ;;  %5462 = vmatprep.subr.mxu1 %v8557_v30 }
 0xf43   : > { %4082 = vmatpush1.msra.mxu0 %v8044_v32  ;;  %5463 = vmatpush3.msra.mxu1 %v8047_v38 }
 0xf44   : > { %4083 = vmatprep.subr.mxu0 %v8050_v41  ;;  %5464 = vmatprep.subr.mxu1 %v8557_v30 }
 0xf45   : > { %4084 = vmatpush1.msra.mxu0 %v8054_v15  ;;  %5465 = vmatpush3.msra.mxu1 %v8057_v18  ;;  %v8704_v18 = vld [vmem:[#allocation39_spill] sm:$0xff] }
 0xf46   : > { %4085 = vmatprep.subr.mxu0 %v8060_v43  ;;  %5466 = vmatprep.subr.mxu1 %v8557_v30  ;;  %v2693_v43 = vadd.f32 %v8704_v18, %v8700_v7 }
 0xf47   : > { %4086 = vmatpush1.msra.mxu0 %v8064_v19  ;;  %5467 = vmatpush3.msra.mxu1 %v8067_v44 }
 0xf48   : > { %4087 = vmatprep.subr.mxu0 %v8070_v20  ;;  %5468 = vmatprep.subr.mxu1 %v8557_v30 }
 0xf49   : > { %4088 = vmatpush1.msra.mxu0 %v8074_v46  ;;  %5469 = vmatpush3.msra.mxu1 %v8077_v21 }
 0xf4a   : > { %4089 = vmatprep.subr.mxu0 %v8080_v47  ;;  %5470 = vmatprep.subr.mxu1 %v8557_v30 }
 0xf4b   : > { %4090 = vmatpush1.msra.mxu0 %v8695_v36  ;;  %5471 = vmatpush3.msra.mxu1 %v8696_v16 }
 0xf4c   : > { %4091 = vmatprep.subr.mxu0 %v8697_v33  ;;  %5472 = vmatprep.subr.mxu1 %v8557_v30 }
 0xf4d   : > { %4092 = vmatpush1.msra.mxu0 %v8698_v57  ;;  %4125 = vmatprep.mubr.f32.mxu0 %v8557_v30 }
 0xf4e   : > { %5473 = vmatpush3.msra.mxu1 %v8699_v6  ;;  %5474 = vmatprep.mubr.msk.f32.mxu1 %vm6122_vm5, %v8557_v30 }
 0xfee   : > { %v3959_v50 = vpop.f32.mrf.mxu0  ;;  %v4030_v9 = vpop.f32.mrf.mxu1 }
 0xfef   : > { %v4034_v13 = vadd.f32 %v3959_v50, %v2687_v8  ;;  %v4048_v51 = vadd.f32 %v5878_v22, %v4030_v9 }
 0xff0   : > { %v5441_v17 = vpop.f32.mrf.mxu1  ;;  %v3961_v12 = vpop.f32.mrf.mxu0 }
 0xff1   : > { %v4529_v63 = vmul.f32 -1.442695, %v4034_v13  ;;  %v4041_v28 = vadd.f32 %v3961_v12, %v2689_v11 }
 0xff3   : > { %5761 = vpow2.f32 %v4529_v63  ;;  %v4530_v61 = vmul.f32 -1.442695, %v4041_v28 }
 0xff5   : > { %5763 = vpow2.f32 %v4530_v61 }
0x1000   : > { %v5762_v29 = vpop.eup %5761 }
0x1001   : > { %v4038_v25 = vadd.f32 1.0, %v5762_v29 }
0x1002   : > { %v5764_v30 = vpop.eup %5763 }
0x1003   : > { %5765 = vrcp.f32 %v4038_v25  ;;  %v4045_v14 = vadd.f32 1.0, %v5764_v30 }
0x1005   : > { %5767 = vrcp.f32 %v4045_v14 }
0x1010   : > { %v5766_v42 = vpop.eup %5765 }
0x1011   : > { %v4049_v26 = vmul.f32 %v5766_v42, %v4048_v51 }
0x1012   : > { %v5768_v53 = vpop.eup %5767 }
0x1013   : > { %v4050_v34 = vadd.f32 %v4049_v26, %v2794_v27  ;;  %v4052_v49 = vsub.f32 1.0, %v5768_v53  ;;  %v4054_v41 = vmul.f32 %v5768_v53, %v8196_v55 }
0x1015   : > { %5769 = vtanh.f32 %v4050_v34 }
0x1022   : > { %v5770_v32 = vpop.eup %5769 }
0x1023   : > { %v4053_v38 = vmul.f32 %v5770_v32, %v4052_v49 }
0x1025   : > { %v4055_v15 = vadd.f32 %v4054_v41, %v4053_v38 }
0x1027   : > { %4531 = vst [vmem:[%s6426_s13 + $0x60] sm:$0xff] %v4055_v15  ;;  %4126 = vmatmul.mubr.f32.vlgmr.msra.gmra.mxu0 %v4055_v15  ;;  %5475 = vmatmul.mubr.f32.vlgmr.msra.gmra.mxu1 %v4055_v15 }
0x10e7   : > { %v4127_v19 = vpop.f32.mrf.mxu0  ;;  %v4198_v44 = vpop.f32.mrf.mxu1 }
0x10e8   : > { %v4202_v20 = vadd.f32 %v4127_v19, %v2693_v43  ;;  %v4216_v56 = vadd.f32 %v5878_v22, %v4198_v44 }
0x10e9   : > { %v5476_v46 = vpop.f32.mrf.mxu1  ;;  %v4129_v47 = vpop.f32.mrf.mxu0 }
0x10ea   : > { %v4532_v21 = vmul.f32 -1.442695, %v4202_v20  ;;  %v4209_v37 = vadd.f32 %v4129_v47, %v2695_v31 }
0x10ec   : > { %5771 = vpow2.f32 %v4532_v21  ;;  %v4533_v24 = vmul.f32 -1.442695, %v4209_v37 }
0x10ee   : > { %5773 = vpow2.f32 %v4533_v24 }
0x10f9   : > { %v5772_v4 = vpop.eup %5771 }
0x10fa   : > { %v4206_v60 = vadd.f32 1.0, %v5772_v4 }
0x10fb   : > { %v5774_v54 = vpop.eup %5773 }
0x10fc   : > { %5775 = vrcp.f32 %v4206_v60  ;;  %v4213_v3 = vadd.f32 1.0, %v5774_v54 }
0x10fe   : > { %5777 = vrcp.f32 %v4213_v3 }
0x1109   : > { %v5776_v58 = vpop.eup %5775 }
0x110a   : > { %v4217_v62 = vmul.f32 %v5776_v58, %v4216_v56 }
0x110b   : > { %v5778_v5 = vpop.eup %5777 }
0x110c   : > { %v4218_v1 = vadd.f32 %v4217_v62, %v2799_v40  ;;  %v4220_v2 = vsub.f32 1.0, %v5778_v5  ;;  %v4222_v48 = vmul.f32 %v5778_v5, %v4055_v15 }
0x110e   : > { %5779 = vtanh.f32 %v4218_v1 }
0x111b   : > { %v5780_v59 = vpop.eup %5779 }
0x111c   : > { %v4221_v35 = vmul.f32 %v5780_v59, %v4220_v2  ;;  %4230 = sbr.rel (%p4535_p10) target bundleno = 4393 (0x1129), region = 168 }
0x111e   : > { %v4223_v55 = vadd.f32 %v4222_v48, %v4221_v35 }
0x1120   : > { %4534 = vst [vmem:[%s6426_s13 + $0x70] sm:$0xff] %v4223_v55  ;;  %4226 = vst [vmem:[#allocation4 + $0x8] sm:$0xff] %v4223_v55 }
0x1121   : > { %v4231_v36 = vld [vmem:[#allocation4] sm:$0xff] }
0x1122   : > { %4233 = vst [vmem:[%s6428_s30] sm:$0xff] %v4231_v36 }
0x1127   : > { %v4232_v16 = vld [vmem:[#allocation4 + $0x8] sm:$0xff] }
0x1128   : > { %4234 = vst [vmem:[%s6428_s30 + $0x8] sm:$0xff] %v4232_v16 }
0x1129 PF: > { %s8708_s29 = sld [smem:[#allocation23_spill]]  ;;  %s4539_s3 = sshll.u32 %s6099_s20, 1 }
0x112a   : > { %s4257_s2 = sshll.u32 %s6426_s13, 4  ;;  %s8709_s11 = sld [smem:[#allocation71_spill]]  ;;  %s8291_s2 = int_to_ptr.vmem [resolvable:$true] %s4257_s2 }
0x112b   : > { %s4236_s14 = scalar_lea.sflag [#allocation10], %s6404_s9  ;;  %s5957_s26 = scalar_lea.vmem %s8291_s2, 2048 }
0x112c   : > { %p5958_p9 = scmp.ne.s32.totalorder %s8291_s2, %s5957_s26  ;;  %p8710_p6 = scmp.ne.s32.totalorder %s8504_s8, 0 }
0x112e   : > { %p5959_p11 = pnand %p5958_p9, %p8710_p6 }
0x112f   : > { %s4546_s25 = sshll.u32 %s8708_s29, 5  ;;  %s6123_s29 = smov [#allocation14]  }
0x1130   : > { %s4254_s5 = sadd.s32 %s4546_s25, %s4539_s3  ;;  %p5960_p4 = pneg %p5959_p11 }
0x1131   : > { %s4541_s27 = sshll.u32 %s4254_s5, 7  ;;  %s5961_s13 = sshll.u32 %s6123_s29, 4  ;;  %s5962_s13 = int_to_ptr.vmem [resolvable:$false] %s5961_s13 }
0x1132   : > { %s8296_s7 = scalar_lea.hbm %s8709_s11, %s4541_s27  ;;  %s5963_s3 = scalar_lea.vmem %s5962_s13, 4096 }
0x1133   : > { %p5964_p8 = scmp.lt.s32.totalorder %s8291_s2, %s5962_s13  ;;  %p5965_p13 = scmp.lt.s32.totalorder %s5963_s3, %s5957_s26 }
0x1135   : > { %p5966_p5 = por %p5965_p13, %p5964_p8 }
0x1137   : > { %p5967_p0 = pnand %p5966_p5, %p5960_p4 }
0x1139   : > { %5970 = shalt.err (!%p5967_p0)
}
0x113a   : > { %s5971_s25 = scalar_lea.hbm %s8296_s7, 2048  ;;  %s5975_s6 = scalar_lea.hbm %s8709_s11, 8192 }
0x113b   : > { %p5972_p12 = scmp.ne.s32.totalorder %s8296_s7, %s5971_s25  ;;  %p5976_p3 = scmp.lt.s32.totalorder %s8296_s7, %s8709_s11 }
0x113c   : > { %p5977_p7 = scmp.lt.s32.totalorder %s5975_s6, %s5971_s25 }
0x113d   : > { %p5973_p1 = pnand %p5972_p12, %p8710_p6 }
0x113e   : > { %p5978_p10 = por %p5977_p7, %p5976_p3 }
0x113f   : > { %p5974_p2 = pneg %p5973_p1 }
0x1141   : > { %p5979_p9 = pnand %p5978_p10, %p5974_p2 }
0x1143   : > { %5982 = shalt.err (!%p5979_p9)
}
0x1144   : > { %s6124_s26 = smov 256   ;;  %s6125_s13 = smov 512  }
0x1145   : > { %s6126_s3 = smov 16   ;;  %s4542_s5 = sshll.u32 %s6099_s20, 7 }
0x1146   : > { %5489 = dma.vmem_to_hbm [thread:$0]  (%p8710_p6), %s8291_s2, 2048, %s8296_s7, %s4236_s14, %s6124_s26, %s6125_s13, %s6126_s3  }
0x1147   : > { %s4272_s25 = sshll.u32 %s6428_s30, 4  ;;  %s8711_s12 = sld [smem:[#allocation72_spill]]  ;;  %s8329_s25 = int_to_ptr.vmem [resolvable:$true] %s4272_s25 }
0x1148   : > { %s8712_s0 = sand.u32 1, %s6079_s15   ;;  %s5983_s4 = scalar_lea.vmem %s8329_s25, 256 }
0x1149   : > { %s8333_s1 = scalar_lea.sflag [#allocation16], %s8712_s0  ;;  %p5984_p11 = scmp.ne.s32.totalorder %s8329_s25, %s5983_s4 }
0x114a   : > { %p8713_p4 = scmp.ne.s32.totalorder %s8509_s19, 0  ;;  %s6127_s8 = smov [#allocation15]  }
0x114b   : > { %s5987_s20 = sshll.u32 %s6127_s8, 4  ;;  %s5988_s20 = int_to_ptr.vmem [resolvable:$false] %s5987_s20 }
0x114c   : > { %p5985_p8 = pnand %p5984_p11, %p8713_p4  ;;  %s5989_s9 = scalar_lea.vmem %s5988_s20, 512 }
0x114d   : > { %s8327_s29 = scalar_lea.hbm %s8711_s12, %s4542_s5  ;;  %p5990_p13 = scmp.lt.s32.totalorder %s8329_s25, %s5988_s20 }
0x114e   : > { %p5986_p6 = pneg %p5985_p8  ;;  %p5991_p5 = scmp.lt.s32.totalorder %s5989_s9, %s5983_s4 }
0x1150   : > { %p5992_p0 = por %p5991_p5, %p5990_p13 }
0x1152   : > { %p5993_p12 = pnand %p5992_p0, %p5986_p6 }
0x1154   : > { %5996 = shalt.err (!%p5993_p12)
}
0x1155   : > { %s5997_s0 = scalar_lea.hbm %s8327_s29, 256  ;;  %s6001_s7 = scalar_lea.hbm %s8711_s12, 512 }
0x1156   : > { %p5998_p1 = scmp.ne.s32.totalorder %s8327_s29, %s5997_s0  ;;  %p6002_p7 = scmp.lt.s32.totalorder %s8327_s29, %s8711_s12 }
0x1157   : > { %p6003_p10 = scmp.lt.s32.totalorder %s6001_s7, %s5997_s0 }
0x1158   : > { %p5999_p2 = pnand %p5998_p1, %p8713_p4 }
0x1159   : > { %p6004_p9 = por %p6003_p10, %p6002_p7 }
0x115a   : > { %p6000_p3 = pneg %p5999_p2 }
0x115c   : > { %p6005_p11 = pnand %p6004_p9, %p6000_p3 }
0x115e   : > { %6008 = shalt.err (!%p6005_p11)
}
0x115f   : > { %s6128_s4 = smov 128   ;;  %s6129_s3 = smov 8  }
0x1160   : > { %5490 = dma.vmem_to_hbm [thread:$0]  (%p8713_p4), %s8329_s25, 256, %s8327_s29, %s8333_s1, %s6128_s4, %s6124_s26, %s6129_s3  }
0x1161 PF: > { %s8714_s5 = sld [smem:[#allocation22_spill]]  ;;  %p5516_p8 = scmp.ge.s32.totalorder %s6111_s23, 2 }
0x1162   : > { %s8715_s27 = sld [smem:[#allocation28_spill]] }
0x1167   : > { %s4287_s6 = sand.u32 1, %s8714_s5  }
0x1168   : > { %p8716_p6 = scmp.ne.s32.totalorder %s8715_s27, 0  ;;  %s4288_s8 = scalar_lea.sflag [#allocation10], %s4287_s6 }
0x116a   : > { %p5504_p13 = pnand %p5516_p8, %p8716_p6 }
0x116c   : > { %p5505_p5 = pneg %p5504_p13 }
0x116e   : > { %6062 = dma.done.wait (%p5505_p5), %s4288_s8, 2048  }
0x116f   : > { %6064 = vsyncadd (%p5505_p5), %s4288_s8, 4294965248  ;;  %s8717_s20 = sld [smem:[#allocation21_spill]] }
0x1170   : > { %s8718_s9 = sld [smem:[#allocation29_spill]] }
0x1175   : > { %s4296_s0 = sand.u32 1, %s8717_s20  }
0x1176   : > { %p8719_p0 = scmp.ne.s32.totalorder %s8718_s9, 0  ;;  %s4297_s19 = scalar_lea.sflag [#allocation16], %s4296_s0 }
0x1178   : > { %p5507_p12 = pnand %p5516_p8, %p8719_p0 }
0x117a   : > { %p5508_p1 = pneg %p5507_p12 }
0x117c   : > { %6066 = dma.done.wait (%p5508_p1), %s4297_s19, 256  }
0x117d   : > { %6068 = vsyncadd (%p5508_p1), %s4297_s19, 4294967040  ;;  %s33_s23 = sadd.s32 1, %s6111_s23   ;;  %s8720_s1 = sld [smem:[#allocation26_spill]] }
0x117e   : > { %p30_p4 = scmp.ge.s32.totalorder %s33_s23, 6   ;;  %s8721_s26 = sld [smem:[#allocation27_spill]] }
0x117f   : > { %s8722_s25 = sld [smem:[#allocation24_spill]]  ;;  %s8724_s29 = smov %s6079_s15 }
0x1180   : > { %s8723_s2 = sld [smem:[#allocation25_spill]]  ;;  %s8725_s30 = smov %s6087_s17 }
0x1181   : > { %s8726_s15 = smov %s6083_s16  ;;  %s8728_s17 = smov %s6091_s18 }
0x1182   : > { %s8730_s19 = smov %s6103_s21  ;;  %s8731_s20 = smov %s6107_s22 }
0x1183   : > { %s8727_s16 = smov %s8720_s1  ;;  %32 = sbr.rel (!%p30_p4) target bundleno = 26 (0x1a), region = 259 }
0x1184   : > { %s8729_s18 = smov %s8721_s26 }
0x1185   : > { %s8732_s21 = smov %s8722_s25 }
0x1186   : > { %s8733_s22 = smov %s8723_s2 }
0x1188   :  { %4302 = vsyncpa [#allocation9], 1 }
0x1189   :  { %4304 = vsyncpa [#allocation9 + $0x1], 1 }
0x118a   :  { %4305 = vsyncpa [#allocation12], 1 }
0x118b   :  { %4306 = vsyncpa [#allocation10], 1 }
0x118c   :  { %4308 = vsyncpa [#allocation10 + $0x1], 1 }
0x118d   :  { %4309 = vsyncpa [#allocation16], 1 }
0x118e   :  { %4311 = vsyncpa [#allocation16 + $0x1], 1 }

</bundles_post_ra>
